<compile_context>
chip_gen: v6e
topology: v6e:2x2x1
jax: 0.10.0
libtpu: 0.0.40
codegen_flags: <defaults>
</compile_context>

<pallas_src>
import functools

import jax
import jax.numpy as jnp
import numpy as np
from jax import lax
from jax.experimental import pallas as pl
from jax.experimental.pallas import tpu as pltpu


# ---------------------------------------------------------------------------
# Kernel A: partial 3x3x3 conv (weight1 folded) + channel concat + conv1
#           (kernel (3,3,1), pad (1,1,0), weight2 folded) + per-sample BN
#           partial sums.   Grid: (N,), fully "parallel".
# Layout inside the kernel: channels-last (D, H, W, C) -> C on the 128-lane
# axis, W on the sublane axis.
# ---------------------------------------------------------------------------
def fused_pconv_conv1_kernel(x_ref, wc_ref, w1_ref, y_ref, stat_ref,
                             x1p_ref, xc_ref):
    _, D, H, W, C = x_ref.shape
    Cc = x1p_ref.shape[-1]
    Co = y_ref.shape[-1]
    cdt = xc_ref.dtype

    # Zero only the halo faces of the padded scratches.  Re-done every grid
    # step (interiors are fully overwritten below), so this stays correct
    # when the batch axis is split across TensorCores.
    x1p_ref[0:1, :, :, :] = jnp.zeros((1, H + 2, W + 2, Cc), cdt)
    x1p_ref[D + 1:D + 2, :, :, :] = jnp.zeros((1, H + 2, W + 2, Cc), cdt)
    x1p_ref[:, 0:1, :, :] = jnp.zeros((D + 2, 1, W + 2, Cc), cdt)
    x1p_ref[:, H + 1:H + 2, :, :] = jnp.zeros((D + 2, 1, W + 2, Cc), cdt)
    x1p_ref[:, :, 0:1, :] = jnp.zeros((D + 2, H + 2, 1, Cc), cdt)
    x1p_ref[:, :, W + 1:W + 2, :] = jnp.zeros((D + 2, H + 2, 1, Cc), cdt)

    xc_ref[0:1, :, :, :] = jnp.zeros((1, H + 2, W, C), cdt)
    xc_ref[D + 1:D + 2, :, :, :] = jnp.zeros((1, H + 2, W, C), cdt)
    xc_ref[:, 0:1, :, :] = jnp.zeros((D + 2, 1, W, C), cdt)
    xc_ref[:, H + 1:H + 2, :, :] = jnp.zeros((D + 2, 1, W, C), cdt)

    xb = x_ref[0]                                        # (D, H, W, C)

    # --- partial 3x3x3 conv on the first Cc channels (weight1 pre-folded) ---
    x1p_ref[1:D + 1, 1:H + 1, 1:W + 1, :] = xb[:, :, :, 0:Cc]
    acc1 = jnp.zeros((D * H * W, Cc), jnp.float32)
    for kd in range(3):                     # statically unrolled taps
        for kh in range(3):
            for kw in range(3):
                patch = x1p_ref[kd:kd + D, kh:kh + H, kw:kw + W, :]
                acc1 = acc1 + jnp.dot(patch.reshape(D * H * W, Cc),
                                      wc_ref[kd * 9 + kh * 3 + kw],
                                      preferred_element_type=jnp.float32)

    # --- build the concatenated conv1 input directly in VMEM ---------------
    # Untouched channels are copied through unscaled (weight2 is folded into
    # the conv1 weight rows); the first Cc channels are then overwritten with
    # the partial-conv result.
    xc_ref[1:D + 1, 1:H + 1, :, :] = xb
    xc_ref[1:D + 1, 1:H + 1, :, 0:Cc] = acc1.reshape(D, H, W, Cc).astype(cdt)

    # --- conv1: kernel (3,3,1), pad (1,1,0) ---------------------------------
    acc2 = jnp.zeros((D * H * W, Co), jnp.float32)
    for kd in range(3):
        for kh in range(3):
            patch = xc_ref[kd:kd + D, kh:kh + H, :, :]
            acc2 = acc2 + jnp.dot(patch.reshape(D * H * W, C),
                                  w1_ref[kd * 3 + kh],
                                  preferred_element_type=jnp.float32)

    y_ref[0] = acc2.reshape(D, H, W, Co).astype(y_ref.dtype)

    # Per-sample partial sums for BatchNorm (reduced over N in the wrapper).
    s1 = jnp.sum(acc2, axis=0, keepdims=True)            # (1, Co)
    s2 = jnp.sum(acc2 * acc2, axis=0, keepdims=True)     # (1, Co)
    stat_ref[0:1, 0:1, :] = s1.reshape(1, 1, Co)
    stat_ref[0:1, 1:2, :] = s2.reshape(1, 1, Co)


# ---------------------------------------------------------------------------
# Kernel B: BN apply (scale/shift) + ReLU + conv2 (kernel (1,3,3),
#           pad (0,1,1)) + residual add.
# Grid: (N, D // d_tile), both axes "parallel" (conv2 has no D extent).
# ---------------------------------------------------------------------------
def bn_relu_conv2_kernel(y_ref, x_ref, bn_ref, w2_ref, o_ref, zp_ref):
    _, TD, H, W, Co = o_ref.shape
    cdt = zp_ref.dtype

    # Zero only the H/W halo faces of the padded scratch (cheap, parallel-safe).
    zp_ref[:, 0:1, :, :] = jnp.zeros((TD, 1, W + 2, Co), cdt)
    zp_ref[:, H + 1:H + 2, :, :] = jnp.zeros((TD, 1, W + 2, Co), cdt)
    zp_ref[:, :, 0:1, :] = jnp.zeros((TD, H + 2, 1, Co), cdt)
    zp_ref[:, :, W + 1:W + 2, :] = jnp.zeros((TD, H + 2, 1, Co), cdt)

    # BatchNorm (batch stats, gamma=1, beta=0) folded to one FMA, then ReLU.
    scale = bn_ref[0:1, :]                               # (1, Co)
    shift = bn_ref[1:2, :]                               # (1, Co)
    z = y_ref[0].astype(jnp.float32) * scale + shift
    z = jnp.maximum(z, 0.0)                              # activation = ReLU
    zp_ref[:, 1:H + 1, 1:W + 1, :] = z.astype(cdt)

    # conv2: kernel (1,3,3), pad (0,1,1).
    acc = jnp.zeros((TD * H * W, Co), jnp.float32)
    for kh in range(3):                     # statically unrolled taps
        for kw in range(3):
            patch = zp_ref[:, kh:kh + H, kw:kw + W, :]
            acc = acc + jnp.dot(patch.reshape(TD * H * W, Co),
                                w2_ref[kh * 3 + kw],
                                preferred_element_type=jnp.float32)

    # Residual add with the original input block.
    o_ref[0] = (acc.reshape(TD, H, W, Co)
                + x_ref[0].astype(jnp.float32)).astype(o_ref.dtype)


# ---------------------------------------------------------------------------
# Wrapper: layout transposes, weight folding/reshaping, BN-stat finalize.
# ---------------------------------------------------------------------------
@functools.partial(jax.jit, static_argnames=("d_tile", "compute_dtype"))
def partial_conv3_pallas(x, wc, w1conv, w2conv, weight1, weight2,
                         *, d_tile=None, compute_dtype=jnp.float32):
    """x: [N, C, D, H, W] (PyTorch NCDHW).  Returns the same shape (float32)."""
    N, C, D, H, W = x.shape
    Cc = C // 4
    Co = w1conv.shape[0]
    assert Co == C, "residual add requires out_dim == in_dim"
    if d_tile is None:
        d_tile = D
    assert D % d_tile == 0, "d_tile must divide D"
    nD = D // d_tile
    cdt = compute_dtype

    xl = jnp.transpose(x, (0, 2, 3, 4, 1)).astype(cdt)         # [N, D, H, W, C]

    # Weights -> [tap, Cin, Cout] with the learnable scalars folded in:
    #   weight1 -> partial-conv weights; weight2 -> conv1 rows of the untouched
    #   channels.  (cat(conv(x1)*w1, x2*w2) only feeds the linear conv1, so
    #   this folding is exact.)
    wc_r = (jnp.transpose(wc, (2, 3, 4, 1, 0)) * weight1).reshape(27, Cc, Cc)
    w1_r = jnp.transpose(w1conv, (2, 3, 4, 1, 0)).reshape(9, C, Co)
    row_scale = jnp.where(jnp.arange(C) >= Cc, weight2, 1.0)
    w1_r = w1_r * row_scale.astype(w1_r.dtype)[None, :, None]
    w2_r = jnp.transpose(w2conv, (2, 3, 4, 1, 0)).reshape(9, Co, Co)
    wc_r, w1_r, w2_r = (w.astype(cdt) for w in (wc_r, w1_r, w2_r))

    vmem_lim = 48 * 1024 * 1024   # safe on v5e/v6e (128 MiB) and v7x (64 MiB)

    # ---- kernel A: partial conv + concat + conv1 + BN partial sums ---------
    y1, stats = pl.pallas_call(
        fused_pconv_conv1_kernel,
        out_shape=(jax.ShapeDtypeStruct((N, D, H, W, Co), cdt),
                   jax.ShapeDtypeStruct((N, 2, Co), jnp.float32)),
        grid_spec=pltpu.PrefetchScalarGridSpec(
            num_scalar_prefetch=0, grid=(N,),
            in_specs=[
                pl.BlockSpec((1, D, H, W, C), lambda n: (n, 0, 0, 0, 0)),
                pl.BlockSpec((27, Cc, Cc), lambda n: (0, 0, 0)),
                pl.BlockSpec((9, C, Co), lambda n: (0, 0, 0)),
            ],
            out_specs=(
                pl.BlockSpec((1, D, H, W, Co), lambda n: (n, 0, 0, 0, 0)),
                pl.BlockSpec((1, 2, Co), lambda n: (n, 0, 0)),
            ),
            scratch_shapes=[
                pltpu.VMEM((D + 2, H + 2, W + 2, Cc), cdt),    # padded x1
                pltpu.VMEM((D + 2, H + 2, W, C), cdt),         # padded concat
            ]),
        compiler_params=pltpu.CompilerParams(
            dimension_semantics=("parallel",),
            vmem_limit_bytes=vmem_lim),
    )(xl, wc_r, w1_r)

    # BatchNorm3d, training mode: biased batch statistics, gamma=1, beta=0.
    # (E[x^2]-E[x]^2 in f32 is fine at these sizes; switch to a centered /
    #  Welford formulation if N*D*H*W grows very large.)
    ssum = jnp.sum(stats, axis=0)                               # (2, Co)
    cnt = jnp.float32(N * D * H * W)
    mean = ssum[0] / cnt
    var = ssum[1] / cnt - mean * mean
    invstd = lax.rsqrt(var + 1e-5)
    bn = jnp.stack([invstd, -mean * invstd], axis=0)            # (2, Co)

    # ---- kernel B: BN apply + ReLU + conv2 + residual ----------------------
    out_l = pl.pallas_call(
        bn_relu_conv2_kernel,
        out_shape=jax.ShapeDtypeStruct((N, D, H, W, Co), jnp.float32),
        grid_spec=pltpu.PrefetchScalarGridSpec(
            num_scalar_prefetch=0, grid=(N, nD),
            in_specs=[
                pl.BlockSpec((1, d_tile, H, W, Co),
                             lambda n, d: (n, d, 0, 0, 0)),
                pl.BlockSpec((1, d_tile, H, W, C),
                             lambda n, d: (n, d, 0, 0, 0)),
                pl.BlockSpec((2, Co), lambda n, d: (0, 0)),
                pl.BlockSpec((9, Co, Co), lambda n, d: (0, 0, 0)),
            ],
            out_specs=pl.BlockSpec((1, d_tile, H, W, Co),
                                   lambda n, d: (n, d, 0, 0, 0)),
            scratch_shapes=[pltpu.VMEM((d_tile, H + 2, W + 2, Co), cdt)]),
        compiler_params=pltpu.CompilerParams(
            dimension_semantics=("parallel", "parallel"),
            vmem_limit_bytes=vmem_lim),
    )(y1, xl, bn, w2_r)

    return jnp.transpose(out_l, (0, 4, 1, 2, 3))                # back to NCDHW


# ---------------------------------------------------------------------------
# Pure-JAX reference (for correctness check only).
# ---------------------------------------------------------------------------
def partial_conv3_ref(x, wc, w1conv, w2conv, weight1, weight2):
    C = x.shape[1]
    Cc = C // 4
    dn = ('NCDHW', 'OIDHW', 'NCDHW')
    x1, x2 = x[:, :Cc], x[:, Cc:]
    x1c = lax.conv_general_dilated(x1, wc, (1, 1, 1),
                                   [(1, 1), (1, 1), (1, 1)],
                                   dimension_numbers=dn) * weight1
    x2s = x2 * weight2
    xcat = jnp.concatenate([x1c, x2s], axis=1)
    y1 = lax.conv_general_dilated(xcat, w1conv, (1, 1, 1),
                                  [(1, 1), (1, 1), (0, 0)],
                                  dimension_numbers=dn)
    mean = y1.mean(axis=(0, 2, 3, 4), keepdims=True)
    var = ((y1 - mean) ** 2).mean(axis=(0, 2, 3, 4), keepdims=True)
    z = jnp.maximum((y1 - mean) * lax.rsqrt(var + 1e-5), 0.0)
    y2 = lax.conv_general_dilated(z, w2conv, (1, 1, 1),
                                  [(0, 0), (1, 1), (1, 1)],
                                  dimension_numbers=dn)
    return x + y2


if __name__ == "__main__":
    # Small shapes consistent with the module (residual needs out_dim == in_dim).
    N, C, D, H, W = 2, 8, 4, 8, 8
    Cc = C // 4
    Co = C

    key = jax.random.PRNGKey(0)
    k1, k2, k3, k4 = jax.random.split(key, 4)
    wc = jax.random.normal(k1, (Cc, Cc, 3, 3, 3), jnp.float32) * 0.2
    w1conv = jax.random.normal(k2, (Co, C, 3, 3, 1), jnp.float32) * 0.1
    w2conv = jax.random.normal(k3, (Co, Co, 1, 3, 3), jnp.float32) * 0.1
    weight1 = jnp.float32(1.25)   # learnable scalar (init = 1.0 in the module)
    weight2 = jnp.float32(0.75)   # learnable scalar (init = 1.0 in the module)
    x = jax.random.normal(k4, (N, C, D, H, W), jnp.float32)

    out = partial_conv3_pallas(x, wc, w1conv, w2conv, weight1, weight2,
                               d_tile=2)
    out = jax.block_until_ready(out)

    ref = partial_conv3_ref(x, wc, w1conv, w2conv, weight1, weight2)
    np.testing.assert_allclose(np.asarray(out), np.asarray(ref),
                               rtol=2e-3, atol=2e-3)
    print("KERNEL_OK")
</pallas_src>

<mosaic_0001>
module attributes {stable_mosaic.version = 11 : i64} {
  func.func @fused_pconv_conv1_kernel(%arg0: i32, %arg1: memref<1x4x8x8x8xf32, #tpu.memory_space<vmem>>, %arg2: memref<27x2x2xf32, #tpu.memory_space<vmem>>, %arg3: memref<9x8x8xf32, #tpu.memory_space<vmem>>, %arg4: memref<1x4x8x8x8xf32, #tpu.memory_space<vmem>>, %arg5: memref<1x2x8xf32, #tpu.memory_space<vmem>>, %arg6: memref<6x10x10x2xf32, #tpu.memory_space<vmem>>, %arg7: memref<6x10x8x8xf32, #tpu.memory_space<vmem>>) attributes {dimension_semantics = [#tpu.dimension_semantics<parallel>], iteration_bounds = array<i64: 2>, scalar_prefetch = 0 : i64, scratch_operands = 2 : i64, tpu.core_type = #tpu.core_type<tc>, window_params = [{transform_indices = @transform_0, window_bounds = array<i64: 1, 4, 8, 8, 8>}, {pipeline_mode = #tpu.pipeline_mode<synchronous>, transform_indices = @transform_1, window_bounds = array<i64: 27, 2, 2>}, {pipeline_mode = #tpu.pipeline_mode<synchronous>, transform_indices = @transform_2, window_bounds = array<i64: 9, 8, 8>}, {transform_indices = @transform_3, window_bounds = array<i64: 1, 4, 8, 8, 8>}, {transform_indices = @transform_4, window_bounds = array<i64: 1, 2, 8>}]} {
    %cst = arith.constant 0.000000e+00 : f32
    %0 = vector.broadcast %cst : f32 to vector<1x10x10x2xf32>
    %c0 = arith.constant 0 : index
    %c0_0 = arith.constant 0 : index
    %c0_1 = arith.constant 0 : index
    %c0_2 = arith.constant 0 : index
    %1 = vector.load %arg6[%c0, %c0_0, %c0_1, %c0_2] : memref<6x10x10x2xf32, #tpu.memory_space<vmem>>, vector<1x10x10x2xf32>
    tpu.vector_store %arg6[%c0, %c0_0, %c0_1, %c0_2], %0 {strides = array<i32>} : memref<6x10x10x2xf32, #tpu.memory_space<vmem>>, vector<1x10x10x2xf32>,
    %cst_3 = arith.constant 0.000000e+00 : f32
    %2 = vector.broadcast %cst_3 : f32 to vector<1x10x10x2xf32>
    %c5 = arith.constant 5 : index
    %c0_4 = arith.constant 0 : index
    %c0_5 = arith.constant 0 : index
    %c0_6 = arith.constant 0 : index
    %3 = vector.load %arg6[%c5, %c0_4, %c0_5, %c0_6] : memref<6x10x10x2xf32, #tpu.memory_space<vmem>>, vector<1x10x10x2xf32>
    tpu.vector_store %arg6[%c5, %c0_4, %c0_5, %c0_6], %2 {strides = array<i32>} : memref<6x10x10x2xf32, #tpu.memory_space<vmem>>, vector<1x10x10x2xf32>,
    %cst_7 = arith.constant 0.000000e+00 : f32
    %4 = vector.broadcast %cst_7 : f32 to vector<6x1x10x2xf32>
    %c0_8 = arith.constant 0 : index
    %c0_9 = arith.constant 0 : index
    %c0_10 = arith.constant 0 : index
    %c0_11 = arith.constant 0 : index
    %5 = vector.load %arg6[%c0_8, %c0_9, %c0_10, %c0_11] : memref<6x10x10x2xf32, #tpu.memory_space<vmem>>, vector<6x1x10x2xf32>
    tpu.vector_store %arg6[%c0_8, %c0_9, %c0_10, %c0_11], %4 {strides = array<i32>} : memref<6x10x10x2xf32, #tpu.memory_space<vmem>>, vector<6x1x10x2xf32>,
    %cst_12 = arith.constant 0.000000e+00 : f32
    %6 = vector.broadcast %cst_12 : f32 to vector<6x1x10x2xf32>
    %c0_13 = arith.constant 0 : index
    %c9 = arith.constant 9 : index
    %c0_14 = arith.constant 0 : index
    %c0_15 = arith.constant 0 : index
    %7 = vector.load %arg6[%c0_13, %c9, %c0_14, %c0_15] : memref<6x10x10x2xf32, #tpu.memory_space<vmem>>, vector<6x1x10x2xf32>
    tpu.vector_store %arg6[%c0_13, %c9, %c0_14, %c0_15], %6 {strides = array<i32>} : memref<6x10x10x2xf32, #tpu.memory_space<vmem>>, vector<6x1x10x2xf32>,
    %cst_16 = arith.constant 0.000000e+00 : f32
    %8 = vector.broadcast %cst_16 : f32 to vector<6x10x1x2xf32>
    %c0_17 = arith.constant 0 : index
    %c0_18 = arith.constant 0 : index
    %c0_19 = arith.constant 0 : index
    %c0_20 = arith.constant 0 : index
    %9 = vector.load %arg6[%c0_17, %c0_18, %c0_19, %c0_20] : memref<6x10x10x2xf32, #tpu.memory_space<vmem>>, vector<6x10x1x2xf32>
    tpu.vector_store %arg6[%c0_17, %c0_18, %c0_19, %c0_20], %8 {strides = array<i32>} : memref<6x10x10x2xf32, #tpu.memory_space<vmem>>, vector<6x10x1x2xf32>,
    %cst_21 = arith.constant 0.000000e+00 : f32
    %10 = vector.broadcast %cst_21 : f32 to vector<6x10x1x2xf32>
    %c0_22 = arith.constant 0 : index
    %c0_23 = arith.constant 0 : index
    %c9_24 = arith.constant 9 : index
    %c0_25 = arith.constant 0 : index
    %11 = vector.load %arg6[%c0_22, %c0_23, %c9_24, %c0_25] : memref<6x10x10x2xf32, #tpu.memory_space<vmem>>, vector<6x10x1x2xf32>
    tpu.vector_store %arg6[%c0_22, %c0_23, %c9_24, %c0_25], %10 {strides = array<i32>} : memref<6x10x10x2xf32, #tpu.memory_space<vmem>>, vector<6x10x1x2xf32>,
    %cst_26 = arith.constant 0.000000e+00 : f32
    %12 = vector.broadcast %cst_26 : f32 to vector<1x10x8x8xf32>
    %c0_27 = arith.constant 0 : index
    %c0_28 = arith.constant 0 : index
    %c0_29 = arith.constant 0 : index
    %c0_30 = arith.constant 0 : index
    %13 = vector.load %arg7[%c0_27, %c0_28, %c0_29, %c0_30] : memref<6x10x8x8xf32, #tpu.memory_space<vmem>>, vector<1x10x8x8xf32>
    tpu.vector_store %arg7[%c0_27, %c0_28, %c0_29, %c0_30], %12 {strides = array<i32>} : memref<6x10x8x8xf32, #tpu.memory_space<vmem>>, vector<1x10x8x8xf32>,
    %cst_31 = arith.constant 0.000000e+00 : f32
    %14 = vector.broadcast %cst_31 : f32 to vector<1x10x8x8xf32>
    %c5_32 = arith.constant 5 : index
    %c0_33 = arith.constant 0 : index
    %c0_34 = arith.constant 0 : index
    %c0_35 = arith.constant 0 : index
    %15 = vector.load %arg7[%c5_32, %c0_33, %c0_34, %c0_35] : memref<6x10x8x8xf32, #tpu.memory_space<vmem>>, vector<1x10x8x8xf32>
    tpu.vector_store %arg7[%c5_32, %c0_33, %c0_34, %c0_35], %14 {strides = array<i32>} : memref<6x10x8x8xf32, #tpu.memory_space<vmem>>, vector<1x10x8x8xf32>,
    %cst_36 = arith.constant 0.000000e+00 : f32
    %16 = vector.broadcast %cst_36 : f32 to vector<6x1x8x8xf32>
    %c0_37 = arith.constant 0 : index
    %c0_38 = arith.constant 0 : index
    %c0_39 = arith.constant 0 : index
    %c0_40 = arith.constant 0 : index
    %17 = vector.load %arg7[%c0_37, %c0_38, %c0_39, %c0_40] : memref<6x10x8x8xf32, #tpu.memory_space<vmem>>, vector<6x1x8x8xf32>
    tpu.vector_store %arg7[%c0_37, %c0_38, %c0_39, %c0_40], %16 {strides = array<i32>} : memref<6x10x8x8xf32, #tpu.memory_space<vmem>>, vector<6x1x8x8xf32>,
    %cst_41 = arith.constant 0.000000e+00 : f32
    %18 = vector.broadcast %cst_41 : f32 to vector<6x1x8x8xf32>
    %c0_42 = arith.constant 0 : index
    %c9_43 = arith.constant 9 : index
    %c0_44 = arith.constant 0 : index
    %c0_45 = arith.constant 0 : index
    %19 = vector.load %arg7[%c0_42, %c9_43, %c0_44, %c0_45] : memref<6x10x8x8xf32, #tpu.memory_space<vmem>>, vector<6x1x8x8xf32>
    tpu.vector_store %arg7[%c0_42, %c9_43, %c0_44, %c0_45], %18 {strides = array<i32>} : memref<6x10x8x8xf32, #tpu.memory_space<vmem>>, vector<6x1x8x8xf32>,
    %c0_46 = arith.constant 0 : index
    %c0_47 = arith.constant 0 : index
    %c0_48 = arith.constant 0 : index
    %c0_49 = arith.constant 0 : index
    %c0_50 = arith.constant 0 : index
    %20 = vector.load %arg1[%c0_46, %c0_47, %c0_48, %c0_49, %c0_50] : memref<1x4x8x8x8xf32, #tpu.memory_space<vmem>>, vector<1x4x8x8x8xf32>
    %21 = vector.shape_cast %20 : vector<1x4x8x8x8xf32> to vector<4x8x8x8xf32>
    %22 = vector.extract_strided_slice %21 {offsets = [0, 0, 0, 0], sizes = [4, 8, 8, 2], strides = [1, 1, 1, 1]} : vector<4x8x8x8xf32> to vector<4x8x8x2xf32>
    %c1 = arith.constant 1 : index
    %c1_51 = arith.constant 1 : index
    %c1_52 = arith.constant 1 : index
    %c0_53 = arith.constant 0 : index
    %23 = vector.load %arg6[%c1, %c1_51, %c1_52, %c0_53] : memref<6x10x10x2xf32, #tpu.memory_space<vmem>>, vector<4x8x8x2xf32>
    tpu.vector_store %arg6[%c1, %c1_51, %c1_52, %c0_53], %22 {strides = array<i32>} : memref<6x10x10x2xf32, #tpu.memory_space<vmem>>, vector<4x8x8x2xf32>,
    %cst_54 = arith.constant 0.000000e+00 : f32
    %24 = vector.broadcast %cst_54 : f32 to vector<256x2xf32>
    %c0_55 = arith.constant 0 : index
    %c0_56 = arith.constant 0 : index
    %c0_57 = arith.constant 0 : index
    %c0_58 = arith.constant 0 : index
    %25 = vector.load %arg6[%c0_55, %c0_56, %c0_57, %c0_58] : memref<6x10x10x2xf32, #tpu.memory_space<vmem>>, vector<4x8x8x2xf32>
    %26 = vector.shape_cast %25 : vector<4x8x8x2xf32> to vector<256x2xf32>
    %c0_59 = arith.constant 0 : index
    %c0_60 = arith.constant 0 : index
    %c0_61 = arith.constant 0 : index
    %27 = vector.load %arg2[%c0_59, %c0_60, %c0_61] : memref<27x2x2xf32, #tpu.memory_space<vmem>>, vector<1x2x2xf32>
    %28 = vector.shape_cast %27 : vector<1x2x2xf32> to vector<2x2xf32>
    %cst_62 = arith.constant dense<0.000000e+00> : vector<256x2xf32>
    %29 = tpu.matmul %26, %28, %cst_62 {dimension_numbers = #tpu.dot_dimension_numbers<[1], [0], [0], [1], [0, 0, 1, 1], [], []>} : vector<256x2xf32>, vector<2x2xf32>, vector<256x2xf32> -> vector<256x2xf32>
    %30 = arith.addf %24, %29 : vector<256x2xf32>
    %c0_63 = arith.constant 0 : index
    %c0_64 = arith.constant 0 : index
    %c1_65 = arith.constant 1 : index
    %c0_66 = arith.constant 0 : index
    %31 = vector.load %arg6[%c0_63, %c0_64, %c1_65, %c0_66] : memref<6x10x10x2xf32, #tpu.memory_space<vmem>>, vector<4x8x8x2xf32>
    %32 = vector.shape_cast %31 : vector<4x8x8x2xf32> to vector<256x2xf32>
    %c1_67 = arith.constant 1 : index
    %c0_68 = arith.constant 0 : index
    %c0_69 = arith.constant 0 : index
    %33 = vector.load %arg2[%c1_67, %c0_68, %c0_69] : memref<27x2x2xf32, #tpu.memory_space<vmem>>, vector<1x2x2xf32>
    %34 = vector.shape_cast %33 : vector<1x2x2xf32> to vector<2x2xf32>
    %cst_70 = arith.constant dense<0.000000e+00> : vector<256x2xf32>
    %35 = tpu.matmul %32, %34, %cst_70 {dimension_numbers = #tpu.dot_dimension_numbers<[1], [0], [0], [1], [0, 0, 1, 1], [], []>} : vector<256x2xf32>, vector<2x2xf32>, vector<256x2xf32> -> vector<256x2xf32>
    %36 = arith.addf %30, %35 : vector<256x2xf32>
    %c0_71 = arith.constant 0 : index
    %c0_72 = arith.constant 0 : index
    %c2 = arith.constant 2 : index
    %c0_73 = arith.constant 0 : index
    %37 = vector.load %arg6[%c0_71, %c0_72, %c2, %c0_73] : memref<6x10x10x2xf32, #tpu.memory_space<vmem>>, vector<4x8x8x2xf32>
    %38 = vector.shape_cast %37 : vector<4x8x8x2xf32> to vector<256x2xf32>
    %c2_74 = arith.constant 2 : index
    %c0_75 = arith.constant 0 : index
    %c0_76 = arith.constant 0 : index
    %39 = vector.load %arg2[%c2_74, %c0_75, %c0_76] : memref<27x2x2xf32, #tpu.memory_space<vmem>>, vector<1x2x2xf32>
    %40 = vector.shape_cast %39 : vector<1x2x2xf32> to vector<2x2xf32>
    %cst_77 = arith.constant dense<0.000000e+00> : vector<256x2xf32>
    %41 = tpu.matmul %38, %40, %cst_77 {dimension_numbers = #tpu.dot_dimension_numbers<[1], [0], [0], [1], [0, 0, 1, 1], [], []>} : vector<256x2xf32>, vector<2x2xf32>, vector<256x2xf32> -> vector<256x2xf32>
    %42 = arith.addf %36, %41 : vector<256x2xf32>
    %c0_78 = arith.constant 0 : index
    %c1_79 = arith.constant 1 : index
    %c0_80 = arith.constant 0 : index
    %c0_81 = arith.constant 0 : index
    %43 = vector.load %arg6[%c0_78, %c1_79, %c0_80, %c0_81] : memref<6x10x10x2xf32, #tpu.memory_space<vmem>>, vector<4x8x8x2xf32>
    %44 = vector.shape_cast %43 : vector<4x8x8x2xf32> to vector<256x2xf32>
    %c3 = arith.constant 3 : index
    %c0_82 = arith.constant 0 : index
    %c0_83 = arith.constant 0 : index
    %45 = vector.load %arg2[%c3, %c0_82, %c0_83] : memref<27x2x2xf32, #tpu.memory_space<vmem>>, vector<1x2x2xf32>
    %46 = vector.shape_cast %45 : vector<1x2x2xf32> to vector<2x2xf32>
    %cst_84 = arith.constant dense<0.000000e+00> : vector<256x2xf32>
    %47 = tpu.matmul %44, %46, %cst_84 {dimension_numbers = #tpu.dot_dimension_numbers<[1], [0], [0], [1], [0, 0, 1, 1], [], []>} : vector<256x2xf32>, vector<2x2xf32>, vector<256x2xf32> -> vector<256x2xf32>
    %48 = arith.addf %42, %47 : vector<256x2xf32>
    %c0_85 = arith.constant 0 : index
    %c1_86 = arith.constant 1 : index
    %c1_87 = arith.constant 1 : index
    %c0_88 = arith.constant 0 : index
    %49 = vector.load %arg6[%c0_85, %c1_86, %c1_87, %c0_88] : memref<6x10x10x2xf32, #tpu.memory_space<vmem>>, vector<4x8x8x2xf32>
    %50 = vector.shape_cast %49 : vector<4x8x8x2xf32> to vector<256x2xf32>
    %c4 = arith.constant 4 : index
    %c0_89 = arith.constant 0 : index
    %c0_90 = arith.constant 0 : index
    %51 = vector.load %arg2[%c4, %c0_89, %c0_90] : memref<27x2x2xf32, #tpu.memory_space<vmem>>, vector<1x2x2xf32>
    %52 = vector.shape_cast %51 : vector<1x2x2xf32> to vector<2x2xf32>
    %cst_91 = arith.constant dense<0.000000e+00> : vector<256x2xf32>
    %53 = tpu.matmul %50, %52, %cst_91 {dimension_numbers = #tpu.dot_dimension_numbers<[1], [0], [0], [1], [0, 0, 1, 1], [], []>} : vector<256x2xf32>, vector<2x2xf32>, vector<256x2xf32> -> vector<256x2xf32>
    %54 = arith.addf %48, %53 : vector<256x2xf32>
    %c0_92 = arith.constant 0 : index
    %c1_93 = arith.constant 1 : index
    %c2_94 = arith.constant 2 : index
    %c0_95 = arith.constant 0 : index
    %55 = vector.load %arg6[%c0_92, %c1_93, %c2_94, %c0_95] : memref<6x10x10x2xf32, #tpu.memory_space<vmem>>, vector<4x8x8x2xf32>
    %56 = vector.shape_cast %55 : vector<4x8x8x2xf32> to vector<256x2xf32>
    %c5_96 = arith.constant 5 : index
    %c0_97 = arith.constant 0 : index
    %c0_98 = arith.constant 0 : index
    %57 = vector.load %arg2[%c5_96, %c0_97, %c0_98] : memref<27x2x2xf32, #tpu.memory_space<vmem>>, vector<1x2x2xf32>
    %58 = vector.shape_cast %57 : vector<1x2x2xf32> to vector<2x2xf32>
    %cst_99 = arith.constant dense<0.000000e+00> : vector<256x2xf32>
    %59 = tpu.matmul %56, %58, %cst_99 {dimension_numbers = #tpu.dot_dimension_numbers<[1], [0], [0], [1], [0, 0, 1, 1], [], []>} : vector<256x2xf32>, vector<2x2xf32>, vector<256x2xf32> -> vector<256x2xf32>
    %60 = arith.addf %54, %59 : vector<256x2xf32>
    %c0_100 = arith.constant 0 : index
    %c2_101 = arith.constant 2 : index
    %c0_102 = arith.constant 0 : index
    %c0_103 = arith.constant 0 : index
    %61 = vector.load %arg6[%c0_100, %c2_101, %c0_102, %c0_103] : memref<6x10x10x2xf32, #tpu.memory_space<vmem>>, vector<4x8x8x2xf32>
    %62 = vector.shape_cast %61 : vector<4x8x8x2xf32> to vector<256x2xf32>
    %c6 = arith.constant 6 : index
    %c0_104 = arith.constant 0 : index
    %c0_105 = arith.constant 0 : index
    %63 = vector.load %arg2[%c6, %c0_104, %c0_105] : memref<27x2x2xf32, #tpu.memory_space<vmem>>, vector<1x2x2xf32>
    %64 = vector.shape_cast %63 : vector<1x2x2xf32> to vector<2x2xf32>
    %cst_106 = arith.constant dense<0.000000e+00> : vector<256x2xf32>
    %65 = tpu.matmul %62, %64, %cst_106 {dimension_numbers = #tpu.dot_dimension_numbers<[1], [0], [0], [1], [0, 0, 1, 1], [], []>} : vector<256x2xf32>, vector<2x2xf32>, vector<256x2xf32> -> vector<256x2xf32>
    %66 = arith.addf %60, %65 : vector<256x2xf32>
    %c0_107 = arith.constant 0 : index
    %c2_108 = arith.constant 2 : index
    %c1_109 = arith.constant 1 : index
    %c0_110 = arith.constant 0 : index
    %67 = vector.load %arg6[%c0_107, %c2_108, %c1_109, %c0_110] : memref<6x10x10x2xf32, #tpu.memory_space<vmem>>, vector<4x8x8x2xf32>
    %68 = vector.shape_cast %67 : vector<4x8x8x2xf32> to vector<256x2xf32>
    %c7 = arith.constant 7 : index
    %c0_111 = arith.constant 0 : index
    %c0_112 = arith.constant 0 : index
    %69 = vector.load %arg2[%c7, %c0_111, %c0_112] : memref<27x2x2xf32, #tpu.memory_space<vmem>>, vector<1x2x2xf32>
    %70 = vector.shape_cast %69 : vector<1x2x2xf32> to vector<2x2xf32>
    %cst_113 = arith.constant dense<0.000000e+00> : vector<256x2xf32>
    %71 = tpu.matmul %68, %70, %cst_113 {dimension_numbers = #tpu.dot_dimension_numbers<[1], [0], [0], [1], [0, 0, 1, 1], [], []>} : vector<256x2xf32>, vector<2x2xf32>, vector<256x2xf32> -> vector<256x2xf32>
    %72 = arith.addf %66, %71 : vector<256x2xf32>
    %c0_114 = arith.constant 0 : index
    %c2_115 = arith.constant 2 : index
    %c2_116 = arith.constant 2 : index
    %c0_117 = arith.constant 0 : index
    %73 = vector.load %arg6[%c0_114, %c2_115, %c2_116, %c0_117] : memref<6x10x10x2xf32, #tpu.memory_space<vmem>>, vector<4x8x8x2xf32>
    %74 = vector.shape_cast %73 : vector<4x8x8x2xf32> to vector<256x2xf32>
    %c8 = arith.constant 8 : index
    %c0_118 = arith.constant 0 : index
    %c0_119 = arith.constant 0 : index
    %75 = vector.load %arg2[%c8, %c0_118, %c0_119] : memref<27x2x2xf32, #tpu.memory_space<vmem>>, vector<1x2x2xf32>
    %76 = vector.shape_cast %75 : vector<1x2x2xf32> to vector<2x2xf32>
    %cst_120 = arith.constant dense<0.000000e+00> : vector<256x2xf32>
    %77 = tpu.matmul %74, %76, %cst_120 {dimension_numbers = #tpu.dot_dimension_numbers<[1], [0], [0], [1], [0, 0, 1, 1], [], []>} : vector<256x2xf32>, vector<2x2xf32>, vector<256x2xf32> -> vector<256x2xf32>
    %78 = arith.addf %72, %77 : vector<256x2xf32>
    %c1_121 = arith.constant 1 : index
    %c0_122 = arith.constant 0 : index
    %c0_123 = arith.constant 0 : index
    %c0_124 = arith.constant 0 : index
    %79 = vector.load %arg6[%c1_121, %c0_122, %c0_123, %c0_124] : memref<6x10x10x2xf32, #tpu.memory_space<vmem>>, vector<4x8x8x2xf32>
    %80 = vector.shape_cast %79 : vector<4x8x8x2xf32> to vector<256x2xf32>
    %c9_125 = arith.constant 9 : index
    %c0_126 = arith.constant 0 : index
    %c0_127 = arith.constant 0 : index
    %81 = vector.load %arg2[%c9_125, %c0_126, %c0_127] : memref<27x2x2xf32, #tpu.memory_space<vmem>>, vector<1x2x2xf32>
    %82 = vector.shape_cast %81 : vector<1x2x2xf32> to vector<2x2xf32>
    %cst_128 = arith.constant dense<0.000000e+00> : vector<256x2xf32>
    %83 = tpu.matmul %80, %82, %cst_128 {dimension_numbers = #tpu.dot_dimension_numbers<[1], [0], [0], [1], [0, 0, 1, 1], [], []>} : vector<256x2xf32>, vector<2x2xf32>, vector<256x2xf32> -> vector<256x2xf32>
    %84 = arith.addf %78, %83 : vector<256x2xf32>
    %c1_129 = arith.constant 1 : index
    %c0_130 = arith.constant 0 : index
    %c1_131 = arith.constant 1 : index
    %c0_132 = arith.constant 0 : index
    %85 = vector.load %arg6[%c1_129, %c0_130, %c1_131, %c0_132] : memref<6x10x10x2xf32, #tpu.memory_space<vmem>>, vector<4x8x8x2xf32>
    %86 = vector.shape_cast %85 : vector<4x8x8x2xf32> to vector<256x2xf32>
    %c10 = arith.constant 10 : index
    %c0_133 = arith.constant 0 : index
    %c0_134 = arith.constant 0 : index
    %87 = vector.load %arg2[%c10, %c0_133, %c0_134] : memref<27x2x2xf32, #tpu.memory_space<vmem>>, vector<1x2x2xf32>
    %88 = vector.shape_cast %87 : vector<1x2x2xf32> to vector<2x2xf32>
    %cst_135 = arith.constant dense<0.000000e+00> : vector<256x2xf32>
    %89 = tpu.matmul %86, %88, %cst_135 {dimension_numbers = #tpu.dot_dimension_numbers<[1], [0], [0], [1], [0, 0, 1, 1], [], []>} : vector<256x2xf32>, vector<2x2xf32>, vector<256x2xf32> -> vector<256x2xf32>
    %90 = arith.addf %84, %89 : vector<256x2xf32>
    %c1_136 = arith.constant 1 : index
    %c0_137 = arith.constant 0 : index
    %c2_138 = arith.constant 2 : index
    %c0_139 = arith.constant 0 : index
    %91 = vector.load %arg6[%c1_136, %c0_137, %c2_138, %c0_139] : memref<6x10x10x2xf32, #tpu.memory_space<vmem>>, vector<4x8x8x2xf32>
    %92 = vector.shape_cast %91 : vector<4x8x8x2xf32> to vector<256x2xf32>
    %c11 = arith.constant 11 : index
    %c0_140 = arith.constant 0 : index
    %c0_141 = arith.constant 0 : index
    %93 = vector.load %arg2[%c11, %c0_140, %c0_141] : memref<27x2x2xf32, #tpu.memory_space<vmem>>, vector<1x2x2xf32>
    %94 = vector.shape_cast %93 : vector<1x2x2xf32> to vector<2x2xf32>
    %cst_142 = arith.constant dense<0.000000e+00> : vector<256x2xf32>
    %95 = tpu.matmul %92, %94, %cst_142 {dimension_numbers = #tpu.dot_dimension_numbers<[1], [0], [0], [1], [0, 0, 1, 1], [], []>} : vector<256x2xf32>, vector<2x2xf32>, vector<256x2xf32> -> vector<256x2xf32>
    %96 = arith.addf %90, %95 : vector<256x2xf32>
    %c1_143 = arith.constant 1 : index
    %c1_144 = arith.constant 1 : index
    %c0_145 = arith.constant 0 : index
    %c0_146 = arith.constant 0 : index
    %97 = vector.load %arg6[%c1_143, %c1_144, %c0_145, %c0_146] : memref<6x10x10x2xf32, #tpu.memory_space<vmem>>, vector<4x8x8x2xf32>
    %98 = vector.shape_cast %97 : vector<4x8x8x2xf32> to vector<256x2xf32>
    %c12 = arith.constant 12 : index
    %c0_147 = arith.constant 0 : index
    %c0_148 = arith.constant 0 : index
    %99 = vector.load %arg2[%c12, %c0_147, %c0_148] : memref<27x2x2xf32, #tpu.memory_space<vmem>>, vector<1x2x2xf32>
    %100 = vector.shape_cast %99 : vector<1x2x2xf32> to vector<2x2xf32>
    %cst_149 = arith.constant dense<0.000000e+00> : vector<256x2xf32>
    %101 = tpu.matmul %98, %100, %cst_149 {dimension_numbers = #tpu.dot_dimension_numbers<[1], [0], [0], [1], [0, 0, 1, 1], [], []>} : vector<256x2xf32>, vector<2x2xf32>, vector<256x2xf32> -> vector<256x2xf32>
    %102 = arith.addf %96, %101 : vector<256x2xf32>
    %c1_150 = arith.constant 1 : index
    %c1_151 = arith.constant 1 : index
    %c1_152 = arith.constant 1 : index
    %c0_153 = arith.constant 0 : index
    %103 = vector.load %arg6[%c1_150, %c1_151, %c1_152, %c0_153] : memref<6x10x10x2xf32, #tpu.memory_space<vmem>>, vector<4x8x8x2xf32>
    %104 = vector.shape_cast %103 : vector<4x8x8x2xf32> to vector<256x2xf32>
    %c13 = arith.constant 13 : index
    %c0_154 = arith.constant 0 : index
    %c0_155 = arith.constant 0 : index
    %105 = vector.load %arg2[%c13, %c0_154, %c0_155] : memref<27x2x2xf32, #tpu.memory_space<vmem>>, vector<1x2x2xf32>
    %106 = vector.shape_cast %105 : vector<1x2x2xf32> to vector<2x2xf32>
    %cst_156 = arith.constant dense<0.000000e+00> : vector<256x2xf32>
    %107 = tpu.matmul %104, %106, %cst_156 {dimension_numbers = #tpu.dot_dimension_numbers<[1], [0], [0], [1], [0, 0, 1, 1], [], []>} : vector<256x2xf32>, vector<2x2xf32>, vector<256x2xf32> -> vector<256x2xf32>
    %108 = arith.addf %102, %107 : vector<256x2xf32>
    %c1_157 = arith.constant 1 : index
    %c1_158 = arith.constant 1 : index
    %c2_159 = arith.constant 2 : index
    %c0_160 = arith.constant 0 : index
    %109 = vector.load %arg6[%c1_157, %c1_158, %c2_159, %c0_160] : memref<6x10x10x2xf32, #tpu.memory_space<vmem>>, vector<4x8x8x2xf32>
    %110 = vector.shape_cast %109 : vector<4x8x8x2xf32> to vector<256x2xf32>
    %c14 = arith.constant 14 : index
    %c0_161 = arith.constant 0 : index
    %c0_162 = arith.constant 0 : index
    %111 = vector.load %arg2[%c14, %c0_161, %c0_162] : memref<27x2x2xf32, #tpu.memory_space<vmem>>, vector<1x2x2xf32>
    %112 = vector.shape_cast %111 : vector<1x2x2xf32> to vector<2x2xf32>
    %cst_163 = arith.constant dense<0.000000e+00> : vector<256x2xf32>
    %113 = tpu.matmul %110, %112, %cst_163 {dimension_numbers = #tpu.dot_dimension_numbers<[1], [0], [0], [1], [0, 0, 1, 1], [], []>} : vector<256x2xf32>, vector<2x2xf32>, vector<256x2xf32> -> vector<256x2xf32>
    %114 = arith.addf %108, %113 : vector<256x2xf32>
    %c1_164 = arith.constant 1 : index
    %c2_165 = arith.constant 2 : index
    %c0_166 = arith.constant 0 : index
    %c0_167 = arith.constant 0 : index
    %115 = vector.load %arg6[%c1_164, %c2_165, %c0_166, %c0_167] : memref<6x10x10x2xf32, #tpu.memory_space<vmem>>, vector<4x8x8x2xf32>
    %116 = vector.shape_cast %115 : vector<4x8x8x2xf32> to vector<256x2xf32>
    %c15 = arith.constant 15 : index
    %c0_168 = arith.constant 0 : index
    %c0_169 = arith.constant 0 : index
    %117 = vector.load %arg2[%c15, %c0_168, %c0_169] : memref<27x2x2xf32, #tpu.memory_space<vmem>>, vector<1x2x2xf32>
    %118 = vector.shape_cast %117 : vector<1x2x2xf32> to vector<2x2xf32>
    %cst_170 = arith.constant dense<0.000000e+00> : vector<256x2xf32>
    %119 = tpu.matmul %116, %118, %cst_170 {dimension_numbers = #tpu.dot_dimension_numbers<[1], [0], [0], [1], [0, 0, 1, 1], [], []>} : vector<256x2xf32>, vector<2x2xf32>, vector<256x2xf32> -> vector<256x2xf32>
    %120 = arith.addf %114, %119 : vector<256x2xf32>
    %c1_171 = arith.constant 1 : index
    %c2_172 = arith.constant 2 : index
    %c1_173 = arith.constant 1 : index
    %c0_174 = arith.constant 0 : index
    %121 = vector.load %arg6[%c1_171, %c2_172, %c1_173, %c0_174] : memref<6x10x10x2xf32, #tpu.memory_space<vmem>>, vector<4x8x8x2xf32>
    %122 = vector.shape_cast %121 : vector<4x8x8x2xf32> to vector<256x2xf32>
    %c16 = arith.constant 16 : index
    %c0_175 = arith.constant 0 : index
    %c0_176 = arith.constant 0 : index
    %123 = vector.load %arg2[%c16, %c0_175, %c0_176] : memref<27x2x2xf32, #tpu.memory_space<vmem>>, vector<1x2x2xf32>
    %124 = vector.shape_cast %123 : vector<1x2x2xf32> to vector<2x2xf32>
    %cst_177 = arith.constant dense<0.000000e+00> : vector<256x2xf32>
    %125 = tpu.matmul %122, %124, %cst_177 {dimension_numbers = #tpu.dot_dimension_numbers<[1], [0], [0], [1], [0, 0, 1, 1], [], []>} : vector<256x2xf32>, vector<2x2xf32>, vector<256x2xf32> -> vector<256x2xf32>
    %126 = arith.addf %120, %125 : vector<256x2xf32>
    %c1_178 = arith.constant 1 : index
    %c2_179 = arith.constant 2 : index
    %c2_180 = arith.constant 2 : index
    %c0_181 = arith.constant 0 : index
    %127 = vector.load %arg6[%c1_178, %c2_179, %c2_180, %c0_181] : memref<6x10x10x2xf32, #tpu.memory_space<vmem>>, vector<4x8x8x2xf32>
    %128 = vector.shape_cast %127 : vector<4x8x8x2xf32> to vector<256x2xf32>
    %c17 = arith.constant 17 : index
    %c0_182 = arith.constant 0 : index
    %c0_183 = arith.constant 0 : index
    %129 = vector.load %arg2[%c17, %c0_182, %c0_183] : memref<27x2x2xf32, #tpu.memory_space<vmem>>, vector<1x2x2xf32>
    %130 = vector.shape_cast %129 : vector<1x2x2xf32> to vector<2x2xf32>
    %cst_184 = arith.constant dense<0.000000e+00> : vector<256x2xf32>
    %131 = tpu.matmul %128, %130, %cst_184 {dimension_numbers = #tpu.dot_dimension_numbers<[1], [0], [0], [1], [0, 0, 1, 1], [], []>} : vector<256x2xf32>, vector<2x2xf32>, vector<256x2xf32> -> vector<256x2xf32>
    %132 = arith.addf %126, %131 : vector<256x2xf32>
    %c2_185 = arith.constant 2 : index
    %c0_186 = arith.constant 0 : index
    %c0_187 = arith.constant 0 : index
    %c0_188 = arith.constant 0 : index
    %133 = vector.load %arg6[%c2_185, %c0_186, %c0_187, %c0_188] : memref<6x10x10x2xf32, #tpu.memory_space<vmem>>, vector<4x8x8x2xf32>
    %134 = vector.shape_cast %133 : vector<4x8x8x2xf32> to vector<256x2xf32>
    %c18 = arith.constant 18 : index
    %c0_189 = arith.constant 0 : index
    %c0_190 = arith.constant 0 : index
    %135 = vector.load %arg2[%c18, %c0_189, %c0_190] : memref<27x2x2xf32, #tpu.memory_space<vmem>>, vector<1x2x2xf32>
    %136 = vector.shape_cast %135 : vector<1x2x2xf32> to vector<2x2xf32>
    %cst_191 = arith.constant dense<0.000000e+00> : vector<256x2xf32>
    %137 = tpu.matmul %134, %136, %cst_191 {dimension_numbers = #tpu.dot_dimension_numbers<[1], [0], [0], [1], [0, 0, 1, 1], [], []>} : vector<256x2xf32>, vector<2x2xf32>, vector<256x2xf32> -> vector<256x2xf32>
    %138 = arith.addf %132, %137 : vector<256x2xf32>
    %c2_192 = arith.constant 2 : index
    %c0_193 = arith.constant 0 : index
    %c1_194 = arith.constant 1 : index
    %c0_195 = arith.constant 0 : index
    %139 = vector.load %arg6[%c2_192, %c0_193, %c1_194, %c0_195] : memref<6x10x10x2xf32, #tpu.memory_space<vmem>>, vector<4x8x8x2xf32>
    %140 = vector.shape_cast %139 : vector<4x8x8x2xf32> to vector<256x2xf32>
    %c19 = arith.constant 19 : index
    %c0_196 = arith.constant 0 : index
    %c0_197 = arith.constant 0 : index
    %141 = vector.load %arg2[%c19, %c0_196, %c0_197] : memref<27x2x2xf32, #tpu.memory_space<vmem>>, vector<1x2x2xf32>
    %142 = vector.shape_cast %141 : vector<1x2x2xf32> to vector<2x2xf32>
    %cst_198 = arith.constant dense<0.000000e+00> : vector<256x2xf32>
    %143 = tpu.matmul %140, %142, %cst_198 {dimension_numbers = #tpu.dot_dimension_numbers<[1], [0], [0], [1], [0, 0, 1, 1], [], []>} : vector<256x2xf32>, vector<2x2xf32>, vector<256x2xf32> -> vector<256x2xf32>
    %144 = arith.addf %138, %143 : vector<256x2xf32>
    %c2_199 = arith.constant 2 : index
    %c0_200 = arith.constant 0 : index
    %c2_201 = arith.constant 2 : index
    %c0_202 = arith.constant 0 : index
    %145 = vector.load %arg6[%c2_199, %c0_200, %c2_201, %c0_202] : memref<6x10x10x2xf32, #tpu.memory_space<vmem>>, vector<4x8x8x2xf32>
    %146 = vector.shape_cast %145 : vector<4x8x8x2xf32> to vector<256x2xf32>
    %c20 = arith.constant 20 : index
    %c0_203 = arith.constant 0 : index
    %c0_204 = arith.constant 0 : index
    %147 = vector.load %arg2[%c20, %c0_203, %c0_204] : memref<27x2x2xf32, #tpu.memory_space<vmem>>, vector<1x2x2xf32>
    %148 = vector.shape_cast %147 : vector<1x2x2xf32> to vector<2x2xf32>
    %cst_205 = arith.constant dense<0.000000e+00> : vector<256x2xf32>
    %149 = tpu.matmul %146, %148, %cst_205 {dimension_numbers = #tpu.dot_dimension_numbers<[1], [0], [0], [1], [0, 0, 1, 1], [], []>} : vector<256x2xf32>, vector<2x2xf32>, vector<256x2xf32> -> vector<256x2xf32>
    %150 = arith.addf %144, %149 : vector<256x2xf32>
    %c2_206 = arith.constant 2 : index
    %c1_207 = arith.constant 1 : index
    %c0_208 = arith.constant 0 : index
    %c0_209 = arith.constant 0 : index
    %151 = vector.load %arg6[%c2_206, %c1_207, %c0_208, %c0_209] : memref<6x10x10x2xf32, #tpu.memory_space<vmem>>, vector<4x8x8x2xf32>
    %152 = vector.shape_cast %151 : vector<4x8x8x2xf32> to vector<256x2xf32>
    %c21 = arith.constant 21 : index
    %c0_210 = arith.constant 0 : index
    %c0_211 = arith.constant 0 : index
    %153 = vector.load %arg2[%c21, %c0_210, %c0_211] : memref<27x2x2xf32, #tpu.memory_space<vmem>>, vector<1x2x2xf32>
    %154 = vector.shape_cast %153 : vector<1x2x2xf32> to vector<2x2xf32>
    %cst_212 = arith.constant dense<0.000000e+00> : vector<256x2xf32>
    %155 = tpu.matmul %152, %154, %cst_212 {dimension_numbers = #tpu.dot_dimension_numbers<[1], [0], [0], [1], [0, 0, 1, 1], [], []>} : vector<256x2xf32>, vector<2x2xf32>, vector<256x2xf32> -> vector<256x2xf32>
    %156 = arith.addf %150, %155 : vector<256x2xf32>
    %c2_213 = arith.constant 2 : index
    %c1_214 = arith.constant 1 : index
    %c1_215 = arith.constant 1 : index
    %c0_216 = arith.constant 0 : index
    %157 = vector.load %arg6[%c2_213, %c1_214, %c1_215, %c0_216] : memref<6x10x10x2xf32, #tpu.memory_space<vmem>>, vector<4x8x8x2xf32>
    %158 = vector.shape_cast %157 : vector<4x8x8x2xf32> to vector<256x2xf32>
    %c22 = arith.constant 22 : index
    %c0_217 = arith.constant 0 : index
    %c0_218 = arith.constant 0 : index
    %159 = vector.load %arg2[%c22, %c0_217, %c0_218] : memref<27x2x2xf32, #tpu.memory_space<vmem>>, vector<1x2x2xf32>
    %160 = vector.shape_cast %159 : vector<1x2x2xf32> to vector<2x2xf32>
    %cst_219 = arith.constant dense<0.000000e+00> : vector<256x2xf32>
    %161 = tpu.matmul %158, %160, %cst_219 {dimension_numbers = #tpu.dot_dimension_numbers<[1], [0], [0], [1], [0, 0, 1, 1], [], []>} : vector<256x2xf32>, vector<2x2xf32>, vector<256x2xf32> -> vector<256x2xf32>
    %162 = arith.addf %156, %161 : vector<256x2xf32>
    %c2_220 = arith.constant 2 : index
    %c1_221 = arith.constant 1 : index
    %c2_222 = arith.constant 2 : index
    %c0_223 = arith.constant 0 : index
    %163 = vector.load %arg6[%c2_220, %c1_221, %c2_222, %c0_223] : memref<6x10x10x2xf32, #tpu.memory_space<vmem>>, vector<4x8x8x2xf32>
    %164 = vector.shape_cast %163 : vector<4x8x8x2xf32> to vector<256x2xf32>
    %c23 = arith.constant 23 : index
    %c0_224 = arith.constant 0 : index
    %c0_225 = arith.constant 0 : index
    %165 = vector.load %arg2[%c23, %c0_224, %c0_225] : memref<27x2x2xf32, #tpu.memory_space<vmem>>, vector<1x2x2xf32>
    %166 = vector.shape_cast %165 : vector<1x2x2xf32> to vector<2x2xf32>
    %cst_226 = arith.constant dense<0.000000e+00> : vector<256x2xf32>
    %167 = tpu.matmul %164, %166, %cst_226 {dimension_numbers = #tpu.dot_dimension_numbers<[1], [0], [0], [1], [0, 0, 1, 1], [], []>} : vector<256x2xf32>, vector<2x2xf32>, vector<256x2xf32> -> vector<256x2xf32>
    %168 = arith.addf %162, %167 : vector<256x2xf32>
    %c2_227 = arith.constant 2 : index
    %c2_228 = arith.constant 2 : index
    %c0_229 = arith.constant 0 : index
    %c0_230 = arith.constant 0 : index
    %169 = vector.load %arg6[%c2_227, %c2_228, %c0_229, %c0_230] : memref<6x10x10x2xf32, #tpu.memory_space<vmem>>, vector<4x8x8x2xf32>
    %170 = vector.shape_cast %169 : vector<4x8x8x2xf32> to vector<256x2xf32>
    %c24 = arith.constant 24 : index
    %c0_231 = arith.constant 0 : index
    %c0_232 = arith.constant 0 : index
    %171 = vector.load %arg2[%c24, %c0_231, %c0_232] : memref<27x2x2xf32, #tpu.memory_space<vmem>>, vector<1x2x2xf32>
    %172 = vector.shape_cast %171 : vector<1x2x2xf32> to vector<2x2xf32>
    %cst_233 = arith.constant dense<0.000000e+00> : vector<256x2xf32>
    %173 = tpu.matmul %170, %172, %cst_233 {dimension_numbers = #tpu.dot_dimension_numbers<[1], [0], [0], [1], [0, 0, 1, 1], [], []>} : vector<256x2xf32>, vector<2x2xf32>, vector<256x2xf32> -> vector<256x2xf32>
    %174 = arith.addf %168, %173 : vector<256x2xf32>
    %c2_234 = arith.constant 2 : index
    %c2_235 = arith.constant 2 : index
    %c1_236 = arith.constant 1 : index
    %c0_237 = arith.constant 0 : index
    %175 = vector.load %arg6[%c2_234, %c2_235, %c1_236, %c0_237] : memref<6x10x10x2xf32, #tpu.memory_space<vmem>>, vector<4x8x8x2xf32>
    %176 = vector.shape_cast %175 : vector<4x8x8x2xf32> to vector<256x2xf32>
    %c25 = arith.constant 25 : index
    %c0_238 = arith.constant 0 : index
    %c0_239 = arith.constant 0 : index
    %177 = vector.load %arg2[%c25, %c0_238, %c0_239] : memref<27x2x2xf32, #tpu.memory_space<vmem>>, vector<1x2x2xf32>
    %178 = vector.shape_cast %177 : vector<1x2x2xf32> to vector<2x2xf32>
    %cst_240 = arith.constant dense<0.000000e+00> : vector<256x2xf32>
    %179 = tpu.matmul %176, %178, %cst_240 {dimension_numbers = #tpu.dot_dimension_numbers<[1], [0], [0], [1], [0, 0, 1, 1], [], []>} : vector<256x2xf32>, vector<2x2xf32>, vector<256x2xf32> -> vector<256x2xf32>
    %180 = arith.addf %174, %179 : vector<256x2xf32>
    %c2_241 = arith.constant 2 : index
    %c2_242 = arith.constant 2 : index
    %c2_243 = arith.constant 2 : index
    %c0_244 = arith.constant 0 : index
    %181 = vector.load %arg6[%c2_241, %c2_242, %c2_243, %c0_244] : memref<6x10x10x2xf32, #tpu.memory_space<vmem>>, vector<4x8x8x2xf32>
    %182 = vector.shape_cast %181 : vector<4x8x8x2xf32> to vector<256x2xf32>
    %c26 = arith.constant 26 : index
    %c0_245 = arith.constant 0 : index
    %c0_246 = arith.constant 0 : index
    %183 = vector.load %arg2[%c26, %c0_245, %c0_246] : memref<27x2x2xf32, #tpu.memory_space<vmem>>, vector<1x2x2xf32>
    %184 = vector.shape_cast %183 : vector<1x2x2xf32> to vector<2x2xf32>
    %cst_247 = arith.constant dense<0.000000e+00> : vector<256x2xf32>
    %185 = tpu.matmul %182, %184, %cst_247 {dimension_numbers = #tpu.dot_dimension_numbers<[1], [0], [0], [1], [0, 0, 1, 1], [], []>} : vector<256x2xf32>, vector<2x2xf32>, vector<256x2xf32> -> vector<256x2xf32>
    %186 = arith.addf %180, %185 : vector<256x2xf32>
    %c1_248 = arith.constant 1 : index
    %c1_249 = arith.constant 1 : index
    %c0_250 = arith.constant 0 : index
    %c0_251 = arith.constant 0 : index
    %187 = vector.load %arg7[%c1_248, %c1_249, %c0_250, %c0_251] : memref<6x10x8x8xf32, #tpu.memory_space<vmem>>, vector<4x8x8x8xf32>
    tpu.vector_store %arg7[%c1_248, %c1_249, %c0_250, %c0_251], %21 {strides = array<i32>} : memref<6x10x8x8xf32, #tpu.memory_space<vmem>>, vector<4x8x8x8xf32>,
    %188 = vector.shape_cast %186 : vector<256x2xf32> to vector<4x8x8x2xf32>
    %c1_252 = arith.constant 1 : index
    %c1_253 = arith.constant 1 : index
    %c0_254 = arith.constant 0 : index
    %c0_255 = arith.constant 0 : index
    %189 = vector.load %arg7[%c1_252, %c1_253, %c0_254, %c0_255] : memref<6x10x8x8xf32, #tpu.memory_space<vmem>>, vector<4x8x8x2xf32>
    tpu.vector_store %arg7[%c1_252, %c1_253, %c0_254, %c0_255], %188 {strides = array<i32>} : memref<6x10x8x8xf32, #tpu.memory_space<vmem>>, vector<4x8x8x2xf32>,
    %cst_256 = arith.constant 0.000000e+00 : f32
    %190 = vector.broadcast %cst_256 : f32 to vector<256x8xf32>
    %c0_257 = arith.constant 0 : index
    %c0_258 = arith.constant 0 : index
    %c0_259 = arith.constant 0 : index
    %c0_260 = arith.constant 0 : index
    %191 = vector.load %arg7[%c0_257, %c0_258, %c0_259, %c0_260] : memref<6x10x8x8xf32, #tpu.memory_space<vmem>>, vector<4x8x8x8xf32>
    %192 = vector.shape_cast %191 : vector<4x8x8x8xf32> to vector<256x8xf32>
    %c0_261 = arith.constant 0 : index
    %c0_262 = arith.constant 0 : index
    %c0_263 = arith.constant 0 : index
    %193 = vector.load %arg3[%c0_261, %c0_262, %c0_263] : memref<9x8x8xf32, #tpu.memory_space<vmem>>, vector<1x8x8xf32>
    %194 = vector.shape_cast %193 : vector<1x8x8xf32> to vector<8x8xf32>
    %cst_264 = arith.constant dense<0.000000e+00> : vector<256x8xf32>
    %195 = tpu.matmul %192, %194, %cst_264 {dimension_numbers = #tpu.dot_dimension_numbers<[1], [0], [0], [1], [0, 0, 1, 1], [], []>} : vector<256x8xf32>, vector<8x8xf32>, vector<256x8xf32> -> vector<256x8xf32>
    %196 = arith.addf %190, %195 : vector<256x8xf32>
    %c0_265 = arith.constant 0 : index
    %c1_266 = arith.constant 1 : index
    %c0_267 = arith.constant 0 : index
    %c0_268 = arith.constant 0 : index
    %197 = vector.load %arg7[%c0_265, %c1_266, %c0_267, %c0_268] : memref<6x10x8x8xf32, #tpu.memory_space<vmem>>, vector<4x8x8x8xf32>
    %198 = vector.shape_cast %197 : vector<4x8x8x8xf32> to vector<256x8xf32>
    %c1_269 = arith.constant 1 : index
    %c0_270 = arith.constant 0 : index
    %c0_271 = arith.constant 0 : index
    %199 = vector.load %arg3[%c1_269, %c0_270, %c0_271] : memref<9x8x8xf32, #tpu.memory_space<vmem>>, vector<1x8x8xf32>
    %200 = vector.shape_cast %199 : vector<1x8x8xf32> to vector<8x8xf32>
    %cst_272 = arith.constant dense<0.000000e+00> : vector<256x8xf32>
    %201 = tpu.matmul %198, %200, %cst_272 {dimension_numbers = #tpu.dot_dimension_numbers<[1], [0], [0], [1], [0, 0, 1, 1], [], []>} : vector<256x8xf32>, vector<8x8xf32>, vector<256x8xf32> -> vector<256x8xf32>
    %202 = arith.addf %196, %201 : vector<256x8xf32>
    %c0_273 = arith.constant 0 : index
    %c2_274 = arith.constant 2 : index
    %c0_275 = arith.constant 0 : index
    %c0_276 = arith.constant 0 : index
    %203 = vector.load %arg7[%c0_273, %c2_274, %c0_275, %c0_276] : memref<6x10x8x8xf32, #tpu.memory_space<vmem>>, vector<4x8x8x8xf32>
    %204 = vector.shape_cast %203 : vector<4x8x8x8xf32> to vector<256x8xf32>
    %c2_277 = arith.constant 2 : index
    %c0_278 = arith.constant 0 : index
    %c0_279 = arith.constant 0 : index
    %205 = vector.load %arg3[%c2_277, %c0_278, %c0_279] : memref<9x8x8xf32, #tpu.memory_space<vmem>>, vector<1x8x8xf32>
    %206 = vector.shape_cast %205 : vector<1x8x8xf32> to vector<8x8xf32>
    %cst_280 = arith.constant dense<0.000000e+00> : vector<256x8xf32>
    %207 = tpu.matmul %204, %206, %cst_280 {dimension_numbers = #tpu.dot_dimension_numbers<[1], [0], [0], [1], [0, 0, 1, 1], [], []>} : vector<256x8xf32>, vector<8x8xf32>, vector<256x8xf32> -> vector<256x8xf32>
    %208 = arith.addf %202, %207 : vector<256x8xf32>
    %c1_281 = arith.constant 1 : index
    %c0_282 = arith.constant 0 : index
    %c0_283 = arith.constant 0 : index
    %c0_284 = arith.constant 0 : index
    %209 = vector.load %arg7[%c1_281, %c0_282, %c0_283, %c0_284] : memref<6x10x8x8xf32, #tpu.memory_space<vmem>>, vector<4x8x8x8xf32>
    %210 = vector.shape_cast %209 : vector<4x8x8x8xf32> to vector<256x8xf32>
    %c3_285 = arith.constant 3 : index
    %c0_286 = arith.constant 0 : index
    %c0_287 = arith.constant 0 : index
    %211 = vector.load %arg3[%c3_285, %c0_286, %c0_287] : memref<9x8x8xf32, #tpu.memory_space<vmem>>, vector<1x8x8xf32>
    %212 = vector.shape_cast %211 : vector<1x8x8xf32> to vector<8x8xf32>
    %cst_288 = arith.constant dense<0.000000e+00> : vector<256x8xf32>
    %213 = tpu.matmul %210, %212, %cst_288 {dimension_numbers = #tpu.dot_dimension_numbers<[1], [0], [0], [1], [0, 0, 1, 1], [], []>} : vector<256x8xf32>, vector<8x8xf32>, vector<256x8xf32> -> vector<256x8xf32>
    %214 = arith.addf %208, %213 : vector<256x8xf32>
    %c1_289 = arith.constant 1 : index
    %c1_290 = arith.constant 1 : index
    %c0_291 = arith.constant 0 : index
    %c0_292 = arith.constant 0 : index
    %215 = vector.load %arg7[%c1_289, %c1_290, %c0_291, %c0_292] : memref<6x10x8x8xf32, #tpu.memory_space<vmem>>, vector<4x8x8x8xf32>
    %216 = vector.shape_cast %215 : vector<4x8x8x8xf32> to vector<256x8xf32>
    %c4_293 = arith.constant 4 : index
    %c0_294 = arith.constant 0 : index
    %c0_295 = arith.constant 0 : index
    %217 = vector.load %arg3[%c4_293, %c0_294, %c0_295] : memref<9x8x8xf32, #tpu.memory_space<vmem>>, vector<1x8x8xf32>
    %218 = vector.shape_cast %217 : vector<1x8x8xf32> to vector<8x8xf32>
    %cst_296 = arith.constant dense<0.000000e+00> : vector<256x8xf32>
    %219 = tpu.matmul %216, %218, %cst_296 {dimension_numbers = #tpu.dot_dimension_numbers<[1], [0], [0], [1], [0, 0, 1, 1], [], []>} : vector<256x8xf32>, vector<8x8xf32>, vector<256x8xf32> -> vector<256x8xf32>
    %220 = arith.addf %214, %219 : vector<256x8xf32>
    %c1_297 = arith.constant 1 : index
    %c2_298 = arith.constant 2 : index
    %c0_299 = arith.constant 0 : index
    %c0_300 = arith.constant 0 : index
    %221 = vector.load %arg7[%c1_297, %c2_298, %c0_299, %c0_300] : memref<6x10x8x8xf32, #tpu.memory_space<vmem>>, vector<4x8x8x8xf32>
    %222 = vector.shape_cast %221 : vector<4x8x8x8xf32> to vector<256x8xf32>
    %c5_301 = arith.constant 5 : index
    %c0_302 = arith.constant 0 : index
    %c0_303 = arith.constant 0 : index
    %223 = vector.load %arg3[%c5_301, %c0_302, %c0_303] : memref<9x8x8xf32, #tpu.memory_space<vmem>>, vector<1x8x8xf32>
    %224 = vector.shape_cast %223 : vector<1x8x8xf32> to vector<8x8xf32>
    %cst_304 = arith.constant dense<0.000000e+00> : vector<256x8xf32>
    %225 = tpu.matmul %222, %224, %cst_304 {dimension_numbers = #tpu.dot_dimension_numbers<[1], [0], [0], [1], [0, 0, 1, 1], [], []>} : vector<256x8xf32>, vector<8x8xf32>, vector<256x8xf32> -> vector<256x8xf32>
    %226 = arith.addf %220, %225 : vector<256x8xf32>
    %c2_305 = arith.constant 2 : index
    %c0_306 = arith.constant 0 : index
    %c0_307 = arith.constant 0 : index
    %c0_308 = arith.constant 0 : index
    %227 = vector.load %arg7[%c2_305, %c0_306, %c0_307, %c0_308] : memref<6x10x8x8xf32, #tpu.memory_space<vmem>>, vector<4x8x8x8xf32>
    %228 = vector.shape_cast %227 : vector<4x8x8x8xf32> to vector<256x8xf32>
    %c6_309 = arith.constant 6 : index
    %c0_310 = arith.constant 0 : index
    %c0_311 = arith.constant 0 : index
    %229 = vector.load %arg3[%c6_309, %c0_310, %c0_311] : memref<9x8x8xf32, #tpu.memory_space<vmem>>, vector<1x8x8xf32>
    %230 = vector.shape_cast %229 : vector<1x8x8xf32> to vector<8x8xf32>
    %cst_312 = arith.constant dense<0.000000e+00> : vector<256x8xf32>
    %231 = tpu.matmul %228, %230, %cst_312 {dimension_numbers = #tpu.dot_dimension_numbers<[1], [0], [0], [1], [0, 0, 1, 1], [], []>} : vector<256x8xf32>, vector<8x8xf32>, vector<256x8xf32> -> vector<256x8xf32>
    %232 = arith.addf %226, %231 : vector<256x8xf32>
    %c2_313 = arith.constant 2 : index
    %c1_314 = arith.constant 1 : index
    %c0_315 = arith.constant 0 : index
    %c0_316 = arith.constant 0 : index
    %233 = vector.load %arg7[%c2_313, %c1_314, %c0_315, %c0_316] : memref<6x10x8x8xf32, #tpu.memory_space<vmem>>, vector<4x8x8x8xf32>
    %234 = vector.shape_cast %233 : vector<4x8x8x8xf32> to vector<256x8xf32>
    %c7_317 = arith.constant 7 : index
    %c0_318 = arith.constant 0 : index
    %c0_319 = arith.constant 0 : index
    %235 = vector.load %arg3[%c7_317, %c0_318, %c0_319] : memref<9x8x8xf32, #tpu.memory_space<vmem>>, vector<1x8x8xf32>
    %236 = vector.shape_cast %235 : vector<1x8x8xf32> to vector<8x8xf32>
    %cst_320 = arith.constant dense<0.000000e+00> : vector<256x8xf32>
    %237 = tpu.matmul %234, %236, %cst_320 {dimension_numbers = #tpu.dot_dimension_numbers<[1], [0], [0], [1], [0, 0, 1, 1], [], []>} : vector<256x8xf32>, vector<8x8xf32>, vector<256x8xf32> -> vector<256x8xf32>
    %238 = arith.addf %232, %237 : vector<256x8xf32>
    %c2_321 = arith.constant 2 : index
    %c2_322 = arith.constant 2 : index
    %c0_323 = arith.constant 0 : index
    %c0_324 = arith.constant 0 : index
    %239 = vector.load %arg7[%c2_321, %c2_322, %c0_323, %c0_324] : memref<6x10x8x8xf32, #tpu.memory_space<vmem>>, vector<4x8x8x8xf32>
    %240 = vector.shape_cast %239 : vector<4x8x8x8xf32> to vector<256x8xf32>
    %c8_325 = arith.constant 8 : index
    %c0_326 = arith.constant 0 : index
    %c0_327 = arith.constant 0 : index
    %241 = vector.load %arg3[%c8_325, %c0_326, %c0_327] : memref<9x8x8xf32, #tpu.memory_space<vmem>>, vector<1x8x8xf32>
    %242 = vector.shape_cast %241 : vector<1x8x8xf32> to vector<8x8xf32>
    %cst_328 = arith.constant dense<0.000000e+00> : vector<256x8xf32>
    %243 = tpu.matmul %240, %242, %cst_328 {dimension_numbers = #tpu.dot_dimension_numbers<[1], [0], [0], [1], [0, 0, 1, 1], [], []>} : vector<256x8xf32>, vector<8x8xf32>, vector<256x8xf32> -> vector<256x8xf32>
    %244 = arith.addf %238, %243 : vector<256x8xf32>
    %245 = vector.shape_cast %244 : vector<256x8xf32> to vector<4x8x8x8xf32>
    %c0_329 = arith.constant 0 : index
    %c0_330 = arith.constant 0 : index
    %c0_331 = arith.constant 0 : index
    %c0_332 = arith.constant 0 : index
    %c0_333 = arith.constant 0 : index
    %246 = vector.load %arg4[%c0_329, %c0_330, %c0_331, %c0_332, %c0_333] : memref<1x4x8x8x8xf32, #tpu.memory_space<vmem>>, vector<1x4x8x8x8xf32>
    %247 = vector.shape_cast %246 : vector<1x4x8x8x8xf32> to vector<4x8x8x8xf32>
    %248 = vector.shape_cast %245 : vector<4x8x8x8xf32> to vector<1x4x8x8x8xf32>
    tpu.vector_store %arg4[%c0_329, %c0_330, %c0_331, %c0_332, %c0_333], %248 {strides = array<i32>} : memref<1x4x8x8x8xf32, #tpu.memory_space<vmem>>, vector<1x4x8x8x8xf32>,
    %cst_334 = arith.constant dense<0.000000e+00> : vector<8xf32>
    %249 = vector.multi_reduction <add>, %244, %cst_334 [0] : vector<256x8xf32> to vector<8xf32>
    %250 = vector.shape_cast %249 : vector<8xf32> to vector<1x8xf32>
    %251 = arith.mulf %244, %244 : vector<256x8xf32>
    %cst_335 = arith.constant dense<0.000000e+00> : vector<8xf32>
    %252 = vector.multi_reduction <add>, %251, %cst_335 [0] : vector<256x8xf32> to vector<8xf32>
    %253 = vector.shape_cast %252 : vector<8xf32> to vector<1x8xf32>
    %254 = vector.shape_cast %250 : vector<1x8xf32> to vector<1x1x8xf32>
    %c0_336 = arith.constant 0 : index
    %c0_337 = arith.constant 0 : index
    %c0_338 = arith.constant 0 : index
    %255 = vector.load %arg5[%c0_336, %c0_337, %c0_338] : memref<1x2x8xf32, #tpu.memory_space<vmem>>, vector<1x1x8xf32>
    tpu.vector_store %arg5[%c0_336, %c0_337, %c0_338], %254 {strides = array<i32>} : memref<1x2x8xf32, #tpu.memory_space<vmem>>, vector<1x1x8xf32>,
    %256 = vector.shape_cast %253 : vector<1x8xf32> to vector<1x1x8xf32>
    %c0_339 = arith.constant 0 : index
    %c1_340 = arith.constant 1 : index
    %c0_341 = arith.constant 0 : index
    %257 = vector.load %arg5[%c0_339, %c1_340, %c0_341] : memref<1x2x8xf32, #tpu.memory_space<vmem>>, vector<1x1x8xf32>
    tpu.vector_store %arg5[%c0_339, %c1_340, %c0_341], %256 {strides = array<i32>} : memref<1x2x8xf32, #tpu.memory_space<vmem>>, vector<1x1x8xf32>,
    return
  }
  func.func @transform_0(%arg0: i32) -> (i32, i32, i32, i32, i32) {
    %c0_i32 = arith.constant 0 : i32
    %c0_i32_0 = arith.constant 0 : i32
    %c0_i32_1 = arith.constant 0 : i32
    %c0_i32_2 = arith.constant 0 : i32
    %c0_i32_3 = arith.constant 0 : i32
    return %arg0, %c0_i32, %c0_i32_0, %c0_i32_1, %c0_i32_2 : i32, i32, i32, i32, i32
  }
  func.func @transform_1(%arg0: i32) -> (i32, i32, i32) {
    %c0_i32 = arith.constant 0 : i32
    %c0_i32_0 = arith.constant 0 : i32
    %c0_i32_1 = arith.constant 0 : i32
    %c0_i32_2 = arith.constant 0 : i32
    return %c0_i32, %c0_i32_0, %c0_i32_1 : i32, i32, i32
  }
  func.func @transform_2(%arg0: i32) -> (i32, i32, i32) {
    %c0_i32 = arith.constant 0 : i32
    %c0_i32_0 = arith.constant 0 : i32
    %c0_i32_1 = arith.constant 0 : i32
    %c0_i32_2 = arith.constant 0 : i32
    return %c0_i32, %c0_i32_0, %c0_i32_1 : i32, i32, i32
  }
  func.func @transform_3(%arg0: i32) -> (i32, i32, i32, i32, i32) {
    %c0_i32 = arith.constant 0 : i32
    %c0_i32_0 = arith.constant 0 : i32
    %c0_i32_1 = arith.constant 0 : i32
    %c0_i32_2 = arith.constant 0 : i32
    %c0_i32_3 = arith.constant 0 : i32
    return %arg0, %c0_i32, %c0_i32_0, %c0_i32_1, %c0_i32_2 : i32, i32, i32, i32, i32
  }
  func.func @transform_4(%arg0: i32) -> (i32, i32, i32) {
    %c0_i32 = arith.constant 0 : i32
    %c0_i32_0 = arith.constant 0 : i32
    %c0_i32_1 = arith.constant 0 : i32
    return %arg0, %c0_i32, %c0_i32_0 : i32, i32, i32
  }
}

module attributes {stable_mosaic.version = 11 : i64} {
  func.func @bn_relu_conv2_kernel(%arg0: i32, %arg1: i32, %arg2: memref<1x2x8x8x8xf32, #tpu.memory_space<vmem>>, %arg3: memref<1x2x8x8x8xf32, #tpu.memory_space<vmem>>, %arg4: memref<2x8xf32, #tpu.memory_space<vmem>>, %arg5: memref<9x8x8xf32, #tpu.memory_space<vmem>>, %arg6: memref<1x2x8x8x8xf32, #tpu.memory_space<vmem>>, %arg7: memref<2x10x10x8xf32, #tpu.memory_space<vmem>>) attributes {dimension_semantics = [#tpu.dimension_semantics<parallel>, #tpu.dimension_semantics<parallel>], iteration_bounds = array<i64: 2, 2>, scalar_prefetch = 0 : i64, scratch_operands = 1 : i64, tpu.core_type = #tpu.core_type<tc>, window_params = [{transform_indices = @transform_0, window_bounds = array<i64: 1, 2, 8, 8, 8>}, {transform_indices = @transform_1, window_bounds = array<i64: 1, 2, 8, 8, 8>}, {pipeline_mode = #tpu.pipeline_mode<synchronous>, transform_indices = @transform_2, window_bounds = array<i64: 2, 8>}, {pipeline_mode = #tpu.pipeline_mode<synchronous>, transform_indices = @transform_3, window_bounds = array<i64: 9, 8, 8>}, {transform_indices = @transform_4, window_bounds = array<i64: 1, 2, 8, 8, 8>}]} {
    %cst = arith.constant 0.000000e+00 : f32
    %0 = vector.broadcast %cst : f32 to vector<2x1x10x8xf32>
    %c0 = arith.constant 0 : index
    %c0_0 = arith.constant 0 : index
    %c0_1 = arith.constant 0 : index
    %c0_2 = arith.constant 0 : index
    %1 = vector.load %arg7[%c0, %c0_0, %c0_1, %c0_2] : memref<2x10x10x8xf32, #tpu.memory_space<vmem>>, vector<2x1x10x8xf32>
    tpu.vector_store %arg7[%c0, %c0_0, %c0_1, %c0_2], %0 {strides = array<i32>} : memref<2x10x10x8xf32, #tpu.memory_space<vmem>>, vector<2x1x10x8xf32>,
    %cst_3 = arith.constant 0.000000e+00 : f32
    %2 = vector.broadcast %cst_3 : f32 to vector<2x1x10x8xf32>
    %c0_4 = arith.constant 0 : index
    %c9 = arith.constant 9 : index
    %c0_5 = arith.constant 0 : index
    %c0_6 = arith.constant 0 : index
    %3 = vector.load %arg7[%c0_4, %c9, %c0_5, %c0_6] : memref<2x10x10x8xf32, #tpu.memory_space<vmem>>, vector<2x1x10x8xf32>
    tpu.vector_store %arg7[%c0_4, %c9, %c0_5, %c0_6], %2 {strides = array<i32>} : memref<2x10x10x8xf32, #tpu.memory_space<vmem>>, vector<2x1x10x8xf32>,
    %cst_7 = arith.constant 0.000000e+00 : f32
    %4 = vector.broadcast %cst_7 : f32 to vector<2x10x1x8xf32>
    %c0_8 = arith.constant 0 : index
    %c0_9 = arith.constant 0 : index
    %c0_10 = arith.constant 0 : index
    %c0_11 = arith.constant 0 : index
    %5 = vector.load %arg7[%c0_8, %c0_9, %c0_10, %c0_11] : memref<2x10x10x8xf32, #tpu.memory_space<vmem>>, vector<2x10x1x8xf32>
    tpu.vector_store %arg7[%c0_8, %c0_9, %c0_10, %c0_11], %4 {strides = array<i32>} : memref<2x10x10x8xf32, #tpu.memory_space<vmem>>, vector<2x10x1x8xf32>,
    %cst_12 = arith.constant 0.000000e+00 : f32
    %6 = vector.broadcast %cst_12 : f32 to vector<2x10x1x8xf32>
    %c0_13 = arith.constant 0 : index
    %c0_14 = arith.constant 0 : index
    %c9_15 = arith.constant 9 : index
    %c0_16 = arith.constant 0 : index
    %7 = vector.load %arg7[%c0_13, %c0_14, %c9_15, %c0_16] : memref<2x10x10x8xf32, #tpu.memory_space<vmem>>, vector<2x10x1x8xf32>
    tpu.vector_store %arg7[%c0_13, %c0_14, %c9_15, %c0_16], %6 {strides = array<i32>} : memref<2x10x10x8xf32, #tpu.memory_space<vmem>>, vector<2x10x1x8xf32>,
    %c0_17 = arith.constant 0 : index
    %c0_18 = arith.constant 0 : index
    %8 = vector.load %arg4[%c0_17, %c0_18] : memref<2x8xf32, #tpu.memory_space<vmem>>, vector<1x8xf32>
    %c1 = arith.constant 1 : index
    %c0_19 = arith.constant 0 : index
    %9 = vector.load %arg4[%c1, %c0_19] : memref<2x8xf32, #tpu.memory_space<vmem>>, vector<1x8xf32>
    %c0_20 = arith.constant 0 : index
    %c0_21 = arith.constant 0 : index
    %c0_22 = arith.constant 0 : index
    %c0_23 = arith.constant 0 : index
    %c0_24 = arith.constant 0 : index
    %10 = vector.load %arg2[%c0_20, %c0_21, %c0_22, %c0_23, %c0_24] : memref<1x2x8x8x8xf32, #tpu.memory_space<vmem>>, vector<1x2x8x8x8xf32>
    %11 = vector.shape_cast %10 : vector<1x2x8x8x8xf32> to vector<2x8x8x8xf32>
    %12 = vector.shape_cast %8 : vector<1x8xf32> to vector<1x1x1x8xf32>
    %13 = vector.broadcast %12 : vector<1x1x1x8xf32> to vector<2x8x8x8xf32>
    %14 = arith.mulf %11, %13 : vector<2x8x8x8xf32>
    %15 = vector.shape_cast %9 : vector<1x8xf32> to vector<1x1x1x8xf32>
    %16 = vector.broadcast %15 : vector<1x1x1x8xf32> to vector<2x8x8x8xf32>
    %17 = arith.addf %14, %16 : vector<2x8x8x8xf32>
    %cst_25 = arith.constant 0.000000e+00 : f32
    %18 = vector.broadcast %cst_25 : f32 to vector<2x8x8x8xf32>
    %19 = arith.maximumf %17, %18 : vector<2x8x8x8xf32>
    %c0_26 = arith.constant 0 : index
    %c1_27 = arith.constant 1 : index
    %c1_28 = arith.constant 1 : index
    %c0_29 = arith.constant 0 : index
    %20 = vector.load %arg7[%c0_26, %c1_27, %c1_28, %c0_29] : memref<2x10x10x8xf32, #tpu.memory_space<vmem>>, vector<2x8x8x8xf32>
    tpu.vector_store %arg7[%c0_26, %c1_27, %c1_28, %c0_29], %19 {strides = array<i32>} : memref<2x10x10x8xf32, #tpu.memory_space<vmem>>, vector<2x8x8x8xf32>,
    %cst_30 = arith.constant 0.000000e+00 : f32
    %21 = vector.broadcast %cst_30 : f32 to vector<128x8xf32>
    %c0_31 = arith.constant 0 : index
    %c0_32 = arith.constant 0 : index
    %c0_33 = arith.constant 0 : index
    %c0_34 = arith.constant 0 : index
    %22 = vector.load %arg7[%c0_31, %c0_32, %c0_33, %c0_34] : memref<2x10x10x8xf32, #tpu.memory_space<vmem>>, vector<2x8x8x8xf32>
    %23 = vector.shape_cast %22 : vector<2x8x8x8xf32> to vector<128x8xf32>
    %c0_35 = arith.constant 0 : index
    %c0_36 = arith.constant 0 : index
    %c0_37 = arith.constant 0 : index
    %24 = vector.load %arg5[%c0_35, %c0_36, %c0_37] : memref<9x8x8xf32, #tpu.memory_space<vmem>>, vector<1x8x8xf32>
    %25 = vector.shape_cast %24 : vector<1x8x8xf32> to vector<8x8xf32>
    %cst_38 = arith.constant dense<0.000000e+00> : vector<128x8xf32>
    %26 = tpu.matmul %23, %25, %cst_38 {dimension_numbers = #tpu.dot_dimension_numbers<[1], [0], [0], [1], [0, 0, 1, 1], [], []>} : vector<128x8xf32>, vector<8x8xf32>, vector<128x8xf32> -> vector<128x8xf32>
    %27 = arith.addf %21, %26 : vector<128x8xf32>
    %c0_39 = arith.constant 0 : index
    %c0_40 = arith.constant 0 : index
    %c1_41 = arith.constant 1 : index
    %c0_42 = arith.constant 0 : index
    %28 = vector.load %arg7[%c0_39, %c0_40, %c1_41, %c0_42] : memref<2x10x10x8xf32, #tpu.memory_space<vmem>>, vector<2x8x8x8xf32>
    %29 = vector.shape_cast %28 : vector<2x8x8x8xf32> to vector<128x8xf32>
    %c1_43 = arith.constant 1 : index
    %c0_44 = arith.constant 0 : index
    %c0_45 = arith.constant 0 : index
    %30 = vector.load %arg5[%c1_43, %c0_44, %c0_45] : memref<9x8x8xf32, #tpu.memory_space<vmem>>, vector<1x8x8xf32>
    %31 = vector.shape_cast %30 : vector<1x8x8xf32> to vector<8x8xf32>
    %cst_46 = arith.constant dense<0.000000e+00> : vector<128x8xf32>
    %32 = tpu.matmul %29, %31, %cst_46 {dimension_numbers = #tpu.dot_dimension_numbers<[1], [0], [0], [1], [0, 0, 1, 1], [], []>} : vector<128x8xf32>, vector<8x8xf32>, vector<128x8xf32> -> vector<128x8xf32>
    %33 = arith.addf %27, %32 : vector<128x8xf32>
    %c0_47 = arith.constant 0 : index
    %c0_48 = arith.constant 0 : index
    %c2 = arith.constant 2 : index
    %c0_49 = arith.constant 0 : index
    %34 = vector.load %arg7[%c0_47, %c0_48, %c2, %c0_49] : memref<2x10x10x8xf32, #tpu.memory_space<vmem>>, vector<2x8x8x8xf32>
    %35 = vector.shape_cast %34 : vector<2x8x8x8xf32> to vector<128x8xf32>
    %c2_50 = arith.constant 2 : index
    %c0_51 = arith.constant 0 : index
    %c0_52 = arith.constant 0 : index
    %36 = vector.load %arg5[%c2_50, %c0_51, %c0_52] : memref<9x8x8xf32, #tpu.memory_space<vmem>>, vector<1x8x8xf32>
    %37 = vector.shape_cast %36 : vector<1x8x8xf32> to vector<8x8xf32>
    %cst_53 = arith.constant dense<0.000000e+00> : vector<128x8xf32>
    %38 = tpu.matmul %35, %37, %cst_53 {dimension_numbers = #tpu.dot_dimension_numbers<[1], [0], [0], [1], [0, 0, 1, 1], [], []>} : vector<128x8xf32>, vector<8x8xf32>, vector<128x8xf32> -> vector<128x8xf32>
    %39 = arith.addf %33, %38 : vector<128x8xf32>
    %c0_54 = arith.constant 0 : index
    %c1_55 = arith.constant 1 : index
    %c0_56 = arith.constant 0 : index
    %c0_57 = arith.constant 0 : index
    %40 = vector.load %arg7[%c0_54, %c1_55, %c0_56, %c0_57] : memref<2x10x10x8xf32, #tpu.memory_space<vmem>>, vector<2x8x8x8xf32>
    %41 = vector.shape_cast %40 : vector<2x8x8x8xf32> to vector<128x8xf32>
    %c3 = arith.constant 3 : index
    %c0_58 = arith.constant 0 : index
    %c0_59 = arith.constant 0 : index
    %42 = vector.load %arg5[%c3, %c0_58, %c0_59] : memref<9x8x8xf32, #tpu.memory_space<vmem>>, vector<1x8x8xf32>
    %43 = vector.shape_cast %42 : vector<1x8x8xf32> to vector<8x8xf32>
    %cst_60 = arith.constant dense<0.000000e+00> : vector<128x8xf32>
    %44 = tpu.matmul %41, %43, %cst_60 {dimension_numbers = #tpu.dot_dimension_numbers<[1], [0], [0], [1], [0, 0, 1, 1], [], []>} : vector<128x8xf32>, vector<8x8xf32>, vector<128x8xf32> -> vector<128x8xf32>
    %45 = arith.addf %39, %44 : vector<128x8xf32>
    %c0_61 = arith.constant 0 : index
    %c1_62 = arith.constant 1 : index
    %c1_63 = arith.constant 1 : index
    %c0_64 = arith.constant 0 : index
    %46 = vector.load %arg7[%c0_61, %c1_62, %c1_63, %c0_64] : memref<2x10x10x8xf32, #tpu.memory_space<vmem>>, vector<2x8x8x8xf32>
    %47 = vector.shape_cast %46 : vector<2x8x8x8xf32> to vector<128x8xf32>
    %c4 = arith.constant 4 : index
    %c0_65 = arith.constant 0 : index
    %c0_66 = arith.constant 0 : index
    %48 = vector.load %arg5[%c4, %c0_65, %c0_66] : memref<9x8x8xf32, #tpu.memory_space<vmem>>, vector<1x8x8xf32>
    %49 = vector.shape_cast %48 : vector<1x8x8xf32> to vector<8x8xf32>
    %cst_67 = arith.constant dense<0.000000e+00> : vector<128x8xf32>
    %50 = tpu.matmul %47, %49, %cst_67 {dimension_numbers = #tpu.dot_dimension_numbers<[1], [0], [0], [1], [0, 0, 1, 1], [], []>} : vector<128x8xf32>, vector<8x8xf32>, vector<128x8xf32> -> vector<128x8xf32>
    %51 = arith.addf %45, %50 : vector<128x8xf32>
    %c0_68 = arith.constant 0 : index
    %c1_69 = arith.constant 1 : index
    %c2_70 = arith.constant 2 : index
    %c0_71 = arith.constant 0 : index
    %52 = vector.load %arg7[%c0_68, %c1_69, %c2_70, %c0_71] : memref<2x10x10x8xf32, #tpu.memory_space<vmem>>, vector<2x8x8x8xf32>
    %53 = vector.shape_cast %52 : vector<2x8x8x8xf32> to vector<128x8xf32>
    %c5 = arith.constant 5 : index
    %c0_72 = arith.constant 0 : index
    %c0_73 = arith.constant 0 : index
    %54 = vector.load %arg5[%c5, %c0_72, %c0_73] : memref<9x8x8xf32, #tpu.memory_space<vmem>>, vector<1x8x8xf32>
    %55 = vector.shape_cast %54 : vector<1x8x8xf32> to vector<8x8xf32>
    %cst_74 = arith.constant dense<0.000000e+00> : vector<128x8xf32>
    %56 = tpu.matmul %53, %55, %cst_74 {dimension_numbers = #tpu.dot_dimension_numbers<[1], [0], [0], [1], [0, 0, 1, 1], [], []>} : vector<128x8xf32>, vector<8x8xf32>, vector<128x8xf32> -> vector<128x8xf32>
    %57 = arith.addf %51, %56 : vector<128x8xf32>
    %c0_75 = arith.constant 0 : index
    %c2_76 = arith.constant 2 : index
    %c0_77 = arith.constant 0 : index
    %c0_78 = arith.constant 0 : index
    %58 = vector.load %arg7[%c0_75, %c2_76, %c0_77, %c0_78] : memref<2x10x10x8xf32, #tpu.memory_space<vmem>>, vector<2x8x8x8xf32>
    %59 = vector.shape_cast %58 : vector<2x8x8x8xf32> to vector<128x8xf32>
    %c6 = arith.constant 6 : index
    %c0_79 = arith.constant 0 : index
    %c0_80 = arith.constant 0 : index
    %60 = vector.load %arg5[%c6, %c0_79, %c0_80] : memref<9x8x8xf32, #tpu.memory_space<vmem>>, vector<1x8x8xf32>
    %61 = vector.shape_cast %60 : vector<1x8x8xf32> to vector<8x8xf32>
    %cst_81 = arith.constant dense<0.000000e+00> : vector<128x8xf32>
    %62 = tpu.matmul %59, %61, %cst_81 {dimension_numbers = #tpu.dot_dimension_numbers<[1], [0], [0], [1], [0, 0, 1, 1], [], []>} : vector<128x8xf32>, vector<8x8xf32>, vector<128x8xf32> -> vector<128x8xf32>
    %63 = arith.addf %57, %62 : vector<128x8xf32>
    %c0_82 = arith.constant 0 : index
    %c2_83 = arith.constant 2 : index
    %c1_84 = arith.constant 1 : index
    %c0_85 = arith.constant 0 : index
    %64 = vector.load %arg7[%c0_82, %c2_83, %c1_84, %c0_85] : memref<2x10x10x8xf32, #tpu.memory_space<vmem>>, vector<2x8x8x8xf32>
    %65 = vector.shape_cast %64 : vector<2x8x8x8xf32> to vector<128x8xf32>
    %c7 = arith.constant 7 : index
    %c0_86 = arith.constant 0 : index
    %c0_87 = arith.constant 0 : index
    %66 = vector.load %arg5[%c7, %c0_86, %c0_87] : memref<9x8x8xf32, #tpu.memory_space<vmem>>, vector<1x8x8xf32>
    %67 = vector.shape_cast %66 : vector<1x8x8xf32> to vector<8x8xf32>
    %cst_88 = arith.constant dense<0.000000e+00> : vector<128x8xf32>
    %68 = tpu.matmul %65, %67, %cst_88 {dimension_numbers = #tpu.dot_dimension_numbers<[1], [0], [0], [1], [0, 0, 1, 1], [], []>} : vector<128x8xf32>, vector<8x8xf32>, vector<128x8xf32> -> vector<128x8xf32>
    %69 = arith.addf %63, %68 : vector<128x8xf32>
    %c0_89 = arith.constant 0 : index
    %c2_90 = arith.constant 2 : index
    %c2_91 = arith.constant 2 : index
    %c0_92 = arith.constant 0 : index
    %70 = vector.load %arg7[%c0_89, %c2_90, %c2_91, %c0_92] : memref<2x10x10x8xf32, #tpu.memory_space<vmem>>, vector<2x8x8x8xf32>
    %71 = vector.shape_cast %70 : vector<2x8x8x8xf32> to vector<128x8xf32>
    %c8 = arith.constant 8 : index
    %c0_93 = arith.constant 0 : index
    %c0_94 = arith.constant 0 : index
    %72 = vector.load %arg5[%c8, %c0_93, %c0_94] : memref<9x8x8xf32, #tpu.memory_space<vmem>>, vector<1x8x8xf32>
    %73 = vector.shape_cast %72 : vector<1x8x8xf32> to vector<8x8xf32>
    %cst_95 = arith.constant dense<0.000000e+00> : vector<128x8xf32>
    %74 = tpu.matmul %71, %73, %cst_95 {dimension_numbers = #tpu.dot_dimension_numbers<[1], [0], [0], [1], [0, 0, 1, 1], [], []>} : vector<128x8xf32>, vector<8x8xf32>, vector<128x8xf32> -> vector<128x8xf32>
    %75 = arith.addf %69, %74 : vector<128x8xf32>
    %76 = vector.shape_cast %75 : vector<128x8xf32> to vector<2x8x8x8xf32>
    %c0_96 = arith.constant 0 : index
    %c0_97 = arith.constant 0 : index
    %c0_98 = arith.constant 0 : index
    %c0_99 = arith.constant 0 : index
    %c0_100 = arith.constant 0 : index
    %77 = vector.load %arg3[%c0_96, %c0_97, %c0_98, %c0_99, %c0_100] : memref<1x2x8x8x8xf32, #tpu.memory_space<vmem>>, vector<1x2x8x8x8xf32>
    %78 = vector.shape_cast %77 : vector<1x2x8x8x8xf32> to vector<2x8x8x8xf32>
    %79 = arith.addf %76, %78 : vector<2x8x8x8xf32>
    %c0_101 = arith.constant 0 : index
    %c0_102 = arith.constant 0 : index
    %c0_103 = arith.constant 0 : index
    %c0_104 = arith.constant 0 : index
    %c0_105 = arith.constant 0 : index
    %80 = vector.load %arg6[%c0_101, %c0_102, %c0_103, %c0_104, %c0_105] : memref<1x2x8x8x8xf32, #tpu.memory_space<vmem>>, vector<1x2x8x8x8xf32>
    %81 = vector.shape_cast %80 : vector<1x2x8x8x8xf32> to vector<2x8x8x8xf32>
    %82 = vector.shape_cast %79 : vector<2x8x8x8xf32> to vector<1x2x8x8x8xf32>
    tpu.vector_store %arg6[%c0_101, %c0_102, %c0_103, %c0_104, %c0_105], %82 {strides = array<i32>} : memref<1x2x8x8x8xf32, #tpu.memory_space<vmem>>, vector<1x2x8x8x8xf32>,
    return
  }
  func.func @transform_0(%arg0: i32, %arg1: i32) -> (i32, i32, i32, i32, i32) {
    %c0_i32 = arith.constant 0 : i32
    %c0_i32_0 = arith.constant 0 : i32
    %c0_i32_1 = arith.constant 0 : i32
    %c0_i32_2 = arith.constant 0 : i32
    return %arg0, %arg1, %c0_i32, %c0_i32_0, %c0_i32_1 : i32, i32, i32, i32, i32
  }
  func.func @transform_1(%arg0: i32, %arg1: i32) -> (i32, i32, i32, i32, i32) {
    %c0_i32 = arith.constant 0 : i32
    %c0_i32_0 = arith.constant 0 : i32
    %c0_i32_1 = arith.constant 0 : i32
    %c0_i32_2 = arith.constant 0 : i32
    return %arg0, %arg1, %c0_i32, %c0_i32_0, %c0_i32_1 : i32, i32, i32, i32, i32
  }
  func.func @transform_2(%arg0: i32, %arg1: i32) -> (i32, i32) {
    %c0_i32 = arith.constant 0 : i32
    %c0_i32_0 = arith.constant 0 : i32
    %c0_i32_1 = arith.constant 0 : i32
    return %c0_i32, %c0_i32_0 : i32, i32
  }
  func.func @transform_3(%arg0: i32, %arg1: i32) -> (i32, i32, i32) {
    %c0_i32 = arith.constant 0 : i32
    %c0_i32_0 = arith.constant 0 : i32
    %c0_i32_1 = arith.constant 0 : i32
    %c0_i32_2 = arith.constant 0 : i32
    return %c0_i32, %c0_i32_0, %c0_i32_1 : i32, i32, i32
  }
  func.func @transform_4(%arg0: i32, %arg1: i32) -> (i32, i32, i32, i32, i32) {
    %c0_i32 = arith.constant 0 : i32
    %c0_i32_0 = arith.constant 0 : i32
    %c0_i32_1 = arith.constant 0 : i32
    %c0_i32_2 = arith.constant 0 : i32
    return %arg0, %arg1, %c0_i32, %c0_i32_0, %c0_i32_1 : i32, i32, i32, i32, i32
  }
}

</mosaic_0001>

<bundles_post_ra>
// kernel: partial_conv3_pallas.3
= control target key start
LH: loop header
LB: loop body
LE: loop exit
PB: predicated region body
PF: predicated region fallthrough
CT: control target
= control target key end

     0   :  { %s3272_s15 = smov 0   ;;  %s3274_s16 = smov 0   ;;  %s4099_s0 = inlined_call_operand.vmem [shape: f32[2,4,8,8,8], index: 0, kind: input, shape index: {}]   ;;  %s4100_s1 = inlined_call_operand.vmem [shape: f32[2,4,8,8,8], index: 1, kind: input, shape index: {}]   ;;  %s4101_s2 = inlined_call_operand.vmem [shape: f32[2,8], index: 2, kind: input, shape index: {}]   ;;  %s4102_s3 = inlined_call_operand.vmem [shape: f32[9,8,8], index: 3, kind: input, shape index: {}]   ;;  %s4103_s4 = inlined_call_operand.vmem [shape: f32[2,4,8,8,8], index: 4, kind: output, shape index: {}]  }
   0x1   :  { %s3276_s17 = smov 0   ;;  %s3278_s18 = smov 0  }
   0x2   :  { %s3280_s19 = smov 0  }
   0x3 LB: > { %s23_s20 = sadd.s32 1, %s3236_s17  ;;  %s26_s21 = sadd.s32 1, %s3240_s18  ;;  %s3244_s19 = sphi %s3280_s19, %s14_s19   ;;  %s3240_s18 = sphi %s3278_s18, %s4145_s18   ;;  %s3236_s17 = sphi %s3276_s17, %s4144_s17   ;;  %s3232_s16 = sphi %s3274_s16, %s4143_s16   ;;  %s3228_s15 = sphi %s3272_s15, %s4142_s15  }
   0x4   : > { %p24_p0 = scmp.ge.s32.totalorder %s23_s20, 2  ;;  %p2607_p1 = scmp.ge.s32.totalorder %s3244_s19, 1 }
   0x5   : > { %p202_p2 = scmp.lt.s32.totalorder %s3244_s19, 5 }
   0x6   : > { %s4147_s20 = smov (%p24_p0, %s23_s20), 0  ;;  %s4149_s21 = smov (!%p24_p0, %s26_s21), %s3240_s18 }
   0x7   : > { %p203_p3 = pnand %p2607_p1, %p202_p2  ;;  %p28_p4 = scmp.ge.s32.totalorder %s4149_s21, 2 }
   0x9   : > { %s4151_s21 = smov (%p28_p4, %s4149_s21), 0  ;;  %206 = sbr.rel (%p203_p3) target bundleno = 390 (0x186), region = 36 }
   0xe   : > { %v2622_v0 = vld [vmem:[%s4102_s3 + $0x8] sm:$0xff]  ;;  %vm281_vm0 = vcmask 64512   ;;  %vm283_vm1 = vcmask 58368   ;;  %vm292_vm2 = vcmask 57344   ;;  %v3312_v1 = vld [vmem:[%s4102_s3] sm:$0xff]  ;;  %v3246_v2 = vmov 0.0  }
   0xf   : > { %3163 = vmatprep.subr.mxu1 %v2622_v0  ;;  %2929 = vmatprep.subr.mxu0 %v2622_v0  ;;  %282 = vst.msk [vmem:[#allocation2] sm:$0xff] %vm281_vm0, %v3246_v2  ;;  %285 = vst.msk [vmem:[#allocation2 + $0xa0] sm:$0xff] %vm281_vm0, %v3246_v2  ;;  %s2608_s26 = sshll.u32 %s3228_s15, 1  ;;  %p249_p5 = scmp.lt.s32.totalorder %s3232_s16, 1  ;;  %v3363_v3 = vld [vmem:[%s4102_s3 + $0x10] sm:$0xff] }
  0x10   : > { %284 = vst.msk [vmem:[#allocation2 + $0x8] sm:$0x3] %vm283_vm1, %v3246_v2  ;;  %286 = vst.msk [vmem:[#allocation2 + $0xa8] sm:$0x3] %vm283_vm1, %v3246_v2  ;;  %3164 = vmatpush3.msra.mxu1 %v2622_v0  ;;  %2930 = vmatpush3.msra.mxu0 %v2622_v0  ;;  %p251_p6 = scmp.lt.s32.totalorder %s2608_s26, 3 }
  0x11   : > { %288 = vst.msk [vmem:[#allocation2 + $0x90] sm:$0xff] %vm281_vm0, %v3246_v2  ;;  %290 = vst.msk [vmem:[#allocation2 + $0x130] sm:$0xff] %vm281_vm0, %v3246_v2  ;;  %2955 = vmatprep.subr.mxu1 %v3312_v1  ;;  %s4153_s16 = smov (!%p249_p5, %s3232_s16), 1  ;;  %2981 = vmatprep.subr.mxu0 %v3363_v3  ;;  %v3375_v6 = vld [vmem:[%s4101_s2] ss:$0 sm:$0xff] }
  0x12   : > { %289 = vst.msk [vmem:[#allocation2 + $0x98] sm:$0x3] %vm283_vm1, %v3246_v2  ;;  %291 = vst.msk [vmem:[#allocation2 + $0x138] sm:$0x3] %vm283_vm1, %v3246_v2  ;;  %s4155_s26 = smov (!%p251_p6, %s2608_s26), 3  ;;  %s2610_s29 = sshll.u32 %s4153_s16, 5 }
  0x13   : > { %294 = vst.msk [vmem:[#allocation2 + $0x10] sm:$0x1] %vm292_vm2, %v3246_v2  ;;  %295 = vst.msk [vmem:[#allocation2 + $0x20] sm:$0x1] %vm292_vm2, %v3246_v2  ;;  %s2609_s30 = sshll.u32 %s4155_s26, 3 }
  0x14   : > { %296 = vst.msk [vmem:[#allocation2 + $0x30] sm:$0x1] %vm292_vm2, %v3246_v2  ;;  %297 = vst.msk [vmem:[#allocation2 + $0x40] sm:$0x1] %vm292_vm2, %v3246_v2  ;;  %s255_s5 = sadd.s32 %s2610_s29, %s2609_s30  ;;  %v3388_v7 = vld [vmem:[%s4101_s2 + $0x1] ss:$0 sm:$0xff] }
  0x15   : > { %298 = vst.msk [vmem:[#allocation2 + $0x50] sm:$0x1] %vm292_vm2, %v3246_v2  ;;  %299 = vst.msk [vmem:[#allocation2 + $0x60] sm:$0x1] %vm292_vm2, %v3246_v2  ;;  %s3370_s6 = sshll.u32 %s255_s5, 3 }
  0x16   : > { %300 = vst.msk [vmem:[#allocation2 + $0x70] sm:$0x1] %vm292_vm2, %v3246_v2  ;;  %301 = vst.msk [vmem:[#allocation2 + $0x80] sm:$0x1] %vm292_vm2, %v3246_v2  ;;  %s3383_s11 = scalar_lea.vmem %s4099_s0, %s3370_s6  ;;  %s3973_s8 = scalar_lea.vmem %s4100_s1, %s3370_s6 }
  0x17   : > { %304 = vst.msk [vmem:[#allocation2 + $0xb0] sm:$0x1] %vm292_vm2, %v3246_v2  ;;  %305 = vst.msk [vmem:[#allocation2 + $0xc0] sm:$0x1] %vm292_vm2, %v3246_v2  ;;  %v441_v4 = vld [vmem:[#allocation2 + $0x1] sm:$0xff]  ;;  %v337_v15 = vld [vmem:[%s3383_s11 + $0x10] sm:$0xff] }
  0x18   : > { %306 = vst.msk [vmem:[#allocation2 + $0xd0] sm:$0x1] %vm292_vm2, %v3246_v2  ;;  %307 = vst.msk [vmem:[#allocation2 + $0xe0] sm:$0x1] %vm292_vm2, %v3246_v2  ;;  %v449_v5 = vld [vmem:[#allocation2 + $0xa1] sm:$0xff]  ;;  %2931 = vmatprep.mubr.msk.f32.mxu0 %vm281_vm0, %v441_v4  ;;  %v345_v16 = vld [vmem:[%s3383_s11 + $0x50] sm:$0xff]  ;;  %v357_v18 = vmul.f32 %v3375_v6, %v337_v15 }
  0x19   : > { %308 = vst.msk [vmem:[#allocation2 + $0xf0] sm:$0x1] %vm292_vm2, %v3246_v2  ;;  %309 = vst.msk [vmem:[#allocation2 + $0x100] sm:$0x1] %vm292_vm2, %v3246_v2  ;;  %2943 = vmatprep.mubr.msk.f32.mxu1 %vm281_vm0, %v449_v5  ;;  %v335_v8 = vld [vmem:[%s3383_s11] sm:$0xff]  ;;  %v336_v10 = vld [vmem:[%s3383_s11 + $0x8] sm:$0xff]  ;;  %v365_v19 = vmul.f32 %v3375_v6, %v345_v16 }
  0x1a   : > { %310 = vst.msk [vmem:[#allocation2 + $0x110] sm:$0x1] %vm292_vm2, %v3246_v2  ;;  %311 = vst.msk [vmem:[#allocation2 + $0x120] sm:$0x1] %vm292_vm2, %v3246_v2  ;;  %v343_v9 = vld [vmem:[%s3383_s11 + $0x40] sm:$0xff]  ;;  %v355_v11 = vmul.f32 %v3375_v6, %v335_v8  ;;  %v356_v13 = vmul.f32 %v3375_v6, %v336_v10  ;;  %v344_v14 = vld [vmem:[%s3383_s11 + $0x48] sm:$0xff]  ;;  %v377_v27 = vadd.f32 %v3388_v7, %v357_v18 }
  0x1b   : > { %314 = vst.msk [vmem:[#allocation2 + $0x19] sm:$0x1] %vm292_vm2, %v3246_v2  ;;  %315 = vst.msk [vmem:[#allocation2 + $0x29] sm:$0x1] %vm292_vm2, %v3246_v2  ;;  %v363_v12 = vmul.f32 %v3375_v6, %v343_v9  ;;  %v364_v17 = vmul.f32 %v3375_v6, %v344_v14  ;;  %v338_v20 = vld [vmem:[%s3383_s11 + $0x18] sm:$0xff]  ;;  %v385_v28 = vadd.f32 %v3388_v7, %v365_v19  ;;  %v339_v30 = vld [vmem:[%s3383_s11 + $0x20] sm:$0xff] }
  0x1c   : > { %316 = vst.msk [vmem:[#allocation2 + $0x39] sm:$0x1] %vm292_vm2, %v3246_v2  ;;  %317 = vst.msk [vmem:[#allocation2 + $0x49] sm:$0x1] %vm292_vm2, %v3246_v2  ;;  %v346_v21 = vld [vmem:[%s3383_s11 + $0x58] sm:$0xff]  ;;  %v375_v22 = vadd.f32 %v3388_v7, %v355_v11  ;;  %v376_v24 = vadd.f32 %v3388_v7, %v356_v13  ;;  %v358_v25 = vmul.f32 %v3375_v6, %v338_v20  ;;  %v347_v31 = vld [vmem:[%s3383_s11 + $0x60] sm:$0xff] }
  0x1d   : > { %318 = vst.msk [vmem:[#allocation2 + $0x59] sm:$0x1] %vm292_vm2, %v3246_v2  ;;  %319 = vst.msk [vmem:[#allocation2 + $0x69] sm:$0x1] %vm292_vm2, %v3246_v2  ;;  %v383_v23 = vadd.f32 %v3388_v7, %v363_v12  ;;  %v384_v26 = vadd.f32 %v3388_v7, %v364_v17  ;;  %v366_v29 = vmul.f32 %v3375_v6, %v346_v21  ;;  %v340_v32 = vld [vmem:[%s3383_s11 + $0x28] sm:$0xff]  ;;  %v341_v38 = vld [vmem:[%s3383_s11 + $0x30] sm:$0xff] }
  0x1e   : > { %320 = vst.msk [vmem:[#allocation2 + $0x79] sm:$0x1] %vm292_vm2, %v3246_v2  ;;  %321 = vst.msk [vmem:[#allocation2 + $0x89] sm:$0x1] %vm292_vm2, %v3246_v2  ;;  %v391_v33 = vmax.f32 %v375_v22, 0.0  ;;  %v392_v35 = vmax.f32 %v376_v24, 0.0  ;;  %v378_v36 = vadd.f32 %v3388_v7, %v358_v25  ;;  %v359_v46 = vmul.f32 %v3375_v6, %v339_v30 }
  0x1f   : > { %324 = vst.msk [vmem:[#allocation2 + $0xb9] sm:$0x1] %vm292_vm2, %v3246_v2  ;;  %325 = vst.msk [vmem:[#allocation2 + $0xc9] sm:$0x1] %vm292_vm2, %v3246_v2  ;;  %v399_v34 = vmax.f32 %v383_v23, 0.0  ;;  %v348_v37 = vld [vmem:[%s3383_s11 + $0x68] sm:$0xff]  ;;  %v386_v43 = vadd.f32 %v3388_v7, %v366_v29  ;;  %v367_v47 = vmul.f32 %v3375_v6, %v347_v31  ;;  %v360_v48 = vmul.f32 %v3375_v6, %v340_v32 }
  0x20   : > { %326 = vst.msk [vmem:[#allocation2 + $0xd9] sm:$0x1] %vm292_vm2, %v3246_v2  ;;  %327 = vst.msk [vmem:[#allocation2 + $0xe9] sm:$0x1] %vm292_vm2, %v3246_v2  ;;  %v349_v39 = vld [vmem:[%s3383_s11 + $0x70] sm:$0xff]  ;;  %v400_v40 = vmax.f32 %v384_v26, 0.0  ;;  %v368_v51 = vmul.f32 %v3375_v6, %v348_v37  ;;  %v361_v52 = vmul.f32 %v3375_v6, %v341_v38  ;;  %v379_v54 = vadd.f32 %v3388_v7, %v359_v46 }
  0x21   : > { %328 = vst.msk [vmem:[#allocation2 + $0xf9] sm:$0x1] %vm292_vm2, %v3246_v2  ;;  %329 = vst.msk [vmem:[#allocation2 + $0x109] sm:$0x1] %vm292_vm2, %v3246_v2  ;;  %v393_v41 = vmax.f32 %v377_v27, 0.0  ;;  %v401_v42 = vmax.f32 %v385_v28, 0.0  ;;  %v369_v53 = vmul.f32 %v3375_v6, %v349_v39  ;;  %v387_v55 = vadd.f32 %v3388_v7, %v367_v47 }
  0x22   : > { %330 = vst.msk [vmem:[#allocation2 + $0x119] sm:$0x1] %vm292_vm2, %v3246_v2  ;;  %331 = vst.msk [vmem:[#allocation2 + $0x129] sm:$0x1] %vm292_vm2, %v3246_v2  ;;  %v342_v44 = vld [vmem:[%s3383_s11 + $0x38] sm:$0xff]  ;;  %v394_v45 = vmax.f32 %v378_v36, 0.0  ;;  %v380_v56 = vadd.f32 %v3388_v7, %v360_v48  ;;  %v388_v58 = vadd.f32 %v3388_v7, %v368_v51  ;;  %v381_v59 = vadd.f32 %v3388_v7, %v361_v52 }
  0x23   : > { %313 = vst.msk [vmem:[#allocation2 + $0x9] sm:$0x1] %vm292_vm2, %v3246_v2  ;;  %293 = vst.msk [vmem:[#allocation2] sm:$0x1] %vm292_vm2, %v3246_v2  ;;  %v350_v49 = vld [vmem:[%s3383_s11 + $0x78] sm:$0xff]  ;;  %v402_v50 = vmax.f32 %v386_v43, 0.0  ;;  %v362_v57 = vmul.f32 %v3375_v6, %v342_v44  ;;  %v389_v60 = vadd.f32 %v3388_v7, %v369_v53  ;;  %s3989_s11 = scalar_lea.vmem %s4103_s4, %s3370_s6 }
  0x24   : > { %323 = vst.msk [vmem:[#allocation2 + $0xa9] sm:$0x1] %vm292_vm2, %v3246_v2  ;;  %302 = vst.msk [vmem:[#allocation2 + $0x90] sm:$0x1] %vm292_vm2, %v3246_v2  ;;  %v370_v61 = vmul.f32 %v3375_v6, %v350_v49  ;;  %v395_v62 = vmax.f32 %v379_v54, 0.0  ;;  %v403_v63 = vmax.f32 %v387_v55, 0.0 }
  0x25   : > { %303 = vst.msk [vmem:[#allocation2 + $0xa0] sm:$0x1] %vm292_vm2, %v3246_v2  ;;  %312 = vst.msk [vmem:[#allocation2 + $0x130] sm:$0x1] %vm292_vm2, %v3246_v2  ;;  %v396_v0 = vmax.f32 %v380_v56, 0.0  ;;  %v404_v4 = vmax.f32 %v388_v58, 0.0 }
  0x26   : > { %322 = vst.msk [vmem:[#allocation2 + $0x99] sm:$0x1] %vm292_vm2, %v3246_v2  ;;  %332 = vst.msk [vmem:[#allocation2 + $0x139] sm:$0x1] %vm292_vm2, %v3246_v2  ;;  %v382_v2 = vadd.f32 %v3388_v7, %v362_v57  ;;  %v397_v5 = vmax.f32 %v381_v59, 0.0  ;;  %v405_v8 = vmax.f32 %v389_v60, 0.0  ;;  %v390_v9 = vadd.f32 %v3388_v7, %v370_v61 }
  0x27   : > { %408 = vst.msk [vmem:[#allocation2 + $0x11] sm:$0xff] %vm281_vm0, %v391_v33  ;;  %416 = vst.msk [vmem:[#allocation2 + $0xb1] sm:$0xff] %vm281_vm0, %v399_v34  ;;  %v2672_v14 = vld [vmem:[%s4102_s3 + $0x18] sm:$0xff]  ;;  %v2689_v15 = vld [vmem:[%s4102_s3 + $0x20] sm:$0xff] }
  0x28   : > { %409 = vst.msk [vmem:[#allocation2 + $0x21] sm:$0xff] %vm281_vm0, %v392_v35  ;;  %417 = vst.msk [vmem:[#allocation2 + $0xc1] sm:$0xff] %vm281_vm0, %v400_v40  ;;  %v398_v10 = vmax.f32 %v382_v2, 0.0  ;;  %v406_v7 = vmax.f32 %v390_v9, 0.0  ;;  %v3535_v30 = vld [vmem:[%s4102_s3 + $0x28] sm:$0xff]  ;;  %v3540_v31 = vld [vmem:[%s4102_s3 + $0x30] sm:$0xff] }
  0x29   : > { %410 = vst.msk [vmem:[#allocation2 + $0x31] sm:$0xff] %vm281_vm0, %v393_v41  ;;  %418 = vst.msk [vmem:[#allocation2 + $0xd1] sm:$0xff] %vm281_vm0, %v401_v42  ;;  %v2740_v58 = vld [vmem:[%s4102_s3 + $0x38] sm:$0xff]  ;;  %v2757_v59 = vld [vmem:[%s4102_s3 + $0x40] sm:$0xff] }
  0x2a   : > { %411 = vst.msk [vmem:[#allocation2 + $0x41] sm:$0xff] %vm281_vm0, %v394_v45  ;;  %419 = vst.msk [vmem:[#allocation2 + $0xe1] sm:$0xff] %vm281_vm0, %v402_v50  ;;  %v424_v24 = vld [vmem:[#allocation2] sm:$0xff] }
  0x2b   : > { %412 = vst.msk [vmem:[#allocation2 + $0x51] sm:$0xff] %vm281_vm0, %v395_v62  ;;  %420 = vst.msk [vmem:[#allocation2 + $0xf1] sm:$0xff] %vm281_vm0, %v403_v63  ;;  %v845_v25 = vld [vmem:[#allocation2 + $0x2] sm:$0xff]  ;;  %v1761_v2 = vld [vmem:[#allocation2 + $0x90] sm:$0xff] }
  0x2c   : > { %413 = vst.msk [vmem:[#allocation2 + $0x61] sm:$0xff] %vm281_vm0, %v396_v0  ;;  %421 = vst.msk [vmem:[#allocation2 + $0x101] sm:$0xff] %vm281_vm0, %v404_v4  ;;  %v432_v42 = vld [vmem:[#allocation2 + $0xa0] sm:$0xff] }
  0x2d   : > { %414 = vst.msk [vmem:[#allocation2 + $0x71] sm:$0xff] %vm281_vm0, %v397_v5  ;;  %422 = vst.msk [vmem:[#allocation2 + $0x111] sm:$0xff] %vm281_vm0, %v405_v8  ;;  %v853_v43 = vld [vmem:[#allocation2 + $0xa2] sm:$0xff]  ;;  %v1769_v5 = vld [vmem:[#allocation2 + $0x130] sm:$0xff] }
  0x2e   : > { %v3449_v11 = vld [vmem:[#allocation2 + $0x11] sm:$0xff]  ;;  %415 = vst.msk [vmem:[#allocation2 + $0x81] sm:$0xff] %vm281_vm0, %v398_v10  ;;  %423 = vst.msk [vmem:[#allocation2 + $0x121] sm:$0xff] %vm281_vm0, %v406_v7 }
  0x2f   : > { %v3451_v6 = vld [vmem:[#allocation2 + $0xb1] sm:$0xff]  ;;  %v3453_v12 = vld [vmem:[#allocation2 + $0x21] sm:$0xff]  ;;  %2932 = vmatmul.mubr.msk.f32.vlgmr.msra.gmra.mxu0 %vm281_vm0, %v3449_v11 }
  0x30   : > { %2944 = vmatmul.mubr.msk.f32.vlgmr.msra.gmra.mxu1 %vm281_vm0, %v3451_v6  ;;  %v3462_v13 = vld [vmem:[#allocation2 + $0xc1] sm:$0xff]  ;;  %2982 = vmatpush3.msra.mxu0 %v3363_v3  ;;  %v3473_v16 = vld [vmem:[#allocation2 + $0x31] sm:$0xff] }
  0x31   : > { %2956 = vmatpush3.msra.mxu1 %v3312_v1  ;;  %v3475_v17 = vld [vmem:[#allocation2 + $0xd1] sm:$0xff]  ;;  %2934 = vmatprep.mubr.msk.f32.mxu0 %vm281_vm0, %v3453_v12  ;;  %v3482_v18 = vld [vmem:[#allocation2 + $0x41] sm:$0xff] }
  0x32   : > { %2946 = vmatprep.mubr.msk.f32.mxu1 %vm281_vm0, %v3462_v13  ;;  %v3484_v19 = vld [vmem:[#allocation2 + $0xe1] sm:$0xff]  ;;  %3007 = vmatprep.subr.mxu1 %v2672_v14  ;;  %v3494_v1 = vld [vmem:[#allocation2 + $0x51] sm:$0xff] }
  0x33   : > { %3033 = vmatprep.subr.mxu0 %v2689_v15  ;;  %2935 = vmatmul.mubr.msk.f32.gmra.mxu0 %vm281_vm0, %v3473_v16  ;;  %v3496_v3 = vld [vmem:[#allocation2 + $0xf1] sm:$0xff]  ;;  %v3498_v20 = vld [vmem:[#allocation2 + $0x61] sm:$0xff] }
  0x34   : > { %2947 = vmatmul.mubr.msk.f32.gmra.mxu1 %vm281_vm0, %v3475_v17  ;;  %2937 = vmatprep.mubr.msk.f32.mxu0 %vm281_vm0, %v3482_v18  ;;  %v3500_v21 = vld [vmem:[#allocation2 + $0x101] sm:$0xff]  ;;  %v3510_v22 = vld [vmem:[#allocation2 + $0x71] sm:$0xff] }
  0x35   : > { %2949 = vmatprep.mubr.msk.f32.mxu1 %vm281_vm0, %v3484_v19  ;;  %v3512_v23 = vld [vmem:[#allocation2 + $0x111] sm:$0xff]  ;;  %v3524_v28 = vld [vmem:[#allocation2 + $0x20] sm:$0xff] }
  0x36   : > { %v3520_v26 = vld [vmem:[#allocation2 + $0x10] sm:$0xff]  ;;  %v3526_v29 = vld [vmem:[#allocation2 + $0x22] sm:$0xff] }
  0x37   : > { %2938 = vmatmul.mubr.msk.f32.gmra.mxu0 %vm281_vm0, %v3494_v1  ;;  %v3522_v27 = vld [vmem:[#allocation2 + $0x12] sm:$0xff]  ;;  %v3550_v34 = vld [vmem:[#allocation2 + $0x40] sm:$0xff] }
  0x38   : > { %2950 = vmatmul.mubr.msk.f32.gmra.mxu1 %vm281_vm0, %v3496_v3  ;;  %2940 = vmatprep.mubr.msk.f32.mxu0 %vm281_vm0, %v3498_v20  ;;  %v3542_v32 = vld [vmem:[#allocation2 + $0x30] sm:$0xff]  ;;  %v3552_v35 = vld [vmem:[#allocation2 + $0x42] sm:$0xff] }
  0x39   : > { %2952 = vmatprep.mubr.msk.f32.mxu1 %vm281_vm0, %v3500_v21  ;;  %v3544_v33 = vld [vmem:[#allocation2 + $0x32] sm:$0xff]  ;;  %v3568_v38 = vld [vmem:[#allocation2 + $0x60] sm:$0xff] }
  0x3a   : > { %v3564_v36 = vld [vmem:[#allocation2 + $0x50] sm:$0xff]  ;;  %v3570_v39 = vld [vmem:[#allocation2 + $0x62] sm:$0xff] }
  0x3b   : > { %2941 = vmatmul.mubr.msk.f32.gmra.mxu0 %vm281_vm0, %v3510_v22  ;;  %v3566_v37 = vld [vmem:[#allocation2 + $0x52] sm:$0xff]  ;;  %v3592_v46 = vld [vmem:[#allocation2 + $0xc0] sm:$0xff] }
  0x3c   : > { %2953 = vmatmul.mubr.msk.f32.gmra.mxu1 %vm281_vm0, %v3512_v23  ;;  %2983 = vmatprep.mubr.msk.f32.mxu0 %vm281_vm0, %v845_v25  ;;  %v3580_v40 = vld [vmem:[#allocation2 + $0x70] sm:$0xff]  ;;  %v3594_v47 = vld [vmem:[#allocation2 + $0xc2] sm:$0xff] }
  0x3d   : > { %2957 = vmatprep.mubr.msk.f32.mxu1 %vm281_vm0, %v424_v24  ;;  %v3582_v41 = vld [vmem:[#allocation2 + $0x72] sm:$0xff]  ;;  %v3607_v50 = vld [vmem:[#allocation2 + $0xe0] sm:$0xff] }
  0x3e   : > { %v433_v44 = vld [vmem:[#allocation2 + $0xb0] sm:$0xff]  ;;  %v3609_v51 = vld [vmem:[#allocation2 + $0xe2] sm:$0xff] }
  0x3f   : > { %2984 = vmatmul.mubr.msk.f32.vlgmr.msra.gmra.mxu0 %vm281_vm0, %v3522_v27  ;;  %v3590_v45 = vld [vmem:[#allocation2 + $0xb2] sm:$0xff]  ;;  %v3623_v54 = vld [vmem:[#allocation2 + $0x100] sm:$0xff] }
  0x40   : > { %2958 = vmatmul.mubr.msk.f32.vlgmr.msra.gmra.mxu1 %vm281_vm0, %v3520_v26  ;;  %3034 = vmatpush3.msra.mxu0 %v2689_v15  ;;  %v3603_v48 = vld [vmem:[#allocation2 + $0xd0] sm:$0xff]  ;;  %v3625_v55 = vld [vmem:[#allocation2 + $0x102] sm:$0xff] }
  0x41   : > { %3008 = vmatpush3.msra.mxu1 %v2672_v14  ;;  %2960 = vmatprep.mubr.msk.f32.mxu1 %vm281_vm0, %v3524_v28  ;;  %v3605_v49 = vld [vmem:[#allocation2 + $0xd2] sm:$0xff]  ;;  %v1079_v60 = vld [vmem:[#allocation2 + $0x80] sm:$0xff] }
  0x42   : > { %2986 = vmatprep.mubr.msk.f32.mxu0 %vm281_vm0, %v3526_v29  ;;  %3059 = vmatprep.subr.mxu1 %v3535_v30  ;;  %v3619_v52 = vld [vmem:[#allocation2 + $0xf0] sm:$0xff]  ;;  %v3679_v61 = vld [vmem:[#allocation2 + $0x81] sm:$0xff] }
  0x43   : > { %3085 = vmatprep.subr.mxu0 %v3540_v31  ;;  %2987 = vmatmul.mubr.msk.f32.gmra.mxu0 %vm281_vm0, %v3544_v33  ;;  %v3621_v53 = vld [vmem:[#allocation2 + $0xf2] sm:$0xff]  ;;  %v1087_v62 = vld [vmem:[#allocation2 + $0x120] sm:$0xff] }
  0x44   : > { %2961 = vmatmul.mubr.msk.f32.gmra.mxu1 %vm281_vm0, %v3542_v32  ;;  %2989 = vmatprep.mubr.msk.f32.mxu0 %vm281_vm0, %v3552_v35  ;;  %v3635_v56 = vld [vmem:[#allocation2 + $0x110] sm:$0xff]  ;;  %v3711_v63 = vld [vmem:[#allocation2 + $0x121] sm:$0xff] }
  0x45   : > { %2963 = vmatprep.mubr.msk.f32.mxu1 %vm281_vm0, %v3550_v34  ;;  %v3637_v57 = vld [vmem:[#allocation2 + $0x112] sm:$0xff]  ;;  %v1533_v0 = vld [vmem:[#allocation2 + $0x82] sm:$0xff] }
  0x46   : > { %v1541_v4 = vld [vmem:[#allocation2 + $0x122] sm:$0xff]  ;;  %v1988_v8 = vld [vmem:[#allocation2 + $0x91] sm:$0xff] }
  0x47   : > { %2990 = vmatmul.mubr.msk.f32.gmra.mxu0 %vm281_vm0, %v3566_v37  ;;  %v2215_v9 = vld [vmem:[#allocation2 + $0x92] sm:$0xff] }
  0x48   : > { %2964 = vmatmul.mubr.msk.f32.gmra.mxu1 %vm281_vm0, %v3564_v36  ;;  %2992 = vmatprep.mubr.msk.f32.mxu0 %vm281_vm0, %v3570_v39  ;;  %v1996_v10 = vld [vmem:[#allocation2 + $0x131] sm:$0xff] }
  0x49   : > { %2966 = vmatprep.mubr.msk.f32.mxu1 %vm281_vm0, %v3568_v38 }
  0x4b   : > { %2993 = vmatmul.mubr.msk.f32.gmra.mxu0 %vm281_vm0, %v3582_v41 }
  0x4c   : > { %2967 = vmatmul.mubr.msk.f32.gmra.mxu1 %vm281_vm0, %v3580_v40  ;;  %2995 = vmatprep.mubr.msk.f32.mxu0 %vm281_vm0, %v853_v43 }
  0x4d   : > { %2969 = vmatprep.mubr.msk.f32.mxu1 %vm281_vm0, %v432_v42 }
  0x4f   : > { %2996 = vmatmul.mubr.msk.f32.gmra.mxu0 %vm281_vm0, %v3590_v45 }
  0x50   : > { %2970 = vmatmul.mubr.msk.f32.gmra.mxu1 %vm281_vm0, %v433_v44  ;;  %2998 = vmatprep.mubr.msk.f32.mxu0 %vm281_vm0, %v3594_v47 }
  0x51   : > { %2972 = vmatprep.mubr.msk.f32.mxu1 %vm281_vm0, %v3592_v46 }
  0x53   : > { %2999 = vmatmul.mubr.msk.f32.gmra.mxu0 %vm281_vm0, %v3605_v49 }
  0x54   : > { %2973 = vmatmul.mubr.msk.f32.gmra.mxu1 %vm281_vm0, %v3603_v48  ;;  %3001 = vmatprep.mubr.msk.f32.mxu0 %vm281_vm0, %v3609_v51 }
  0x55   : > { %2975 = vmatprep.mubr.msk.f32.mxu1 %vm281_vm0, %v3607_v50 }
  0x57   : > { %3002 = vmatmul.mubr.msk.f32.gmra.mxu0 %vm281_vm0, %v3621_v53 }
  0x58   : > { %2976 = vmatmul.mubr.msk.f32.gmra.mxu1 %vm281_vm0, %v3619_v52  ;;  %3004 = vmatprep.mubr.msk.f32.mxu0 %vm281_vm0, %v3625_v55 }
  0x59   : > { %2978 = vmatprep.mubr.msk.f32.mxu1 %vm281_vm0, %v3623_v54 }
  0x5b   : > { %3005 = vmatmul.mubr.msk.f32.gmra.mxu0 %vm281_vm0, %v3637_v57 }
  0x5c   : > { %2979 = vmatmul.mubr.msk.f32.gmra.mxu1 %vm281_vm0, %v3635_v56  ;;  %3035 = vmatprep.mubr.msk.f32.mxu0 %vm281_vm0, %v3449_v11  ;;  %v2223_v11 = vld [vmem:[#allocation2 + $0x132] sm:$0xff] }
  0x5d   : > { %3009 = vmatprep.mubr.msk.f32.mxu1 %vm281_vm0, %v3520_v26 }
  0x5f   : > { %3036 = vmatmul.mubr.msk.f32.vlgmr.msra.gmra.mxu0 %vm281_vm0, %v3453_v12 }
  0x60   : > { %3010 = vmatmul.mubr.msk.f32.vlgmr.msra.gmra.mxu1 %vm281_vm0, %v3524_v28  ;;  %3086 = vmatpush3.msra.mxu0 %v3540_v31 }
  0x61   : > { %3060 = vmatpush3.msra.mxu1 %v3535_v30  ;;  %3012 = vmatprep.mubr.msk.f32.mxu1 %vm281_vm0, %v3542_v32 }
  0x62   : > { %3038 = vmatprep.mubr.msk.f32.mxu0 %vm281_vm0, %v3473_v16  ;;  %3111 = vmatprep.subr.mxu1 %v2740_v58 }
  0x63   : > { %3137 = vmatprep.subr.mxu0 %v2757_v59  ;;  %3039 = vmatmul.mubr.msk.f32.gmra.mxu0 %vm281_vm0, %v3482_v18 }
  0x64   : > { %3013 = vmatmul.mubr.msk.f32.gmra.mxu1 %vm281_vm0, %v3550_v34  ;;  %3041 = vmatprep.mubr.msk.f32.mxu0 %vm281_vm0, %v3494_v1 }
  0x65   : > { %3015 = vmatprep.mubr.msk.f32.mxu1 %vm281_vm0, %v3564_v36 }
  0x67   : > { %3042 = vmatmul.mubr.msk.f32.gmra.mxu0 %vm281_vm0, %v3498_v20 }
  0x68   : > { %3016 = vmatmul.mubr.msk.f32.gmra.mxu1 %vm281_vm0, %v3568_v38  ;;  %3044 = vmatprep.mubr.msk.f32.mxu0 %vm281_vm0, %v3510_v22 }
  0x69   : > { %3018 = vmatprep.mubr.msk.f32.mxu1 %vm281_vm0, %v3580_v40 }
  0x6b   : > { %3045 = vmatmul.mubr.msk.f32.gmra.mxu0 %vm281_vm0, %v3679_v61 }
  0x6c   : > { %3019 = vmatmul.mubr.msk.f32.gmra.mxu1 %vm281_vm0, %v1079_v60  ;;  %3047 = vmatprep.mubr.msk.f32.mxu0 %vm281_vm0, %v3451_v6 }
  0x6d   : > { %3021 = vmatprep.mubr.msk.f32.mxu1 %vm281_vm0, %v433_v44 }
  0x6f   : > { %3048 = vmatmul.mubr.msk.f32.gmra.mxu0 %vm281_vm0, %v3462_v13 }
  0x70   : > { %3022 = vmatmul.mubr.msk.f32.gmra.mxu1 %vm281_vm0, %v3592_v46  ;;  %3050 = vmatprep.mubr.msk.f32.mxu0 %vm281_vm0, %v3475_v17 }
  0x71   : > { %3024 = vmatprep.mubr.msk.f32.mxu1 %vm281_vm0, %v3603_v48 }
  0x73   : > { %3051 = vmatmul.mubr.msk.f32.gmra.mxu0 %vm281_vm0, %v3484_v19 }
  0x74   : > { %3025 = vmatmul.mubr.msk.f32.gmra.mxu1 %vm281_vm0, %v3607_v50  ;;  %3053 = vmatprep.mubr.msk.f32.mxu0 %vm281_vm0, %v3496_v3 }
  0x75   : > { %3027 = vmatprep.mubr.msk.f32.mxu1 %vm281_vm0, %v3619_v52 }
  0x77   : > { %3054 = vmatmul.mubr.msk.f32.gmra.mxu0 %vm281_vm0, %v3500_v21 }
  0x78   : > { %3028 = vmatmul.mubr.msk.f32.gmra.mxu1 %vm281_vm0, %v3623_v54  ;;  %3056 = vmatprep.mubr.msk.f32.mxu0 %vm281_vm0, %v3512_v23 }
  0x79   : > { %3030 = vmatprep.mubr.msk.f32.mxu1 %vm281_vm0, %v3635_v56 }
  0x7b   : > { %3057 = vmatmul.mubr.msk.f32.gmra.mxu0 %vm281_vm0, %v3711_v63 }
  0x7c   : > { %3031 = vmatmul.mubr.msk.f32.gmra.mxu1 %vm281_vm0, %v1087_v62  ;;  %3087 = vmatprep.mubr.msk.f32.mxu0 %vm281_vm0, %v3524_v28 }
  0x7d   : > { %3061 = vmatprep.mubr.msk.f32.mxu1 %vm281_vm0, %v3522_v27 }
  0x7f   : > { %3088 = vmatmul.mubr.msk.f32.vlgmr.msra.gmra.mxu0 %vm281_vm0, %v3542_v32 }
  0x80   : > { %3062 = vmatmul.mubr.msk.f32.vlgmr.msra.gmra.mxu1 %vm281_vm0, %v3526_v29  ;;  %3138 = vmatpush3.msra.mxu0 %v2757_v59 }
  0x81   : > { %3112 = vmatpush3.msra.mxu1 %v2740_v58  ;;  %3064 = vmatprep.mubr.msk.f32.mxu1 %vm281_vm0, %v3544_v33 }
  0x82   : > { %3090 = vmatprep.mubr.msk.f32.mxu0 %vm281_vm0, %v3550_v34 }
  0x83   : > { %3091 = vmatmul.mubr.msk.f32.gmra.mxu0 %vm281_vm0, %v3564_v36 }
  0x84   : > { %3065 = vmatmul.mubr.msk.f32.gmra.mxu1 %vm281_vm0, %v3552_v35  ;;  %3093 = vmatprep.mubr.msk.f32.mxu0 %vm281_vm0, %v3568_v38 }
  0x85   : > { %3067 = vmatprep.mubr.msk.f32.mxu1 %vm281_vm0, %v3566_v37 }
  0x87   : > { %3094 = vmatmul.mubr.msk.f32.gmra.mxu0 %vm281_vm0, %v3580_v40 }
  0x88   : > { %3068 = vmatmul.mubr.msk.f32.gmra.mxu1 %vm281_vm0, %v3570_v39  ;;  %3096 = vmatprep.mubr.msk.f32.mxu0 %vm281_vm0, %v1079_v60 }
  0x89   : > { %3070 = vmatprep.mubr.msk.f32.mxu1 %vm281_vm0, %v3582_v41 }
  0x8b   : > { %3097 = vmatmul.mubr.msk.f32.gmra.mxu0 %vm281_vm0, %v1761_v2 }
  0x8c   : > { %3071 = vmatmul.mubr.msk.f32.gmra.mxu1 %vm281_vm0, %v1533_v0  ;;  %3099 = vmatprep.mubr.msk.f32.mxu0 %vm281_vm0, %v3592_v46 }
  0x8d   : > { %3073 = vmatprep.mubr.msk.f32.mxu1 %vm281_vm0, %v3590_v45 }
  0x8f   : > { %3100 = vmatmul.mubr.msk.f32.gmra.mxu0 %vm281_vm0, %v3603_v48 }
  0x90   : > { %3074 = vmatmul.mubr.msk.f32.gmra.mxu1 %vm281_vm0, %v3594_v47  ;;  %3102 = vmatprep.mubr.msk.f32.mxu0 %vm281_vm0, %v3607_v50 }
  0x91   : > { %3076 = vmatprep.mubr.msk.f32.mxu1 %vm281_vm0, %v3605_v49 }
  0x93   : > { %3103 = vmatmul.mubr.msk.f32.gmra.mxu0 %vm281_vm0, %v3619_v52 }
  0x94   : > { %3077 = vmatmul.mubr.msk.f32.gmra.mxu1 %vm281_vm0, %v3609_v51  ;;  %3105 = vmatprep.mubr.msk.f32.mxu0 %vm281_vm0, %v3623_v54 }
  0x95   : > { %3079 = vmatprep.mubr.msk.f32.mxu1 %vm281_vm0, %v3621_v53 }
  0x97   : > { %3106 = vmatmul.mubr.msk.f32.gmra.mxu0 %vm281_vm0, %v3635_v56 }
  0x98   : > { %3080 = vmatmul.mubr.msk.f32.gmra.mxu1 %vm281_vm0, %v3625_v55  ;;  %3108 = vmatprep.mubr.msk.f32.mxu0 %vm281_vm0, %v1087_v62 }
  0x99   : > { %3082 = vmatprep.mubr.msk.f32.mxu1 %vm281_vm0, %v3637_v57 }
  0x9b   : > { %3109 = vmatmul.mubr.msk.f32.gmra.mxu0 %vm281_vm0, %v1769_v5 }
  0x9c   : > { %3083 = vmatmul.mubr.msk.f32.gmra.mxu1 %vm281_vm0, %v1541_v4  ;;  %3139 = vmatprep.mubr.msk.f32.mxu0 %vm281_vm0, %v3526_v29 }
  0x9d   : > { %3113 = vmatprep.mubr.msk.f32.mxu1 %vm281_vm0, %v3453_v12 }
  0x9f   : > { %3140 = vmatmul.mubr.msk.f32.vlgmr.msra.gmra.mxu0 %vm281_vm0, %v3544_v33 }
  0xa0   : > { %3114 = vmatmul.mubr.msk.f32.vlgmr.msra.gmra.mxu1 %vm281_vm0, %v3473_v16  ;;  %3142 = vmatprep.mubr.msk.f32.mxu0 %vm281_vm0, %v3552_v35 }
  0xa1   : > { %3116 = vmatprep.mubr.msk.f32.mxu1 %vm281_vm0, %v3482_v18 }
  0xa3   : > { %3143 = vmatmul.mubr.msk.f32.gmra.mxu0 %vm281_vm0, %v3566_v37 }
  0xa4   : > { %3117 = vmatmul.mubr.msk.f32.gmra.mxu1 %vm281_vm0, %v3494_v1  ;;  %3145 = vmatprep.mubr.msk.f32.mxu0 %vm281_vm0, %v3570_v39 }
  0xa5   : > { %3119 = vmatprep.mubr.msk.f32.mxu1 %vm281_vm0, %v3498_v20 }
  0xa7   : > { %3146 = vmatmul.mubr.msk.f32.gmra.mxu0 %vm281_vm0, %v3582_v41 }
  0xa8   : > { %3120 = vmatmul.mubr.msk.f32.gmra.mxu1 %vm281_vm0, %v3510_v22  ;;  %3148 = vmatprep.mubr.msk.f32.mxu0 %vm281_vm0, %v1533_v0 }
  0xa9   : > { %3122 = vmatprep.mubr.msk.f32.mxu1 %vm281_vm0, %v3679_v61 }
  0xab   : > { %3149 = vmatmul.mubr.msk.f32.gmra.mxu0 %vm281_vm0, %v2215_v9 }
  0xac   : > { %3123 = vmatmul.mubr.msk.f32.gmra.mxu1 %vm281_vm0, %v1988_v8  ;;  %3151 = vmatprep.mubr.msk.f32.mxu0 %vm281_vm0, %v3594_v47 }
  0xad   : > { %3125 = vmatprep.mubr.msk.f32.mxu1 %vm281_vm0, %v3462_v13 }
  0xaf   : > { %3152 = vmatmul.mubr.msk.f32.gmra.mxu0 %vm281_vm0, %v3605_v49 }
  0xb0   : > { %3126 = vmatmul.mubr.msk.f32.gmra.mxu1 %vm281_vm0, %v3475_v17  ;;  %3154 = vmatprep.mubr.msk.f32.mxu0 %vm281_vm0, %v3609_v51 }
  0xb1   : > { %3128 = vmatprep.mubr.msk.f32.mxu1 %vm281_vm0, %v3484_v19 }
  0xb3   : > { %3155 = vmatmul.mubr.msk.f32.gmra.mxu0 %vm281_vm0, %v3621_v53 }
  0xb4   : > { %3129 = vmatmul.mubr.msk.f32.gmra.mxu1 %vm281_vm0, %v3496_v3  ;;  %3157 = vmatprep.mubr.msk.f32.mxu0 %vm281_vm0, %v3625_v55 }
  0xb5   : > { %3131 = vmatprep.mubr.msk.f32.mxu1 %vm281_vm0, %v3500_v21 }
  0xb7   : > { %3158 = vmatmul.mubr.msk.f32.gmra.mxu0 %vm281_vm0, %v3637_v57 }
  0xb8   : > { %3132 = vmatmul.mubr.msk.f32.gmra.mxu1 %vm281_vm0, %v3512_v23  ;;  %3160 = vmatprep.mubr.msk.f32.mxu0 %vm281_vm0, %v1541_v4 }
  0xb9   : > { %3134 = vmatprep.mubr.msk.f32.mxu1 %vm281_vm0, %v3711_v63 }
  0xbb   : > { %3161 = vmatmul.mubr.msk.f32.gmra.mxu0 %vm281_vm0, %v2223_v11 }
  0xbc   : > { %3135 = vmatmul.mubr.msk.f32.gmra.mxu1 %vm281_vm0, %v1996_v10 }
  0xef   : > { %v2933_v6 = vpop.f32.mrf.mxu0 }
  0xf0   : > { %v2945_v12 = vpop.f32.mrf.mxu1 }
  0xf1   : > { %v573_v7 = vpop.f32.mrf.mxu0 }
  0xf2   : > { %v613_v13 = vpop.f32.mrf.mxu1 }
  0xf3   : > { %v2936_v14 = vpop.f32.mrf.mxu0 }
  0xf4   : > { %v2948_v15 = vpop.f32.mrf.mxu1 }
  0xf5   : > { %v583_v16 = vpop.f32.mrf.mxu0 }
  0xf6   : > { %v623_v17 = vpop.f32.mrf.mxu1 }
  0xf7   : > { %v2939_v18 = vpop.f32.mrf.mxu0 }
  0xf8   : > { %v2951_v19 = vpop.f32.mrf.mxu1 }
  0xf9   : > { %v593_v1 = vpop.f32.mrf.mxu0 }
  0xfa   : > { %v633_v3 = vpop.f32.mrf.mxu1 }
  0xfb   : > { %v2942_v20 = vpop.f32.mrf.mxu0 }
  0xfc   : > { %v2954_v21 = vpop.f32.mrf.mxu1 }
  0xfd   : > { %v603_v22 = vpop.f32.mrf.mxu0 }
  0xfe   : > { %v3832_v23 = vpop.f32.mrf.mxu1 }
  0xff   : > { %v2985_v25 = vpop.f32.mrf.mxu0 }
 0x100   : > { %v2959_v24 = vpop.f32.mrf.mxu1 }
 0x101   : > { %v772_v26 = vadd.f32 %v2959_v24, %v2933_v6  ;;  %v977_v28 = vpop.f32.mrf.mxu0 }
 0x102   : > { %v766_v27 = vpop.f32.mrf.mxu1 }
 0x103   : > { %v3834_v29 = vadd.f32 %v2985_v25, %v772_v26  ;;  %v767_v30 = vadd.f32 %v766_v27, %v573_v7  ;;  %v2988_v32 = vpop.f32.mrf.mxu0 }
 0x104   : > { %v2962_v31 = vpop.f32.mrf.mxu1 }
 0x105   : > { %v3836_v33 = vadd.f32 %v977_v28, %v767_v30  ;;  %v782_v34 = vadd.f32 %v2962_v31, %v2936_v14  ;;  %v987_v36 = vpop.f32.mrf.mxu0 }
 0x106   : > { %v776_v35 = vpop.f32.mrf.mxu1 }
 0x107   : > { %v3838_v37 = vadd.f32 %v2988_v32, %v782_v34  ;;  %v777_v38 = vadd.f32 %v776_v35, %v583_v16  ;;  %v2991_v40 = vpop.f32.mrf.mxu0 }
 0x108   : > { %v2965_v39 = vpop.f32.mrf.mxu1 }
 0x109   : > { %v3840_v41 = vadd.f32 %v987_v36, %v777_v38  ;;  %v792_v42 = vadd.f32 %v2965_v39, %v2939_v18  ;;  %v997_v44 = vpop.f32.mrf.mxu0 }
 0x10a   : > { %v786_v43 = vpop.f32.mrf.mxu1 }
 0x10b   : > { %v3842_v45 = vadd.f32 %v2991_v40, %v792_v42  ;;  %v787_v46 = vadd.f32 %v786_v43, %v593_v1  ;;  %v2994_v48 = vpop.f32.mrf.mxu0 }
 0x10c   : > { %v2968_v47 = vpop.f32.mrf.mxu1 }
 0x10d   : > { %v3844_v49 = vadd.f32 %v997_v44, %v787_v46  ;;  %v802_v50 = vadd.f32 %v2968_v47, %v2942_v20  ;;  %v1007_v52 = vpop.f32.mrf.mxu0 }
 0x10e   : > { %v796_v51 = vpop.f32.mrf.mxu1 }
 0x10f   : > { %v3846_v53 = vadd.f32 %v2994_v48, %v802_v50  ;;  %v797_v54 = vadd.f32 %v796_v51, %v603_v22  ;;  %v2997_v56 = vpop.f32.mrf.mxu0 }
 0x110   : > { %v2971_v55 = vpop.f32.mrf.mxu1 }
 0x111   : > { %v3848_v57 = vadd.f32 %v1007_v52, %v797_v54  ;;  %v812_v58 = vadd.f32 %v2971_v55, %v2945_v12  ;;  %v1017_v60 = vpop.f32.mrf.mxu0 }
 0x112   : > { %v806_v59 = vpop.f32.mrf.mxu1 }
 0x113   : > { %v3850_v61 = vadd.f32 %v2997_v56, %v812_v58  ;;  %v807_v62 = vadd.f32 %v806_v59, %v613_v13  ;;  %v3000_v0 = vpop.f32.mrf.mxu0 }
 0x114   : > { %v2974_v63 = vpop.f32.mrf.mxu1 }
 0x115   : > { %v3852_v2 = vadd.f32 %v1017_v60, %v807_v62  ;;  %v822_v4 = vadd.f32 %v2974_v63, %v2948_v15  ;;  %v1027_v8 = vpop.f32.mrf.mxu0 }
 0x116   : > { %v816_v5 = vpop.f32.mrf.mxu1 }
 0x117   : > { %v3854_v9 = vadd.f32 %v3000_v0, %v822_v4  ;;  %v817_v10 = vadd.f32 %v816_v5, %v623_v17  ;;  %v3003_v6 = vpop.f32.mrf.mxu0 }
 0x118   : > { %v2977_v11 = vpop.f32.mrf.mxu1 }
 0x119   : > { %v3856_v7 = vadd.f32 %v1027_v8, %v817_v10  ;;  %v832_v12 = vadd.f32 %v2977_v11, %v2951_v19  ;;  %v1037_v16 = vpop.f32.mrf.mxu0 }
 0x11a   : > { %v826_v14 = vpop.f32.mrf.mxu1 }
 0x11b   : > { %v3858_v18 = vadd.f32 %v3003_v6, %v832_v12  ;;  %v827_v13 = vadd.f32 %v826_v14, %v633_v3  ;;  %v3006_v20 = vpop.f32.mrf.mxu0 }
 0x11c   : > { %v2980_v1 = vpop.f32.mrf.mxu1 }
 0x11d   : > { %v3860_v22 = vadd.f32 %v1037_v16, %v827_v13  ;;  %v842_v15 = vadd.f32 %v2980_v1, %v2954_v21  ;;  %v1047_v25 = vpop.f32.mrf.mxu0 }
 0x11e   : > { %v836_v24 = vpop.f32.mrf.mxu1 }
 0x11f   : > { %4104 = vst [vmem:[#allocation3_spill] sm:$0xff] %v3860_v22  ;;  %v3862_v26 = vadd.f32 %v3006_v20, %v842_v15  ;;  %v837_v17 = vadd.f32 %v836_v24, %v3832_v23  ;;  %v3037_v28 = vpop.f32.mrf.mxu0 }
 0x120   : > { %v3011_v27 = vpop.f32.mrf.mxu1 }
 0x121   : > { %4105 = vst [vmem:[#allocation4_spill] sm:$0xff] %v3862_v26  ;;  %v3865_v30 = vadd.f32 %v1047_v25, %v837_v17  ;;  %v1431_v31 = vpop.f32.mrf.mxu0  ;;  %v1284_v26 = vadd.f32 %v3011_v27, %v3834_v29 }
 0x122   : > { %v1204_v19 = vpop.f32.mrf.mxu1 }
 0x123   : > { %4106 = vst [vmem:[#allocation5_spill] sm:$0xff] %v3865_v30  ;;  %v3867_v34 = vpop.f32.mrf.mxu0  ;;  %v1283_v22 = vadd.f32 %v1204_v19, %v3836_v33 }
 0x124   : > { %v3014_v32 = vpop.f32.mrf.mxu1 }
 0x125   : > { %v3869_v35 = vpop.f32.mrf.mxu0 }
 0x126   : > { %v1214_v3 = vpop.f32.mrf.mxu1 }
 0x127   : > { %v3871_v21 = vpop.f32.mrf.mxu0  ;;  %v1285_v29 = vadd.f32 %v1214_v3, %v3840_v41 }
 0x128   : > { %v3017_v36 = vpop.f32.mrf.mxu1 }
 0x129   : > { %v3873_v39 = vpop.f32.mrf.mxu0 }
 0x12a   : > { %v1224_v38 = vpop.f32.mrf.mxu1 }
 0x12b   : > { %v3877_v23 = vpop.f32.mrf.mxu0 }
 0x12c   : > { %v3875_v40 = vpop.f32.mrf.mxu1 }
 0x12d   : > { %v3881_v43 = vpop.f32.mrf.mxu0 }
 0x12e   : > { %v3879_v42 = vpop.f32.mrf.mxu1 }
 0x12f   : > { %v3885_v46 = vpop.f32.mrf.mxu0 }
 0x130   : > { %v3883_v44 = vpop.f32.mrf.mxu1 }
 0x131   : > { %v3889_v48 = vpop.f32.mrf.mxu0 }
 0x132   : > { %v3887_v47 = vpop.f32.mrf.mxu1 }
 0x133   : > { %v3893_v51 = vpop.f32.mrf.mxu0 }
 0x134   : > { %v3891_v50 = vpop.f32.mrf.mxu1 }
 0x135   : > { %v3897_v54 = vpop.f32.mrf.mxu0 }
 0x136   : > { %v3895_v52 = vpop.f32.mrf.mxu1  ;;  %4107 = vst [vmem:[#allocation6_spill] sm:$0xff] %v3897_v54 }
 0x137   : > { %v3901_v56 = vpop.f32.mrf.mxu0 }
 0x138   : > { %v3899_v55 = vpop.f32.mrf.mxu1  ;;  %4108 = vst [vmem:[#allocation7_spill] sm:$0xff] %v3901_v56 }
 0x139   : > { %v3905_v59 = vpop.f32.mrf.mxu0 }
 0x13a   : > { %v3903_v58 = vpop.f32.mrf.mxu1  ;;  %4110 = vst [vmem:[#allocation9_spill] sm:$0xff] %v3905_v59 }
 0x13b   : > { %4109 = vst [vmem:[#allocation8_spill] sm:$0xff] %v3903_v58  ;;  %v3909_v62 = vpop.f32.mrf.mxu0 }
 0x13c   : > { %v3907_v60 = vpop.f32.mrf.mxu1  ;;  %4112 = vst [vmem:[#allocation11_spill] sm:$0xff] %v3909_v62 }
 0x13d   : > { %4111 = vst [vmem:[#allocation10_spill] sm:$0xff] %v3907_v60  ;;  %v3913_v0 = vpop.f32.mrf.mxu0 }
 0x13e   : > { %v3911_v63 = vpop.f32.mrf.mxu1  ;;  %4114 = vst [vmem:[#allocation13_spill] sm:$0xff] %v3913_v0 }
 0x13f   : > { %4113 = vst [vmem:[#allocation12_spill] sm:$0xff] %v3911_v63  ;;  %v3089_v5 = vpop.f32.mrf.mxu0 }
 0x140   : > { %v3063_v4 = vpop.f32.mrf.mxu1 }
 0x141   : > { %v1886_v10 = vpop.f32.mrf.mxu0 }
 0x142   : > { %v1658_v8 = vpop.f32.mrf.mxu1 }
 0x143   : > { %v3092_v6 = vpop.f32.mrf.mxu0 }
 0x144   : > { %v3066_v11 = vpop.f32.mrf.mxu1 }
 0x145   : > { %v3915_v14 = vpop.f32.mrf.mxu0 }
 0x146   : > { %v1668_v12 = vpop.f32.mrf.mxu1 }
 0x147   : > { %v3917_v13 = vpop.f32.mrf.mxu0 }
 0x148   : > { %v3069_v16 = vpop.f32.mrf.mxu1 }
 0x149   : > { %v3919_v20 = vpop.f32.mrf.mxu0 }
 0x14a   : > { %v1678_v1 = vpop.f32.mrf.mxu1 }
 0x14b   : > { %v3923_v24 = vpop.f32.mrf.mxu0 }
 0x14c   : > { %v3921_v15 = vpop.f32.mrf.mxu1 }
 0x14d   : > { %v3927_v17 = vpop.f32.mrf.mxu0 }
 0x14e   : > { %v3925_v25 = vpop.f32.mrf.mxu1  ;;  %4115 = vst [vmem:[#allocation14_spill] sm:$0xff] %v3927_v17 }
 0x14f   : > { %v3931_v62 = vpop.f32.mrf.mxu0 }
 0x150   : > { %v3929_v0 = vpop.f32.mrf.mxu1  ;;  %4116 = vst [vmem:[#allocation15_spill] sm:$0xff] %v3931_v62  ;;  %v1511_v62 = vadd.f32 %v3037_v28, %v1284_v26 }
 0x151   : > { %v3935_v30 = vpop.f32.mrf.mxu0 }
 0x152   : > { %v3933_v63 = vpop.f32.mrf.mxu1  ;;  %4118 = vst [vmem:[#allocation17_spill] sm:$0xff] %v3935_v30  ;;  %v1738_v27 = vadd.f32 %v3063_v4, %v1511_v62  ;;  %v1289_v62 = vadd.f32 %v3879_v42, %v3848_v57  ;;  %v2436_v4 = vld [vmem:[%s3973_s8 + $0x8] sm:$0xff]  ;;  %v2435_v57 = vld [vmem:[%s3973_s8] sm:$0xff] }
 0x153   : > { %4117 = vst [vmem:[#allocation16_spill] sm:$0xff] %v3933_v63  ;;  %v3939_v60 = vpop.f32.mrf.mxu0  ;;  %v1286_v63 = vadd.f32 %v3014_v32, %v3838_v37  ;;  %v1287_v37 = vadd.f32 %v1224_v38, %v3844_v49 }
 0x154   : > { %v3937_v59 = vpop.f32.mrf.mxu1  ;;  %4120 = vst [vmem:[#allocation19_spill] sm:$0xff] %v3939_v60  ;;  %v1510_v60 = vadd.f32 %v1431_v31, %v1283_v22  ;;  %v1512_v22 = vadd.f32 %v3869_v35, %v1285_v29  ;;  %v1966_v31 = vadd.f32 %v3089_v5, %v1738_v27 }
 0x155   : > { %4119 = vst [vmem:[#allocation18_spill] sm:$0xff] %v3937_v59  ;;  %v3944_v58 = vpop.f32.mrf.mxu0  ;;  %v1513_v19 = vadd.f32 %v3867_v34, %v1286_v63  ;;  %v1290_v34 = vadd.f32 %v3875_v40, %v3846_v53 }
 0x156   : > { %v3942_v56 = vpop.f32.mrf.mxu1  ;;  %4122 = vst [vmem:[#allocation21_spill] sm:$0xff] %v3944_v58  ;;  %v1288_v58 = vadd.f32 %v3017_v36, %v3842_v45  ;;  %v1737_v26 = vadd.f32 %v1658_v8, %v1510_v60  ;;  %v1739_v38 = vadd.f32 %v1668_v12, %v1512_v22  ;;  %v1514_v60 = vadd.f32 %v3873_v39, %v1287_v37 }
 0x157   : > { %4121 = vst [vmem:[#allocation20_spill] sm:$0xff] %v3942_v56  ;;  %v3949_v17 = vpop.f32.mrf.mxu0  ;;  %v1740_v41 = vadd.f32 %v3066_v11, %v1513_v19  ;;  %v1517_v40 = vadd.f32 %v3877_v23, %v1290_v34  ;;  %v1516_v23 = vadd.f32 %v3881_v43, %v1289_v62  ;;  %v1294_v43 = vadd.f32 %v3891_v50, %v3854_v9  ;;  %v2440_v50 = vld [vmem:[%s3973_s8 + $0x28] sm:$0xff] }
 0x158   : > { %v3947_v54 = vpop.f32.mrf.mxu1  ;;  %v1515_v45 = vadd.f32 %v3871_v21, %v1288_v58  ;;  %v1965_v36 = vadd.f32 %v1886_v10, %v1737_v26  ;;  %v1292_v10 = vadd.f32 %v3883_v44, %v3850_v61  ;;  %v1741_v11 = vadd.f32 %v1678_v1, %v1514_v60  ;;  %v2438_v1 = vld [vmem:[%s3973_s8 + $0x18] sm:$0xff] }
 0x159   : > { %v3954_v59 = vpop.f32.mrf.mxu0  ;;  %v1968_v21 = vadd.f32 %v3092_v6, %v1740_v41  ;;  %v1967_v6 = vadd.f32 %v3915_v14, %v1739_v38  ;;  %v1291_v61 = vadd.f32 %v3887_v47, %v3852_v2  ;;  %v1744_v26 = vadd.f32 %v3921_v15, %v1517_v40  ;;  %v2437_v47 = vld [vmem:[%s3973_s8 + $0x10] sm:$0xff] }
 0x15a   : > { %v3952_v30 = vpop.f32.mrf.mxu1  ;;  %v1742_v63 = vadd.f32 %v3069_v16, %v1515_v45  ;;  %v1969_v2 = vadd.f32 %v3919_v20, %v1741_v11  ;;  %v1743_v45 = vadd.f32 %v3925_v25, %v1516_v23  ;;  %v1521_v62 = vadd.f32 %v3893_v51, %v1294_v43  ;;  %v4126_v51 = vld [vmem:[#allocation3_spill] sm:$0xff] }
 0x15b   : > { %v3960_v33 = vpop.f32.mrf.mxu0  ;;  %v1972_v38 = vadd.f32 %v3923_v24, %v1744_v26  ;;  %v4133_v26 = vld [vmem:[#allocation17_spill] sm:$0xff] }
 0x15c   : > { %v3958_v56 = vpop.f32.mrf.mxu1  ;;  %v1970_v44 = vadd.f32 %v3917_v13, %v1742_v63 }
 0x15d   : > { %v3966_v32 = vpop.f32.mrf.mxu0 }
 0x15e   : > { %v3964_v28 = vpop.f32.mrf.mxu1  ;;  %v4134_v43 = vld [vmem:[#allocation20_spill] sm:$0xff] }
 0x15f   : > { %v3141_v3 = vpop.f32.mrf.mxu0 }
 0x160   : > { %v3115_v49 = vpop.f32.mrf.mxu1 }
 0x161   : > { %v2193_v35 = vadd.f32 %v3115_v49, %v1966_v31  ;;  %v2340_v8 = vpop.f32.mrf.mxu0  ;;  %v1519_v31 = vadd.f32 %v3885_v46, %v1292_v10  ;;  %v1293_v46 = vadd.f32 %v3895_v52, %v3856_v7  ;;  %v4123_v7 = vld [vmem:[#allocation16_spill] sm:$0xff] }
 0x162   : > { %v2113_v5 = vpop.f32.mrf.mxu1  ;;  %v4127_v10 = vld [vmem:[#allocation8_spill] sm:$0xff] }
 0x163   : > { %v2420_v58 = vadd.f32 %v3141_v3, %v2193_v35  ;;  %v2192_v53 = vadd.f32 %v2113_v5, %v1965_v36  ;;  %v3144_v42 = vpop.f32.mrf.mxu0  ;;  %v1518_v3 = vadd.f32 %v3889_v48, %v1291_v61  ;;  %v1746_v9 = vadd.f32 %v3929_v0, %v1519_v31  ;;  %v2439_v0 = vld [vmem:[%s3973_s8 + $0x20] sm:$0xff]  ;;  %v4124_v5 = vld [vmem:[#allocation14_spill] sm:$0xff] }
 0x164   : > { %v3118_v39 = vpop.f32.mrf.mxu1  ;;  %v1296_v48 = vadd.f32 %v3899_v55, %v3858_v18  ;;  %v1295_v11 = vadd.f32 %v4127_v10, %v4126_v51  ;;  %v4128_v18 = vld [vmem:[#allocation15_spill] sm:$0xff] }
 0x165   : > { %v2452_v12 = vadd.f32 %v2436_v4, %v2420_v58  ;;  %v2419_v16 = vadd.f32 %v2340_v8, %v2192_v53  ;;  %v2195_v29 = vadd.f32 %v3118_v39, %v1968_v21  ;;  %v2350_v19 = vpop.f32.mrf.mxu0  ;;  %v1745_v52 = vadd.f32 %v4123_v7, %v1518_v3  ;;  %v4125_v53 = vld [vmem:[#allocation6_spill] sm:$0xff]  ;;  %v4130_v61 = vld [vmem:[#allocation7_spill] sm:$0xff] }
 0x166   : > { %v2123_v27 = vpop.f32.mrf.mxu1  ;;  %v1971_v8 = vadd.f32 %v4124_v5, %v1743_v45  ;;  %v1520_v40 = vadd.f32 %v4125_v53, %v1293_v46  ;;  %v1974_v55 = vadd.f32 %v4128_v18, %v1746_v9  ;;  %v4135_v45 = vld [vmem:[#allocation9_spill] sm:$0xff]  ;;  %v2444_v9 = vld [vmem:[%s3973_s8 + $0x48] sm:$0xff] }
 0x167   : > { %2468 = vst.msk [vmem:[%s3989_s11 + $0x8] sm:$0xff] %vm281_vm0, %v2452_v12  ;;  %v2451_v14 = vadd.f32 %v2435_v57, %v2419_v16  ;;  %v2422_v37 = vadd.f32 %v3144_v42, %v2195_v29  ;;  %v2194_v22 = vadd.f32 %v2123_v27, %v1967_v6  ;;  %v3147_v41 = vpop.f32.mrf.mxu0  ;;  %v2442_v57 = vld [vmem:[%s3973_s8 + $0x38] sm:$0xff] }
 0x168   : > { %v3121_v13 = vpop.f32.mrf.mxu1  ;;  %v4129_v6 = vld [vmem:[#allocation18_spill] sm:$0xff] }
 0x169   : > { %2467 = vst.msk [vmem:[%s3989_s11] sm:$0xff] %vm281_vm0, %v2451_v14  ;;  %v2454_v15 = vadd.f32 %v2438_v1, %v2422_v37  ;;  %v2421_v34 = vadd.f32 %v2350_v19, %v2194_v22  ;;  %v2197_v49 = vadd.f32 %v3121_v13, %v1970_v44  ;;  %v2360_v36 = vpop.f32.mrf.mxu0  ;;  %v1748_v12 = vadd.f32 %v4129_v6, %v1521_v62  ;;  %v4131_v1 = vld [vmem:[#allocation4_spill] sm:$0xff]  ;;  %v4132_v27 = vld [vmem:[#allocation10_spill] sm:$0xff]  ;;  %v2441_v37 = vld [vmem:[%s3973_s8 + $0x30] sm:$0xff] }
 0x16a   : > { %v2133_v20 = vpop.f32.mrf.mxu1  ;;  %v1523_v44 = vadd.f32 %v4130_v61, %v1296_v48  ;;  %v1298_v19 = vadd.f32 %v4132_v27, %v4131_v1  ;;  %v1973_v14 = vadd.f32 %v4133_v26, %v1745_v52  ;;  %v4139_v62 = vld [vmem:[#allocation11_spill] sm:$0xff] }
 0x16b   : > { %2470 = vst.msk [vmem:[%s3989_s11 + $0x18] sm:$0xff] %vm281_vm0, %v2454_v15  ;;  %v2453_v25 = vadd.f32 %v2437_v47, %v2421_v34  ;;  %v2424_v35 = vadd.f32 %v3147_v41, %v2197_v49  ;;  %v2196_v60 = vadd.f32 %v2133_v20, %v1969_v2  ;;  %v3150_v4 = vpop.f32.mrf.mxu0  ;;  %v1747_v2 = vadd.f32 %v4134_v43, %v1520_v40  ;;  %v4136_v34 = vld [vmem:[#allocation5_spill] sm:$0xff]  ;;  %v4137_v49 = vld [vmem:[#allocation12_spill] sm:$0xff]  ;;  %v2443_v52 = vld [vmem:[%s3973_s8 + $0x40] sm:$0xff] }
 0x16c   : > { %v3124_v63 = vpop.f32.mrf.mxu1  ;;  %v1522_v15 = vadd.f32 %v4135_v45, %v1295_v11  ;;  %v1297_v3 = vadd.f32 %v4137_v49, %v4136_v34  ;;  %v1750_v46 = vadd.f32 %v3947_v54, %v1523_v44  ;;  %v1525_v48 = vadd.f32 %v4139_v62, %v1298_v19  ;;  %v4140_v54 = vld [vmem:[#allocation21_spill] sm:$0xff]  ;;  %v2446_v40 = vld [vmem:[%s3973_s8 + $0x58] sm:$0xff] }
 0x16d   : > { %2469 = vst.msk [vmem:[%s3989_s11 + $0x10] sm:$0xff] %vm281_vm0, %v2453_v25  ;;  %v2456_v24 = vadd.f32 %v2440_v50, %v2424_v35  ;;  %v2423_v21 = vadd.f32 %v2360_v36, %v2196_v60  ;;  %v2199_v58 = vadd.f32 %v3124_v63, %v1972_v38  ;;  %v2370_v42 = vpop.f32.mrf.mxu0  ;;  %v4138_v36 = vld [vmem:[#allocation19_spill] sm:$0xff]  ;;  %v2449_v45 = vld [vmem:[%s3973_s8 + $0x70] sm:$0xff] }
 0x16e   : > { %v2143_v39 = vpop.f32.mrf.mxu1  ;;  %v1976_v38 = vadd.f32 %v4138_v36, %v1748_v12  ;;  %v1749_v7 = vadd.f32 %v3952_v30, %v1522_v15  ;;  %v1978_v53 = vadd.f32 %v3949_v17, %v1750_v46  ;;  %v1752_v10 = vadd.f32 %v3958_v56, %v1525_v48 }
 0x16f   : > { %2472 = vst.msk [vmem:[%s3989_s11 + $0x28] sm:$0xff] %vm281_vm0, %v2456_v24  ;;  %v2455_v16 = vadd.f32 %v2439_v0, %v2423_v21  ;;  %v2426_v29 = vadd.f32 %v3150_v4, %v2199_v58  ;;  %v2198_v23 = vadd.f32 %v2143_v39, %v1971_v8  ;;  %v3153_v31 = vpop.f32.mrf.mxu0  ;;  %v1975_v4 = vadd.f32 %v4140_v54, %v1747_v2  ;;  %v4141_v21 = vld [vmem:[#allocation13_spill] sm:$0xff] }
 0x170   : > { %v3127_v22 = vpop.f32.mrf.mxu1  ;;  %v1524_v58 = vadd.f32 %v4141_v21, %v1297_v3  ;;  %v2445_v39 = vld [vmem:[%s3973_s8 + $0x50] sm:$0xff]  ;;  %v1980_v44 = vadd.f32 %v3960_v33, %v1752_v10  ;;  %v2450_v33 = vld [vmem:[%s3973_s8 + $0x78] sm:$0xff] }
 0x171   : > { %2471 = vst.msk [vmem:[%s3989_s11 + $0x20] sm:$0xff] %vm281_vm0, %v2455_v16  ;;  %v2458_v47 = vadd.f32 %v2442_v57, %v2426_v29  ;;  %v2425_v13 = vadd.f32 %v2370_v42, %v2198_v23  ;;  %v2201_v41 = vadd.f32 %v3127_v22, %v1974_v55  ;;  %v2380_v20 = vpop.f32.mrf.mxu0  ;;  %v1977_v57 = vadd.f32 %v3954_v59, %v1749_v7  ;;  %v2448_v29 = vld [vmem:[%s3973_s8 + $0x68] sm:$0xff] }
 0x172   : > { %v2153_v50 = vpop.f32.mrf.mxu1  ;;  %v1751_v17 = vadd.f32 %v3964_v28, %v1524_v58  ;;  %v2447_v28 = vld [vmem:[%s3973_s8 + $0x60] sm:$0xff] }
 0x173   : > { %2474 = vst.msk [vmem:[%s3989_s11 + $0x38] sm:$0xff] %vm281_vm0, %v2458_v47  ;;  %v2457_v25 = vadd.f32 %v2441_v37, %v2425_v13  ;;  %v2428_v35 = vadd.f32 %v3153_v31, %v2201_v41  ;;  %v2200_v60 = vadd.f32 %v2153_v50, %v1973_v14  ;;  %v3156_v63 = vpop.f32.mrf.mxu0 }
 0x174   : > { %v3130_v0 = vpop.f32.mrf.mxu1  ;;  %v1979_v14 = vadd.f32 %v3966_v32, %v1751_v17 }
 0x175   : > { %2473 = vst.msk [vmem:[%s3989_s11 + $0x30] sm:$0xff] %vm281_vm0, %v2457_v25  ;;  %v2460_v5 = vadd.f32 %v2444_v9, %v2428_v35  ;;  %v2427_v8 = vadd.f32 %v2380_v20, %v2200_v60  ;;  %v2203_v24 = vadd.f32 %v3130_v0, %v1976_v38  ;;  %v2390_v30 = vpop.f32.mrf.mxu0 }
 0x176   : > { %v2163_v51 = vpop.f32.mrf.mxu1 }
 0x177   : > { %2476 = vst.msk [vmem:[%s3989_s11 + $0x48] sm:$0xff] %vm281_vm0, %v2460_v5  ;;  %v2459_v11 = vadd.f32 %v2443_v52, %v2427_v8  ;;  %v2430_v18 = vadd.f32 %v3156_v63, %v2203_v24  ;;  %v2202_v55 = vadd.f32 %v2163_v51, %v1975_v4  ;;  %v3159_v6 = vpop.f32.mrf.mxu0 }
 0x178   : > { %v3133_v42 = vpop.f32.mrf.mxu1 }
 0x179   : > { %2475 = vst.msk [vmem:[%s3989_s11 + $0x40] sm:$0xff] %vm281_vm0, %v2459_v11  ;;  %v2462_v12 = vadd.f32 %v2446_v40, %v2430_v18  ;;  %v2429_v16 = vadd.f32 %v2390_v30, %v2202_v55  ;;  %v2205_v56 = vadd.f32 %v3133_v42, %v1978_v53  ;;  %v2400_v61 = vpop.f32.mrf.mxu0 }
 0x17a   : > { %v2173_v23 = vpop.f32.mrf.mxu1 }
 0x17b   : > { %2478 = vst.msk [vmem:[%s3989_s11 + $0x58] sm:$0xff] %vm281_vm0, %v2462_v12  ;;  %v2461_v59 = vadd.f32 %v2445_v39, %v2429_v16  ;;  %v2432_v1 = vadd.f32 %v3159_v6, %v2205_v56  ;;  %v2204_v27 = vadd.f32 %v2173_v23, %v1977_v57  ;;  %v3162_v26 = vpop.f32.mrf.mxu0 }
 0x17c   : > { %v3136_v19 = vpop.f32.mrf.mxu1 }
 0x17d   : > { %2477 = vst.msk [vmem:[%s3989_s11 + $0x50] sm:$0xff] %vm281_vm0, %v2461_v59  ;;  %v2464_v37 = vadd.f32 %v2448_v29, %v2432_v1  ;;  %v2431_v22 = vadd.f32 %v2400_v61, %v2204_v27  ;;  %v2207_v31 = vadd.f32 %v3136_v19, %v1980_v44  ;;  %v2410_v41 = vpop.f32.mrf.mxu0 }
 0x17e   : > { %v2183_v43 = vpop.f32.mrf.mxu1 }
 0x17f   : > { %2480 = vst.msk [vmem:[%s3989_s11 + $0x68] sm:$0xff] %vm281_vm0, %v2464_v37  ;;  %v2463_v2 = vadd.f32 %v2447_v28, %v2431_v22  ;;  %v2434_v47 = vadd.f32 %v3162_v26, %v2207_v31  ;;  %v2206_v13 = vadd.f32 %v2183_v43, %v1979_v14 }
 0x181   : > { %2479 = vst.msk [vmem:[%s3989_s11 + $0x60] sm:$0xff] %vm281_vm0, %v2463_v2  ;;  %v2466_v15 = vadd.f32 %v2450_v33, %v2434_v47  ;;  %v2433_v32 = vadd.f32 %v2410_v41, %v2206_v13 }
 0x183   : > { %2482 = vst.msk [vmem:[%s3989_s11 + $0x78] sm:$0xff] %vm281_vm0, %v2466_v15  ;;  %v2465_v34 = vadd.f32 %v2449_v45, %v2433_v32 }
 0x185   : > { %2481 = vst.msk [vmem:[%s3989_s11 + $0x70] sm:$0xff] %vm281_vm0, %v2465_v34 }
 0x186 PF: > { %s14_s19 = sadd.s32 1, %s3244_s19   ;;  %s4142_s15 = smov %s3236_s17 }
 0x187   : > { %p11_p7 = scmp.ge.s32.totalorder %s14_s19, 6   ;;  %s4143_s16 = smov %s3240_s18 }
 0x188   : > { %s4144_s17 = smov %s4147_s20  ;;  %s4145_s18 = smov %s4151_s21 }
 0x189   :  { %13 = sbr.rel (!%p11_p7) target bundleno = 3 (0x3), region = 80 }

// kernel: partial_conv3_pallas.2
= control target key start
LH: loop header
LB: loop body
LE: loop exit
PB: predicated region body
PF: predicated region fallthrough
CT: control target
= control target key end

     0   :  { %s19010_s15 = smov 0   ;;  %s25182_s0 = inlined_call_operand.vmem [shape: f32[2,4,8,8,8], index: 0, kind: input, shape index: {}]   ;;  %s25183_s1 = inlined_call_operand.vmem [shape: f32[27,2,2], index: 1, kind: input, shape index: {}]   ;;  %s25184_s2 = inlined_call_operand.vmem [shape: f32[9,8,8], index: 2, kind: input, shape index: {}]   ;;  %s25185_s3 = inlined_call_operand.vmem [shape: f32[2,4,8,8,8], index: 3, kind: output, shape index: {0}]   ;;  %s25186_s4 = inlined_call_operand.vmem [shape: f32[2,2,8], index: 4, kind: output, shape index: {1}]  }
   0x1 LB: > { %s14752_s16 = sadd.s32 4294967295, %s18982_s15   ;;  %p14756_p0 = scmp.ge.s32.totalorder %s18982_s15, 1  ;;  %s18982_s15 = sphi %s19010_s15, %s15_s15  }
   0x2   : > { %p165_p1 = scmp.lt.s32.totalorder %s18982_s15, 3 }
   0x4   : > { %p166_p2 = pnand %p14756_p0, %p165_p1 }
   0x6   : > { %169 = sbr.rel (%p166_p2) target bundleno = 1681 (0x691), region = 32 }
   0xb   : > { %v19021_v0 = vld [vmem:[%s25183_s1 + $0x2] sm:$0x3]  ;;  %vm661_vm0 = vcmask 1041408   ;;  %vm209_vm1 = vcmask 15360   ;;  %vm211_vm2 = vcmask 9216   ;;  %v25187_v1 = vmov 0.0  }
   0xc   : > { %17167 = vmatprep.subr.msk.mxu0 %vm661_vm0, %v19021_v0  ;;  %210 = vst.msk [vmem:[#allocation2] sm:$0xff] %vm209_vm1, %v25187_v1  ;;  %vm277_vm3 = vcmask 8192   ;;  %213 = vst.msk [vmem:[#allocation2 + $0x10] sm:$0xff] %vm209_vm1, %v25187_v1  ;;  %v19140_v2 = vld [vmem:[%s25183_s1] sm:$0x3]  ;;  %p19149_p3 = scmp.lt.s32.totalorder %s14752_s16, 1 }
   0xd   : > { %212 = vst.msk [vmem:[#allocation2 + $0x8] sm:$0x3] %vm211_vm2, %v25187_v1  ;;  %214 = vst.msk [vmem:[#allocation2 + $0x18] sm:$0x3] %vm211_vm2, %v25187_v1  ;;  %v19145_v3 = vld [vmem:[%s25183_s1 + $0x4] sm:$0x3]  ;;  %17168 = vmatpush3.msk.msra.mxu0 %vm661_vm0, %v19021_v0  ;;  %17217 = vmatprep.subr.msk.mxu1 %vm661_vm0, %v19140_v2 }
   0xe   : > { %215 = vst.msk [vmem:[#allocation2 + $0x20] sm:$0xff] %vm209_vm1, %v25187_v1  ;;  %217 = vst.msk [vmem:[#allocation2 + $0x30] sm:$0xff] %vm209_vm1, %v25187_v1  ;;  %v14863_v4 = vld [vmem:[%s25183_s1 + $0x6] sm:$0x3]  ;;  %17267 = vmatprep.subr.msk.mxu0 %vm661_vm0, %v19145_v3  ;;  %17218 = vmatpush3.msk.msra.mxu1 %vm661_vm0, %v19140_v2  ;;  %s25952_s16 = smov (!%p19149_p3, %s14752_s16), 1  ;;  %vm398_vm4 = vcmask 64512  }
   0xf   : > { %216 = vst.msk [vmem:[#allocation2 + $0x28] sm:$0x3] %vm211_vm2, %v25187_v1  ;;  %218 = vst.msk [vmem:[#allocation2 + $0x38] sm:$0x3] %vm211_vm2, %v25187_v1  ;;  %17317 = vmatprep.subr.msk.mxu1 %vm661_vm0, %v14863_v4  ;;  %s15977_s26 = sshll.u32 %s25952_s16, 8  ;;  %vm14663_vm5 = vcmask 57344  }
  0x10   : > { %219 = vst.msk [vmem:[#allocation2 + $0x40] sm:$0xff] %vm209_vm1, %v25187_v1  ;;  %221 = vst.msk [vmem:[#allocation2 + $0x50] sm:$0xff] %vm209_vm1, %v25187_v1  ;;  %s19433_s29 = scalar_lea.vmem %s25182_s0, %s15977_s26  ;;  %v19465_v14 = vld [vmem:[%s25183_s1 + $0x8] sm:$0x3]  ;;  %s24899_s27 = scalar_lea.vmem %s25185_s3, %s15977_s26 }
  0x11   : > { %220 = vst.msk [vmem:[#allocation2 + $0x48] sm:$0x3] %vm211_vm2, %v25187_v1  ;;  %222 = vst.msk [vmem:[#allocation2 + $0x58] sm:$0x3] %vm211_vm2, %v25187_v1  ;;  %v19436_v5 = vld [vmem:[%s19433_s29] sm:$0xff]  ;;  %v19439_v6 = vld [vmem:[%s19433_s29 + $0x8] sm:$0xff] }
  0x12   : > { %223 = vst.msk [vmem:[#allocation2 + $0x60] sm:$0xff] %vm209_vm1, %v25187_v1  ;;  %225 = vst.msk [vmem:[#allocation2 + $0x70] sm:$0xff] %vm209_vm1, %v25187_v1  ;;  %v19442_v7 = vld [vmem:[%s19433_s29 + $0x10] sm:$0xff]  ;;  %v19484_v19 = vld [vmem:[%s19433_s29 + $0x18] sm:$0xff]  ;;  %s14761_s26 = sshll.u32 %s25952_s16, 1 }
  0x13   : > { %224 = vst.msk [vmem:[#allocation2 + $0x68] sm:$0x3] %vm211_vm2, %v25187_v1  ;;  %226 = vst.msk [vmem:[#allocation2 + $0x78] sm:$0x3] %vm211_vm2, %v25187_v1  ;;  %v19487_v20 = vld [vmem:[%s19433_s29 + $0x20] sm:$0xff]  ;;  %v19490_v21 = vld [vmem:[%s19433_s29 + $0x28] sm:$0xff]  ;;  %s208_s30 = scalar_lea.vmem %s25186_s4, %s14761_s26 }
  0x14   : > { %227 = vst.msk [vmem:[#allocation2 + $0x80] sm:$0xff] %vm209_vm1, %v25187_v1  ;;  %229 = vst.msk [vmem:[#allocation2 + $0x90] sm:$0xff] %vm209_vm1, %v25187_v1  ;;  %v19444_v8 = vld [vmem:[#allocation2 + $0x11] sm:$0xff]  ;;  %v19519_v26 = vld [vmem:[%s19433_s29 + $0x40] sm:$0xff] }
  0x15   : > { %228 = vst.msk [vmem:[#allocation2 + $0x88] sm:$0x3] %vm211_vm2, %v25187_v1  ;;  %230 = vst.msk [vmem:[#allocation2 + $0x98] sm:$0x3] %vm211_vm2, %v25187_v1  ;;  %v19516_v25 = vld [vmem:[%s19433_s29 + $0x30] sm:$0xff]  ;;  %v19530_v29 = vld [vmem:[%s19433_s29 + $0x48] sm:$0xff] }
  0x16   : > { %232 = vst.msk [vmem:[#allocation2 + $0x320] sm:$0xff] %vm209_vm1, %v25187_v1  ;;  %234 = vst.msk [vmem:[#allocation2 + $0x330] sm:$0xff] %vm209_vm1, %v25187_v1  ;;  %v19455_v12 = vld [vmem:[#allocation2 + $0x21] sm:$0xff]  ;;  %v19471_v15 = vld [vmem:[#allocation2 + $0x31] sm:$0xff] }
  0x17   : > { %233 = vst.msk [vmem:[#allocation2 + $0x328] sm:$0x3] %vm211_vm2, %v25187_v1  ;;  %235 = vst.msk [vmem:[#allocation2 + $0x338] sm:$0x3] %vm211_vm2, %v25187_v1  ;;  %v19533_v30 = vld [vmem:[%s19433_s29 + $0x50] sm:$0xff]  ;;  %v19542_v31 = vld [vmem:[%s19433_s29 + $0x58] sm:$0xff] }
  0x18   : > { %236 = vst.msk [vmem:[#allocation2 + $0x340] sm:$0xff] %vm209_vm1, %v25187_v1  ;;  %238 = vst.msk [vmem:[#allocation2 + $0x350] sm:$0xff] %vm209_vm1, %v25187_v1  ;;  %v19479_v17 = vld [vmem:[#allocation2 + $0x41] sm:$0xff]  ;;  %v19507_v22 = vld [vmem:[#allocation2 + $0x51] sm:$0xff] }
  0x19   : > { %237 = vst.msk [vmem:[#allocation2 + $0x348] sm:$0x3] %vm211_vm2, %v25187_v1  ;;  %239 = vst.msk [vmem:[#allocation2 + $0x358] sm:$0x3] %vm211_vm2, %v25187_v1  ;;  %v19545_v32 = vld [vmem:[%s19433_s29 + $0x60] sm:$0xff]  ;;  %v19548_v33 = vld [vmem:[%s19433_s29 + $0x68] sm:$0xff] }
  0x1a   : > { %240 = vst.msk [vmem:[#allocation2 + $0x360] sm:$0xff] %vm209_vm1, %v25187_v1  ;;  %242 = vst.msk [vmem:[#allocation2 + $0x370] sm:$0xff] %vm209_vm1, %v25187_v1  ;;  %v19513_v24 = vld [vmem:[#allocation2 + $0x61] sm:$0xff]  ;;  %v19521_v27 = vld [vmem:[#allocation2 + $0x71] sm:$0xff] }
  0x1b   : > { %241 = vst.msk [vmem:[#allocation2 + $0x368] sm:$0x3] %vm211_vm2, %v25187_v1  ;;  %243 = vst.msk [vmem:[#allocation2 + $0x378] sm:$0x3] %vm211_vm2, %v25187_v1  ;;  %v19563_v35 = vld [vmem:[%s19433_s29 + $0x70] sm:$0xff]  ;;  %v19566_v36 = vld [vmem:[%s19433_s29 + $0x80] sm:$0xff] }
  0x1c   : > { %244 = vst.msk [vmem:[#allocation2 + $0x380] sm:$0xff] %vm209_vm1, %v25187_v1  ;;  %246 = vst.msk [vmem:[#allocation2 + $0x390] sm:$0xff] %vm209_vm1, %v25187_v1  ;;  %v19575_v38 = vld [vmem:[%s19433_s29 + $0x88] sm:$0xff]  ;;  %v19578_v39 = vld [vmem:[%s19433_s29 + $0x90] sm:$0xff] }
  0x1d   : > { %245 = vst.msk [vmem:[#allocation2 + $0x388] sm:$0x3] %vm211_vm2, %v25187_v1  ;;  %247 = vst.msk [vmem:[#allocation2 + $0x398] sm:$0x3] %vm211_vm2, %v25187_v1  ;;  %v19592_v42 = vld [vmem:[%s19433_s29 + $0x98] sm:$0xff]  ;;  %v19595_v43 = vld [vmem:[%s19433_s29 + $0xa0] sm:$0xff] }
  0x1e   : > { %248 = vst.msk [vmem:[#allocation2 + $0x3a0] sm:$0xff] %vm209_vm1, %v25187_v1  ;;  %250 = vst.msk [vmem:[#allocation2 + $0x3b0] sm:$0xff] %vm209_vm1, %v25187_v1  ;;  %v19598_v44 = vld [vmem:[%s19433_s29 + $0xa8] sm:$0xff]  ;;  %v19646_v56 = vld [vmem:[%s19433_s29 + $0xb0] sm:$0xff] }
  0x1f   : > { %249 = vst.msk [vmem:[#allocation2 + $0x3a8] sm:$0x3] %vm211_vm2, %v25187_v1  ;;  %251 = vst.msk [vmem:[#allocation2 + $0x3b8] sm:$0x3] %vm211_vm2, %v25187_v1  ;;  %v19670_v62 = vld [vmem:[%s19433_s29 + $0x38] sm:$0xff] }
  0x20   : > { %254 = vst.msk [vmem:[#allocation2 + $0xa0] sm:$0xff] %vm209_vm1, %v25187_v1  ;;  %256 = vst.msk [vmem:[#allocation2 + $0x140] sm:$0xff] %vm209_vm1, %v25187_v1 }
  0x21   : > { %255 = vst.msk [vmem:[#allocation2 + $0xa8] sm:$0x3] %vm211_vm2, %v25187_v1  ;;  %257 = vst.msk [vmem:[#allocation2 + $0x148] sm:$0x3] %vm211_vm2, %v25187_v1 }
  0x22   : > { %258 = vst.msk [vmem:[#allocation2 + $0x1e0] sm:$0xff] %vm209_vm1, %v25187_v1  ;;  %260 = vst.msk [vmem:[#allocation2 + $0x280] sm:$0xff] %vm209_vm1, %v25187_v1 }
  0x23   : > { %259 = vst.msk [vmem:[#allocation2 + $0x1e8] sm:$0x3] %vm211_vm2, %v25187_v1  ;;  %261 = vst.msk [vmem:[#allocation2 + $0x288] sm:$0x3] %vm211_vm2, %v25187_v1 }
  0x24   : > { %267 = vst.msk [vmem:[#allocation2 + $0x130] sm:$0xff] %vm209_vm1, %v25187_v1  ;;  %269 = vst.msk [vmem:[#allocation2 + $0x1d0] sm:$0xff] %vm209_vm1, %v25187_v1 }
  0x25   : > { %268 = vst.msk [vmem:[#allocation2 + $0x138] sm:$0x3] %vm211_vm2, %v25187_v1  ;;  %270 = vst.msk [vmem:[#allocation2 + $0x1d8] sm:$0x3] %vm211_vm2, %v25187_v1 }
  0x26   : > { %271 = vst.msk [vmem:[#allocation2 + $0x270] sm:$0xff] %vm209_vm1, %v25187_v1  ;;  %273 = vst.msk [vmem:[#allocation2 + $0x310] sm:$0xff] %vm209_vm1, %v25187_v1 }
  0x27   : > { %272 = vst.msk [vmem:[#allocation2 + $0x278] sm:$0x3] %vm211_vm2, %v25187_v1  ;;  %274 = vst.msk [vmem:[#allocation2 + $0x318] sm:$0x3] %vm211_vm2, %v25187_v1 }
  0x28   : > { %252 = vst.msk [vmem:[#allocation2] sm:$0xff] %vm209_vm1, %v25187_v1  ;;  %262 = vst.msk [vmem:[#allocation2 + $0x320] sm:$0xff] %vm209_vm1, %v25187_v1  ;;  %v539_v37 = vld [vmem:[#allocation2 + $0xa1] sm:$0xff] }
  0x29   : > { %253 = vst.msk [vmem:[#allocation2 + $0x8] sm:$0x3] %vm211_vm2, %v25187_v1  ;;  %263 = vst.msk [vmem:[#allocation2 + $0x328] sm:$0x3] %vm211_vm2, %v25187_v1  ;;  %v547_v59 = vld [vmem:[#allocation2 + $0x141] sm:$0xff] }
  0x2a   : > { %289 = vst.msk [vmem:[#allocation2 + $0xb0] sm:$0x1] %vm277_vm3, %v25187_v1  ;;  %290 = vst.msk [vmem:[#allocation2 + $0xc0] sm:$0x1] %vm277_vm3, %v25187_v1 }
  0x2b   : > { %291 = vst.msk [vmem:[#allocation2 + $0xd0] sm:$0x1] %vm277_vm3, %v25187_v1  ;;  %292 = vst.msk [vmem:[#allocation2 + $0xe0] sm:$0x1] %vm277_vm3, %v25187_v1 }
  0x2c   : > { %293 = vst.msk [vmem:[#allocation2 + $0xf0] sm:$0x1] %vm277_vm3, %v25187_v1  ;;  %294 = vst.msk [vmem:[#allocation2 + $0x100] sm:$0x1] %vm277_vm3, %v25187_v1 }
  0x2d   : > { %295 = vst.msk [vmem:[#allocation2 + $0x110] sm:$0x1] %vm277_vm3, %v25187_v1  ;;  %296 = vst.msk [vmem:[#allocation2 + $0x120] sm:$0x1] %vm277_vm3, %v25187_v1 }
  0x2e   : > { %299 = vst.msk [vmem:[#allocation2 + $0x150] sm:$0x1] %vm277_vm3, %v25187_v1  ;;  %300 = vst.msk [vmem:[#allocation2 + $0x160] sm:$0x1] %vm277_vm3, %v25187_v1 }
  0x2f   : > { %301 = vst.msk [vmem:[#allocation2 + $0x170] sm:$0x1] %vm277_vm3, %v25187_v1  ;;  %302 = vst.msk [vmem:[#allocation2 + $0x180] sm:$0x1] %vm277_vm3, %v25187_v1 }
  0x30   : > { %303 = vst.msk [vmem:[#allocation2 + $0x190] sm:$0x1] %vm277_vm3, %v25187_v1  ;;  %304 = vst.msk [vmem:[#allocation2 + $0x1a0] sm:$0x1] %vm277_vm3, %v25187_v1  ;;  %v531_v9 = vld [vmem:[#allocation2 + $0x1] sm:$0xff] }
  0x31   : > { %305 = vst.msk [vmem:[#allocation2 + $0x1b0] sm:$0x1] %vm277_vm3, %v25187_v1  ;;  %306 = vst.msk [vmem:[#allocation2 + $0x1c0] sm:$0x1] %vm277_vm3, %v25187_v1  ;;  %17169 = vmatprep.mubr.msk.f32.mxu0 %vm209_vm1, %v531_v9 }
  0x32   : > { %309 = vst.msk [vmem:[#allocation2 + $0x1f0] sm:$0x1] %vm277_vm3, %v25187_v1  ;;  %310 = vst.msk [vmem:[#allocation2 + $0x200] sm:$0x1] %vm277_vm3, %v25187_v1  ;;  %17170 = vmatmul.mubr.msk.f32.vlgmr.msra.gmra.mxu0 %vm209_vm1, %v19444_v8 }
  0x33   : > { %311 = vst.msk [vmem:[#allocation2 + $0x210] sm:$0x1] %vm277_vm3, %v25187_v1  ;;  %312 = vst.msk [vmem:[#allocation2 + $0x220] sm:$0x1] %vm277_vm3, %v25187_v1  ;;  %17268 = vmatpush3.msk.msra.mxu0 %vm661_vm0, %v19145_v3  ;;  %17172 = vmatprep.mubr.msk.f32.mxu0 %vm209_vm1, %v19455_v12 }
  0x34   : > { %313 = vst.msk [vmem:[#allocation2 + $0x230] sm:$0x1] %vm277_vm3, %v25187_v1  ;;  %314 = vst.msk [vmem:[#allocation2 + $0x240] sm:$0x1] %vm277_vm3, %v25187_v1  ;;  %17367 = vmatprep.subr.msk.mxu0 %vm661_vm0, %v19465_v14 }
  0x35   : > { %315 = vst.msk [vmem:[#allocation2 + $0x250] sm:$0x1] %vm277_vm3, %v25187_v1  ;;  %316 = vst.msk [vmem:[#allocation2 + $0x260] sm:$0x1] %vm277_vm3, %v25187_v1 }
  0x36   : > { %319 = vst.msk [vmem:[#allocation2 + $0x290] sm:$0x1] %vm277_vm3, %v25187_v1  ;;  %320 = vst.msk [vmem:[#allocation2 + $0x2a0] sm:$0x1] %vm277_vm3, %v25187_v1  ;;  %17173 = vmatmul.mubr.msk.f32.gmra.mxu0 %vm209_vm1, %v19471_v15 }
  0x37   : > { %321 = vst.msk [vmem:[#allocation2 + $0x2b0] sm:$0x1] %vm277_vm3, %v25187_v1  ;;  %322 = vst.msk [vmem:[#allocation2 + $0x2c0] sm:$0x1] %vm277_vm3, %v25187_v1  ;;  %17175 = vmatprep.mubr.msk.f32.mxu0 %vm209_vm1, %v19479_v17 }
  0x38   : > { %323 = vst.msk [vmem:[#allocation2 + $0x2d0] sm:$0x1] %vm277_vm3, %v25187_v1  ;;  %324 = vst.msk [vmem:[#allocation2 + $0x2e0] sm:$0x1] %vm277_vm3, %v25187_v1 }
  0x39   : > { %325 = vst.msk [vmem:[#allocation2 + $0x2f0] sm:$0x1] %vm277_vm3, %v25187_v1  ;;  %326 = vst.msk [vmem:[#allocation2 + $0x300] sm:$0x1] %vm277_vm3, %v25187_v1 }
  0x3a   : > { %349 = vst.msk [vmem:[#allocation2 + $0xb9] sm:$0x1] %vm277_vm3, %v25187_v1  ;;  %350 = vst.msk [vmem:[#allocation2 + $0xc9] sm:$0x1] %vm277_vm3, %v25187_v1  ;;  %17176 = vmatmul.mubr.msk.f32.gmra.mxu0 %vm209_vm1, %v19507_v22 }
  0x3b   : > { %351 = vst.msk [vmem:[#allocation2 + $0xd9] sm:$0x1] %vm277_vm3, %v25187_v1  ;;  %352 = vst.msk [vmem:[#allocation2 + $0xe9] sm:$0x1] %vm277_vm3, %v25187_v1  ;;  %17178 = vmatprep.mubr.msk.f32.mxu0 %vm209_vm1, %v19513_v24 }
  0x3c   : > { %353 = vst.msk [vmem:[#allocation2 + $0xf9] sm:$0x1] %vm277_vm3, %v25187_v1  ;;  %354 = vst.msk [vmem:[#allocation2 + $0x109] sm:$0x1] %vm277_vm3, %v25187_v1 }
  0x3d   : > { %355 = vst.msk [vmem:[#allocation2 + $0x119] sm:$0x1] %vm277_vm3, %v25187_v1  ;;  %356 = vst.msk [vmem:[#allocation2 + $0x129] sm:$0x1] %vm277_vm3, %v25187_v1 }
  0x3e   : > { %359 = vst.msk [vmem:[#allocation2 + $0x159] sm:$0x1] %vm277_vm3, %v25187_v1  ;;  %360 = vst.msk [vmem:[#allocation2 + $0x169] sm:$0x1] %vm277_vm3, %v25187_v1  ;;  %17179 = vmatmul.mubr.msk.f32.gmra.mxu0 %vm209_vm1, %v19521_v27 }
  0x3f   : > { %361 = vst.msk [vmem:[#allocation2 + $0x179] sm:$0x1] %vm277_vm3, %v25187_v1  ;;  %362 = vst.msk [vmem:[#allocation2 + $0x189] sm:$0x1] %vm277_vm3, %v25187_v1  ;;  %17181 = vmatprep.mubr.msk.f32.mxu0 %vm209_vm1, %v539_v37 }
  0x40   : > { %363 = vst.msk [vmem:[#allocation2 + $0x199] sm:$0x1] %vm277_vm3, %v25187_v1  ;;  %364 = vst.msk [vmem:[#allocation2 + $0x1a9] sm:$0x1] %vm277_vm3, %v25187_v1 }
  0x41   : > { %365 = vst.msk [vmem:[#allocation2 + $0x1b9] sm:$0x1] %vm277_vm3, %v25187_v1  ;;  %366 = vst.msk [vmem:[#allocation2 + $0x1c9] sm:$0x1] %vm277_vm3, %v25187_v1 }
  0x42   : > { %369 = vst.msk [vmem:[#allocation2 + $0x1f9] sm:$0x1] %vm277_vm3, %v25187_v1  ;;  %370 = vst.msk [vmem:[#allocation2 + $0x209] sm:$0x1] %vm277_vm3, %v25187_v1 }
  0x43   : > { %371 = vst.msk [vmem:[#allocation2 + $0x219] sm:$0x1] %vm277_vm3, %v25187_v1  ;;  %372 = vst.msk [vmem:[#allocation2 + $0x229] sm:$0x1] %vm277_vm3, %v25187_v1 }
  0x44   : > { %373 = vst.msk [vmem:[#allocation2 + $0x239] sm:$0x1] %vm277_vm3, %v25187_v1  ;;  %374 = vst.msk [vmem:[#allocation2 + $0x249] sm:$0x1] %vm277_vm3, %v25187_v1 }
  0x45   : > { %375 = vst.msk [vmem:[#allocation2 + $0x259] sm:$0x1] %vm277_vm3, %v25187_v1  ;;  %376 = vst.msk [vmem:[#allocation2 + $0x269] sm:$0x1] %vm277_vm3, %v25187_v1 }
  0x46   : > { %379 = vst.msk [vmem:[#allocation2 + $0x299] sm:$0x1] %vm277_vm3, %v25187_v1  ;;  %380 = vst.msk [vmem:[#allocation2 + $0x2a9] sm:$0x1] %vm277_vm3, %v25187_v1 }
  0x47   : > { %381 = vst.msk [vmem:[#allocation2 + $0x2b9] sm:$0x1] %vm277_vm3, %v25187_v1  ;;  %382 = vst.msk [vmem:[#allocation2 + $0x2c9] sm:$0x1] %vm277_vm3, %v25187_v1 }
  0x48   : > { %383 = vst.msk [vmem:[#allocation2 + $0x2d9] sm:$0x1] %vm277_vm3, %v25187_v1  ;;  %384 = vst.msk [vmem:[#allocation2 + $0x2e9] sm:$0x1] %vm277_vm3, %v25187_v1 }
  0x49   : > { %385 = vst.msk [vmem:[#allocation2 + $0x2f9] sm:$0x1] %vm277_vm3, %v25187_v1  ;;  %386 = vst.msk [vmem:[#allocation2 + $0x309] sm:$0x1] %vm277_vm3, %v25187_v1 }
  0x4a   : > { %265 = vst.msk [vmem:[#allocation2 + $0x90] sm:$0xff] %vm209_vm1, %v25187_v1  ;;  %275 = vst.msk [vmem:[#allocation2 + $0x3b0] sm:$0xff] %vm209_vm1, %v25187_v1 }
  0x4b   : > { %266 = vst.msk [vmem:[#allocation2 + $0x98] sm:$0x3] %vm211_vm2, %v25187_v1  ;;  %276 = vst.msk [vmem:[#allocation2 + $0x3b8] sm:$0x3] %vm211_vm2, %v25187_v1 }
  0x4c   : > { %279 = vst.msk [vmem:[#allocation2 + $0x10] sm:$0x1] %vm277_vm3, %v25187_v1  ;;  %280 = vst.msk [vmem:[#allocation2 + $0x20] sm:$0x1] %vm277_vm3, %v25187_v1 }
  0x4d   : > { %281 = vst.msk [vmem:[#allocation2 + $0x30] sm:$0x1] %vm277_vm3, %v25187_v1  ;;  %282 = vst.msk [vmem:[#allocation2 + $0x40] sm:$0x1] %vm277_vm3, %v25187_v1 }
  0x4e   : > { %283 = vst.msk [vmem:[#allocation2 + $0x50] sm:$0x1] %vm277_vm3, %v25187_v1  ;;  %284 = vst.msk [vmem:[#allocation2 + $0x60] sm:$0x1] %vm277_vm3, %v25187_v1 }
  0x4f   : > { %285 = vst.msk [vmem:[#allocation2 + $0x70] sm:$0x1] %vm277_vm3, %v25187_v1  ;;  %286 = vst.msk [vmem:[#allocation2 + $0x80] sm:$0x1] %vm277_vm3, %v25187_v1 }
  0x50   : > { %288 = vst.msk [vmem:[#allocation2 + $0xa0] sm:$0x1] %vm277_vm3, %v25187_v1  ;;  %297 = vst.msk [vmem:[#allocation2 + $0x130] sm:$0x1] %vm277_vm3, %v25187_v1 }
  0x51   : > { %298 = vst.msk [vmem:[#allocation2 + $0x140] sm:$0x1] %vm277_vm3, %v25187_v1  ;;  %307 = vst.msk [vmem:[#allocation2 + $0x1d0] sm:$0x1] %vm277_vm3, %v25187_v1 }
  0x52   : > { %308 = vst.msk [vmem:[#allocation2 + $0x1e0] sm:$0x1] %vm277_vm3, %v25187_v1  ;;  %317 = vst.msk [vmem:[#allocation2 + $0x270] sm:$0x1] %vm277_vm3, %v25187_v1 }
  0x53   : > { %318 = vst.msk [vmem:[#allocation2 + $0x280] sm:$0x1] %vm277_vm3, %v25187_v1  ;;  %327 = vst.msk [vmem:[#allocation2 + $0x310] sm:$0x1] %vm277_vm3, %v25187_v1  ;;  %v19452_v10 = vld [vmem:[#allocation2 + $0x10] sm:$0xff]  ;;  %v19457_v13 = vld [vmem:[#allocation2 + $0x20] sm:$0xff] }
  0x54   : > { %329 = vst.msk [vmem:[#allocation2 + $0x330] sm:$0x1] %vm277_vm3, %v25187_v1  ;;  %330 = vst.msk [vmem:[#allocation2 + $0x340] sm:$0x1] %vm277_vm3, %v25187_v1  ;;  %v19477_v16 = vld [vmem:[#allocation2 + $0x30] sm:$0xff]  ;;  %v19481_v18 = vld [vmem:[#allocation2 + $0x40] sm:$0xff] }
  0x55   : > { %331 = vst.msk [vmem:[#allocation2 + $0x350] sm:$0x1] %vm277_vm3, %v25187_v1  ;;  %332 = vst.msk [vmem:[#allocation2 + $0x360] sm:$0x1] %vm277_vm3, %v25187_v1  ;;  %v19509_v23 = vld [vmem:[#allocation2 + $0x50] sm:$0xff]  ;;  %v19523_v28 = vld [vmem:[#allocation2 + $0x60] sm:$0xff] }
  0x56   : > { %333 = vst.msk [vmem:[#allocation2 + $0x370] sm:$0x1] %vm277_vm3, %v25187_v1  ;;  %334 = vst.msk [vmem:[#allocation2 + $0x380] sm:$0x1] %vm277_vm3, %v25187_v1  ;;  %v19554_v34 = vld [vmem:[#allocation2 + $0x70] sm:$0xff] }
  0x57   : > { %335 = vst.msk [vmem:[#allocation2 + $0x390] sm:$0x1] %vm277_vm3, %v25187_v1  ;;  %336 = vst.msk [vmem:[#allocation2 + $0x3a0] sm:$0x1] %vm277_vm3, %v25187_v1  ;;  %v506_v40 = vld [vmem:[#allocation2 + $0xa0] sm:$0xff] }
  0x58   : > { %339 = vst.msk [vmem:[#allocation2 + $0x19] sm:$0x1] %vm277_vm3, %v25187_v1  ;;  %340 = vst.msk [vmem:[#allocation2 + $0x29] sm:$0x1] %vm277_vm3, %v25187_v1  ;;  %v514_v60 = vld [vmem:[#allocation2 + $0x140] sm:$0xff] }
  0x59   : > { %341 = vst.msk [vmem:[#allocation2 + $0x39] sm:$0x1] %vm277_vm3, %v25187_v1  ;;  %342 = vst.msk [vmem:[#allocation2 + $0x49] sm:$0x1] %vm277_vm3, %v25187_v1 }
  0x5a   : > { %343 = vst.msk [vmem:[#allocation2 + $0x59] sm:$0x1] %vm277_vm3, %v25187_v1  ;;  %344 = vst.msk [vmem:[#allocation2 + $0x69] sm:$0x1] %vm277_vm3, %v25187_v1 }
  0x5b   : > { %345 = vst.msk [vmem:[#allocation2 + $0x79] sm:$0x1] %vm277_vm3, %v25187_v1  ;;  %346 = vst.msk [vmem:[#allocation2 + $0x89] sm:$0x1] %vm277_vm3, %v25187_v1 }
  0x5c   : > { %348 = vst.msk [vmem:[#allocation2 + $0xa9] sm:$0x1] %vm277_vm3, %v25187_v1  ;;  %357 = vst.msk [vmem:[#allocation2 + $0x139] sm:$0x1] %vm277_vm3, %v25187_v1 }
  0x5d   : > { %358 = vst.msk [vmem:[#allocation2 + $0x149] sm:$0x1] %vm277_vm3, %v25187_v1  ;;  %367 = vst.msk [vmem:[#allocation2 + $0x1d9] sm:$0x1] %vm277_vm3, %v25187_v1 }
  0x5e   : > { %368 = vst.msk [vmem:[#allocation2 + $0x1e9] sm:$0x1] %vm277_vm3, %v25187_v1  ;;  %377 = vst.msk [vmem:[#allocation2 + $0x279] sm:$0x1] %vm277_vm3, %v25187_v1 }
  0x5f   : > { %378 = vst.msk [vmem:[#allocation2 + $0x289] sm:$0x1] %vm277_vm3, %v25187_v1  ;;  %387 = vst.msk [vmem:[#allocation2 + $0x319] sm:$0x1] %vm277_vm3, %v25187_v1 }
  0x60   : > { %389 = vst.msk [vmem:[#allocation2 + $0x339] sm:$0x1] %vm277_vm3, %v25187_v1  ;;  %390 = vst.msk [vmem:[#allocation2 + $0x349] sm:$0x1] %vm277_vm3, %v25187_v1 }
  0x61   : > { %391 = vst.msk [vmem:[#allocation2 + $0x359] sm:$0x1] %vm277_vm3, %v25187_v1  ;;  %392 = vst.msk [vmem:[#allocation2 + $0x369] sm:$0x1] %vm277_vm3, %v25187_v1 }
  0x62   : > { %393 = vst.msk [vmem:[#allocation2 + $0x379] sm:$0x1] %vm277_vm3, %v25187_v1  ;;  %394 = vst.msk [vmem:[#allocation2 + $0x389] sm:$0x1] %vm277_vm3, %v25187_v1 }
  0x63   : > { %395 = vst.msk [vmem:[#allocation2 + $0x399] sm:$0x1] %vm277_vm3, %v25187_v1  ;;  %396 = vst.msk [vmem:[#allocation2 + $0x3a9] sm:$0x1] %vm277_vm3, %v25187_v1 }
  0x64   : > { %338 = vst.msk [vmem:[#allocation2 + $0x9] sm:$0x1] %vm277_vm3, %v25187_v1  ;;  %278 = vst.msk [vmem:[#allocation2] sm:$0x1] %vm277_vm3, %v25187_v1 }
  0x65   : > { %287 = vst.msk [vmem:[#allocation2 + $0x90] sm:$0x1] %vm277_vm3, %v25187_v1  ;;  %328 = vst.msk [vmem:[#allocation2 + $0x320] sm:$0x1] %vm277_vm3, %v25187_v1 }
  0x66   : > { %337 = vst.msk [vmem:[#allocation2 + $0x3b0] sm:$0x1] %vm277_vm3, %v25187_v1  ;;  %347 = vst.msk [vmem:[#allocation2 + $0x99] sm:$0x1] %vm277_vm3, %v25187_v1 }
  0x67   : > { %388 = vst.msk [vmem:[#allocation2 + $0x329] sm:$0x1] %vm277_vm3, %v25187_v1  ;;  %397 = vst.msk [vmem:[#allocation2 + $0x3b9] sm:$0x1] %vm277_vm3, %v25187_v1 }
  0x68   : > { %25332 = vst [vmem:[#allocation4_spill] sm:$0xff] %v19436_v5  ;;  %25333 = vst [vmem:[#allocation5_spill] sm:$0xff] %v19439_v6 }
  0x69   : > { %25334 = vst [vmem:[#allocation6_spill] sm:$0xff] %v19442_v7  ;;  %466 = vst.msk [vmem:[#allocation2 + $0xb1] sm:$0xff] %vm209_vm1, %v19436_v5  ;;  %v19859_v5 = vld [vmem:[#allocation2 + $0x72] sm:$0xff] }
  0x6a   : > { %467 = vst.msk [vmem:[#allocation2 + $0xc1] sm:$0xff] %vm209_vm1, %v19439_v6  ;;  %468 = vst.msk [vmem:[#allocation2 + $0xd1] sm:$0xff] %vm209_vm1, %v19442_v7  ;;  %v19816_v7 = vld [vmem:[%s25183_s1 + $0xc] sm:$0x3]  ;;  %v19833_v6 = vld [vmem:[#allocation2 + $0x42] sm:$0xff] }
  0x6b   : > { %v498_v11 = vld [vmem:[#allocation2] sm:$0xff]  ;;  %25335 = vst [vmem:[#allocation7_spill] sm:$0xff] %v19477_v16  ;;  %25336 = vst [vmem:[#allocation8_spill] sm:$0xff] %v19481_v18 }
  0x6c   : > { %17219 = vmatprep.mubr.msk.f32.mxu1 %vm209_vm1, %v498_v11  ;;  %25337 = vst [vmem:[#allocation9_spill] sm:$0xff] %v19484_v19  ;;  %25338 = vst [vmem:[#allocation10_spill] sm:$0xff] %v19487_v20 }
  0x6d   : > { %17220 = vmatmul.mubr.msk.f32.vlgmr.msra.gmra.mxu1 %vm209_vm1, %v19452_v10  ;;  %25339 = vst [vmem:[#allocation11_spill] sm:$0xff] %v19490_v21  ;;  %469 = vst.msk [vmem:[#allocation2 + $0xe1] sm:$0xff] %vm209_vm1, %v19484_v19  ;;  %v19809_v19 = vld [vmem:[#allocation2 + $0x22] sm:$0xff] }
  0x6e   : > { %17222 = vmatprep.mubr.msk.f32.mxu1 %vm209_vm1, %v19457_v13  ;;  %17318 = vmatpush3.msk.msra.mxu1 %vm661_vm0, %v14863_v4  ;;  %470 = vst.msk [vmem:[#allocation2 + $0xf1] sm:$0xff] %vm209_vm1, %v19487_v20  ;;  %471 = vst.msk [vmem:[#allocation2 + $0x101] sm:$0xff] %vm209_vm1, %v19490_v21  ;;  %v19690_v4 = vld [vmem:[%s19433_s29 + $0x78] sm:$0xff]  ;;  %v1214_v21 = vld [vmem:[#allocation2 + $0x2] sm:$0xff] }
  0x6f   : > { %25340 = vst [vmem:[#allocation12_spill] sm:$0xff] %v19509_v23  ;;  %25341 = vst [vmem:[#allocation13_spill] sm:$0xff] %v19516_v25  ;;  %v19805_v20 = vld [vmem:[#allocation2 + $0x12] sm:$0xff] }
  0x70   : > { %25342 = vst [vmem:[#allocation14_spill] sm:$0xff] %v19519_v26  ;;  %25343 = vst [vmem:[#allocation15_spill] sm:$0xff] %v19523_v28  ;;  %v19586_v41 = vld [vmem:[#allocation2 + $0xb1] sm:$0xff] }
  0x71   : > { %17223 = vmatmul.mubr.msk.f32.gmra.mxu1 %vm209_vm1, %v19477_v16  ;;  %472 = vst.msk [vmem:[#allocation2 + $0x111] sm:$0xff] %vm209_vm1, %v19516_v25  ;;  %474 = vst.msk [vmem:[#allocation2 + $0x151] sm:$0xff] %vm209_vm1, %v19519_v26  ;;  %v19601_v45 = vld [vmem:[#allocation2 + $0xb0] sm:$0xff]  ;;  %v19603_v46 = vld [vmem:[#allocation2 + $0xc1] sm:$0xff]  ;;  %17182 = vmatmul.mubr.msk.f32.gmra.mxu0 %vm209_vm1, %v19586_v41 }
  0x72   : > { %17225 = vmatprep.mubr.msk.f32.mxu1 %vm209_vm1, %v19481_v18  ;;  %25344 = vst [vmem:[#allocation16_spill] sm:$0xff] %v19530_v29  ;;  %25345 = vst [vmem:[#allocation17_spill] sm:$0xff] %v19533_v30  ;;  %v19611_v47 = vld [vmem:[#allocation2 + $0xc0] sm:$0xff]  ;;  %17184 = vmatprep.mubr.msk.f32.mxu0 %vm209_vm1, %v19603_v46  ;;  %v19619_v48 = vld [vmem:[#allocation2 + $0xd1] sm:$0xff] }
  0x73   : > { %475 = vst.msk [vmem:[#allocation2 + $0x161] sm:$0xff] %vm209_vm1, %v19530_v29  ;;  %476 = vst.msk [vmem:[#allocation2 + $0x171] sm:$0xff] %vm209_vm1, %v19533_v30  ;;  %v19623_v49 = vld [vmem:[#allocation2 + $0xd0] sm:$0xff] }
  0x74   : > { %25346 = vst [vmem:[#allocation18_spill] sm:$0xff] %v19542_v31  ;;  %25347 = vst [vmem:[#allocation19_spill] sm:$0xff] %v19545_v32  ;;  %v19625_v50 = vld [vmem:[#allocation2 + $0xe1] sm:$0xff] }
  0x75   : > { %25348 = vst [vmem:[#allocation20_spill] sm:$0xff] %v19548_v33  ;;  %17226 = vmatmul.mubr.msk.f32.gmra.mxu1 %vm209_vm1, %v19509_v23  ;;  %25349 = vst [vmem:[#allocation21_spill] sm:$0xff] %v19554_v34  ;;  %v19627_v51 = vld [vmem:[#allocation2 + $0xe0] sm:$0xff]  ;;  %17185 = vmatmul.mubr.msk.f32.gmra.mxu0 %vm209_vm1, %v19619_v48  ;;  %v19635_v52 = vld [vmem:[#allocation2 + $0xf1] sm:$0xff] }
  0x76   : > { %477 = vst.msk [vmem:[#allocation2 + $0x181] sm:$0xff] %vm209_vm1, %v19542_v31  ;;  %478 = vst.msk [vmem:[#allocation2 + $0x191] sm:$0xff] %vm209_vm1, %v19545_v32  ;;  %17228 = vmatprep.mubr.msk.f32.mxu1 %vm209_vm1, %v19523_v28  ;;  %17187 = vmatprep.mubr.msk.f32.mxu0 %vm209_vm1, %v19625_v50  ;;  %v19639_v53 = vld [vmem:[#allocation2 + $0xf0] sm:$0xff]  ;;  %v19641_v54 = vld [vmem:[#allocation2 + $0x101] sm:$0xff] }
  0x77   : > { %479 = vst.msk [vmem:[#allocation2 + $0x1a1] sm:$0xff] %vm209_vm1, %v19548_v33  ;;  %25350 = vst [vmem:[#allocation22_spill] sm:$0xff] %v19563_v35  ;;  %v19643_v55 = vld [vmem:[#allocation2 + $0x100] sm:$0xff] }
  0x78   : > { %25351 = vst [vmem:[#allocation23_spill] sm:$0xff] %v19566_v36  ;;  %480 = vst.msk [vmem:[#allocation2 + $0x1b1] sm:$0xff] %vm209_vm1, %v19563_v35  ;;  %v19656_v57 = vld [vmem:[#allocation2 + $0x111] sm:$0xff] }
  0x79   : > { %482 = vst.msk [vmem:[#allocation2 + $0x1f1] sm:$0xff] %vm209_vm1, %v19566_v36  ;;  %25352 = vst [vmem:[#allocation24_spill] sm:$0xff] %v19575_v38  ;;  %17229 = vmatmul.mubr.msk.f32.gmra.mxu1 %vm209_vm1, %v19554_v34  ;;  %17188 = vmatmul.mubr.msk.f32.gmra.mxu0 %vm209_vm1, %v19635_v52  ;;  %v19660_v58 = vld [vmem:[#allocation2 + $0x110] sm:$0xff] }
  0x7a   : > { %25353 = vst [vmem:[#allocation25_spill] sm:$0xff] %v19578_v39  ;;  %483 = vst.msk [vmem:[#allocation2 + $0x201] sm:$0xff] %vm209_vm1, %v19575_v38  ;;  %17231 = vmatprep.mubr.msk.f32.mxu1 %vm209_vm1, %v506_v40  ;;  %17190 = vmatprep.mubr.msk.f32.mxu0 %vm209_vm1, %v19641_v54  ;;  %v19667_v61 = vld [vmem:[#allocation2 + $0x151] sm:$0xff]  ;;  %v19675_v0 = vld [vmem:[#allocation2 + $0x161] sm:$0xff] }
  0x7b   : > { %484 = vst.msk [vmem:[#allocation2 + $0x211] sm:$0xff] %vm209_vm1, %v19578_v39  ;;  %25354 = vst [vmem:[#allocation26_spill] sm:$0xff] %v19592_v42  ;;  %v19673_v63 = vld [vmem:[#allocation2 + $0x150] sm:$0xff]  ;;  %v19679_v2 = vld [vmem:[#allocation2 + $0x160] sm:$0xff] }
  0x7c   : > { %25355 = vst [vmem:[#allocation27_spill] sm:$0xff] %v19595_v43  ;;  %25356 = vst [vmem:[#allocation28_spill] sm:$0xff] %v19598_v44  ;;  %v19687_v3 = vld [vmem:[#allocation2 + $0x171] sm:$0xff]  ;;  %v19707_v40 = vld [vmem:[%s25183_s1 + $0xa] sm:$0x3] }
  0x7d   : > { %485 = vst.msk [vmem:[#allocation2 + $0x221] sm:$0xff] %vm209_vm1, %v19592_v42  ;;  %486 = vst.msk [vmem:[#allocation2 + $0x231] sm:$0xff] %vm209_vm1, %v19595_v43  ;;  %17232 = vmatmul.mubr.msk.f32.gmra.mxu1 %vm209_vm1, %v19601_v45  ;;  %17191 = vmatmul.mubr.msk.f32.gmra.mxu0 %vm209_vm1, %v19656_v57  ;;  %v19694_v9 = vld [vmem:[#allocation2 + $0x170] sm:$0xff]  ;;  %v19696_v11 = vld [vmem:[#allocation2 + $0x181] sm:$0xff] }
  0x7e   : > { %487 = vst.msk [vmem:[#allocation2 + $0x241] sm:$0xff] %vm209_vm1, %v19598_v44  ;;  %25357 = vst [vmem:[#allocation29_spill] sm:$0xff] %v19611_v47  ;;  %17234 = vmatprep.mubr.msk.f32.mxu1 %vm209_vm1, %v19611_v47  ;;  %17193 = vmatprep.mubr.msk.f32.mxu0 %vm209_vm1, %v547_v59  ;;  %v19700_v37 = vld [vmem:[#allocation2 + $0x180] sm:$0xff]  ;;  %v19710_v59 = vld [vmem:[%s19433_s29 + $0xb8] sm:$0xff] }
  0x7f   : > { %25358 = vst [vmem:[#allocation30_spill] sm:$0xff] %v19623_v49  ;;  %25359 = vst [vmem:[#allocation31_spill] sm:$0xff] %v19627_v51  ;;  %v19722_v1 = vld [vmem:[#allocation2 + $0x190] sm:$0xff]  ;;  %17417 = vmatprep.subr.msk.mxu1 %vm661_vm0, %v19707_v40  ;;  %v19728_v44 = vld [vmem:[#allocation2 + $0x1a0] sm:$0xff] }
  0x80   : > { %25360 = vst [vmem:[#allocation32_spill] sm:$0xff] %v19639_v53  ;;  %25361 = vst [vmem:[#allocation33_spill] sm:$0xff] %v19643_v55  ;;  %v19740_v43 = vld [vmem:[#allocation2 + $0x1b0] sm:$0xff]  ;;  %v555_v42 = vld [vmem:[#allocation2 + $0x1e1] sm:$0xff] }
  0x81   : > { %17235 = vmatmul.mubr.msk.f32.gmra.mxu1 %vm209_vm1, %v19623_v49  ;;  %25362 = vst [vmem:[#allocation34_spill] sm:$0xff] %v19646_v56  ;;  %488 = vst.msk [vmem:[#allocation2 + $0x251] sm:$0xff] %vm209_vm1, %v19646_v56  ;;  %17194 = vmatmul.mubr.msk.f32.gmra.mxu0 %vm209_vm1, %v19667_v61  ;;  %v19724_v56 = vld [vmem:[#allocation2 + $0x1a1] sm:$0xff]  ;;  %v19747_v38 = vld [vmem:[#allocation2 + $0x1f1] sm:$0xff] }
  0x82   : > { %17237 = vmatprep.mubr.msk.f32.mxu1 %vm209_vm1, %v19627_v51  ;;  %25363 = vst [vmem:[#allocation35_spill] sm:$0xff] %v19660_v58  ;;  %25364 = vst [vmem:[#allocation36_spill] sm:$0xff] %v19670_v62  ;;  %17196 = vmatprep.mubr.msk.f32.mxu0 %vm209_vm1, %v19675_v0  ;;  %v522_v39 = vld [vmem:[#allocation2 + $0x1e0] sm:$0xff]  ;;  %v19750_v36 = vld [vmem:[#allocation2 + $0x1f0] sm:$0xff] }
  0x83   : > { %473 = vst.msk [vmem:[#allocation2 + $0x121] sm:$0xff] %vm209_vm1, %v19670_v62  ;;  %25365 = vst [vmem:[#allocation37_spill] sm:$0xff] %v19679_v2  ;;  %v19754_v35 = vld [vmem:[#allocation2 + $0x200] sm:$0xff] }
  0x84   : > { %25366 = vst [vmem:[#allocation38_spill] sm:$0xff] %v19690_v4  ;;  %25367 = vst [vmem:[#allocation39_spill] sm:$0xff] %v19694_v9  ;;  %v19768_v33 = vld [vmem:[#allocation2 + $0x221] sm:$0xff]  ;;  %v19778_v31 = vld [vmem:[#allocation2 + $0x231] sm:$0xff] }
  0x85   : > { %17238 = vmatmul.mubr.msk.f32.gmra.mxu1 %vm209_vm1, %v19639_v53  ;;  %481 = vst.msk [vmem:[#allocation2 + $0x1c1] sm:$0xff] %vm209_vm1, %v19690_v4  ;;  %25368 = vst [vmem:[#allocation40_spill] sm:$0xff] %v19700_v37  ;;  %17197 = vmatmul.mubr.msk.f32.gmra.mxu0 %vm209_vm1, %v19687_v3  ;;  %v19752_v4 = vld [vmem:[#allocation2 + $0x201] sm:$0xff]  ;;  %v19782_v30 = vld [vmem:[#allocation2 + $0x230] sm:$0xff] }
  0x86   : > { %17240 = vmatprep.mubr.msk.f32.mxu1 %vm209_vm1, %v19643_v55  ;;  %25369 = vst [vmem:[#allocation41_spill] sm:$0xff] %v19710_v59  ;;  %17199 = vmatprep.mubr.msk.f32.mxu0 %vm209_vm1, %v19696_v11  ;;  %489 = vst.msk [vmem:[#allocation2 + $0x261] sm:$0xff] %vm209_vm1, %v19710_v59  ;;  %v19736_v59 = vld [vmem:[#allocation2 + $0x1b1] sm:$0xff]  ;;  %v19770_v32 = vld [vmem:[#allocation2 + $0x220] sm:$0xff] }
  0x87   : > { %25370 = vst [vmem:[#allocation42_spill] sm:$0xff] %v19722_v1  ;;  %25371 = vst [vmem:[#allocation43_spill] sm:$0xff] %v19728_v44  ;;  %v19784_v29 = vld [vmem:[#allocation2 + $0x241] sm:$0xff] }
  0x88   : > { %25372 = vst [vmem:[#allocation44_spill] sm:$0xff] %v19740_v43  ;;  %25373 = vst [vmem:[#allocation45_spill] sm:$0xff] %v19754_v35  ;;  %v19786_v26 = vld [vmem:[#allocation2 + $0x240] sm:$0xff]  ;;  %v19794_v62 = vld [vmem:[#allocation2 + $0x251] sm:$0xff] }
  0x89   : > { %17241 = vmatmul.mubr.msk.f32.gmra.mxu1 %vm209_vm1, %v19660_v58  ;;  %25375 = vst [vmem:[#allocation47_spill] sm:$0xff] %v19770_v32  ;;  %v19798_v25 = vld [vmem:[#allocation2 + $0x250] sm:$0xff] }
  0x8a   : > { %17243 = vmatprep.mubr.msk.f32.mxu1 %vm209_vm1, %v514_v60  ;;  %v19716_v60 = vld [vmem:[#allocation2 + $0x191] sm:$0xff]  ;;  %25376 = vst [vmem:[#allocation48_spill] sm:$0xff] %v19798_v25 }
  0x8b   : > { %17200 = vmatmul.mubr.msk.f32.gmra.mxu0 %vm209_vm1, %v19716_v60 }
  0x8c   : > { %17202 = vmatprep.mubr.msk.f32.mxu0 %vm209_vm1, %v19724_v56 }
  0x8d   : > { %17244 = vmatmul.mubr.msk.f32.gmra.mxu1 %vm209_vm1, %v19673_v63 }
  0x8e   : > { %17246 = vmatprep.mubr.msk.f32.mxu1 %vm209_vm1, %v19679_v2 }
  0x8f   : > { %17203 = vmatmul.mubr.msk.f32.gmra.mxu0 %vm209_vm1, %v19736_v59 }
  0x90   : > { %17205 = vmatprep.mubr.msk.f32.mxu0 %vm209_vm1, %v555_v42  ;;  %v19762_v42 = vld [vmem:[#allocation2 + $0x211] sm:$0xff] }
  0x91   : > { %17247 = vmatmul.mubr.msk.f32.gmra.mxu1 %vm209_vm1, %v19694_v9 }
  0x92   : > { %17249 = vmatprep.mubr.msk.f32.mxu1 %vm209_vm1, %v19700_v37 }
  0x93   : > { %17206 = vmatmul.mubr.msk.f32.gmra.mxu0 %vm209_vm1, %v19747_v38 }
  0x94   : > { %17208 = vmatprep.mubr.msk.f32.mxu0 %vm209_vm1, %v19752_v4 }
  0x95   : > { %17250 = vmatmul.mubr.msk.f32.gmra.mxu1 %vm209_vm1, %v19722_v1 }
  0x96   : > { %17252 = vmatprep.mubr.msk.f32.mxu1 %vm209_vm1, %v19728_v44 }
  0x97   : > { %17209 = vmatmul.mubr.msk.f32.gmra.mxu0 %vm209_vm1, %v19762_v42 }
  0x98   : > { %17211 = vmatprep.mubr.msk.f32.mxu0 %vm209_vm1, %v19768_v33 }
  0x99   : > { %17253 = vmatmul.mubr.msk.f32.gmra.mxu1 %vm209_vm1, %v19740_v43 }
  0x9a   : > { %17255 = vmatprep.mubr.msk.f32.mxu1 %vm209_vm1, %v522_v39  ;;  %v19766_v39 = vld [vmem:[#allocation2 + $0x210] sm:$0xff] }
  0x9b   : > { %25374 = vst [vmem:[#allocation46_spill] sm:$0xff] %v19766_v39  ;;  %17212 = vmatmul.mubr.msk.f32.gmra.mxu0 %vm209_vm1, %v19778_v31 }
  0x9c   : > { %17214 = vmatprep.mubr.msk.f32.mxu0 %vm209_vm1, %v19784_v29 }
  0x9d   : > { %17256 = vmatmul.mubr.msk.f32.gmra.mxu1 %vm209_vm1, %v19750_v36 }
  0x9e   : > { %17258 = vmatprep.mubr.msk.f32.mxu1 %vm209_vm1, %v19754_v35 }
  0x9f   : > { %17215 = vmatmul.mubr.msk.f32.gmra.mxu0 %vm209_vm1, %v19794_v62 }
  0xa0   : > { %17269 = vmatprep.mubr.msk.f32.mxu0 %vm209_vm1, %v1214_v21  ;;  %v19822_v21 = vld [vmem:[#allocation2 + $0x32] sm:$0xff] }
  0xa1   : > { %17259 = vmatmul.mubr.msk.f32.gmra.mxu1 %vm209_vm1, %v19766_v39 }
  0xa2   : > { %17261 = vmatprep.mubr.msk.f32.mxu1 %vm209_vm1, %v19770_v32 }
  0xa3   : > { %17270 = vmatmul.mubr.msk.f32.vlgmr.msra.gmra.mxu0 %vm209_vm1, %v19805_v20 }
  0xa4   : > { %17368 = vmatpush3.msk.msra.mxu0 %vm661_vm0, %v19465_v14  ;;  %17272 = vmatprep.mubr.msk.f32.mxu0 %vm209_vm1, %v19809_v19  ;;  %v19847_v14 = vld [vmem:[#allocation2 + $0x52] sm:$0xff] }
  0xa5   : > { %17262 = vmatmul.mubr.msk.f32.gmra.mxu1 %vm209_vm1, %v19782_v30  ;;  %17467 = vmatprep.subr.msk.mxu0 %vm661_vm0, %v19816_v7 }
  0xa6   : > { %17264 = vmatprep.mubr.msk.f32.mxu1 %vm209_vm1, %v19786_v26 }
  0xa7   : > { %17273 = vmatmul.mubr.msk.f32.gmra.mxu0 %vm209_vm1, %v19822_v21 }
  0xa8   : > { %17275 = vmatprep.mubr.msk.f32.mxu0 %vm209_vm1, %v19833_v6 }
  0xa9   : > { %17265 = vmatmul.mubr.msk.f32.gmra.mxu1 %vm209_vm1, %v19798_v25 }
  0xaa   : > { %17319 = vmatprep.mubr.msk.f32.mxu1 %vm209_vm1, %v19452_v10  ;;  %v19827_v10 = vld [vmem:[%s25183_s1 + $0xe] sm:$0x3] }
  0xab   : > { %17276 = vmatmul.mubr.msk.f32.gmra.mxu0 %vm209_vm1, %v19847_v14 }
  0xad   : > { %17320 = vmatmul.mubr.msk.f32.vlgmr.msra.gmra.mxu1 %vm209_vm1, %v19457_v13 }
  0xae   : > { %17322 = vmatprep.mubr.msk.f32.mxu1 %vm209_vm1, %v19477_v16  ;;  %17418 = vmatpush3.msk.msra.mxu1 %vm661_vm0, %v19707_v40  ;;  %v19851_v40 = vld [vmem:[#allocation2 + $0x62] sm:$0xff] }
  0xaf   : > { %17517 = vmatprep.subr.msk.mxu1 %vm661_vm0, %v19827_v10  ;;  %17278 = vmatprep.mubr.msk.f32.mxu0 %vm209_vm1, %v19851_v40  ;;  %v1222_v16 = vld [vmem:[#allocation2 + $0xa2] sm:$0xff] }
  0xb0   : > { %17279 = vmatmul.mubr.msk.f32.gmra.mxu0 %vm209_vm1, %v19859_v5 }
  0xb1   : > { %17323 = vmatmul.mubr.msk.f32.gmra.mxu1 %vm209_vm1, %v19481_v18  ;;  %v19863_v18 = vld [vmem:[#allocation2 + $0x80] sm:$0xff]  ;;  %17281 = vmatprep.mubr.msk.f32.mxu0 %vm209_vm1, %v1222_v16 }
  0xb2   : > { %17325 = vmatprep.mubr.msk.f32.mxu1 %vm209_vm1, %v19509_v23  ;;  %25377 = vst [vmem:[#allocation49_spill] sm:$0xff] %v19863_v18  ;;  %v19874_v23 = vld [vmem:[#allocation2 + $0xc2] sm:$0xff] }
  0xb3   : > { %v19886_v16 = vld [vmem:[#allocation2 + $0xe2] sm:$0xff] }
  0xb5   : > { %17326 = vmatmul.mubr.msk.f32.gmra.mxu1 %vm209_vm1, %v19523_v28  ;;  %v19870_v28 = vld [vmem:[#allocation2 + $0xb2] sm:$0xff] }
  0xb6   : > { %17328 = vmatprep.mubr.msk.f32.mxu1 %vm209_vm1, %v19554_v34  ;;  %17282 = vmatmul.mubr.msk.f32.gmra.mxu0 %vm209_vm1, %v19870_v28  ;;  %v19882_v34 = vld [vmem:[#allocation2 + $0xd2] sm:$0xff] }
  0xb7   : > { %17284 = vmatprep.mubr.msk.f32.mxu0 %vm209_vm1, %v19874_v23 }
  0xb9   : > { %17329 = vmatmul.mubr.msk.f32.gmra.mxu1 %vm209_vm1, %v19863_v18  ;;  %v1230_v18 = vld [vmem:[#allocation2 + $0x142] sm:$0xff] }
  0xba   : > { %17331 = vmatprep.mubr.msk.f32.mxu1 %vm209_vm1, %v19601_v45  ;;  %17285 = vmatmul.mubr.msk.f32.gmra.mxu0 %vm209_vm1, %v19882_v34  ;;  %v19894_v45 = vld [vmem:[#allocation2 + $0xf2] sm:$0xff] }
  0xbb   : > { %17287 = vmatprep.mubr.msk.f32.mxu0 %vm209_vm1, %v19886_v16 }
  0xbd   : > { %17332 = vmatmul.mubr.msk.f32.gmra.mxu1 %vm209_vm1, %v19611_v47  ;;  %v19898_v47 = vld [vmem:[#allocation2 + $0x102] sm:$0xff] }
  0xbe   : > { %17334 = vmatprep.mubr.msk.f32.mxu1 %vm209_vm1, %v19623_v49  ;;  %17288 = vmatmul.mubr.msk.f32.gmra.mxu0 %vm209_vm1, %v19894_v45  ;;  %v19910_v49 = vld [vmem:[#allocation2 + $0x120] sm:$0xff] }
  0xbf   : > { %17290 = vmatprep.mubr.msk.f32.mxu0 %vm209_vm1, %v19898_v47  ;;  %25378 = vst [vmem:[#allocation50_spill] sm:$0xff] %v19910_v49 }
  0xc1   : > { %17335 = vmatmul.mubr.msk.f32.gmra.mxu1 %vm209_vm1, %v19627_v51  ;;  %v19906_v51 = vld [vmem:[#allocation2 + $0x112] sm:$0xff] }
  0xc2   : > { %17337 = vmatprep.mubr.msk.f32.mxu1 %vm209_vm1, %v19639_v53  ;;  %17291 = vmatmul.mubr.msk.f32.gmra.mxu0 %vm209_vm1, %v19906_v51  ;;  %v19921_v53 = vld [vmem:[#allocation2 + $0x162] sm:$0xff] }
  0xc3   : > { %17293 = vmatprep.mubr.msk.f32.mxu0 %vm209_vm1, %v1230_v18  ;;  %v19933_v18 = vld [vmem:[#allocation2 + $0x182] sm:$0xff] }
  0xc5   : > { %17338 = vmatmul.mubr.msk.f32.gmra.mxu1 %vm209_vm1, %v19643_v55  ;;  %v19917_v55 = vld [vmem:[#allocation2 + $0x152] sm:$0xff] }
  0xc6   : > { %17340 = vmatprep.mubr.msk.f32.mxu1 %vm209_vm1, %v19660_v58  ;;  %17294 = vmatmul.mubr.msk.f32.gmra.mxu0 %vm209_vm1, %v19917_v55  ;;  %v19929_v58 = vld [vmem:[#allocation2 + $0x172] sm:$0xff] }
  0xc7   : > { %17296 = vmatprep.mubr.msk.f32.mxu0 %vm209_vm1, %v19921_v53 }
  0xc9   : > { %17341 = vmatmul.mubr.msk.f32.gmra.mxu1 %vm209_vm1, %v19910_v49  ;;  %v1238_v49 = vld [vmem:[#allocation2 + $0x1e2] sm:$0xff] }
  0xca   : > { %17343 = vmatprep.mubr.msk.f32.mxu1 %vm209_vm1, %v19673_v63  ;;  %17297 = vmatmul.mubr.msk.f32.gmra.mxu0 %vm209_vm1, %v19929_v58  ;;  %v19941_v63 = vld [vmem:[#allocation2 + $0x192] sm:$0xff] }
  0xcb   : > { %17299 = vmatprep.mubr.msk.f32.mxu0 %vm209_vm1, %v19933_v18 }
  0xcd   : > { %17344 = vmatmul.mubr.msk.f32.gmra.mxu1 %vm209_vm1, %v19679_v2  ;;  %v19945_v2 = vld [vmem:[#allocation2 + $0x1a2] sm:$0xff] }
  0xce   : > { %17346 = vmatprep.mubr.msk.f32.mxu1 %vm209_vm1, %v19694_v9  ;;  %17300 = vmatmul.mubr.msk.f32.gmra.mxu0 %vm209_vm1, %v19941_v63  ;;  %v19957_v9 = vld [vmem:[#allocation2 + $0x1c0] sm:$0xff] }
  0xcf   : > { %17302 = vmatprep.mubr.msk.f32.mxu0 %vm209_vm1, %v19945_v2 }
  0xd1   : > { %17347 = vmatmul.mubr.msk.f32.gmra.mxu1 %vm209_vm1, %v19700_v37  ;;  %v19953_v37 = vld [vmem:[#allocation2 + $0x1b2] sm:$0xff] }
  0xd2   : > { %17349 = vmatprep.mubr.msk.f32.mxu1 %vm209_vm1, %v19722_v1  ;;  %17303 = vmatmul.mubr.msk.f32.gmra.mxu0 %vm209_vm1, %v19953_v37  ;;  %v19968_v1 = vld [vmem:[#allocation2 + $0x202] sm:$0xff] }
  0xd3   : > { %17305 = vmatprep.mubr.msk.f32.mxu0 %vm209_vm1, %v1238_v49  ;;  %v19980_v49 = vld [vmem:[#allocation2 + $0x222] sm:$0xff] }
  0xd5   : > { %17350 = vmatmul.mubr.msk.f32.gmra.mxu1 %vm209_vm1, %v19728_v44  ;;  %v19964_v44 = vld [vmem:[#allocation2 + $0x1f2] sm:$0xff] }
  0xd6   : > { %17352 = vmatprep.mubr.msk.f32.mxu1 %vm209_vm1, %v19740_v43  ;;  %17306 = vmatmul.mubr.msk.f32.gmra.mxu0 %vm209_vm1, %v19964_v44  ;;  %v19976_v43 = vld [vmem:[#allocation2 + $0x212] sm:$0xff] }
  0xd7   : > { %17308 = vmatprep.mubr.msk.f32.mxu0 %vm209_vm1, %v19968_v1 }
  0xd9   : > { %17353 = vmatmul.mubr.msk.f32.gmra.mxu1 %vm209_vm1, %v19957_v9 }
  0xda   : > { %17355 = vmatprep.mubr.msk.f32.mxu1 %vm209_vm1, %v19750_v36  ;;  %17309 = vmatmul.mubr.msk.f32.gmra.mxu0 %vm209_vm1, %v19976_v43  ;;  %v19988_v36 = vld [vmem:[#allocation2 + $0x232] sm:$0xff] }
  0xdb   : > { %17311 = vmatprep.mubr.msk.f32.mxu0 %vm209_vm1, %v19980_v49 }
  0xdd   : > { %17356 = vmatmul.mubr.msk.f32.gmra.mxu1 %vm209_vm1, %v19754_v35  ;;  %v19992_v35 = vld [vmem:[#allocation2 + $0x242] sm:$0xff] }
  0xde   : > { %17358 = vmatprep.mubr.msk.f32.mxu1 %vm209_vm1, %v19766_v39  ;;  %17312 = vmatmul.mubr.msk.f32.gmra.mxu0 %vm209_vm1, %v19988_v36  ;;  %v20004_v39 = vld [vmem:[#allocation2 + $0x260] sm:$0xff] }
  0xdf   : > { %17314 = vmatprep.mubr.msk.f32.mxu0 %vm209_vm1, %v19992_v35 }
  0xe1   : > { %17359 = vmatmul.mubr.msk.f32.gmra.mxu1 %vm209_vm1, %v19770_v32  ;;  %v20000_v32 = vld [vmem:[#allocation2 + $0x252] sm:$0xff] }
  0xe2   : > { %17361 = vmatprep.mubr.msk.f32.mxu1 %vm209_vm1, %v19782_v30  ;;  %17315 = vmatmul.mubr.msk.f32.gmra.mxu0 %vm209_vm1, %v20000_v32 }
  0xe3   : > { %17369 = vmatprep.mubr.msk.f32.mxu0 %vm209_vm1, %v19444_v8  ;;  %v20028_v8 = vld [vmem:[%s25183_s1 + $0x12] sm:$0x3] }
  0xe5   : > { %17362 = vmatmul.mubr.msk.f32.gmra.mxu1 %vm209_vm1, %v19786_v26 }
  0xe6   : > { %17364 = vmatprep.mubr.msk.f32.mxu1 %vm209_vm1, %v19798_v25  ;;  %17370 = vmatmul.mubr.msk.f32.vlgmr.msra.gmra.mxu0 %vm209_vm1, %v19455_v12  ;;  %v20019_v25 = vld [vmem:[%s25183_s1 + $0x10] sm:$0x3] }
  0xe7   : > { %17468 = vmatpush3.msk.msra.mxu0 %vm661_vm0, %v19816_v7  ;;  %17372 = vmatprep.mubr.msk.f32.mxu0 %vm209_vm1, %v19471_v15  ;;  %v20054_v7 = vld [vmem:[#allocation2 + $0x81] sm:$0xff] }
  0xe8   : > { %17567 = vmatprep.subr.msk.mxu0 %vm661_vm0, %v20019_v25 }
  0xe9   : > { %17365 = vmatmul.mubr.msk.f32.gmra.mxu1 %vm209_vm1, %v20004_v39 }
  0xea   : > { %17419 = vmatprep.mubr.msk.f32.mxu1 %vm209_vm1, %v19805_v20  ;;  %17373 = vmatmul.mubr.msk.f32.gmra.mxu0 %vm209_vm1, %v19479_v17  ;;  %v20058_v20 = vld [vmem:[#allocation2 + $0x82] sm:$0xff] }
  0xeb   : > { %17375 = vmatprep.mubr.msk.f32.mxu0 %vm209_vm1, %v19507_v22 }
  0xed   : > { %17420 = vmatmul.mubr.msk.f32.vlgmr.msra.gmra.mxu1 %vm209_vm1, %v19809_v19 }
  0xee   : > { %17422 = vmatprep.mubr.msk.f32.mxu1 %vm209_vm1, %v19822_v21  ;;  %17518 = vmatpush3.msk.msra.mxu1 %vm661_vm0, %v19827_v10 }
  0xef   : > { %17617 = vmatprep.subr.msk.mxu1 %vm661_vm0, %v20028_v8  ;;  %17376 = vmatmul.mubr.msk.f32.gmra.mxu0 %vm209_vm1, %v19513_v24 }
  0xf0   : > { %17378 = vmatprep.mubr.msk.f32.mxu0 %vm209_vm1, %v19521_v27 }
  0xf1   : > { %17423 = vmatmul.mubr.msk.f32.gmra.mxu1 %vm209_vm1, %v19833_v6 }
  0xf2   : > { %17425 = vmatprep.mubr.msk.f32.mxu1 %vm209_vm1, %v19847_v14 }
  0xf3   : > { %17379 = vmatmul.mubr.msk.f32.gmra.mxu0 %vm209_vm1, %v20054_v7 }
  0xf4   : > { %17381 = vmatprep.mubr.msk.f32.mxu0 %vm209_vm1, %v19586_v41  ;;  %v20133_v41 = vld [vmem:[#allocation2 + $0x1c2] sm:$0xff] }
  0xf5   : > { %17426 = vmatmul.mubr.msk.f32.gmra.mxu1 %vm209_vm1, %v19851_v40 }
  0xf6   : > { %17428 = vmatprep.mubr.msk.f32.mxu1 %vm209_vm1, %v19859_v5  ;;  %v20090_v5 = vld [vmem:[#allocation2 + $0x121] sm:$0xff] }
  0xf7   : > { %17382 = vmatmul.mubr.msk.f32.gmra.mxu0 %vm209_vm1, %v19603_v46 }
  0xf8   : > { %17384 = vmatprep.mubr.msk.f32.mxu0 %vm209_vm1, %v19619_v48 }
  0xf9   : > { %17429 = vmatmul.mubr.msk.f32.gmra.mxu1 %vm209_vm1, %v20058_v20 }
  0xfa   : > { %17431 = vmatprep.mubr.msk.f32.mxu1 %vm209_vm1, %v19870_v28  ;;  %v20126_v28 = vld [vmem:[#allocation2 + $0x1c1] sm:$0xff] }
  0xfb   : > { %17385 = vmatmul.mubr.msk.f32.gmra.mxu0 %vm209_vm1, %v19625_v50 }
  0xfc   : > { %17387 = vmatprep.mubr.msk.f32.mxu0 %vm209_vm1, %v19635_v52 }
  0xfd   : > { %17432 = vmatmul.mubr.msk.f32.gmra.mxu1 %vm209_vm1, %v19874_v23  ;;  %v20094_v23 = vld [vmem:[#allocation2 + $0x122] sm:$0xff] }
  0xfe   : > { %17434 = vmatprep.mubr.msk.f32.mxu1 %vm209_vm1, %v19882_v34  ;;  %v20129_v34 = vld [vmem:[%s19433_s29 + $0xc0] sm:$0xff] }
  0xff   : > { %17388 = vmatmul.mubr.msk.f32.gmra.mxu0 %vm209_vm1, %v19641_v54  ;;  %25379 = vst [vmem:[#allocation51_spill] sm:$0xff] %v20129_v34  ;;  %490 = vst.msk [vmem:[#allocation2 + $0x291] sm:$0xff] %vm209_vm1, %v20129_v34 }
 0x100   : > { %17390 = vmatprep.mubr.msk.f32.mxu0 %vm209_vm1, %v19656_v57 }
 0x101   : > { %17435 = vmatmul.mubr.msk.f32.gmra.mxu1 %vm209_vm1, %v19886_v16  ;;  %v25388_v16 = vld [vmem:[#allocation12_spill] sm:$0xff] }
 0x102   : > { %17437 = vmatprep.mubr.msk.f32.mxu1 %vm209_vm1, %v19894_v45 }
 0x103   : > { %17391 = vmatmul.mubr.msk.f32.gmra.mxu0 %vm209_vm1, %v20090_v5 }
 0x104   : > { %17393 = vmatprep.mubr.msk.f32.mxu0 %vm209_vm1, %v19667_v61 }
 0x105   : > { %17438 = vmatmul.mubr.msk.f32.gmra.mxu1 %vm209_vm1, %v19898_v47  ;;  %v20140_v47 = vld [vmem:[%s19433_s29 + $0xc8] sm:$0xff] }
 0x106   : > { %17440 = vmatprep.mubr.msk.f32.mxu1 %vm209_vm1, %v19906_v51  ;;  %25380 = vst [vmem:[#allocation52_spill] sm:$0xff] %v20140_v47  ;;  %491 = vst.msk [vmem:[#allocation2 + $0x2a1] sm:$0xff] %vm209_vm1, %v20140_v47  ;;  %v20149_v51 = vld [vmem:[%s19433_s29 + $0xd0] sm:$0xff] }
 0x107   : > { %17394 = vmatmul.mubr.msk.f32.gmra.mxu0 %vm209_vm1, %v19675_v0  ;;  %25381 = vst [vmem:[#allocation53_spill] sm:$0xff] %v20149_v51  ;;  %492 = vst.msk [vmem:[#allocation2 + $0x2b1] sm:$0xff] %vm209_vm1, %v20149_v51 }
 0x108   : > { %17396 = vmatprep.mubr.msk.f32.mxu0 %vm209_vm1, %v19687_v3 }
 0x109   : > { %17441 = vmatmul.mubr.msk.f32.gmra.mxu1 %vm209_vm1, %v20094_v23 }
 0x10a   : > { %17443 = vmatprep.mubr.msk.f32.mxu1 %vm209_vm1, %v19917_v55  ;;  %v20201_v55 = vld [vmem:[#allocation2 + $0x262] sm:$0xff] }
 0x10b   : > { %17397 = vmatmul.mubr.msk.f32.gmra.mxu0 %vm209_vm1, %v19696_v11 }
 0x10c   : > { %17399 = vmatprep.mubr.msk.f32.mxu0 %vm209_vm1, %v19716_v60 }
 0x10d   : > { %17444 = vmatmul.mubr.msk.f32.gmra.mxu1 %vm209_vm1, %v19921_v53  ;;  %v20158_v53 = vld [vmem:[%s19433_s29 + $0xd8] sm:$0xff] }
 0x10e   : > { %17446 = vmatprep.mubr.msk.f32.mxu1 %vm209_vm1, %v19929_v58  ;;  %25382 = vst [vmem:[#allocation54_spill] sm:$0xff] %v20158_v53  ;;  %493 = vst.msk [vmem:[#allocation2 + $0x2c1] sm:$0xff] %vm209_vm1, %v20158_v53  ;;  %v25386_v58 = vld [vmem:[#allocation7_spill] sm:$0xff] }
 0x10f   : > { %17400 = vmatmul.mubr.msk.f32.gmra.mxu0 %vm209_vm1, %v19724_v56 }
 0x110   : > { %17402 = vmatprep.mubr.msk.f32.mxu0 %vm209_vm1, %v19736_v59 }
 0x111   : > { %17447 = vmatmul.mubr.msk.f32.gmra.mxu1 %vm209_vm1, %v19933_v18 }
 0x112   : > { %17449 = vmatprep.mubr.msk.f32.mxu1 %vm209_vm1, %v19941_v63 }
 0x113   : > { %17403 = vmatmul.mubr.msk.f32.gmra.mxu0 %vm209_vm1, %v20126_v28 }
 0x114   : > { %17405 = vmatprep.mubr.msk.f32.mxu0 %vm209_vm1, %v19747_v38  ;;  %v20167_v38 = vld [vmem:[%s19433_s29 + $0xe0] sm:$0xff] }
 0x115   : > { %17450 = vmatmul.mubr.msk.f32.gmra.mxu1 %vm209_vm1, %v19945_v2  ;;  %25383 = vst [vmem:[#allocation55_spill] sm:$0xff] %v20167_v38  ;;  %494 = vst.msk [vmem:[#allocation2 + $0x2d1] sm:$0xff] %vm209_vm1, %v20167_v38 }
 0x116   : > { %17452 = vmatprep.mubr.msk.f32.mxu1 %vm209_vm1, %v19953_v37  ;;  %v25387_v37 = vld [vmem:[#allocation8_spill] sm:$0xff] }
 0x117   : > { %17406 = vmatmul.mubr.msk.f32.gmra.mxu0 %vm209_vm1, %v19752_v4 }
 0x118   : > { %17408 = vmatprep.mubr.msk.f32.mxu0 %vm209_vm1, %v19762_v42 }
 0x119   : > { %17453 = vmatmul.mubr.msk.f32.gmra.mxu1 %vm209_vm1, %v20133_v41 }
 0x11a   : > { %17455 = vmatprep.mubr.msk.f32.mxu1 %vm209_vm1, %v19964_v44  ;;  %v20176_v44 = vld [vmem:[%s19433_s29 + $0xe8] sm:$0xff] }
 0x11b   : > { %17409 = vmatmul.mubr.msk.f32.gmra.mxu0 %vm209_vm1, %v19768_v33  ;;  %25384 = vst [vmem:[#allocation56_spill] sm:$0xff] %v20176_v44  ;;  %495 = vst.msk [vmem:[#allocation2 + $0x2e1] sm:$0xff] %vm209_vm1, %v20176_v44 }
 0x11c   : > { %17411 = vmatprep.mubr.msk.f32.mxu0 %vm209_vm1, %v19778_v31 }
 0x11d   : > { %17456 = vmatmul.mubr.msk.f32.gmra.mxu1 %vm209_vm1, %v19968_v1  ;;  %v20185_v1 = vld [vmem:[%s19433_s29 + $0xf0] sm:$0xff] }
 0x11e   : > { %17458 = vmatprep.mubr.msk.f32.mxu1 %vm209_vm1, %v19976_v43  ;;  %25385 = vst [vmem:[#allocation57_spill] sm:$0xff] %v20185_v1  ;;  %496 = vst.msk [vmem:[#allocation2 + $0x2f1] sm:$0xff] %vm209_vm1, %v20185_v1  ;;  %v20197_v43 = vld [vmem:[#allocation2 + $0x261] sm:$0xff] }
 0x11f   : > { %17412 = vmatmul.mubr.msk.f32.gmra.mxu0 %vm209_vm1, %v19784_v29 }
 0x120   : > { %17414 = vmatprep.mubr.msk.f32.mxu0 %vm209_vm1, %v19794_v62 }
 0x121   : > { %17459 = vmatmul.mubr.msk.f32.gmra.mxu1 %vm209_vm1, %v19980_v49 }
 0x122   : > { %17461 = vmatprep.mubr.msk.f32.mxu1 %vm209_vm1, %v19988_v36 }
 0x123   : > { %17415 = vmatmul.mubr.msk.f32.gmra.mxu0 %vm209_vm1, %v20197_v43 }
 0x124   : > { %17469 = vmatprep.mubr.msk.f32.mxu0 %vm209_vm1, %v19457_v13 }
 0x125   : > { %17462 = vmatmul.mubr.msk.f32.gmra.mxu1 %vm209_vm1, %v19992_v35  ;;  %v17171_v35 = vpop.f32.mrf.mxu0 }
 0x126   : > { %17464 = vmatprep.mubr.msk.f32.mxu1 %vm209_vm1, %v20000_v32  ;;  %v20216_v32 = vld [vmem:[%s25183_s1 + $0x14] sm:$0x3] }
 0x127   : > { %17470 = vmatmul.mubr.msk.f32.vlgmr.msra.gmra.mxu0 %vm209_vm1, %v25386_v58  ;;  %v731_v2 = vpop.f32.mrf.mxu0 }
 0x128   : > { %17568 = vmatpush3.msk.msra.mxu0 %vm661_vm0, %v20019_v25  ;;  %17472 = vmatprep.mubr.msk.f32.mxu0 %vm209_vm1, %v25387_v37 }
 0x129   : > { %17465 = vmatmul.mubr.msk.f32.gmra.mxu1 %vm209_vm1, %v20201_v55  ;;  %17667 = vmatprep.subr.msk.mxu0 %vm661_vm0, %v20216_v32  ;;  %v17174_v25 = vpop.f32.mrf.mxu0 }
 0x12a   : > { %17519 = vmatprep.mubr.msk.f32.mxu1 %vm209_vm1, %v19455_v12  ;;  %v20225_v12 = vld [vmem:[%s25183_s1 + $0x16] sm:$0x3] }
 0x12b   : > { %17473 = vmatmul.mubr.msk.f32.gmra.mxu0 %vm209_vm1, %v25388_v16  ;;  %v741_v63 = vpop.f32.mrf.mxu0 }
 0x12d   : > { %v17221_v61 = vpop.f32.mrf.mxu1  ;;  %17520 = vmatmul.mubr.msk.f32.vlgmr.msra.gmra.mxu1 %vm209_vm1, %v19471_v15 }
 0x12e   : > { %v20227_v13 = vadd.f32 %v17221_v61, %v17171_v35  ;;  %17522 = vmatprep.mubr.msk.f32.mxu1 %vm209_vm1, %v19479_v17  ;;  %17618 = vmatpush3.msk.msra.mxu1 %vm661_vm0, %v20028_v8  ;;  %v25389_v17 = vld [vmem:[#allocation15_spill] sm:$0xff]  ;;  %v17177_v8 = vpop.f32.mrf.mxu0  ;;  %v25390_v35 = vld [vmem:[#allocation21_spill] sm:$0xff]  ;;  %v2783_v61 = vld [vmem:[#allocation2 + $0x90] sm:$0xff] }
 0x12f   : > { %v1055_v10 = vpop.f32.mrf.mxu1  ;;  %17717 = vmatprep.subr.msk.mxu1 %vm661_vm0, %v20225_v12  ;;  %17475 = vmatprep.mubr.msk.f32.mxu0 %vm209_vm1, %v25389_v17 }
 0x130   : > { %v20237_v15 = vadd.f32 %v1055_v10, %v731_v2  ;;  %17476 = vmatmul.mubr.msk.f32.gmra.mxu0 %vm209_vm1, %v25390_v35  ;;  %v751_v37 = vpop.f32.mrf.mxu0  ;;  %v25393_v35 = vld [vmem:[#allocation30_spill] sm:$0xff] }
 0x131   : > { %v17224_v45 = vpop.f32.mrf.mxu1  ;;  %17523 = vmatmul.mubr.msk.f32.gmra.mxu1 %vm209_vm1, %v19507_v22  ;;  %v25391_v22 = vld [vmem:[#allocation49_spill] sm:$0xff] }
 0x132   : > { %v20247_v18 = vadd.f32 %v17224_v45, %v17174_v25  ;;  %17525 = vmatprep.mubr.msk.f32.mxu1 %vm209_vm1, %v19513_v24  ;;  %17478 = vmatprep.mubr.msk.f32.mxu0 %vm209_vm1, %v25391_v22  ;;  %v3173_v24 = vld [vmem:[#allocation2 + $0x91] sm:$0xff]  ;;  %v17180_v16 = vpop.f32.mrf.mxu0 }
 0x133   : > { %v1065_v49 = vpop.f32.mrf.mxu1  ;;  %v25394_v22 = vld [vmem:[#allocation31_spill] sm:$0xff] }
 0x134   : > { %v20251_v36 = vadd.f32 %v1065_v49, %v741_v63  ;;  %17479 = vmatmul.mubr.msk.f32.gmra.mxu0 %vm209_vm1, %v2783_v61  ;;  %v761_v63 = vpop.f32.mrf.mxu0 }
 0x135   : > { %v17227_v58 = vpop.f32.mrf.mxu1  ;;  %17526 = vmatmul.mubr.msk.f32.gmra.mxu1 %vm209_vm1, %v19521_v27  ;;  %v25392_v27 = vld [vmem:[#allocation29_spill] sm:$0xff] }
 0x136   : > { %v20259_v2 = vadd.f32 %v17227_v58, %v17177_v8  ;;  %17528 = vmatprep.mubr.msk.f32.mxu1 %vm209_vm1, %v20054_v7  ;;  %17481 = vmatprep.mubr.msk.f32.mxu0 %vm209_vm1, %v25392_v27  ;;  %v17183_v8 = vpop.f32.mrf.mxu0 }
 0x137   : > { %v1075_v10 = vpop.f32.mrf.mxu1 }
 0x138   : > { %v20263_v25 = vadd.f32 %v1075_v10, %v751_v37  ;;  %17482 = vmatmul.mubr.msk.f32.gmra.mxu0 %vm209_vm1, %v25393_v35  ;;  %v771_v37 = vpop.f32.mrf.mxu0  ;;  %v25397_v35 = vld [vmem:[#allocation35_spill] sm:$0xff] }
 0x139   : > { %v17230_v45 = vpop.f32.mrf.mxu1  ;;  %17529 = vmatmul.mubr.msk.f32.gmra.mxu1 %vm209_vm1, %v3173_v24  ;;  %17484 = vmatprep.mubr.msk.f32.mxu0 %vm209_vm1, %v25394_v22  ;;  %v2791_v22 = vld [vmem:[#allocation2 + $0x130] sm:$0xff] }
 0x13a   : > { %v20269_v17 = vadd.f32 %v17230_v45, %v17180_v16  ;;  %17531 = vmatprep.mubr.msk.f32.mxu1 %vm209_vm1, %v19603_v46  ;;  %v17186_v10 = vpop.f32.mrf.mxu0  ;;  %v25395_v16 = vld [vmem:[#allocation32_spill] sm:$0xff] }
 0x13b   : > { %v1085_v7 = vpop.f32.mrf.mxu1 }
 0x13c   : > { %v20273_v49 = vadd.f32 %v1085_v7, %v761_v63  ;;  %17485 = vmatmul.mubr.msk.f32.gmra.mxu0 %vm209_vm1, %v25395_v16  ;;  %v781_v63 = vpop.f32.mrf.mxu0 }
 0x13d   : > { %v17233_v58 = vpop.f32.mrf.mxu1  ;;  %17532 = vmatmul.mubr.msk.f32.gmra.mxu1 %vm209_vm1, %v19619_v48  ;;  %v25396_v48 = vld [vmem:[#allocation33_spill] sm:$0xff] }
 0x13e   : > { %v20281_v61 = vadd.f32 %v17233_v58, %v17183_v8  ;;  %17534 = vmatprep.mubr.msk.f32.mxu1 %vm209_vm1, %v19625_v50  ;;  %17487 = vmatprep.mubr.msk.f32.mxu0 %vm209_vm1, %v25396_v48  ;;  %v17189_v8 = vpop.f32.mrf.mxu0 }
 0x13f   : > { %v1095_v46 = vpop.f32.mrf.mxu1 }
 0x140   : > { %v20285_v24 = vadd.f32 %v1095_v46, %v771_v37  ;;  %17488 = vmatmul.mubr.msk.f32.gmra.mxu0 %vm209_vm1, %v25397_v35  ;;  %v791_v46 = vpop.f32.mrf.mxu0 }
 0x141   : > { %v17236_v45 = vpop.f32.mrf.mxu1  ;;  %17535 = vmatmul.mubr.msk.f32.gmra.mxu1 %vm209_vm1, %v19635_v52  ;;  %v25398_v52 = vld [vmem:[#allocation50_spill] sm:$0xff] }
 0x142   : > { %v20293_v27 = vadd.f32 %v17236_v45, %v17186_v10  ;;  %17537 = vmatprep.mubr.msk.f32.mxu1 %vm209_vm1, %v19641_v54  ;;  %17490 = vmatprep.mubr.msk.f32.mxu0 %vm209_vm1, %v25398_v52  ;;  %v3181_v54 = vld [vmem:[#allocation2 + $0x131] sm:$0xff]  ;;  %v17192_v45 = vpop.f32.mrf.mxu0 }
 0x143   : > { %v1105_v50 = vpop.f32.mrf.mxu1 }
 0x144   : > { %v20297_v7 = vadd.f32 %v1105_v50, %v781_v63  ;;  %17491 = vmatmul.mubr.msk.f32.gmra.mxu0 %vm209_vm1, %v2791_v22  ;;  %v801_v50 = vpop.f32.mrf.mxu0  ;;  %v25401_v22 = vld [vmem:[#allocation40_spill] sm:$0xff] }
 0x145   : > { %v17239_v58 = vpop.f32.mrf.mxu1  ;;  %17538 = vmatmul.mubr.msk.f32.gmra.mxu1 %vm209_vm1, %v19656_v57  ;;  %v25399_v57 = vld [vmem:[#allocation37_spill] sm:$0xff] }
 0x146   : > { %v20305_v37 = vadd.f32 %v17239_v58, %v17189_v8  ;;  %17540 = vmatprep.mubr.msk.f32.mxu1 %vm209_vm1, %v20090_v5  ;;  %17493 = vmatprep.mubr.msk.f32.mxu0 %vm209_vm1, %v25399_v57  ;;  %v17195_v35 = vpop.f32.mrf.mxu0  ;;  %v25400_v58 = vld [vmem:[#allocation39_spill] sm:$0xff] }
 0x147   : > { %v1115_v10 = vpop.f32.mrf.mxu1 }
 0x148   : > { %v20309_v16 = vadd.f32 %v1115_v10, %v791_v46  ;;  %17494 = vmatmul.mubr.msk.f32.gmra.mxu0 %vm209_vm1, %v25400_v58 }
 0x149   : > { %v17242_v48 = vpop.f32.mrf.mxu1  ;;  %17541 = vmatmul.mubr.msk.f32.gmra.mxu1 %vm209_vm1, %v3181_v54  ;;  %17496 = vmatprep.mubr.msk.f32.mxu0 %vm209_vm1, %v25401_v22  ;;  %v811_v54 = vpop.f32.mrf.mxu0 }
 0x14a   : > { %v20315_v63 = vadd.f32 %v17242_v48, %v17192_v45  ;;  %17543 = vmatprep.mubr.msk.f32.mxu1 %vm209_vm1, %v19675_v0  ;;  %v25402_v48 = vld [vmem:[#allocation42_spill] sm:$0xff] }
 0x14b   : > { %v1125_v5 = vpop.f32.mrf.mxu1  ;;  %v17198_v45 = vpop.f32.mrf.mxu0 }
 0x14c   : > { %v20319_v8 = vadd.f32 %v1125_v5, %v801_v50  ;;  %17497 = vmatmul.mubr.msk.f32.gmra.mxu0 %vm209_vm1, %v25402_v48 }
 0x14d   : > { %v17245_v52 = vpop.f32.mrf.mxu1  ;;  %17544 = vmatmul.mubr.msk.f32.gmra.mxu1 %vm209_vm1, %v19687_v3  ;;  %v25403_v3 = vld [vmem:[#allocation43_spill] sm:$0xff]  ;;  %v821_v5 = vpop.f32.mrf.mxu0 }
 0x14e   : > { %v20327_v46 = vadd.f32 %v17245_v52, %v17195_v35  ;;  %17546 = vmatprep.mubr.msk.f32.mxu1 %vm209_vm1, %v19696_v11  ;;  %17499 = vmatprep.mubr.msk.f32.mxu0 %vm209_vm1, %v25403_v3  ;;  %v25404_v52 = vld [vmem:[#allocation44_spill] sm:$0xff] }
 0x14f   : > { %v1135_v0 = vpop.f32.mrf.mxu1  ;;  %v17201_v58 = vpop.f32.mrf.mxu0 }
 0x150   : > { %v20331_v10 = vadd.f32 %v1135_v0, %v811_v54  ;;  %17500 = vmatmul.mubr.msk.f32.gmra.mxu0 %vm209_vm1, %v25404_v52  ;;  %v25406_v52 = vld [vmem:[#allocation46_spill] sm:$0xff] }
 0x151   : > { %v17248_v57 = vpop.f32.mrf.mxu1  ;;  %17547 = vmatmul.mubr.msk.f32.gmra.mxu1 %vm209_vm1, %v19716_v60  ;;  %17502 = vmatprep.mubr.msk.f32.mxu0 %vm209_vm1, %v19957_v9  ;;  %v2799_v60 = vld [vmem:[#allocation2 + $0x1d0] sm:$0xff]  ;;  %v831_v0 = vpop.f32.mrf.mxu0 }
 0x152   : > { %v20339_v50 = vadd.f32 %v17248_v57, %v17198_v45  ;;  %17549 = vmatprep.mubr.msk.f32.mxu1 %vm209_vm1, %v19724_v56  ;;  %v3189_v56 = vld [vmem:[#allocation2 + $0x1d1] sm:$0xff] }
 0x153   : > { %v1145_v11 = vpop.f32.mrf.mxu1  ;;  %v17204_v57 = vpop.f32.mrf.mxu0 }
 0x154   : > { %v20343_v35 = vadd.f32 %v1145_v11, %v821_v5  ;;  %17503 = vmatmul.mubr.msk.f32.gmra.mxu0 %vm209_vm1, %v2799_v60  ;;  %v25407_v60 = vld [vmem:[#allocation47_spill] sm:$0xff] }
 0x155   : > { %v17251_v22 = vpop.f32.mrf.mxu1  ;;  %17550 = vmatmul.mubr.msk.f32.gmra.mxu1 %vm209_vm1, %v19736_v59  ;;  %v25405_v59 = vld [vmem:[#allocation45_spill] sm:$0xff]  ;;  %v841_v5 = vpop.f32.mrf.mxu0 }
 0x156   : > { %v20351_v54 = vadd.f32 %v17251_v22, %v17201_v58  ;;  %17552 = vmatprep.mubr.msk.f32.mxu1 %vm209_vm1, %v20126_v28  ;;  %17505 = vmatprep.mubr.msk.f32.mxu0 %vm209_vm1, %v25405_v59 }
 0x157   : > { %v1155_v45 = vpop.f32.mrf.mxu1  ;;  %v17207_v58 = vpop.f32.mrf.mxu0 }
 0x158   : > { %v20355_v48 = vadd.f32 %v1155_v45, %v831_v0  ;;  %17506 = vmatmul.mubr.msk.f32.gmra.mxu0 %vm209_vm1, %v25406_v52 }
 0x159   : > { %v17254_v3 = vpop.f32.mrf.mxu1  ;;  %17553 = vmatmul.mubr.msk.f32.gmra.mxu1 %vm209_vm1, %v3189_v56  ;;  %17508 = vmatprep.mubr.msk.f32.mxu0 %vm209_vm1, %v25407_v60  ;;  %v851_v56 = vpop.f32.mrf.mxu0  ;;  %v3947_v60 = vld [vmem:[#allocation2 + $0xa0] sm:$0xff] }
 0x15a   : > { %v20361_v9 = vadd.f32 %v17254_v3, %v17204_v57  ;;  %17555 = vmatprep.mubr.msk.f32.mxu1 %vm209_vm1, %v19752_v4 }
 0x15b   : > { %v1165_v28 = vpop.f32.mrf.mxu1  ;;  %v17210_v57 = vpop.f32.mrf.mxu0 }
 0x15c   : > { %v20365_v11 = vadd.f32 %v1165_v28, %v841_v5  ;;  %17509 = vmatmul.mubr.msk.f32.gmra.mxu0 %vm209_vm1, %v19782_v30 }
 0x15d   : > { %v17257_v22 = vpop.f32.mrf.mxu1  ;;  %17556 = vmatmul.mubr.msk.f32.gmra.mxu1 %vm209_vm1, %v19762_v42  ;;  %17511 = vmatprep.mubr.msk.f32.mxu0 %vm209_vm1, %v19786_v26  ;;  %v861_v59 = vpop.f32.mrf.mxu0  ;;  %v2807_v26 = vld [vmem:[#allocation2 + $0x270] sm:$0xff] }
 0x15e   : > { %v20373_v0 = vadd.f32 %v17257_v22, %v17207_v58  ;;  %17558 = vmatprep.mubr.msk.f32.mxu1 %vm209_vm1, %v19768_v33  ;;  %v25408_v58 = vld [vmem:[#allocation48_spill] sm:$0xff] }
 0x15f   : > { %v1175_v4 = vpop.f32.mrf.mxu1  ;;  %v17213_v28 = vpop.f32.mrf.mxu0 }
 0x160   : > { %v20377_v45 = vadd.f32 %v1175_v4, %v851_v56  ;;  %17512 = vmatmul.mubr.msk.f32.gmra.mxu0 %vm209_vm1, %v25408_v58  ;;  %v20417_v58 = vld [vmem:[%s25183_s1 + $0x18] sm:$0x3] }
 0x161   : > { %v17260_v3 = vpop.f32.mrf.mxu1  ;;  %17559 = vmatmul.mubr.msk.f32.gmra.mxu1 %vm209_vm1, %v19778_v31  ;;  %17514 = vmatprep.mubr.msk.f32.mxu0 %vm209_vm1, %v20004_v39  ;;  %v871_v52 = vpop.f32.mrf.mxu0 }
 0x162   : > { %v20385_v42 = vadd.f32 %v17260_v3, %v17210_v57  ;;  %17561 = vmatprep.mubr.msk.f32.mxu1 %vm209_vm1, %v19784_v29  ;;  %v3197_v29 = vld [vmem:[#allocation2 + $0x271] sm:$0xff] }
 0x163   : > { %v1185_v33 = vpop.f32.mrf.mxu1  ;;  %v17216_v4 = vpop.f32.mrf.mxu0 }
 0x164   : > { %v20389_v5 = vadd.f32 %v1185_v33, %v861_v59  ;;  %17515 = vmatmul.mubr.msk.f32.gmra.mxu0 %vm209_vm1, %v2807_v26  ;;  %v3949_v59 = vld [vmem:[#allocation2 + $0xc0] sm:$0xff]  ;;  %v20426_v26 = vld [vmem:[%s25183_s1 + $0x1a] sm:$0x3] }
 0x165   : > { %v17263_v30 = vpop.f32.mrf.mxu1  ;;  %17562 = vmatmul.mubr.msk.f32.gmra.mxu1 %vm209_vm1, %v19794_v62  ;;  %17569 = vmatprep.mubr.msk.f32.mxu0 %vm209_vm1, %v19809_v19  ;;  %v881_v39 = vpop.f32.mrf.mxu0 }
 0x166   : > { %v20397_v31 = vadd.f32 %v17263_v30, %v17213_v28  ;;  %17564 = vmatprep.mubr.msk.f32.mxu1 %vm209_vm1, %v20197_v43  ;;  %v3948_v43 = vld [vmem:[#allocation2 + $0xb0] sm:$0xff] }
 0x167   : > { %v1195_v22 = vpop.f32.mrf.mxu1  ;;  %v17271_v28 = vpop.f32.mrf.mxu0 }
 0x168   : > { %v20401_v56 = vadd.f32 %v1195_v22, %v871_v52  ;;  %17570 = vmatmul.mubr.msk.f32.vlgmr.msra.gmra.mxu0 %vm209_vm1, %v19822_v21  ;;  %v1573_v19 = vadd.f32 %v17271_v28, %v20227_v13  ;;  %v3950_v21 = vld [vmem:[#allocation2 + $0xd0] sm:$0xff]  ;;  %v3951_v22 = vld [vmem:[#allocation2 + $0xe0] sm:$0xff] }
 0x169   : > { %v17266_v57 = vpop.f32.mrf.mxu1  ;;  %17565 = vmatmul.mubr.msk.f32.gmra.mxu1 %vm209_vm1, %v3197_v29  ;;  %17668 = vmatpush3.msk.msra.mxu0 %vm661_vm0, %v20216_v32  ;;  %v1413_v52 = vpop.f32.mrf.mxu0 }
 0x16a   : > { %v20407_v62 = vadd.f32 %v17266_v57, %v17216_v4  ;;  %17619 = vmatprep.mubr.msk.f32.mxu1 %vm209_vm1, %v3947_v60  ;;  %17572 = vmatprep.mubr.msk.f32.mxu0 %vm209_vm1, %v19833_v6  ;;  %v1572_v13 = vadd.f32 %v1413_v52, %v20237_v15 }
 0x16b   : > { %v1205_v3 = vpop.f32.mrf.mxu1  ;;  %17767 = vmatprep.subr.msk.mxu0 %vm661_vm0, %v20417_v58  ;;  %v17274_v60 = vpop.f32.mrf.mxu0 }
 0x16c   : > { %v20410_v33 = vadd.f32 %v1205_v3, %v881_v39  ;;  %17573 = vmatmul.mubr.msk.f32.gmra.mxu0 %vm209_vm1, %v19847_v14  ;;  %v1575_v6 = vadd.f32 %v17274_v60, %v20247_v18  ;;  %v3952_v39 = vld [vmem:[#allocation2 + $0xf0] sm:$0xff] }
 0x16d   : > { %v17321_v30 = vpop.f32.mrf.mxu1  ;;  %17620 = vmatmul.mubr.msk.f32.vlgmr.msra.gmra.mxu1 %vm209_vm1, %v3948_v43  ;;  %17575 = vmatprep.mubr.msk.f32.mxu0 %vm209_vm1, %v19851_v40  ;;  %v1423_v57 = vpop.f32.mrf.mxu0  ;;  %v3563_v40 = vld [vmem:[#allocation2 + $0x92] sm:$0xff] }
 0x16e   : > { %17622 = vmatprep.mubr.msk.f32.mxu1 %vm209_vm1, %v3949_v59  ;;  %v20432_v29 = vadd.f32 %v17321_v30, %v1573_v19  ;;  %17718 = vmatpush3.msk.msra.mxu1 %vm661_vm0, %v20225_v12  ;;  %v3561_v12 = vld [vmem:[#allocation2 + $0x72] sm:$0xff]  ;;  %v1574_v14 = vadd.f32 %v1423_v57, %v20251_v36  ;;  %v3953_v59 = vld [vmem:[#allocation2 + $0x100] sm:$0xff] }
 0x16f   : > { %v1804_v32 = vpop.f32.mrf.mxu1  ;;  %17817 = vmatprep.subr.msk.mxu1 %vm661_vm0, %v20426_v26  ;;  %v17277_v18 = vpop.f32.mrf.mxu0  ;;  %v3954_v36 = vld [vmem:[#allocation2 + $0x110] sm:$0xff] }
 0x170   : > { %v20443_v15 = vadd.f32 %v1804_v32, %v1572_v13  ;;  %17576 = vmatmul.mubr.msk.f32.gmra.mxu0 %vm209_vm1, %v3561_v12  ;;  %v1577_v28 = vadd.f32 %v17277_v18, %v20259_v2  ;;  %v20472_v12 = vld [vmem:[#allocation2 + $0xd2] sm:$0xff] }
 0x171   : > { %v17324_v4 = vpop.f32.mrf.mxu1  ;;  %17623 = vmatmul.mubr.msk.f32.gmra.mxu1 %vm209_vm1, %v3950_v21  ;;  %17578 = vmatprep.mubr.msk.f32.mxu0 %vm209_vm1, %v20058_v20  ;;  %v1433_v52 = vpop.f32.mrf.mxu0  ;;  %v20460_v21 = vld [vmem:[#allocation2 + $0xc2] sm:$0xff]  ;;  %v3956_v57 = vld [vmem:[#allocation2 + $0x150] sm:$0xff] }
 0x172   : > { %17625 = vmatprep.mubr.msk.f32.mxu1 %vm209_vm1, %v3951_v22  ;;  %v20450_v43 = vadd.f32 %v17324_v4, %v1575_v6  ;;  %v1576_v13 = vadd.f32 %v1433_v52, %v20263_v25  ;;  %v3955_v22 = vld [vmem:[#allocation2 + $0x140] sm:$0xff]  ;;  %v20488_v52 = vld [vmem:[#allocation2 + $0xf2] sm:$0xff] }
 0x173   : > { %v1814_v3 = vpop.f32.mrf.mxu1  ;;  %v17280_v60 = vpop.f32.mrf.mxu0 }
 0x174   : > { %v20454_v19 = vadd.f32 %v1814_v3, %v1574_v14  ;;  %17579 = vmatmul.mubr.msk.f32.gmra.mxu0 %vm209_vm1, %v3563_v40  ;;  %v1579_v6 = vadd.f32 %v17280_v60, %v20269_v17  ;;  %v3959_v60 = vld [vmem:[#allocation2 + $0x180] sm:$0xff] }
 0x175   : > { %v17327_v30 = vpop.f32.mrf.mxu1  ;;  %17626 = vmatmul.mubr.msk.f32.gmra.mxu1 %vm209_vm1, %v3952_v39  ;;  %17581 = vmatprep.mubr.msk.f32.mxu0 %vm209_vm1, %v20460_v21  ;;  %v1443_v25 = vpop.f32.mrf.mxu0  ;;  %v20475_v39 = vld [vmem:[#allocation2 + $0xe2] sm:$0xff] }
 0x176   : > { %17628 = vmatprep.mubr.msk.f32.mxu1 %vm209_vm1, %v3953_v59  ;;  %v20463_v32 = vadd.f32 %v17327_v30, %v1577_v28  ;;  %v1578_v14 = vadd.f32 %v1443_v25, %v20273_v49  ;;  %v3957_v59 = vld [vmem:[#allocation2 + $0x160] sm:$0xff] }
 0x177   : > { %v1824_v2 = vpop.f32.mrf.mxu1  ;;  %v17283_v18 = vpop.f32.mrf.mxu0 }
 0x178   : > { %v20467_v4 = vadd.f32 %v1824_v2, %v1576_v13  ;;  %17582 = vmatmul.mubr.msk.f32.gmra.mxu0 %vm209_vm1, %v20472_v12  ;;  %v1581_v28 = vadd.f32 %v17283_v18, %v20281_v61  ;;  %v20491_v13 = vld [vmem:[#allocation2 + $0x102] sm:$0xff] }
 0x179   : > { %v17330_v20 = vpop.f32.mrf.mxu1  ;;  %17629 = vmatmul.mubr.msk.f32.gmra.mxu1 %vm209_vm1, %v3954_v36  ;;  %17584 = vmatprep.mubr.msk.f32.mxu0 %vm209_vm1, %v20475_v39  ;;  %v1453_v49 = vpop.f32.mrf.mxu0  ;;  %v3958_v36 = vld [vmem:[#allocation2 + $0x170] sm:$0xff] }
 0x17a   : > { %17631 = vmatprep.mubr.msk.f32.mxu1 %vm209_vm1, %v3955_v22  ;;  %v20478_v3 = vadd.f32 %v17330_v20, %v1579_v6  ;;  %v1580_v2 = vadd.f32 %v1453_v49, %v20285_v24 }
 0x17b   : > { %v1834_v17 = vpop.f32.mrf.mxu1  ;;  %v17286_v6 = vpop.f32.mrf.mxu0 }
 0x17c   : > { %v20483_v30 = vadd.f32 %v1834_v17, %v1578_v14  ;;  %17585 = vmatmul.mubr.msk.f32.gmra.mxu0 %vm209_vm1, %v20488_v52  ;;  %v1583_v20 = vadd.f32 %v17286_v6, %v20293_v27  ;;  %v20504_v14 = vld [vmem:[#allocation2 + $0x112] sm:$0xff]  ;;  %v3961_v27 = vld [vmem:[#allocation2 + $0x1a0] sm:$0xff] }
 0x17d   : > { %v17333_v40 = vpop.f32.mrf.mxu1  ;;  %17632 = vmatmul.mubr.msk.f32.gmra.mxu1 %vm209_vm1, %v3956_v57  ;;  %17587 = vmatprep.mubr.msk.f32.mxu0 %vm209_vm1, %v20491_v13  ;;  %v1463_v24 = vpop.f32.mrf.mxu0  ;;  %v3960_v17 = vld [vmem:[#allocation2 + $0x190] sm:$0xff]  ;;  %v20519_v6 = vld [vmem:[#allocation2 + $0x162] sm:$0xff] }
 0x17e   : > { %17634 = vmatprep.mubr.msk.f32.mxu1 %vm209_vm1, %v3957_v59  ;;  %v20494_v22 = vadd.f32 %v17333_v40, %v1581_v28  ;;  %v1582_v59 = vadd.f32 %v1463_v24, %v20297_v7  ;;  %v3963_v24 = vld [vmem:[#allocation2 + $0x1e0] sm:$0xff] }
 0x17f   : > { %v1844_v61 = vpop.f32.mrf.mxu1  ;;  %v17289_v40 = vpop.f32.mrf.mxu0 }
 0x180   : > { %v20499_v25 = vadd.f32 %v1844_v61, %v1580_v2  ;;  %17588 = vmatmul.mubr.msk.f32.gmra.mxu0 %vm209_vm1, %v20504_v14  ;;  %v1585_v49 = vadd.f32 %v17289_v40, %v20305_v37  ;;  %v3571_v61 = vld [vmem:[#allocation2 + $0x132] sm:$0xff] }
 0x181   : > { %v17336_v57 = vpop.f32.mrf.mxu1  ;;  %17635 = vmatmul.mubr.msk.f32.gmra.mxu1 %vm209_vm1, %v3958_v36  ;;  %17590 = vmatprep.mubr.msk.f32.mxu0 %vm209_vm1, %v20094_v23  ;;  %v1473_v7 = vpop.f32.mrf.mxu0  ;;  %v3964_v40 = vld [vmem:[#allocation2 + $0x1f0] sm:$0xff] }
 0x182   : > { %17637 = vmatprep.mubr.msk.f32.mxu1 %vm209_vm1, %v3959_v60  ;;  %v20508_v18 = vadd.f32 %v17336_v57, %v1583_v20  ;;  %v3962_v60 = vld [vmem:[#allocation2 + $0x1b0] sm:$0xff]  ;;  %v1584_v20 = vadd.f32 %v1473_v7, %v20309_v16  ;;  %v3965_v7 = vld [vmem:[#allocation2 + $0x200] sm:$0xff] }
 0x183   : > { %v1854_v28 = vpop.f32.mrf.mxu1 }
 0x184   : > { %v20513_v36 = vadd.f32 %v1854_v28, %v1582_v59  ;;  %v17292_v59 = vpop.f32.mrf.mxu0  ;;  %17591 = vmatmul.mubr.msk.f32.gmra.mxu0 %vm209_vm1, %v3571_v61 }
 0x185   : > { %v17339_v2 = vpop.f32.mrf.mxu1  ;;  %17638 = vmatmul.mubr.msk.f32.gmra.mxu1 %vm209_vm1, %v3960_v17  ;;  %v1587_v17 = vadd.f32 %v17292_v59, %v20315_v63  ;;  %17593 = vmatprep.mubr.msk.f32.mxu0 %vm209_vm1, %v20519_v6 }
 0x186   : > { %17640 = vmatprep.mubr.msk.f32.mxu1 %vm209_vm1, %v3961_v27  ;;  %v20522_v57 = vadd.f32 %v17339_v2, %v1585_v49  ;;  %v20531_v27 = vld [vmem:[#allocation2 + $0x172] sm:$0xff]  ;;  %v1483_v16 = vpop.f32.mrf.mxu0  ;;  %v20534_v49 = vld [vmem:[#allocation2 + $0x182] sm:$0xff] }
 0x187   : > { %v1864_v37 = vpop.f32.mrf.mxu1  ;;  %v1586_v2 = vadd.f32 %v1483_v16, %v20319_v8 }
 0x188   : > { %v20526_v28 = vadd.f32 %v1864_v37, %v1584_v20  ;;  %v17295_v20 = vpop.f32.mrf.mxu0  ;;  %17594 = vmatmul.mubr.msk.f32.gmra.mxu0 %vm209_vm1, %v20531_v27 }
 0x189   : > { %v17342_v23 = vpop.f32.mrf.mxu1  ;;  %17641 = vmatmul.mubr.msk.f32.gmra.mxu1 %vm209_vm1, %v3962_v60  ;;  %v1589_v60 = vadd.f32 %v17295_v20, %v20327_v46  ;;  %17596 = vmatprep.mubr.msk.f32.mxu0 %vm209_vm1, %v20534_v49 }
 0x18a   : > { %17643 = vmatprep.mubr.msk.f32.mxu1 %vm209_vm1, %v3963_v24  ;;  %v20537_v61 = vadd.f32 %v17342_v23, %v1587_v17  ;;  %v20547_v24 = vld [vmem:[#allocation2 + $0x192] sm:$0xff]  ;;  %v1493_v8 = vpop.f32.mrf.mxu0  ;;  %v20550_v23 = vld [vmem:[#allocation2 + $0x1a2] sm:$0xff] }
 0x18b   : > { %v1874_v63 = vpop.f32.mrf.mxu1  ;;  %v3966_v17 = vld [vmem:[#allocation2 + $0x210] sm:$0xff]  ;;  %v1588_v16 = vadd.f32 %v1493_v8, %v20331_v10 }
 0x18c   : > { %v20542_v37 = vadd.f32 %v1874_v63, %v1586_v2  ;;  %v3967_v2 = vld [vmem:[#allocation2 + $0x220] sm:$0xff]  ;;  %v17298_v63 = vpop.f32.mrf.mxu0  ;;  %17597 = vmatmul.mubr.msk.f32.gmra.mxu0 %vm209_vm1, %v20547_v24 }
 0x18d   : > { %v17345_v59 = vpop.f32.mrf.mxu1  ;;  %17644 = vmatmul.mubr.msk.f32.gmra.mxu1 %vm209_vm1, %v3964_v40  ;;  %v1591_v40 = vadd.f32 %v17298_v63, %v20339_v50  ;;  %17599 = vmatprep.mubr.msk.f32.mxu0 %vm209_vm1, %v20550_v23  ;;  %v3969_v50 = vld [vmem:[#allocation2 + $0x240] sm:$0xff] }
 0x18e   : > { %17646 = vmatprep.mubr.msk.f32.mxu1 %vm209_vm1, %v3965_v7  ;;  %v20553_v1 = vadd.f32 %v17345_v59, %v1589_v60  ;;  %v20563_v7 = vld [vmem:[#allocation2 + $0x1b2] sm:$0xff]  ;;  %v1503_v10 = vpop.f32.mrf.mxu0 }
 0x18f   : > { %v1884_v46 = vpop.f32.mrf.mxu1  ;;  %v3968_v60 = vld [vmem:[#allocation2 + $0x230] sm:$0xff]  ;;  %v1590_v59 = vadd.f32 %v1503_v10, %v20343_v35 }
 0x190   : > { %v20558_v20 = vadd.f32 %v1884_v46, %v1588_v16  ;;  %v17301_v16 = vpop.f32.mrf.mxu0  ;;  %17600 = vmatmul.mubr.msk.f32.gmra.mxu0 %vm209_vm1, %v20563_v7 }
 0x191   : > { %v17348_v44 = vpop.f32.mrf.mxu1  ;;  %17647 = vmatmul.mubr.msk.f32.gmra.mxu1 %vm209_vm1, %v3966_v17  ;;  %v1593_v17 = vadd.f32 %v17301_v16, %v20351_v54  ;;  %17602 = vmatprep.mubr.msk.f32.mxu0 %vm209_vm1, %v20133_v41 }
 0x192   : > { %17649 = vmatprep.mubr.msk.f32.mxu1 %vm209_vm1, %v3967_v2  ;;  %v20567_v8 = vadd.f32 %v17348_v44, %v1591_v40  ;;  %v3579_v2 = vld [vmem:[#allocation2 + $0x1d2] sm:$0xff]  ;;  %v1513_v35 = vpop.f32.mrf.mxu0  ;;  %v20578_v40 = vld [vmem:[#allocation2 + $0x202] sm:$0xff] }
 0x193   : > { %v1894_v38 = vpop.f32.mrf.mxu1  ;;  %v3970_v44 = vld [vmem:[#allocation2 + $0x250] sm:$0xff]  ;;  %v1592_v10 = vadd.f32 %v1513_v35, %v20355_v48 }
 0x194   : > { %v20572_v46 = vadd.f32 %v1894_v38, %v1590_v59  ;;  %v3971_v38 = vld [vmem:[#allocation2 + $0x280] sm:$0xff]  ;;  %v17304_v59 = vpop.f32.mrf.mxu0  ;;  %17603 = vmatmul.mubr.msk.f32.gmra.mxu0 %vm209_vm1, %v3579_v2 }
 0x195   : > { %v17351_v63 = vpop.f32.mrf.mxu1  ;;  %17650 = vmatmul.mubr.msk.f32.gmra.mxu1 %vm209_vm1, %v3968_v60  ;;  %v1595_v60 = vadd.f32 %v17304_v59, %v20361_v9  ;;  %17605 = vmatprep.mubr.msk.f32.mxu0 %vm209_vm1, %v20578_v40 }
 0x196   : > { %17652 = vmatprep.mubr.msk.f32.mxu1 %vm209_vm1, %v3969_v50  ;;  %v20581_v53 = vadd.f32 %v17351_v63, %v1593_v17  ;;  %v20590_v50 = vld [vmem:[#allocation2 + $0x212] sm:$0xff]  ;;  %v1523_v48 = vpop.f32.mrf.mxu0  ;;  %v20593_v63 = vld [vmem:[#allocation2 + $0x222] sm:$0xff] }
 0x197   : > { %v1904_v54 = vpop.f32.mrf.mxu1  ;;  %v3972_v17 = vld [vmem:[#allocation2 + $0x290] sm:$0xff]  ;;  %v1594_v2 = vadd.f32 %v1523_v48, %v20365_v11 }
 0x198   : > { %v20585_v16 = vadd.f32 %v1904_v54, %v1592_v10  ;;  %v3973_v10 = vld [vmem:[#allocation2 + $0x2a0] sm:$0xff]  ;;  %v17307_v54 = vpop.f32.mrf.mxu0  ;;  %17606 = vmatmul.mubr.msk.f32.gmra.mxu0 %vm209_vm1, %v20590_v50  ;;  %v20606_v11 = vld [vmem:[#allocation2 + $0x232] sm:$0xff] }
 0x199   : > { %v17354_v41 = vpop.f32.mrf.mxu1  ;;  %17653 = vmatmul.mubr.msk.f32.gmra.mxu1 %vm209_vm1, %v3970_v44  ;;  %v1597_v44 = vadd.f32 %v17307_v54, %v20373_v0  ;;  %17608 = vmatprep.mubr.msk.f32.mxu0 %vm209_vm1, %v20593_v63 }
 0x19a   : > { %17655 = vmatprep.mubr.msk.f32.mxu1 %vm209_vm1, %v3971_v38  ;;  %v20596_v35 = vadd.f32 %v17354_v41, %v1595_v60  ;;  %v1533_v38 = vpop.f32.mrf.mxu0  ;;  %v3974_v60 = vld [vmem:[#allocation2 + $0x2b0] sm:$0xff]  ;;  %v20609_v41 = vld [vmem:[#allocation2 + $0x242] sm:$0xff] }
 0x19b   : > { %v1914_v9 = vpop.f32.mrf.mxu1  ;;  %v1596_v48 = vadd.f32 %v1533_v38, %v20377_v45 }
 0x19c   : > { %v20601_v59 = vadd.f32 %v1914_v9, %v1594_v2  ;;  %v20614_v2 = vld [vmem:[#allocation2 + $0x2c0] sm:$0xff]  ;;  %v20617_v9 = vld [vmem:[%s19433_s29 + $0xf8] sm:$0xff]  ;;  %17609 = vmatmul.mubr.msk.f32.gmra.mxu0 %vm209_vm1, %v20606_v11 }
 0x19d   : > { %v17357_v51 = vpop.f32.mrf.mxu1  ;;  %17656 = vmatmul.mubr.msk.f32.gmra.mxu1 %vm209_vm1, %v3972_v17  ;;  %25409 = vst [vmem:[#allocation7_spill] sm:$0xff] %v20614_v2  ;;  %25410 = vst [vmem:[#allocation8_spill] sm:$0xff] %v20617_v9  ;;  %v17310_v17 = vpop.f32.mrf.mxu0  ;;  %17611 = vmatprep.mubr.msk.f32.mxu0 %vm209_vm1, %v20609_v41 }
 0x19e   : > { %17658 = vmatprep.mubr.msk.f32.mxu1 %vm209_vm1, %v3973_v10  ;;  %v20612_v47 = vadd.f32 %v17357_v51, %v1597_v44  ;;  %497 = vst.msk [vmem:[#allocation2 + $0x301] sm:$0xff] %vm209_vm1, %v20617_v9  ;;  %v1599_v10 = vadd.f32 %v17310_v17, %v20385_v42  ;;  %v20629_v51 = vld [vmem:[#allocation2 + $0x252] sm:$0xff] }
 0x19f   : > { %v1924_v0 = vpop.f32.mrf.mxu1  ;;  %v1543_v45 = vpop.f32.mrf.mxu0  ;;  %v3976_v44 = vld [vmem:[#allocation2 + $0x2d0] sm:$0xff] }
 0x1a0   : > { %v20624_v54 = vadd.f32 %v1924_v0, %v1596_v48  ;;  %v1598_v38 = vadd.f32 %v1543_v45, %v20389_v5  ;;  %v20636_v48 = vld [vmem:[#allocation2 + $0x2e0] sm:$0xff]  ;;  %17612 = vmatmul.mubr.msk.f32.gmra.mxu0 %vm209_vm1, %v20629_v51  ;;  %v3587_v5 = vld [vmem:[#allocation2 + $0x272] sm:$0xff] }
 0x1a1   : > { %v17360_v34 = vpop.f32.mrf.mxu1  ;;  %17659 = vmatmul.mubr.msk.f32.gmra.mxu1 %vm209_vm1, %v3974_v60  ;;  %25413 = vst [vmem:[#allocation21_spill] sm:$0xff] %v20636_v48  ;;  %v17313_v0 = vpop.f32.mrf.mxu0  ;;  %17614 = vmatprep.mubr.msk.f32.mxu0 %vm209_vm1, %v20201_v55  ;;  %v4337_v45 = vld [vmem:[#allocation2 + $0xa1] sm:$0xff] }
 0x1a2   : > { %25411 = vst [vmem:[#allocation12_spill] sm:$0xff] %v20624_v54  ;;  %17661 = vmatprep.mubr.msk.f32.mxu1 %vm209_vm1, %v20614_v2  ;;  %v20634_v9 = vadd.f32 %v17360_v34, %v1599_v10  ;;  %v1601_v60 = vadd.f32 %v17313_v0, %v20397_v31  ;;  %v20648_v10 = vld [vmem:[#allocation2 + $0x2f0] sm:$0xff] }
 0x1a3   : > { %v1934_v42 = vpop.f32.mrf.mxu1  ;;  %v1553_v34 = vpop.f32.mrf.mxu0  ;;  %25414 = vst [vmem:[#allocation49_spill] sm:$0xff] %v20648_v10 }
 0x1a4   : > { %25412 = vst [vmem:[#allocation15_spill] sm:$0xff] %v20634_v9  ;;  %v20641_v17 = vadd.f32 %v1934_v42, %v1598_v38  ;;  %v1600_v2 = vadd.f32 %v1553_v34, %v20401_v56  ;;  %v4727_v38 = vld [vmem:[#allocation2 + $0xa2] sm:$0xff]  ;;  %17615 = vmatmul.mubr.msk.f32.gmra.mxu0 %vm209_vm1, %v3587_v5 }
 0x1a5   : > { %v17363_v54 = vpop.f32.mrf.mxu1  ;;  %17662 = vmatmul.mubr.msk.f32.gmra.mxu1 %vm209_vm1, %v3976_v44  ;;  %v17316_v42 = vpop.f32.mrf.mxu0  ;;  %17669 = vmatprep.mubr.msk.f32.mxu0 %vm209_vm1, %v4337_v45  ;;  %v20675_v45 = vld [vmem:[%s25183_s1 + $0x1c] sm:$0x3] }
 0x1a6   : > { %17664 = vmatprep.mubr.msk.f32.mxu1 %vm209_vm1, %v20636_v48  ;;  %v20651_v9 = vadd.f32 %v17363_v54, %v1601_v60  ;;  %v1603_v44 = vadd.f32 %v17316_v42, %v20407_v62  ;;  %v20660_v48 = vld [vmem:[#allocation2 + $0xb1] sm:$0xff] }
 0x1a7   : > { %v1944_v31 = vpop.f32.mrf.mxu1  ;;  %v1563_v56 = vpop.f32.mrf.mxu0  ;;  %v20663_v54 = vld [vmem:[#allocation2 + $0xb2] sm:$0xff] }
 0x1a8   : > { %v20655_v55 = vadd.f32 %v1944_v31, %v1600_v2  ;;  %25415 = vst [vmem:[#allocation29_spill] sm:$0xff] %v20663_v54  ;;  %v1602_v60 = vadd.f32 %v1563_v56, %v20410_v33  ;;  %v20668_v2 = vld [vmem:[#allocation2 + $0xc1] sm:$0xff]  ;;  %17670 = vmatmul.mubr.msk.f32.vlgmr.msra.gmra.mxu0 %vm209_vm1, %v20660_v48  ;;  %v20684_v42 = vld [vmem:[#allocation2 + $0xd1] sm:$0xff] }
 0x1a9   : > { %v17366_v0 = vpop.f32.mrf.mxu1  ;;  %17665 = vmatmul.mubr.msk.f32.gmra.mxu1 %vm209_vm1, %v20648_v10  ;;  %v17371_v34 = vpop.f32.mrf.mxu0  ;;  %17768 = vmatpush3.msk.msra.mxu0 %vm661_vm0, %v20417_v58 }
 0x1aa   : > { %17719 = vmatprep.mubr.msk.f32.mxu1 %vm209_vm1, %v4727_v38  ;;  %v20666_v5 = vadd.f32 %v17366_v0, %v1603_v44  ;;  %v2354_v38 = vadd.f32 %v17371_v34, %v20432_v29  ;;  %v20689_v44 = vld [vmem:[%s25183_s1 + $0x1e] sm:$0x3]  ;;  %17672 = vmatprep.mubr.msk.f32.mxu0 %vm209_vm1, %v20668_v2  ;;  %v20695_v29 = vld [vmem:[#allocation2 + $0xe1] sm:$0xff] }
 0x1ab   : > { %v1954_v62 = vpop.f32.mrf.mxu1  ;;  %v2194_v0 = vpop.f32.mrf.mxu0  ;;  %17867 = vmatprep.subr.msk.mxu0 %vm661_vm0, %v20675_v45 }
 0x1ac   : > { %v20677_v31 = vadd.f32 %v1954_v62, %v1602_v60  ;;  %v2353_v58 = vadd.f32 %v2194_v0, %v20443_v15  ;;  %17673 = vmatmul.mubr.msk.f32.gmra.mxu0 %vm209_vm1, %v20684_v42 }
 0x1ad   : > { %v17421_v33 = vpop.f32.mrf.mxu1  ;;  %17720 = vmatmul.mubr.msk.f32.vlgmr.msra.gmra.mxu1 %vm209_vm1, %v20663_v54  ;;  %v17374_v62 = vpop.f32.mrf.mxu0  ;;  %17675 = vmatprep.mubr.msk.f32.mxu0 %vm209_vm1, %v20695_v29 }
 0x1ae   : > { %17722 = vmatprep.mubr.msk.f32.mxu1 %vm209_vm1, %v20460_v21  ;;  %v20698_v56 = vadd.f32 %v17421_v33, %v2354_v38  ;;  %17818 = vmatpush3.msk.msra.mxu1 %vm661_vm0, %v20426_v26  ;;  %v2356_v21 = vadd.f32 %v17374_v62, %v20450_v43  ;;  %v20715_v26 = vld [vmem:[#allocation2 + $0xf1] sm:$0xff]  ;;  %v20719_v33 = vld [vmem:[#allocation2 + $0x101] sm:$0xff] }
 0x1af   : > { %v2584_v60 = vpop.f32.mrf.mxu1  ;;  %17917 = vmatprep.subr.msk.mxu1 %vm661_vm0, %v20689_v44  ;;  %v2204_v38 = vpop.f32.mrf.mxu0 }
 0x1b0   : > { %v20709_v34 = vadd.f32 %v2584_v60, %v2353_v58  ;;  %v2355_v0 = vadd.f32 %v2204_v38, %v20454_v19  ;;  %17676 = vmatmul.mubr.msk.f32.gmra.mxu0 %vm209_vm1, %v20715_v26 }
 0x1b1   : > { %v17424_v15 = vpop.f32.mrf.mxu1  ;;  %17723 = vmatmul.mubr.msk.f32.gmra.mxu1 %vm209_vm1, %v20472_v12  ;;  %v17377_v60 = vpop.f32.mrf.mxu0  ;;  %17678 = vmatprep.mubr.msk.f32.mxu0 %vm209_vm1, %v20719_v33 }
 0x1b2   : > { %17725 = vmatprep.mubr.msk.f32.mxu1 %vm209_vm1, %v20475_v39  ;;  %v20722_v43 = vadd.f32 %v17424_v15, %v2356_v21  ;;  %v2358_v12 = vadd.f32 %v17377_v60, %v20463_v32  ;;  %v20733_v39 = vld [vmem:[#allocation2 + $0x111] sm:$0xff]  ;;  %v4345_v21 = vld [vmem:[#allocation2 + $0x141] sm:$0xff] }
 0x1b3   : > { %v2594_v58 = vpop.f32.mrf.mxu1  ;;  %v2214_v19 = vpop.f32.mrf.mxu0 }
 0x1b4   : > { %v20727_v62 = vadd.f32 %v2594_v58, %v2355_v0  ;;  %v2357_v15 = vadd.f32 %v2214_v19, %v20467_v4  ;;  %v4735_v0 = vld [vmem:[#allocation2 + $0x142] sm:$0xff]  ;;  %17679 = vmatmul.mubr.msk.f32.gmra.mxu0 %vm209_vm1, %v20733_v39 }
 0x1b5   : > { %v17427_v54 = vpop.f32.mrf.mxu1  ;;  %17726 = vmatmul.mubr.msk.f32.gmra.mxu1 %vm209_vm1, %v20488_v52  ;;  %v17380_v58 = vpop.f32.mrf.mxu0  ;;  %17681 = vmatprep.mubr.msk.f32.mxu0 %vm209_vm1, %v4345_v21 }
 0x1b6   : > { %17728 = vmatprep.mubr.msk.f32.mxu1 %vm209_vm1, %v20491_v13  ;;  %v20738_v38 = vadd.f32 %v17427_v54, %v2358_v12  ;;  %v2360_v52 = vadd.f32 %v17380_v58, %v20478_v3  ;;  %v20748_v13 = vld [vmem:[#allocation2 + $0x151] sm:$0xff]  ;;  %v20753_v12 = vld [vmem:[#allocation2 + $0x161] sm:$0xff] }
 0x1b7   : > { %v2604_v32 = vpop.f32.mrf.mxu1  ;;  %v2224_v4 = vpop.f32.mrf.mxu0  ;;  %v20751_v54 = vld [vmem:[#allocation2 + $0x152] sm:$0xff] }
 0x1b8   : > { %v20743_v60 = vadd.f32 %v2604_v32, %v2357_v15  ;;  %25416 = vst [vmem:[#allocation30_spill] sm:$0xff] %v20751_v54  ;;  %v2359_v19 = vadd.f32 %v2224_v4, %v20483_v30  ;;  %17682 = vmatmul.mubr.msk.f32.gmra.mxu0 %vm209_vm1, %v20748_v13 }
 0x1b9   : > { %v17430_v10 = vpop.f32.mrf.mxu1  ;;  %17729 = vmatmul.mubr.msk.f32.gmra.mxu1 %vm209_vm1, %v20504_v14  ;;  %v17383_v32 = vpop.f32.mrf.mxu0  ;;  %17684 = vmatprep.mubr.msk.f32.mxu0 %vm209_vm1, %v20753_v12 }
 0x1ba   : > { %17731 = vmatprep.mubr.msk.f32.mxu1 %vm209_vm1, %v4735_v0  ;;  %v20756_v3 = vadd.f32 %v17430_v10, %v2360_v52  ;;  %v2362_v14 = vadd.f32 %v17383_v32, %v20494_v22  ;;  %v20767_v0 = vld [vmem:[#allocation2 + $0x171] sm:$0xff]  ;;  %v20771_v10 = vld [vmem:[#allocation2 + $0x181] sm:$0xff] }
 0x1bb   : > { %v2614_v15 = vpop.f32.mrf.mxu1  ;;  %v2234_v30 = vpop.f32.mrf.mxu0 }
 0x1bc   : > { %v20761_v21 = vadd.f32 %v2614_v15, %v2359_v19  ;;  %v2361_v52 = vadd.f32 %v2234_v30, %v20499_v25  ;;  %17685 = vmatmul.mubr.msk.f32.gmra.mxu0 %vm209_vm1, %v20767_v0 }
 0x1bd   : > { %v17433_v58 = vpop.f32.mrf.mxu1  ;;  %17732 = vmatmul.mubr.msk.f32.gmra.mxu1 %vm209_vm1, %v20751_v54  ;;  %v17386_v19 = vpop.f32.mrf.mxu0  ;;  %17687 = vmatprep.mubr.msk.f32.mxu0 %vm209_vm1, %v20771_v10 }
 0x1be   : > { %17734 = vmatprep.mubr.msk.f32.mxu1 %vm209_vm1, %v20519_v6  ;;  %v20774_v22 = vadd.f32 %v17433_v58, %v2362_v14  ;;  %v2364_v15 = vadd.f32 %v17386_v19, %v20508_v18  ;;  %v20785_v6 = vld [vmem:[#allocation2 + $0x191] sm:$0xff]  ;;  %v20789_v14 = vld [vmem:[#allocation2 + $0x1a1] sm:$0xff] }
 0x1bf   : > { %v2624_v4 = vpop.f32.mrf.mxu1  ;;  %v2244_v25 = vpop.f32.mrf.mxu0  ;;  %25417 = vst [vmem:[#allocation31_spill] sm:$0xff] %v20789_v14 }
 0x1c0   : > { %v20779_v32 = vadd.f32 %v2624_v4, %v2361_v52  ;;  %v2363_v58 = vadd.f32 %v2244_v25, %v20513_v36  ;;  %17688 = vmatmul.mubr.msk.f32.gmra.mxu0 %vm209_vm1, %v20785_v6 }
 0x1c1   : > { %v17436_v54 = vpop.f32.mrf.mxu1  ;;  %17735 = vmatmul.mubr.msk.f32.gmra.mxu1 %vm209_vm1, %v20531_v27  ;;  %v17389_v52 = vpop.f32.mrf.mxu0  ;;  %17690 = vmatprep.mubr.msk.f32.mxu0 %vm209_vm1, %v20789_v14 }
 0x1c2   : > { %17737 = vmatprep.mubr.msk.f32.mxu1 %vm209_vm1, %v20534_v49  ;;  %v20792_v18 = vadd.f32 %v17436_v54, %v2364_v15  ;;  %v2366_v27 = vadd.f32 %v17389_v52, %v20522_v57  ;;  %v20803_v49 = vld [vmem:[#allocation2 + $0x1b1] sm:$0xff]  ;;  %v4353_v54 = vld [vmem:[#allocation2 + $0x1e1] sm:$0xff] }
 0x1c3   : > { %v2634_v30 = vpop.f32.mrf.mxu1  ;;  %v2254_v36 = vpop.f32.mrf.mxu0 }
 0x1c4   : > { %v20797_v4 = vadd.f32 %v2634_v30, %v2363_v58  ;;  %v2365_v15 = vadd.f32 %v2254_v36, %v20526_v28  ;;  %v4743_v58 = vld [vmem:[#allocation2 + $0x1e2] sm:$0xff]  ;;  %17691 = vmatmul.mubr.msk.f32.gmra.mxu0 %vm209_vm1, %v20803_v49 }
 0x1c5   : > { %v17439_v19 = vpop.f32.mrf.mxu1  ;;  %17738 = vmatmul.mubr.msk.f32.gmra.mxu1 %vm209_vm1, %v20547_v24  ;;  %v17392_v30 = vpop.f32.mrf.mxu0  ;;  %17693 = vmatprep.mubr.msk.f32.mxu0 %vm209_vm1, %v4353_v54 }
 0x1c6   : > { %17740 = vmatprep.mubr.msk.f32.mxu1 %vm209_vm1, %v20550_v23  ;;  %v20808_v25 = vadd.f32 %v17439_v19, %v2366_v27  ;;  %v2368_v24 = vadd.f32 %v17392_v30, %v20537_v61  ;;  %v20818_v23 = vld [vmem:[#allocation2 + $0x1f1] sm:$0xff]  ;;  %v20823_v19 = vld [vmem:[#allocation2 + $0x201] sm:$0xff] }
 0x1c7   : > { %v2644_v57 = vpop.f32.mrf.mxu1  ;;  %v2264_v28 = vpop.f32.mrf.mxu0  ;;  %v20821_v27 = vld [vmem:[#allocation2 + $0x1f2] sm:$0xff] }
 0x1c8   : > { %v20813_v52 = vadd.f32 %v2644_v57, %v2365_v15  ;;  %25418 = vst [vmem:[#allocation32_spill] sm:$0xff] %v20821_v27  ;;  %v2367_v36 = vadd.f32 %v2264_v28, %v20542_v37  ;;  %17694 = vmatmul.mubr.msk.f32.gmra.mxu0 %vm209_vm1, %v20818_v23 }
 0x1c9   : > { %v17442_v14 = vpop.f32.mrf.mxu1  ;;  %17741 = vmatmul.mubr.msk.f32.gmra.mxu1 %vm209_vm1, %v20563_v7  ;;  %v17395_v57 = vpop.f32.mrf.mxu0  ;;  %17696 = vmatprep.mubr.msk.f32.mxu0 %vm209_vm1, %v20823_v19 }
 0x1ca   : > { %17743 = vmatprep.mubr.msk.f32.mxu1 %vm209_vm1, %v4743_v58  ;;  %v20826_v61 = vadd.f32 %v17442_v14, %v2368_v24  ;;  %v2370_v7 = vadd.f32 %v17395_v57, %v20553_v1  ;;  %v20837_v58 = vld [vmem:[#allocation2 + $0x211] sm:$0xff]  ;;  %v20841_v14 = vld [vmem:[#allocation2 + $0x221] sm:$0xff] }
 0x1cb   : > { %v2654_v15 = vpop.f32.mrf.mxu1  ;;  %v2274_v37 = vpop.f32.mrf.mxu0 }
 0x1cc   : > { %v20831_v54 = vadd.f32 %v2654_v15, %v2367_v36  ;;  %v2369_v24 = vadd.f32 %v2274_v37, %v20558_v20  ;;  %17697 = vmatmul.mubr.msk.f32.gmra.mxu0 %vm209_vm1, %v20837_v58 }
 0x1cd   : > { %v17445_v30 = vpop.f32.mrf.mxu1  ;;  %17744 = vmatmul.mubr.msk.f32.gmra.mxu1 %vm209_vm1, %v20821_v27  ;;  %v17398_v36 = vpop.f32.mrf.mxu0  ;;  %17699 = vmatprep.mubr.msk.f32.mxu0 %vm209_vm1, %v20841_v14 }
 0x1ce   : > { %17746 = vmatprep.mubr.msk.f32.mxu1 %vm209_vm1, %v20578_v40  ;;  %v20844_v1 = vadd.f32 %v17445_v30, %v2370_v7  ;;  %v2372_v15 = vadd.f32 %v17398_v36, %v20567_v8  ;;  %v20855_v40 = vld [vmem:[#allocation2 + $0x231] sm:$0xff]  ;;  %v20859_v7 = vld [vmem:[#allocation2 + $0x241] sm:$0xff] }
 0x1cf   : > { %v2664_v28 = vpop.f32.mrf.mxu1  ;;  %v2284_v20 = vpop.f32.mrf.mxu0  ;;  %25419 = vst [vmem:[#allocation33_spill] sm:$0xff] %v20859_v7 }
 0x1d0   : > { %v20849_v57 = vadd.f32 %v2664_v28, %v2369_v24  ;;  %v2371_v30 = vadd.f32 %v2284_v20, %v20572_v46  ;;  %17700 = vmatmul.mubr.msk.f32.gmra.mxu0 %vm209_vm1, %v20855_v40 }
 0x1d1   : > { %v17448_v27 = vpop.f32.mrf.mxu1  ;;  %17747 = vmatmul.mubr.msk.f32.gmra.mxu1 %vm209_vm1, %v20590_v50  ;;  %v17401_v24 = vpop.f32.mrf.mxu0  ;;  %17702 = vmatprep.mubr.msk.f32.mxu0 %vm209_vm1, %v20859_v7 }
 0x1d2   : > { %17749 = vmatprep.mubr.msk.f32.mxu1 %vm209_vm1, %v20593_v63  ;;  %v20862_v8 = vadd.f32 %v17448_v27, %v2372_v15  ;;  %v2374_v50 = vadd.f32 %v17401_v24, %v20581_v53  ;;  %v20873_v63 = vld [vmem:[#allocation2 + $0x251] sm:$0xff]  ;;  %v4361_v27 = vld [vmem:[#allocation2 + $0x281] sm:$0xff] }
 0x1d3   : > { %v2674_v37 = vpop.f32.mrf.mxu1  ;;  %v2294_v46 = vpop.f32.mrf.mxu0 }
 0x1d4   : > { %v20867_v28 = vadd.f32 %v2674_v37, %v2371_v30  ;;  %v2373_v15 = vadd.f32 %v2294_v46, %v20585_v16  ;;  %v4751_v30 = vld [vmem:[#allocation2 + $0x282] sm:$0xff]  ;;  %17703 = vmatmul.mubr.msk.f32.gmra.mxu0 %vm209_vm1, %v20873_v63 }
 0x1d5   : > { %v17451_v36 = vpop.f32.mrf.mxu1  ;;  %17750 = vmatmul.mubr.msk.f32.gmra.mxu1 %vm209_vm1, %v20606_v11  ;;  %v17404_v37 = vpop.f32.mrf.mxu0  ;;  %17705 = vmatprep.mubr.msk.f32.mxu0 %vm209_vm1, %v4361_v27 }
 0x1d6   : > { %17752 = vmatprep.mubr.msk.f32.mxu1 %vm209_vm1, %v20609_v41  ;;  %v20878_v20 = vadd.f32 %v17451_v36, %v2374_v50  ;;  %v2376_v11 = vadd.f32 %v17404_v37, %v20596_v35  ;;  %v20888_v41 = vld [vmem:[#allocation2 + $0x291] sm:$0xff]  ;;  %v20893_v36 = vld [vmem:[#allocation2 + $0x2a1] sm:$0xff] }
 0x1d7   : > { %v2684_v53 = vpop.f32.mrf.mxu1  ;;  %25420 = vst [vmem:[#allocation35_spill] sm:$0xff] %v20888_v41  ;;  %v2304_v16 = vpop.f32.mrf.mxu0  ;;  %v20891_v50 = vld [vmem:[#allocation2 + $0x292] sm:$0xff]  ;;  %25422 = vst [vmem:[#allocation37_spill] sm:$0xff] %v20893_v36 }
 0x1d8   : > { %v20883_v24 = vadd.f32 %v2684_v53, %v2373_v15  ;;  %25421 = vst [vmem:[#allocation50_spill] sm:$0xff] %v20891_v50  ;;  %v2375_v46 = vadd.f32 %v2304_v16, %v20601_v59  ;;  %v20898_v53 = vld [vmem:[#allocation2 + $0x2a2] sm:$0xff]  ;;  %17706 = vmatmul.mubr.msk.f32.gmra.mxu0 %vm209_vm1, %v20888_v41  ;;  %v20909_v59 = vld [vmem:[#allocation2 + $0x2b1] sm:$0xff] }
 0x1d9   : > { %v17454_v7 = vpop.f32.mrf.mxu1  ;;  %17753 = vmatmul.mubr.msk.f32.gmra.mxu1 %vm209_vm1, %v20629_v51  ;;  %25424 = vst [vmem:[#allocation40_spill] sm:$0xff] %v20898_v53  ;;  %v17407_v37 = vpop.f32.mrf.mxu0  ;;  %17708 = vmatprep.mubr.msk.f32.mxu0 %vm209_vm1, %v20893_v36  ;;  %v20915_v16 = vld [vmem:[#allocation2 + $0x2c1] sm:$0xff]  ;;  %v25430_v36 = vld [vmem:[#allocation15_spill] sm:$0xff] }
 0x1da   : > { %17755 = vmatprep.mubr.msk.f32.mxu1 %vm209_vm1, %v4751_v30  ;;  %v20896_v35 = vadd.f32 %v17454_v7, %v2376_v11  ;;  %v2378_v51 = vadd.f32 %v17407_v37, %v20612_v47  ;;  %v20913_v11 = vld [vmem:[#allocation2 + $0x2b2] sm:$0xff]  ;;  %25427 = vst [vmem:[#allocation44_spill] sm:$0xff] %v20915_v16  ;;  %v25428_v47 = vld [vmem:[#allocation12_spill] sm:$0xff] }
 0x1db   : > { %v2694_v15 = vpop.f32.mrf.mxu1  ;;  %v2314_v7 = vpop.f32.mrf.mxu0  ;;  %25426 = vst [vmem:[#allocation43_spill] sm:$0xff] %v20913_v11 }
 0x1dc   : > { %25423 = vst [vmem:[#allocation39_spill] sm:$0xff] %v20896_v35  ;;  %v20903_v27 = vadd.f32 %v2694_v15, %v2375_v46  ;;  %v2377_v46 = vadd.f32 %v2314_v7, %v25428_v47  ;;  %17709 = vmatmul.mubr.msk.f32.gmra.mxu0 %vm209_vm1, %v20909_v59  ;;  %v20935_v7 = vld [vmem:[#allocation2 + $0x2d2] sm:$0xff]  ;;  %v20937_v47 = vld [vmem:[#allocation2 + $0x2e1] sm:$0xff] }
 0x1dd   : > { %v17457_v30 = vpop.f32.mrf.mxu1  ;;  %17756 = vmatmul.mubr.msk.f32.gmra.mxu1 %vm209_vm1, %v20891_v50  ;;  %v17410_v50 = vpop.f32.mrf.mxu0  ;;  %17711 = vmatprep.mubr.msk.f32.mxu0 %vm209_vm1, %v20915_v16  ;;  %25432 = vst [vmem:[#allocation47_spill] sm:$0xff] %v20935_v7  ;;  %25433 = vst [vmem:[#allocation48_spill] sm:$0xff] %v20937_v47 }
 0x1de   : > { %25425 = vst [vmem:[#allocation42_spill] sm:$0xff] %v20903_v27  ;;  %17758 = vmatprep.mubr.msk.f32.mxu1 %vm209_vm1, %v20898_v53  ;;  %v20918_v15 = vadd.f32 %v17457_v30, %v2378_v51  ;;  %v20920_v27 = vld [vmem:[#allocation2 + $0x2c2] sm:$0xff]  ;;  %v2380_v41 = vadd.f32 %v17410_v50, %v25430_v36  ;;  %v20931_v51 = vld [vmem:[#allocation2 + $0x2d1] sm:$0xff] }
 0x1df   : > { %v2704_v37 = vpop.f32.mrf.mxu1  ;;  %25429 = vst [vmem:[#allocation45_spill] sm:$0xff] %v20920_v27  ;;  %v2324_v30 = vpop.f32.mrf.mxu0 }
 0x1e0   : > { %v20925_v35 = vadd.f32 %v2704_v37, %v2377_v46  ;;  %v2379_v50 = vadd.f32 %v2324_v30, %v20641_v17  ;;  %v20942_v37 = vld [vmem:[#allocation2 + $0x2e2] sm:$0xff]  ;;  %17712 = vmatmul.mubr.msk.f32.gmra.mxu0 %vm209_vm1, %v20931_v51  ;;  %v20953_v17 = vld [vmem:[#allocation2 + $0x2f1] sm:$0xff] }
 0x1e1   : > { %v17460_v53 = vpop.f32.mrf.mxu1  ;;  %17759 = vmatmul.mubr.msk.f32.gmra.mxu1 %vm209_vm1, %v20913_v11  ;;  %25434 = vst [vmem:[#allocation12_spill] sm:$0xff] %v20942_v37  ;;  %v17413_v11 = vpop.f32.mrf.mxu0  ;;  %17714 = vmatprep.mubr.msk.f32.mxu0 %vm209_vm1, %v20937_v47  ;;  %v5117_v30 = vld [vmem:[#allocation2 + $0xb0] sm:$0xff] }
 0x1e2   : > { %25431 = vst [vmem:[#allocation46_spill] sm:$0xff] %v20925_v35  ;;  %17761 = vmatprep.mubr.msk.f32.mxu1 %vm209_vm1, %v20920_v27  ;;  %v20940_v36 = vadd.f32 %v17460_v53, %v2380_v41  ;;  %v2382_v16 = vadd.f32 %v17413_v11, %v20651_v9  ;;  %v20957_v53 = vld [vmem:[#allocation2 + $0x2f2] sm:$0xff] }
 0x1e3   : > { %v2714_v46 = vpop.f32.mrf.mxu1  ;;  %v2334_v41 = vpop.f32.mrf.mxu0  ;;  %25436 = vst [vmem:[#allocation58_spill] sm:$0xff] %v20957_v53 }
 0x1e4   : > { %v20947_v35 = vadd.f32 %v2714_v46, %v2379_v50  ;;  %v2381_v9 = vadd.f32 %v2334_v41, %v20655_v55  ;;  %17715 = vmatmul.mubr.msk.f32.gmra.mxu0 %vm209_vm1, %v20953_v17 }
 0x1e5   : > { %v17463_v27 = vpop.f32.mrf.mxu1  ;;  %17762 = vmatmul.mubr.msk.f32.gmra.mxu1 %vm209_vm1, %v20935_v7  ;;  %v17416_v46 = vpop.f32.mrf.mxu0  ;;  %17769 = vmatprep.mubr.msk.f32.mxu0 %vm209_vm1, %v5117_v30  ;;  %v20984_v30 = vld [vmem:[%s25183_s1 + $0x20] sm:$0x3] }
 0x1e6   : > { %25435 = vst [vmem:[#allocation15_spill] sm:$0xff] %v20947_v35  ;;  %17764 = vmatprep.mubr.msk.f32.mxu1 %vm209_vm1, %v20942_v37  ;;  %v20960_v11 = vadd.f32 %v17463_v27, %v2382_v16  ;;  %v2384_v7 = vadd.f32 %v17416_v46, %v20666_v5  ;;  %v20970_v37 = vld [vmem:[#allocation2 + $0xc0] sm:$0xff]  ;;  %v20977_v5 = vld [vmem:[#allocation2 + $0xd0] sm:$0xff] }
 0x1e7   : > { %v2724_v50 = vpop.f32.mrf.mxu1  ;;  %v2344_v55 = vpop.f32.mrf.mxu0 }
 0x1e8   : > { %v20965_v47 = vadd.f32 %v2724_v50, %v2381_v9  ;;  %v2383_v27 = vadd.f32 %v2344_v55, %v20677_v31  ;;  %17770 = vmatmul.mubr.msk.f32.vlgmr.msra.gmra.mxu0 %vm209_vm1, %v20970_v37 }
 0x1e9   : > { %v17466_v35 = vpop.f32.mrf.mxu1  ;;  %17765 = vmatmul.mubr.msk.f32.gmra.mxu1 %vm209_vm1, %v20957_v53  ;;  %v17471_v9 = vpop.f32.mrf.mxu0  ;;  %17868 = vmatpush3.msk.msra.mxu0 %vm661_vm0, %v20675_v45 }
 0x1ea   : > { %17819 = vmatprep.mubr.msk.f32.mxu1 %vm209_vm1, %v20660_v48  ;;  %v20975_v16 = vadd.f32 %v17466_v35, %v2384_v7  ;;  %v3135_v48 = vadd.f32 %v17471_v9, %v20698_v56  ;;  %v20993_v35 = vld [vmem:[#allocation2 + $0xe0] sm:$0xff]  ;;  %17772 = vmatprep.mubr.msk.f32.mxu0 %vm209_vm1, %v20977_v5  ;;  %v21004_v56 = vld [vmem:[#allocation2 + $0xf0] sm:$0xff] }
 0x1eb   : > { %v2734_v41 = vpop.f32.mrf.mxu1  ;;  %v20998_v7 = vld [vmem:[%s25183_s1 + $0x22] sm:$0x3]  ;;  %v2975_v46 = vpop.f32.mrf.mxu0  ;;  %17967 = vmatprep.subr.msk.mxu0 %vm661_vm0, %v20984_v30 }
 0x1ec   : > { %v20986_v50 = vadd.f32 %v2734_v41, %v2383_v27  ;;  %v3134_v45 = vadd.f32 %v2975_v46, %v20709_v34  ;;  %17773 = vmatmul.mubr.msk.f32.gmra.mxu0 %vm209_vm1, %v20993_v35 }
 0x1ed   : > { %v17521_v31 = vpop.f32.mrf.mxu1  ;;  %17820 = vmatmul.mubr.msk.f32.vlgmr.msra.gmra.mxu1 %vm209_vm1, %v20668_v2  ;;  %v17474_v27 = vpop.f32.mrf.mxu0  ;;  %17775 = vmatprep.mubr.msk.f32.mxu0 %vm209_vm1, %v21004_v56 }
 0x1ee   : > { %17822 = vmatprep.mubr.msk.f32.mxu1 %vm209_vm1, %v20684_v42  ;;  %v21007_v55 = vadd.f32 %v17521_v31, %v3135_v48  ;;  %17918 = vmatpush3.msk.msra.mxu1 %vm661_vm0, %v20689_v44  ;;  %v3137_v42 = vadd.f32 %v17474_v27, %v20722_v43  ;;  %v21024_v44 = vld [vmem:[#allocation2 + $0x100] sm:$0xff]  ;;  %v21028_v48 = vld [vmem:[#allocation2 + $0x110] sm:$0xff] }
 0x1ef   : > { %v3365_v2 = vpop.f32.mrf.mxu1  ;;  %18017 = vmatprep.subr.msk.mxu1 %vm661_vm0, %v20998_v7  ;;  %v2985_v9 = vpop.f32.mrf.mxu0 }
 0x1f0   : > { %v21018_v41 = vadd.f32 %v3365_v2, %v3134_v45  ;;  %v3136_v31 = vadd.f32 %v2985_v9, %v20727_v62  ;;  %17776 = vmatmul.mubr.msk.f32.gmra.mxu0 %vm209_vm1, %v21024_v44 }
 0x1f1   : > { %v17524_v34 = vpop.f32.mrf.mxu1  ;;  %17823 = vmatmul.mubr.msk.f32.gmra.mxu1 %vm209_vm1, %v20695_v29  ;;  %v17477_v45 = vpop.f32.mrf.mxu0  ;;  %17778 = vmatprep.mubr.msk.f32.mxu0 %vm209_vm1, %v21028_v48 }
 0x1f2   : > { %17825 = vmatprep.mubr.msk.f32.mxu1 %vm209_vm1, %v20715_v26  ;;  %v21031_v43 = vadd.f32 %v17524_v34, %v3137_v42  ;;  %v3139_v29 = vadd.f32 %v17477_v45, %v20738_v38  ;;  %v21042_v26 = vld [vmem:[#allocation2 + $0x120] sm:$0xff]  ;;  %v5125_v34 = vld [vmem:[#allocation2 + $0x150] sm:$0xff] }
 0x1f3   : > { %v3375_v46 = vpop.f32.mrf.mxu1  ;;  %v2995_v62 = vpop.f32.mrf.mxu0  ;;  %v21046_v42 = vld [vmem:[#allocation2 + $0x121] sm:$0xff] }
 0x1f4   : > { %v21036_v2 = vadd.f32 %v3375_v46, %v3136_v31  ;;  %25437 = vst [vmem:[#allocation59_spill] sm:$0xff] %v21046_v42  ;;  %v3138_v38 = vadd.f32 %v2995_v62, %v20743_v60  ;;  %17779 = vmatmul.mubr.msk.f32.gmra.mxu0 %vm209_vm1, %v21042_v26 }
 0x1f5   : > { %v17527_v27 = vpop.f32.mrf.mxu1  ;;  %17826 = vmatmul.mubr.msk.f32.gmra.mxu1 %vm209_vm1, %v20719_v33  ;;  %v17480_v46 = vpop.f32.mrf.mxu0  ;;  %17781 = vmatprep.mubr.msk.f32.mxu0 %vm209_vm1, %v5125_v34 }
 0x1f6   : > { %17828 = vmatprep.mubr.msk.f32.mxu1 %vm209_vm1, %v20733_v39  ;;  %v21049_v9 = vadd.f32 %v17527_v27, %v3139_v29  ;;  %v3141_v33 = vadd.f32 %v17480_v46, %v20756_v3  ;;  %v21059_v39 = vld [vmem:[#allocation2 + $0x160] sm:$0xff]  ;;  %v21063_v29 = vld [vmem:[#allocation2 + $0x170] sm:$0xff] }
 0x1f7   : > { %v3385_v31 = vpop.f32.mrf.mxu1  ;;  %v3005_v60 = vpop.f32.mrf.mxu0 }
 0x1f8   : > { %v21054_v45 = vadd.f32 %v3385_v31, %v3138_v38  ;;  %v3140_v27 = vadd.f32 %v3005_v60, %v20761_v21  ;;  %17782 = vmatmul.mubr.msk.f32.gmra.mxu0 %vm209_vm1, %v21059_v39 }
 0x1f9   : > { %v17530_v53 = vpop.f32.mrf.mxu1  ;;  %17829 = vmatmul.mubr.msk.f32.gmra.mxu1 %vm209_vm1, %v21046_v42  ;;  %v17483_v38 = vpop.f32.mrf.mxu0  ;;  %17784 = vmatprep.mubr.msk.f32.mxu0 %vm209_vm1, %v21063_v29  ;;  %v25439_v42 = vld [vmem:[#allocation31_spill] sm:$0xff] }
 0x1fa   : > { %17831 = vmatprep.mubr.msk.f32.mxu1 %vm209_vm1, %v20748_v13  ;;  %v21066_v62 = vadd.f32 %v17530_v53, %v3141_v33  ;;  %v3143_v31 = vadd.f32 %v17483_v38, %v20774_v22  ;;  %v21077_v13 = vld [vmem:[#allocation2 + $0x180] sm:$0xff]  ;;  %v21081_v53 = vld [vmem:[#allocation2 + $0x190] sm:$0xff] }
 0x1fb   : > { %v3395_v3 = vpop.f32.mrf.mxu1  ;;  %v3015_v21 = vpop.f32.mrf.mxu0 }
 0x1fc   : > { %v21071_v34 = vadd.f32 %v3395_v3, %v3140_v27  ;;  %v3142_v33 = vadd.f32 %v3015_v21, %v20779_v32  ;;  %17785 = vmatmul.mubr.msk.f32.gmra.mxu0 %vm209_vm1, %v21077_v13 }
 0x1fd   : > { %v17533_v46 = vpop.f32.mrf.mxu1  ;;  %17832 = vmatmul.mubr.msk.f32.gmra.mxu1 %vm209_vm1, %v20753_v12  ;;  %v17486_v27 = vpop.f32.mrf.mxu0  ;;  %17787 = vmatprep.mubr.msk.f32.mxu0 %vm209_vm1, %v21081_v53 }
 0x1fe   : > { %17834 = vmatprep.mubr.msk.f32.mxu1 %vm209_vm1, %v20767_v0  ;;  %v21084_v22 = vadd.f32 %v17533_v46, %v3143_v31  ;;  %v3145_v12 = vadd.f32 %v17486_v27, %v20792_v18  ;;  %v21095_v0 = vld [vmem:[#allocation2 + $0x1a0] sm:$0xff]  ;;  %v21099_v31 = vld [vmem:[#allocation2 + $0x1b0] sm:$0xff] }
 0x1ff   : > { %v3405_v60 = vpop.f32.mrf.mxu1  ;;  %v3025_v32 = vpop.f32.mrf.mxu0  ;;  %25438 = vst [vmem:[#allocation60_spill] sm:$0xff] %v21099_v31 }
 0x200   : > { %v21089_v3 = vadd.f32 %v3405_v60, %v3142_v33  ;;  %v3144_v46 = vadd.f32 %v3025_v32, %v20797_v4  ;;  %17788 = vmatmul.mubr.msk.f32.gmra.mxu0 %vm209_vm1, %v21095_v0 }
 0x201   : > { %v17536_v38 = vpop.f32.mrf.mxu1  ;;  %17835 = vmatmul.mubr.msk.f32.gmra.mxu1 %vm209_vm1, %v20771_v10  ;;  %v17489_v33 = vpop.f32.mrf.mxu0  ;;  %17790 = vmatprep.mubr.msk.f32.mxu0 %vm209_vm1, %v21099_v31 }
 0x202   : > { %17837 = vmatprep.mubr.msk.f32.mxu1 %vm209_vm1, %v20785_v6  ;;  %v21102_v18 = vadd.f32 %v17536_v38, %v3145_v12  ;;  %v3147_v10 = vadd.f32 %v17489_v33, %v20808_v25  ;;  %v21113_v6 = vld [vmem:[#allocation2 + $0x1c0] sm:$0xff]  ;;  %v5133_v38 = vld [vmem:[#allocation2 + $0x1f0] sm:$0xff] }
 0x203   : > { %v3415_v21 = vpop.f32.mrf.mxu1  ;;  %v3035_v4 = vpop.f32.mrf.mxu0  ;;  %v21117_v12 = vld [vmem:[#allocation2 + $0x1c1] sm:$0xff] }
 0x204   : > { %v21107_v60 = vadd.f32 %v3415_v21, %v3144_v46  ;;  %25440 = vst [vmem:[#allocation31_spill] sm:$0xff] %v21117_v12  ;;  %v3146_v25 = vadd.f32 %v3035_v4, %v20813_v52  ;;  %17791 = vmatmul.mubr.msk.f32.gmra.mxu0 %vm209_vm1, %v21113_v6 }
 0x205   : > { %v17539_v27 = vpop.f32.mrf.mxu1  ;;  %17838 = vmatmul.mubr.msk.f32.gmra.mxu1 %vm209_vm1, %v25439_v42  ;;  %v17492_v21 = vpop.f32.mrf.mxu0  ;;  %17793 = vmatprep.mubr.msk.f32.mxu0 %vm209_vm1, %v5133_v38 }
 0x206   : > { %17840 = vmatprep.mubr.msk.f32.mxu1 %vm209_vm1, %v20803_v49  ;;  %v21120_v32 = vadd.f32 %v17539_v27, %v3147_v10  ;;  %v3149_v42 = vadd.f32 %v17492_v21, %v20826_v61  ;;  %v21130_v49 = vld [vmem:[#allocation2 + $0x200] sm:$0xff]  ;;  %v21134_v10 = vld [vmem:[#allocation2 + $0x210] sm:$0xff] }
 0x207   : > { %v3425_v46 = vpop.f32.mrf.mxu1  ;;  %v3045_v52 = vpop.f32.mrf.mxu0 }
 0x208   : > { %v21125_v33 = vadd.f32 %v3425_v46, %v3146_v25  ;;  %v3148_v27 = vadd.f32 %v3045_v52, %v20831_v54  ;;  %17794 = vmatmul.mubr.msk.f32.gmra.mxu0 %vm209_vm1, %v21130_v49 }
 0x209   : > { %v17542_v31 = vpop.f32.mrf.mxu1  ;;  %17841 = vmatmul.mubr.msk.f32.gmra.mxu1 %vm209_vm1, %v21117_v12  ;;  %v17495_v25 = vpop.f32.mrf.mxu0  ;;  %17796 = vmatprep.mubr.msk.f32.mxu0 %vm209_vm1, %v21134_v10  ;;  %v25443_v12 = vld [vmem:[#allocation33_spill] sm:$0xff] }
 0x20a   : > { %17843 = vmatprep.mubr.msk.f32.mxu1 %vm209_vm1, %v20818_v23  ;;  %v21137_v4 = vadd.f32 %v17542_v31, %v3149_v42  ;;  %v3151_v46 = vadd.f32 %v17495_v25, %v20844_v1  ;;  %v21148_v23 = vld [vmem:[#allocation2 + $0x220] sm:$0xff]  ;;  %v21152_v31 = vld [vmem:[#allocation2 + $0x230] sm:$0xff] }
 0x20b   : > { %v3435_v61 = vpop.f32.mrf.mxu1  ;;  %v3055_v54 = vpop.f32.mrf.mxu0 }
 0x20c   : > { %v21142_v38 = vadd.f32 %v3435_v61, %v3148_v27  ;;  %v3150_v42 = vadd.f32 %v3055_v54, %v20849_v57  ;;  %17797 = vmatmul.mubr.msk.f32.gmra.mxu0 %vm209_vm1, %v21148_v23 }
 0x20d   : > { %v17545_v21 = vpop.f32.mrf.mxu1  ;;  %17844 = vmatmul.mubr.msk.f32.gmra.mxu1 %vm209_vm1, %v20823_v19  ;;  %v17498_v27 = vpop.f32.mrf.mxu0  ;;  %17799 = vmatprep.mubr.msk.f32.mxu0 %vm209_vm1, %v21152_v31 }
 0x20e   : > { %17846 = vmatprep.mubr.msk.f32.mxu1 %vm209_vm1, %v20837_v58  ;;  %v21155_v1 = vadd.f32 %v17545_v21, %v3151_v46  ;;  %v3153_v19 = vadd.f32 %v17498_v27, %v20862_v8  ;;  %v21166_v58 = vld [vmem:[#allocation2 + $0x240] sm:$0xff]  ;;  %v21170_v46 = vld [vmem:[#allocation2 + $0x250] sm:$0xff] }
 0x20f   : > { %v3445_v52 = vpop.f32.mrf.mxu1  ;;  %v3065_v57 = vpop.f32.mrf.mxu0  ;;  %25441 = vst [vmem:[#allocation61_spill] sm:$0xff] %v21170_v46 }
 0x210   : > { %v21160_v61 = vadd.f32 %v3445_v52, %v3150_v42  ;;  %v3152_v21 = vadd.f32 %v3065_v57, %v20867_v28  ;;  %17800 = vmatmul.mubr.msk.f32.gmra.mxu0 %vm209_vm1, %v21166_v58 }
 0x211   : > { %v17548_v25 = vpop.f32.mrf.mxu1  ;;  %17847 = vmatmul.mubr.msk.f32.gmra.mxu1 %vm209_vm1, %v20841_v14  ;;  %v17501_v42 = vpop.f32.mrf.mxu0  ;;  %17802 = vmatprep.mubr.msk.f32.mxu0 %vm209_vm1, %v21170_v46 }
 0x212   : > { %17849 = vmatprep.mubr.msk.f32.mxu1 %vm209_vm1, %v20855_v40  ;;  %v21173_v8 = vadd.f32 %v17548_v25, %v3153_v19  ;;  %v3155_v14 = vadd.f32 %v17501_v42, %v20878_v20  ;;  %v21184_v40 = vld [vmem:[#allocation2 + $0x260] sm:$0xff]  ;;  %v5141_v25 = vld [vmem:[#allocation2 + $0x290] sm:$0xff] }
 0x213   : > { %v3455_v54 = vpop.f32.mrf.mxu1  ;;  %25444 = vst [vmem:[#allocation33_spill] sm:$0xff] %v21184_v40  ;;  %v3075_v28 = vpop.f32.mrf.mxu0  ;;  %v21188_v19 = vld [vmem:[#allocation2 + $0x261] sm:$0xff] }
 0x214   : > { %v21178_v52 = vadd.f32 %v3455_v54, %v3152_v21  ;;  %25445 = vst [vmem:[#allocation63_spill] sm:$0xff] %v21188_v19  ;;  %v3154_v20 = vadd.f32 %v3075_v28, %v20883_v24  ;;  %17803 = vmatmul.mubr.msk.f32.gmra.mxu0 %vm209_vm1, %v21184_v40  ;;  %v25450_v28 = vld [vmem:[#allocation42_spill] sm:$0xff] }
 0x215   : > { %v17551_v27 = vpop.f32.mrf.mxu1  ;;  %17850 = vmatmul.mubr.msk.f32.gmra.mxu1 %vm209_vm1, %v25443_v12  ;;  %v17504_v54 = vpop.f32.mrf.mxu0  ;;  %v25447_v12 = vld [vmem:[#allocation39_spill] sm:$0xff]  ;;  %17805 = vmatprep.mubr.msk.f32.mxu0 %vm209_vm1, %v5141_v25 }
 0x216   : > { %25442 = vst [vmem:[#allocation62_spill] sm:$0xff] %v21178_v52  ;;  %17852 = vmatprep.mubr.msk.f32.mxu1 %vm209_vm1, %v20873_v63  ;;  %v21191_v57 = vadd.f32 %v17551_v27, %v3155_v14  ;;  %v3157_v42 = vadd.f32 %v17504_v54, %v25447_v12  ;;  %v21201_v63 = vld [vmem:[#allocation2 + $0x2a0] sm:$0xff]  ;;  %v25448_v14 = vld [vmem:[#allocation35_spill] sm:$0xff]  ;;  %v21205_v27 = vld [vmem:[#allocation2 + $0x2b0] sm:$0xff] }
 0x217   : > { %v3465_v21 = vpop.f32.mrf.mxu1  ;;  %v3085_v24 = vpop.f32.mrf.mxu0  ;;  %25449 = vst [vmem:[#allocation39_spill] sm:$0xff] %v21205_v27 }
 0x218   : > { %25446 = vst [vmem:[#allocation64_spill] sm:$0xff] %v21191_v57  ;;  %v21196_v46 = vadd.f32 %v3465_v21, %v3154_v20  ;;  %v3156_v40 = vadd.f32 %v3085_v24, %v25450_v28  ;;  %17806 = vmatmul.mubr.msk.f32.gmra.mxu0 %vm209_vm1, %v21201_v63 }
 0x219   : > { %v17554_v52 = vpop.f32.mrf.mxu1  ;;  %17853 = vmatmul.mubr.msk.f32.gmra.mxu1 %vm209_vm1, %v21188_v19  ;;  %v17507_v21 = vpop.f32.mrf.mxu0  ;;  %v25452_v19 = vld [vmem:[#allocation37_spill] sm:$0xff]  ;;  %17808 = vmatprep.mubr.msk.f32.mxu0 %vm209_vm1, %v21205_v27 }
 0x21a   : > { %17855 = vmatprep.mubr.msk.f32.mxu1 %vm209_vm1, %v25448_v14  ;;  %v21208_v57 = vadd.f32 %v17554_v52, %v3157_v42  ;;  %v3159_v54 = vadd.f32 %v17507_v21, %v20918_v15  ;;  %v21221_v52 = vld [vmem:[#allocation2 + $0x2d0] sm:$0xff] }
 0x21b   : > { %v3475_v20 = vpop.f32.mrf.mxu1  ;;  %v3095_v14 = vpop.f32.mrf.mxu0  ;;  %25453 = vst [vmem:[#allocation42_spill] sm:$0xff] %v21221_v52  ;;  %v25454_v42 = vld [vmem:[#allocation46_spill] sm:$0xff] }
 0x21c   : > { %v21213_v25 = vadd.f32 %v3475_v20, %v3156_v40  ;;  %v3158_v24 = vadd.f32 %v3095_v14, %v25454_v42  ;;  %v25455_v20 = vld [vmem:[#allocation7_spill] sm:$0xff] }
 0x21d   : > { %v17557_v12 = vpop.f32.mrf.mxu1  ;;  %17856 = vmatmul.mubr.msk.f32.gmra.mxu1 %vm209_vm1, %v25452_v19  ;;  %v17510_v40 = vpop.f32.mrf.mxu0  ;;  %17809 = vmatmul.mubr.msk.f32.gmra.mxu0 %vm209_vm1, %v25455_v20 }
 0x21e   : > { %25451 = vst [vmem:[#allocation35_spill] sm:$0xff] %v21213_v25  ;;  %17858 = vmatprep.mubr.msk.f32.mxu1 %vm209_vm1, %v20909_v59  ;;  %v21224_v28 = vadd.f32 %v17557_v12, %v3159_v54  ;;  %v3161_v19 = vadd.f32 %v17510_v40, %v20940_v36  ;;  %v25456_v25 = vld [vmem:[#allocation44_spill] sm:$0xff]  ;;  %17811 = vmatprep.mubr.msk.f32.mxu0 %vm209_vm1, %v21221_v52  ;;  %v25457_v54 = vld [vmem:[#allocation15_spill] sm:$0xff]  ;;  %v25458_v36 = vld [vmem:[#allocation21_spill] sm:$0xff] }
 0x21f   : > { %v3485_v15 = vpop.f32.mrf.mxu1  ;;  %v3105_v59 = vpop.f32.mrf.mxu0  ;;  %v25459_v40 = vld [vmem:[#allocation48_spill] sm:$0xff]  ;;  %v25460_v52 = vld [vmem:[#allocation49_spill] sm:$0xff] }
 0x220   : > { %v21229_v21 = vadd.f32 %v3485_v15, %v3158_v24  ;;  %v3160_v12 = vadd.f32 %v3105_v59, %v25457_v54 }
 0x221   : > { %v17560_v27 = vpop.f32.mrf.mxu1  ;;  %17859 = vmatmul.mubr.msk.f32.gmra.mxu1 %vm209_vm1, %v25456_v25  ;;  %v17513_v20 = vpop.f32.mrf.mxu0  ;;  %17812 = vmatmul.mubr.msk.f32.gmra.mxu0 %vm209_vm1, %v25458_v36  ;;  %v21267_v36 = vld [vmem:[#allocation2 + $0xc2] sm:$0xff] }
 0x222   : > { %17861 = vmatprep.mubr.msk.f32.mxu1 %vm209_vm1, %v20931_v51  ;;  %v21238_v14 = vadd.f32 %v17560_v27, %v3161_v19  ;;  %v3163_v24 = vadd.f32 %v17513_v20, %v20960_v11  ;;  %17814 = vmatprep.mubr.msk.f32.mxu0 %vm209_vm1, %v25460_v52  ;;  %v21249_v51 = vld [vmem:[#allocation2 + $0x300] sm:$0xff] }
 0x223   : > { %v3495_v42 = vpop.f32.mrf.mxu1  ;;  %v3115_v27 = vpop.f32.mrf.mxu0  ;;  %v21253_v19 = vld [vmem:[#allocation2 + $0x301] sm:$0xff] }
 0x224   : > { %v21243_v15 = vadd.f32 %v3495_v42, %v3160_v12  ;;  %25461 = vst [vmem:[#allocation37_spill] sm:$0xff] %v21253_v19  ;;  %v3162_v59 = vadd.f32 %v3115_v27, %v20965_v47 }
 0x225   : > { %v17563_v25 = vpop.f32.mrf.mxu1  ;;  %17862 = vmatmul.mubr.msk.f32.gmra.mxu1 %vm209_vm1, %v25459_v40  ;;  %v17516_v12 = vpop.f32.mrf.mxu0  ;;  %17815 = vmatmul.mubr.msk.f32.gmra.mxu0 %vm209_vm1, %v21249_v51  ;;  %v21274_v40 = vld [vmem:[#allocation2 + $0xd2] sm:$0xff] }
 0x226   : > { %17864 = vmatprep.mubr.msk.f32.mxu1 %vm209_vm1, %v20953_v17  ;;  %v21256_v11 = vadd.f32 %v17563_v25, %v3163_v24  ;;  %v3165_v42 = vadd.f32 %v17516_v12, %v20975_v16  ;;  %v25462_v17 = vld [vmem:[#allocation29_spill] sm:$0xff] }
 0x227   : > { %v3505_v54 = vpop.f32.mrf.mxu1  ;;  %17869 = vmatprep.mubr.msk.f32.mxu0 %vm209_vm1, %v25462_v17  ;;  %v3125_v47 = vpop.f32.mrf.mxu0  ;;  %v21290_v12 = vld [vmem:[#allocation2 + $0xe2] sm:$0xff] }
 0x228   : > { %v21261_v52 = vadd.f32 %v3505_v54, %v3162_v59  ;;  %v3164_v24 = vadd.f32 %v3125_v47, %v20986_v50  ;;  %v21281_v59 = vld [vmem:[%s25183_s1 + $0x24] sm:$0x3] }
 0x229   : > { %v17566_v20 = vpop.f32.mrf.mxu1  ;;  %17865 = vmatmul.mubr.msk.f32.gmra.mxu1 %vm209_vm1, %v21253_v19  ;;  %v17571_v27 = vpop.f32.mrf.mxu0  ;;  %17870 = vmatmul.mubr.msk.f32.vlgmr.msra.gmra.mxu0 %vm209_vm1, %v21267_v36  ;;  %v25465_v19 = vld [vmem:[#allocation32_spill] sm:$0xff] }
 0x22a   : > { %17919 = vmatprep.mubr.msk.f32.mxu1 %vm209_vm1, %v20970_v37  ;;  %v21272_v25 = vadd.f32 %v17566_v20, %v3165_v42  ;;  %v3915_v37 = vadd.f32 %v17571_v27, %v21007_v55  ;;  %17968 = vmatpush3.msk.msra.mxu0 %vm661_vm0, %v20984_v30  ;;  %v21295_v42 = vld [vmem:[%s25183_s1 + $0x26] sm:$0x3]  ;;  %v21301_v55 = vld [vmem:[#allocation2 + $0xf2] sm:$0xff] }
 0x22b   : > { %v3515_v16 = vpop.f32.mrf.mxu1  ;;  %v3755_v20 = vpop.f32.mrf.mxu0  ;;  %17872 = vmatprep.mubr.msk.f32.mxu0 %vm209_vm1, %v21274_v40  ;;  %18067 = vmatprep.subr.msk.mxu0 %vm661_vm0, %v21281_v59  ;;  %v21325_v27 = vld [vmem:[#allocation2 + $0x112] sm:$0xff] }
 0x22c   : > { %v21283_v54 = vadd.f32 %v3515_v16, %v3164_v24  ;;  %v3914_v30 = vadd.f32 %v3755_v20, %v21018_v41 }
 0x22d   : > { %v17621_v50 = vpop.f32.mrf.mxu1  ;;  %17920 = vmatmul.mubr.msk.f32.vlgmr.msra.gmra.mxu1 %vm209_vm1, %v20977_v5  ;;  %v17574_v47 = vpop.f32.mrf.mxu0  ;;  %17873 = vmatmul.mubr.msk.f32.gmra.mxu0 %vm209_vm1, %v21290_v12 }
 0x22e   : > { %17922 = vmatprep.mubr.msk.f32.mxu1 %vm209_vm1, %v20993_v35  ;;  %v21304_v17 = vadd.f32 %v17621_v50, %v3915_v37  ;;  %18018 = vmatpush3.msk.msra.mxu1 %vm661_vm0, %v20998_v7  ;;  %v3917_v35 = vadd.f32 %v17574_v47, %v21031_v43  ;;  %v21321_v7 = vld [vmem:[#allocation2 + $0x102] sm:$0xff]  ;;  %v6295_v47 = vld [vmem:[#allocation2 + $0x130] sm:$0xff] }
 0x22f   : > { %v4146_v5 = vpop.f32.mrf.mxu1  ;;  %18117 = vmatprep.subr.msk.mxu1 %vm661_vm0, %v21295_v42  ;;  %17875 = vmatprep.mubr.msk.f32.mxu0 %vm209_vm1, %v21301_v55  ;;  %v3765_v16 = vpop.f32.mrf.mxu0 }
 0x230   : > { %v21315_v24 = vadd.f32 %v4146_v5, %v3914_v30  ;;  %v3916_v37 = vadd.f32 %v3765_v16, %v21036_v2 }
 0x231   : > { %v17624_v41 = vpop.f32.mrf.mxu1  ;;  %17923 = vmatmul.mubr.msk.f32.gmra.mxu1 %vm209_vm1, %v21004_v56  ;;  %v17577_v20 = vpop.f32.mrf.mxu0  ;;  %17876 = vmatmul.mubr.msk.f32.gmra.mxu0 %vm209_vm1, %v21321_v7 }
 0x232   : > { %17925 = vmatprep.mubr.msk.f32.mxu1 %vm209_vm1, %v21024_v44  ;;  %v21328_v43 = vadd.f32 %v17624_v41, %v3917_v35  ;;  %v3919_v56 = vadd.f32 %v17577_v20, %v21049_v9  ;;  %17878 = vmatprep.mubr.msk.f32.mxu0 %vm209_vm1, %v21325_v27  ;;  %v21339_v44 = vld [vmem:[#allocation2 + $0x122] sm:$0xff]  ;;  %v25463_v20 = vld [vmem:[#allocation30_spill] sm:$0xff] }
 0x233   : > { %v4156_v50 = vpop.f32.mrf.mxu1  ;;  %v3775_v2 = vpop.f32.mrf.mxu0 }
 0x234   : > { %v21333_v30 = vadd.f32 %v4156_v50, %v3916_v37  ;;  %v3918_v35 = vadd.f32 %v3775_v2, %v21054_v45 }
 0x235   : > { %v17627_v5 = vpop.f32.mrf.mxu1  ;;  %17926 = vmatmul.mubr.msk.f32.gmra.mxu1 %vm209_vm1, %v21028_v48  ;;  %v17580_v16 = vpop.f32.mrf.mxu0  ;;  %17879 = vmatmul.mubr.msk.f32.gmra.mxu0 %vm209_vm1, %v21339_v44 }
 0x236   : > { %17928 = vmatprep.mubr.msk.f32.mxu1 %vm209_vm1, %v21042_v26  ;;  %v21344_v41 = vadd.f32 %v17627_v5, %v3919_v56  ;;  %v3921_v48 = vadd.f32 %v17580_v16, %v21066_v62  ;;  %17881 = vmatprep.mubr.msk.f32.mxu0 %vm209_vm1, %v25463_v20  ;;  %v21354_v26 = vld [vmem:[#allocation2 + $0x162] sm:$0xff]  ;;  %v21358_v56 = vld [vmem:[#allocation2 + $0x172] sm:$0xff] }
 0x237   : > { %v4166_v9 = vpop.f32.mrf.mxu1  ;;  %v3785_v45 = vpop.f32.mrf.mxu0 }
 0x238   : > { %v21349_v37 = vadd.f32 %v4166_v9, %v3918_v35  ;;  %v3920_v5 = vadd.f32 %v3785_v45, %v21071_v34 }
 0x239   : > { %v17630_v50 = vpop.f32.mrf.mxu1  ;;  %17929 = vmatmul.mubr.msk.f32.gmra.mxu1 %vm209_vm1, %v6295_v47  ;;  %v17583_v35 = vpop.f32.mrf.mxu0  ;;  %17882 = vmatmul.mubr.msk.f32.gmra.mxu0 %vm209_vm1, %v21354_v26 }
 0x23a   : > { %17931 = vmatprep.mubr.msk.f32.mxu1 %vm209_vm1, %v21059_v39  ;;  %v21361_v2 = vadd.f32 %v17630_v50, %v3921_v48  ;;  %v3923_v47 = vadd.f32 %v17583_v35, %v21084_v22  ;;  %17884 = vmatprep.mubr.msk.f32.mxu0 %vm209_vm1, %v21358_v56  ;;  %v21372_v39 = vld [vmem:[#allocation2 + $0x182] sm:$0xff]  ;;  %v21376_v48 = vld [vmem:[#allocation2 + $0x192] sm:$0xff] }
 0x23b   : > { %v4176_v62 = vpop.f32.mrf.mxu1  ;;  %v3795_v34 = vpop.f32.mrf.mxu0  ;;  %v21394_v35 = vld [vmem:[#allocation2 + $0x1b2] sm:$0xff] }
 0x23c   : > { %v21366_v9 = vadd.f32 %v4176_v62, %v3920_v5  ;;  %v3922_v50 = vadd.f32 %v3795_v34, %v21089_v3 }
 0x23d   : > { %v17633_v16 = vpop.f32.mrf.mxu1  ;;  %17932 = vmatmul.mubr.msk.f32.gmra.mxu1 %vm209_vm1, %v21063_v29  ;;  %v17586_v45 = vpop.f32.mrf.mxu0  ;;  %17885 = vmatmul.mubr.msk.f32.gmra.mxu0 %vm209_vm1, %v21372_v39 }
 0x23e   : > { %17934 = vmatprep.mubr.msk.f32.mxu1 %vm209_vm1, %v21077_v13  ;;  %v21379_v22 = vadd.f32 %v17633_v16, %v3923_v47  ;;  %v3925_v29 = vadd.f32 %v17586_v45, %v21102_v18  ;;  %17887 = vmatprep.mubr.msk.f32.mxu0 %vm209_vm1, %v21376_v48  ;;  %v21390_v13 = vld [vmem:[#allocation2 + $0x1a2] sm:$0xff] }
 0x23f   : > { %v4186_v20 = vpop.f32.mrf.mxu1  ;;  %v3805_v3 = vpop.f32.mrf.mxu0  ;;  %v25464_v45 = vld [vmem:[#allocation60_spill] sm:$0xff] }
 0x240   : > { %v21384_v5 = vadd.f32 %v4186_v20, %v3922_v50  ;;  %v3924_v47 = vadd.f32 %v3805_v3, %v21107_v60 }
 0x241   : > { %v17636_v62 = vpop.f32.mrf.mxu1  ;;  %17935 = vmatmul.mubr.msk.f32.gmra.mxu1 %vm209_vm1, %v21081_v53  ;;  %v17589_v34 = vpop.f32.mrf.mxu0  ;;  %17888 = vmatmul.mubr.msk.f32.gmra.mxu0 %vm209_vm1, %v21390_v13 }
 0x242   : > { %17937 = vmatprep.mubr.msk.f32.mxu1 %vm209_vm1, %v21095_v0  ;;  %v21397_v18 = vadd.f32 %v17636_v62, %v3925_v29  ;;  %v3927_v53 = vadd.f32 %v17589_v34, %v21120_v32  ;;  %17890 = vmatprep.mubr.msk.f32.mxu0 %vm209_vm1, %v21394_v35  ;;  %v21408_v0 = vld [vmem:[#allocation2 + $0x1c2] sm:$0xff]  ;;  %v6303_v29 = vld [vmem:[#allocation2 + $0x1d0] sm:$0xff] }
 0x243   : > { %v4196_v16 = vpop.f32.mrf.mxu1  ;;  %v3815_v60 = vpop.f32.mrf.mxu0 }
 0x244   : > { %v21402_v50 = vadd.f32 %v4196_v16, %v3924_v47  ;;  %v3926_v62 = vadd.f32 %v3815_v60, %v21125_v33 }
 0x245   : > { %v17639_v20 = vpop.f32.mrf.mxu1  ;;  %17938 = vmatmul.mubr.msk.f32.gmra.mxu1 %vm209_vm1, %v25464_v45  ;;  %v17592_v47 = vpop.f32.mrf.mxu0  ;;  %17891 = vmatmul.mubr.msk.f32.gmra.mxu0 %vm209_vm1, %v21408_v0 }
 0x246   : > { %17940 = vmatprep.mubr.msk.f32.mxu1 %vm209_vm1, %v21113_v6  ;;  %v21413_v3 = vadd.f32 %v17639_v20, %v3927_v53  ;;  %v3929_v16 = vadd.f32 %v17592_v47, %v21137_v4  ;;  %17893 = vmatprep.mubr.msk.f32.mxu0 %vm209_vm1, %v25465_v19  ;;  %v21423_v6 = vld [vmem:[#allocation2 + $0x202] sm:$0xff]  ;;  %v21427_v53 = vld [vmem:[#allocation2 + $0x212] sm:$0xff] }
 0x247   : > { %v4206_v32 = vpop.f32.mrf.mxu1  ;;  %v3825_v33 = vpop.f32.mrf.mxu0  ;;  %v21445_v47 = vld [vmem:[#allocation2 + $0x232] sm:$0xff] }
 0x248   : > { %v21418_v34 = vadd.f32 %v4206_v32, %v3926_v62  ;;  %v3928_v20 = vadd.f32 %v3825_v33, %v21142_v38  ;;  %25466 = vst [vmem:[#allocation46_spill] sm:$0xff] %v21445_v47 }
 0x249   : > { %v17642_v45 = vpop.f32.mrf.mxu1  ;;  %17941 = vmatmul.mubr.msk.f32.gmra.mxu1 %vm209_vm1, %v6303_v29  ;;  %v17595_v62 = vpop.f32.mrf.mxu0  ;;  %17894 = vmatmul.mubr.msk.f32.gmra.mxu0 %vm209_vm1, %v21423_v6 }
 0x24a   : > { %17943 = vmatprep.mubr.msk.f32.mxu1 %vm209_vm1, %v21130_v49  ;;  %v21430_v60 = vadd.f32 %v17642_v45, %v3929_v16  ;;  %v3931_v29 = vadd.f32 %v17595_v62, %v21155_v1  ;;  %17896 = vmatprep.mubr.msk.f32.mxu0 %vm209_vm1, %v21427_v53  ;;  %v21441_v49 = vld [vmem:[#allocation2 + $0x222] sm:$0xff]  ;;  %v21463_v62 = vld [vmem:[#allocation2 + $0x252] sm:$0xff] }
 0x24b   : > { %v4216_v4 = vpop.f32.mrf.mxu1  ;;  %v3835_v38 = vpop.f32.mrf.mxu0  ;;  %25469 = vst [vmem:[#allocation15_spill] sm:$0xff] %v21463_v62 }
 0x24c   : > { %v21435_v19 = vadd.f32 %v4216_v4, %v3928_v20  ;;  %v3930_v16 = vadd.f32 %v3835_v38, %v21160_v61 }
 0x24d   : > { %v17645_v32 = vpop.f32.mrf.mxu1  ;;  %17944 = vmatmul.mubr.msk.f32.gmra.mxu1 %vm209_vm1, %v21134_v10  ;;  %v17598_v33 = vpop.f32.mrf.mxu0  ;;  %17897 = vmatmul.mubr.msk.f32.gmra.mxu0 %vm209_vm1, %v21441_v49 }
 0x24e   : > { %17946 = vmatprep.mubr.msk.f32.mxu1 %vm209_vm1, %v21148_v23  ;;  %v21448_v1 = vadd.f32 %v17645_v32, %v3931_v29  ;;  %v3933_v10 = vadd.f32 %v17598_v33, %v21173_v8  ;;  %17899 = vmatprep.mubr.msk.f32.mxu0 %vm209_vm1, %v21445_v47  ;;  %v21459_v23 = vld [vmem:[#allocation2 + $0x242] sm:$0xff]  ;;  %v25470_v29 = vld [vmem:[#allocation62_spill] sm:$0xff] }
 0x24f   : > { %v4226_v45 = vpop.f32.mrf.mxu1  ;;  %25468 = vst [vmem:[#allocation44_spill] sm:$0xff] %v21459_v23  ;;  %v3845_v61 = vpop.f32.mrf.mxu0 }
 0x250   : > { %v21453_v20 = vadd.f32 %v4226_v45, %v3930_v16  ;;  %v3932_v32 = vadd.f32 %v3845_v61, %v25470_v29  ;;  %v6311_v61 = vld [vmem:[#allocation2 + $0x270] sm:$0xff] }
 0x251   : > { %v17648_v4 = vpop.f32.mrf.mxu1  ;;  %17947 = vmatmul.mubr.msk.f32.gmra.mxu1 %vm209_vm1, %v21152_v31  ;;  %v17601_v16 = vpop.f32.mrf.mxu0  ;;  %17900 = vmatmul.mubr.msk.f32.gmra.mxu0 %vm209_vm1, %v21459_v23  ;;  %v25471_v31 = vld [vmem:[#allocation64_spill] sm:$0xff] }
 0x252   : > { %25467 = vst [vmem:[#allocation7_spill] sm:$0xff] %v21453_v20  ;;  %17949 = vmatprep.mubr.msk.f32.mxu1 %vm209_vm1, %v21166_v58  ;;  %v21466_v8 = vadd.f32 %v17648_v4, %v3933_v10  ;;  %v3935_v45 = vadd.f32 %v17601_v16, %v25471_v31  ;;  %v25472_v20 = vld [vmem:[#allocation61_spill] sm:$0xff]  ;;  %17902 = vmatprep.mubr.msk.f32.mxu0 %vm209_vm1, %v21463_v62  ;;  %v25475_v62 = vld [vmem:[#allocation50_spill] sm:$0xff] }
 0x253   : > { %v4236_v38 = vpop.f32.mrf.mxu1  ;;  %v21477_v58 = vld [vmem:[#allocation2 + $0x262] sm:$0xff]  ;;  %v3855_v10 = vpop.f32.mrf.mxu0 }
 0x254   : > { %v21471_v33 = vadd.f32 %v4236_v38, %v3932_v32  ;;  %25473 = vst [vmem:[#allocation21_spill] sm:$0xff] %v21477_v58  ;;  %v25474_v4 = vld [vmem:[#allocation33_spill] sm:$0xff]  ;;  %v3934_v29 = vadd.f32 %v3855_v10, %v21196_v46  ;;  %v25476_v46 = vld [vmem:[#allocation35_spill] sm:$0xff] }
 0x255   : > { %v17651_v47 = vpop.f32.mrf.mxu1  ;;  %17950 = vmatmul.mubr.msk.f32.gmra.mxu1 %vm209_vm1, %v25472_v20  ;;  %v17604_v38 = vpop.f32.mrf.mxu0  ;;  %17903 = vmatmul.mubr.msk.f32.gmra.mxu0 %vm209_vm1, %v21477_v58  ;;  %v21497_v58 = vld [vmem:[#allocation2 + $0x2c0] sm:$0xff] }
 0x256   : > { %17952 = vmatprep.mubr.msk.f32.mxu1 %vm209_vm1, %v25474_v4  ;;  %v21482_v23 = vadd.f32 %v17651_v47, %v3935_v45  ;;  %v3937_v20 = vadd.f32 %v17604_v38, %v21208_v57  ;;  %17905 = vmatprep.mubr.msk.f32.mxu0 %vm209_vm1, %v25475_v62  ;;  %25477 = vst [vmem:[#allocation48_spill] sm:$0xff] %v21497_v58  ;;  %v25479_v38 = vld [vmem:[#allocation39_spill] sm:$0xff] }
 0x257   : > { %v4246_v32 = vpop.f32.mrf.mxu1  ;;  %v3865_v4 = vpop.f32.mrf.mxu0 }
 0x258   : > { %v21487_v16 = vadd.f32 %v4246_v32, %v3934_v29  ;;  %v3936_v47 = vadd.f32 %v3865_v4, %v25476_v46  ;;  %v25478_v29 = vld [vmem:[#allocation40_spill] sm:$0xff] }
 0x259   : > { %v17654_v31 = vpop.f32.mrf.mxu1  ;;  %17953 = vmatmul.mubr.msk.f32.gmra.mxu1 %vm209_vm1, %v6311_v61  ;;  %v17607_v57 = vpop.f32.mrf.mxu0  ;;  %17906 = vmatmul.mubr.msk.f32.gmra.mxu0 %vm209_vm1, %v25478_v29  ;;  %v21513_v29 = vld [vmem:[#allocation2 + $0x2e0] sm:$0xff] }
 0x25a   : > { %17955 = vmatprep.mubr.msk.f32.mxu1 %vm209_vm1, %v21201_v63  ;;  %v21495_v45 = vadd.f32 %v17654_v31, %v3937_v20  ;;  %v3939_v61 = vadd.f32 %v17607_v57, %v21224_v28  ;;  %v25480_v63 = vld [vmem:[#allocation43_spill] sm:$0xff]  ;;  %25481 = vst [vmem:[#allocation49_spill] sm:$0xff] %v21513_v29 }
 0x25b   : > { %v4256_v10 = vpop.f32.mrf.mxu1  ;;  %17908 = vmatprep.mubr.msk.f32.mxu0 %vm209_vm1, %v25480_v63  ;;  %v3875_v20 = vpop.f32.mrf.mxu0  ;;  %v25483_v63 = vld [vmem:[#allocation42_spill] sm:$0xff] }
 0x25c   : > { %v21502_v32 = vadd.f32 %v4256_v10, %v3936_v47  ;;  %v3938_v31 = vadd.f32 %v3875_v20, %v21229_v21  ;;  %v25482_v47 = vld [vmem:[#allocation45_spill] sm:$0xff] }
 0x25d   : > { %v17657_v62 = vpop.f32.mrf.mxu1  ;;  %17956 = vmatmul.mubr.msk.f32.gmra.mxu1 %vm209_vm1, %v25479_v38  ;;  %v17610_v28 = vpop.f32.mrf.mxu0  ;;  %17909 = vmatmul.mubr.msk.f32.gmra.mxu0 %vm209_vm1, %v25482_v47 }
 0x25e   : > { %17958 = vmatprep.mubr.msk.f32.mxu1 %vm209_vm1, %v21497_v58  ;;  %v21511_v4 = vadd.f32 %v17657_v62, %v3939_v61  ;;  %v3941_v10 = vadd.f32 %v17610_v28, %v21238_v14  ;;  %v25484_v58 = vld [vmem:[#allocation47_spill] sm:$0xff]  ;;  %v21526_v61 = vld [vmem:[#allocation2 + $0x2f0] sm:$0xff] }
 0x25f   : > { %v4266_v46 = vpop.f32.mrf.mxu1  ;;  %17911 = vmatprep.mubr.msk.f32.mxu0 %vm209_vm1, %v25484_v58  ;;  %v3885_v21 = vpop.f32.mrf.mxu0  ;;  %25485 = vst [vmem:[#allocation29_spill] sm:$0xff] %v21526_v61 }
 0x260   : > { %v21518_v57 = vadd.f32 %v4266_v46, %v3938_v31  ;;  %v3940_v62 = vadd.f32 %v3885_v21, %v21243_v15  ;;  %v25486_v46 = vld [vmem:[#allocation12_spill] sm:$0xff] }
 0x261   : > { %v17660_v38 = vpop.f32.mrf.mxu1  ;;  %17959 = vmatmul.mubr.msk.f32.gmra.mxu1 %vm209_vm1, %v25483_v63  ;;  %v17613_v31 = vpop.f32.mrf.mxu0  ;;  %17912 = vmatmul.mubr.msk.f32.gmra.mxu0 %vm209_vm1, %v25486_v46  ;;  %v25487_v63 = vld [vmem:[#allocation58_spill] sm:$0xff] }
 0x262   : > { %17961 = vmatprep.mubr.msk.f32.mxu1 %vm209_vm1, %v21513_v29  ;;  %v21529_v20 = vadd.f32 %v17660_v38, %v3941_v10  ;;  %v3943_v28 = vadd.f32 %v17613_v31, %v21256_v11  ;;  %17914 = vmatprep.mubr.msk.f32.mxu0 %vm209_vm1, %v25487_v63  ;;  %v21540_v29 = vld [vmem:[#allocation2 + $0x302] sm:$0xff]  ;;  %v6319_v10 = vld [vmem:[#allocation2 + $0x310] sm:$0xff] }
 0x263   : > { %v4276_v14 = vpop.f32.mrf.mxu1  ;;  %25488 = vst [vmem:[#allocation30_spill] sm:$0xff] %v21540_v29  ;;  %v3895_v15 = vpop.f32.mrf.mxu0  ;;  %v6678_v38 = vld [vmem:[#allocation2 + $0xc1] sm:$0xff] }
 0x264   : > { %v21534_v47 = vadd.f32 %v4276_v14, %v3940_v62  ;;  %v3942_v21 = vadd.f32 %v3895_v15, %v21261_v52  ;;  %v6680_v15 = vld [vmem:[#allocation2 + $0xe1] sm:$0xff] }
 0x265   : > { %v17663_v58 = vpop.f32.mrf.mxu1  ;;  %17962 = vmatmul.mubr.msk.f32.gmra.mxu1 %vm209_vm1, %v21526_v61  ;;  %v17616_v14 = vpop.f32.mrf.mxu0  ;;  %17915 = vmatmul.mubr.msk.f32.gmra.mxu0 %vm209_vm1, %v21540_v29 }
 0x266   : > { %17964 = vmatprep.mubr.msk.f32.mxu1 %vm209_vm1, %v21249_v51  ;;  %v21545_v11 = vadd.f32 %v17663_v58, %v3943_v28  ;;  %v3945_v31 = vadd.f32 %v17616_v14, %v21272_v25  ;;  %17969 = vmatprep.mubr.msk.f32.mxu0 %vm209_vm1, %v6678_v38  ;;  %v6679_v51 = vld [vmem:[#allocation2 + $0xd1] sm:$0xff]  ;;  %v21563_v25 = vld [vmem:[%s25183_s1 + $0x28] sm:$0x3] }
 0x267   : > { %v4286_v62 = vpop.f32.mrf.mxu1  ;;  %v3905_v61 = vpop.f32.mrf.mxu0 }
 0x268   : > { %v21550_v46 = vadd.f32 %v4286_v62, %v3942_v21  ;;  %v3944_v52 = vadd.f32 %v3905_v61, %v21283_v54  ;;  %v6681_v54 = vld [vmem:[#allocation2 + $0xf1] sm:$0xff]  ;;  %v21575_v61 = vld [vmem:[%s25183_s1 + $0x2a] sm:$0x3] }
 0x269   : > { %v17666_v63 = vpop.f32.mrf.mxu1  ;;  %17965 = vmatmul.mubr.msk.f32.gmra.mxu1 %vm209_vm1, %v6319_v10  ;;  %v17671_v29 = vpop.f32.mrf.mxu0  ;;  %17970 = vmatmul.mubr.msk.f32.vlgmr.msra.gmra.mxu0 %vm209_vm1, %v6679_v51 }
 0x26a   : > { %18019 = vmatprep.mubr.msk.f32.mxu1 %vm209_vm1, %v21267_v36  ;;  %v21557_v28 = vadd.f32 %v17666_v63, %v3945_v31  ;;  %v4696_v38 = vadd.f32 %v17671_v29, %v21304_v17  ;;  %18068 = vmatpush3.msk.msra.mxu0 %vm661_vm0, %v21281_v59  ;;  %v6682_v17 = vld [vmem:[#allocation2 + $0x101] sm:$0xff] }
 0x26b   : > { %v4296_v58 = vpop.f32.mrf.mxu1  ;;  %v4536_v21 = vpop.f32.mrf.mxu0  ;;  %17972 = vmatprep.mubr.msk.f32.mxu0 %vm209_vm1, %v6680_v15  ;;  %18167 = vmatprep.subr.msk.mxu0 %vm661_vm0, %v21563_v25 }
 0x26c   : > { %v21565_v10 = vadd.f32 %v4296_v58, %v3944_v52  ;;  %v4695_v29 = vadd.f32 %v4536_v21, %v21315_v24 }
 0x26d   : > { %v17721_v36 = vpop.f32.mrf.mxu1  ;;  %18020 = vmatmul.mubr.msk.f32.vlgmr.msra.gmra.mxu1 %vm209_vm1, %v21274_v40  ;;  %v17674_v40 = vpop.f32.mrf.mxu0  ;;  %17973 = vmatmul.mubr.msk.f32.gmra.mxu0 %vm209_vm1, %v6681_v54  ;;  %v21611_v54 = vld [vmem:[#allocation2 + $0x161] sm:$0xff] }
 0x26e   : > { %18022 = vmatprep.mubr.msk.f32.mxu1 %vm209_vm1, %v21290_v12  ;;  %v21581_v59 = vadd.f32 %v17721_v36, %v4696_v38  ;;  %18118 = vmatpush3.msk.msra.mxu1 %vm661_vm0, %v21295_v42  ;;  %v4698_v12 = vadd.f32 %v17674_v40, %v21328_v43  ;;  %v6683_v42 = vld [vmem:[#allocation2 + $0x111] sm:$0xff] }
 0x26f   : > { %v4926_v62 = vpop.f32.mrf.mxu1  ;;  %18217 = vmatprep.subr.msk.mxu1 %vm661_vm0, %v21575_v61  ;;  %17975 = vmatprep.mubr.msk.f32.mxu0 %vm209_vm1, %v6682_v17  ;;  %v4546_v31 = vpop.f32.mrf.mxu0  ;;  %v25489_v38 = vld [vmem:[#allocation59_spill] sm:$0xff] }
 0x270   : > { %v21591_v14 = vadd.f32 %v4926_v62, %v4695_v29  ;;  %v4697_v63 = vadd.f32 %v4546_v31, %v21333_v30  ;;  %v7075_v30 = vld [vmem:[#allocation2 + $0x132] sm:$0xff] }
 0x271   : > { %v17724_v24 = vpop.f32.mrf.mxu1  ;;  %18023 = vmatmul.mubr.msk.f32.gmra.mxu1 %vm209_vm1, %v21301_v55  ;;  %v17677_v58 = vpop.f32.mrf.mxu0  ;;  %17976 = vmatmul.mubr.msk.f32.gmra.mxu0 %vm209_vm1, %v6683_v42 }
 0x272   : > { %18025 = vmatprep.mubr.msk.f32.mxu1 %vm209_vm1, %v21321_v7  ;;  %v21599_v51 = vadd.f32 %v17724_v24, %v4698_v12  ;;  %v4700_v43 = vadd.f32 %v17677_v58, %v21344_v41  ;;  %17978 = vmatprep.mubr.msk.f32.mxu0 %vm209_vm1, %v25489_v38  ;;  %v6685_v7 = vld [vmem:[#allocation2 + $0x131] sm:$0xff] }
 0x273   : > { %v4936_v52 = vpop.f32.mrf.mxu1  ;;  %v4556_v36 = vpop.f32.mrf.mxu0 }
 0x274   : > { %v21603_v15 = vadd.f32 %v4936_v52, %v4697_v63  ;;  %v4699_v21 = vadd.f32 %v4556_v36, %v21349_v37  ;;  %v21627_v37 = vld [vmem:[#allocation2 + $0x181] sm:$0xff] }
 0x275   : > { %v17727_v55 = vpop.f32.mrf.mxu1  ;;  %18026 = vmatmul.mubr.msk.f32.gmra.mxu1 %vm209_vm1, %v21325_v27  ;;  %v17680_v29 = vpop.f32.mrf.mxu0  ;;  %17979 = vmatmul.mubr.msk.f32.gmra.mxu0 %vm209_vm1, %v6685_v7 }
 0x276   : > { %18028 = vmatprep.mubr.msk.f32.mxu1 %vm209_vm1, %v21339_v44  ;;  %v21614_v41 = vadd.f32 %v17727_v55, %v4700_v43  ;;  %v4702_v27 = vadd.f32 %v17680_v29, %v21361_v2  ;;  %17981 = vmatprep.mubr.msk.f32.mxu0 %vm209_vm1, %v21611_v54  ;;  %v21623_v44 = vld [vmem:[#allocation2 + $0x171] sm:$0xff]  ;;  %v21645_v43 = vld [vmem:[#allocation2 + $0x1a1] sm:$0xff] }
 0x277   : > { %v4946_v17 = vpop.f32.mrf.mxu1  ;;  %v4566_v12 = vpop.f32.mrf.mxu0 }
 0x278   : > { %v21618_v62 = vadd.f32 %v4946_v17, %v4699_v21  ;;  %v4701_v24 = vadd.f32 %v4566_v12, %v21366_v9  ;;  %v25490_v12 = vld [vmem:[#allocation31_spill] sm:$0xff] }
 0x279   : > { %v17730_v40 = vpop.f32.mrf.mxu1  ;;  %18029 = vmatmul.mubr.msk.f32.gmra.mxu1 %vm209_vm1, %v7075_v30  ;;  %v17683_v31 = vpop.f32.mrf.mxu0  ;;  %17982 = vmatmul.mubr.msk.f32.gmra.mxu0 %vm209_vm1, %v21623_v44 }
 0x27a   : > { %18031 = vmatprep.mubr.msk.f32.mxu1 %vm209_vm1, %v21354_v26  ;;  %v21630_v42 = vadd.f32 %v17730_v40, %v4702_v27  ;;  %v4704_v63 = vadd.f32 %v17683_v31, %v21379_v22  ;;  %17984 = vmatprep.mubr.msk.f32.mxu0 %vm209_vm1, %v21627_v37  ;;  %v21641_v26 = vld [vmem:[#allocation2 + $0x191] sm:$0xff] }
 0x27b   : > { %v4956_v2 = vpop.f32.mrf.mxu1  ;;  %v4576_v9 = vpop.f32.mrf.mxu0 }
 0x27c   : > { %v21635_v52 = vadd.f32 %v4956_v2, %v4701_v24  ;;  %v4703_v55 = vadd.f32 %v4576_v9, %v21384_v5  ;;  %v7083_v24 = vld [vmem:[#allocation2 + $0x1d2] sm:$0xff]  ;;  %v21677_v2 = vld [vmem:[#allocation2 + $0x201] sm:$0xff] }
 0x27d   : > { %v17733_v58 = vpop.f32.mrf.mxu1  ;;  %18032 = vmatmul.mubr.msk.f32.gmra.mxu1 %vm209_vm1, %v21358_v56  ;;  %v17686_v7 = vpop.f32.mrf.mxu0  ;;  %17985 = vmatmul.mubr.msk.f32.gmra.mxu0 %vm209_vm1, %v21641_v26 }
 0x27e   : > { %18034 = vmatprep.mubr.msk.f32.mxu1 %vm209_vm1, %v21372_v39  ;;  %v21648_v22 = vadd.f32 %v17733_v58, %v4704_v63  ;;  %v4706_v56 = vadd.f32 %v17686_v7, %v21397_v18  ;;  %17987 = vmatprep.mubr.msk.f32.mxu0 %vm209_vm1, %v21645_v43  ;;  %v21659_v39 = vld [vmem:[#allocation2 + $0x1b1] sm:$0xff] }
 0x27f   : > { %v4966_v38 = vpop.f32.mrf.mxu1  ;;  %v4586_v5 = vpop.f32.mrf.mxu0 }
 0x280   : > { %v21653_v36 = vadd.f32 %v4966_v38, %v4703_v55  ;;  %v4705_v21 = vadd.f32 %v4586_v5, %v21402_v50 }
 0x281   : > { %v17736_v30 = vpop.f32.mrf.mxu1  ;;  %18035 = vmatmul.mubr.msk.f32.gmra.mxu1 %vm209_vm1, %v21376_v48  ;;  %v17689_v29 = vpop.f32.mrf.mxu0  ;;  %17988 = vmatmul.mubr.msk.f32.gmra.mxu0 %vm209_vm1, %v21659_v39 }
 0x282   : > { %18037 = vmatprep.mubr.msk.f32.mxu1 %vm209_vm1, %v21390_v13  ;;  %v21664_v17 = vadd.f32 %v17736_v30, %v4706_v56  ;;  %v4708_v48 = vadd.f32 %v17689_v29, %v21413_v3  ;;  %17990 = vmatprep.mubr.msk.f32.mxu0 %vm209_vm1, %v25490_v12  ;;  %v6693_v13 = vld [vmem:[#allocation2 + $0x1d1] sm:$0xff]  ;;  %v21711_v29 = vld [vmem:[#allocation2 + $0x241] sm:$0xff] }
 0x283   : > { %v4976_v18 = vpop.f32.mrf.mxu1  ;;  %v4596_v50 = vpop.f32.mrf.mxu0 }
 0x284   : > { %v21669_v27 = vadd.f32 %v4976_v18, %v4705_v21  ;;  %v4707_v31 = vadd.f32 %v4596_v50, %v21418_v34  ;;  %v21693_v34 = vld [vmem:[#allocation2 + $0x221] sm:$0xff] }
 0x285   : > { %v17739_v40 = vpop.f32.mrf.mxu1  ;;  %18038 = vmatmul.mubr.msk.f32.gmra.mxu1 %vm209_vm1, %v21394_v35  ;;  %v17692_v58 = vpop.f32.mrf.mxu0  ;;  %17991 = vmatmul.mubr.msk.f32.gmra.mxu0 %vm209_vm1, %v6693_v13 }
 0x286   : > { %18040 = vmatprep.mubr.msk.f32.mxu1 %vm209_vm1, %v21408_v0  ;;  %v21680_v3 = vadd.f32 %v17739_v40, %v4708_v48  ;;  %v4710_v35 = vadd.f32 %v17692_v58, %v21430_v60  ;;  %17993 = vmatprep.mubr.msk.f32.mxu0 %vm209_vm1, %v21677_v2  ;;  %v21689_v0 = vld [vmem:[#allocation2 + $0x211] sm:$0xff]  ;;  %v25493_v58 = vld [vmem:[#allocation44_spill] sm:$0xff] }
 0x287   : > { %v4986_v63 = vpop.f32.mrf.mxu1  ;;  %v4606_v38 = vpop.f32.mrf.mxu0  ;;  %v25491_v48 = vld [vmem:[#allocation7_spill] sm:$0xff] }
 0x288   : > { %v21684_v9 = vadd.f32 %v4986_v63, %v4707_v31  ;;  %v4709_v7 = vadd.f32 %v4606_v38, %v21435_v19  ;;  %v25492_v31 = vld [vmem:[#allocation46_spill] sm:$0xff] }
 0x289   : > { %v17742_v55 = vpop.f32.mrf.mxu1  ;;  %18041 = vmatmul.mubr.msk.f32.gmra.mxu1 %vm209_vm1, %v7083_v24  ;;  %v17695_v30 = vpop.f32.mrf.mxu0  ;;  %17994 = vmatmul.mubr.msk.f32.gmra.mxu0 %vm209_vm1, %v21689_v0 }
 0x28a   : > { %18043 = vmatprep.mubr.msk.f32.mxu1 %vm209_vm1, %v21423_v6  ;;  %v21696_v56 = vadd.f32 %v17742_v55, %v4710_v35  ;;  %v4712_v5 = vadd.f32 %v17695_v30, %v21448_v1  ;;  %17996 = vmatprep.mubr.msk.f32.mxu0 %vm209_vm1, %v21693_v34  ;;  %v21707_v6 = vld [vmem:[#allocation2 + $0x231] sm:$0xff] }
 0x28b   : > { %v4996_v60 = vpop.f32.mrf.mxu1  ;;  %v4616_v19 = vpop.f32.mrf.mxu0 }
 0x28c   : > { %v21701_v21 = vadd.f32 %v4996_v60, %v4709_v7  ;;  %v4711_v40 = vadd.f32 %v4616_v19, %v25491_v48  ;;  %v6701_v19 = vld [vmem:[#allocation2 + $0x271] sm:$0xff]  ;;  %v25496_v48 = vld [vmem:[#allocation21_spill] sm:$0xff] }
 0x28d   : > { %v17745_v18 = vpop.f32.mrf.mxu1  ;;  %18044 = vmatmul.mubr.msk.f32.gmra.mxu1 %vm209_vm1, %v21427_v53  ;;  %v17698_v13 = vpop.f32.mrf.mxu0  ;;  %17997 = vmatmul.mubr.msk.f32.gmra.mxu0 %vm209_vm1, %v21707_v6 }
 0x28e   : > { %18046 = vmatprep.mubr.msk.f32.mxu1 %vm209_vm1, %v21441_v49  ;;  %v21714_v1 = vadd.f32 %v17745_v18, %v4712_v5  ;;  %v4714_v53 = vadd.f32 %v17698_v13, %v21466_v8  ;;  %17999 = vmatprep.mubr.msk.f32.mxu0 %vm209_vm1, %v21711_v29  ;;  %v21725_v49 = vld [vmem:[#allocation2 + $0x251] sm:$0xff] }
 0x28f   : > { %v5006_v12 = vpop.f32.mrf.mxu1  ;;  %v4626_v63 = vpop.f32.mrf.mxu0  ;;  %v25494_v5 = vld [vmem:[#allocation15_spill] sm:$0xff] }
 0x290   : > { %v21719_v50 = vadd.f32 %v5006_v12, %v4711_v40  ;;  %v4713_v35 = vadd.f32 %v4626_v63, %v21471_v33  ;;  %v25495_v18 = vld [vmem:[#allocation63_spill] sm:$0xff]  ;;  %v21743_v12 = vld [vmem:[#allocation2 + $0x2a1] sm:$0xff] }
 0x291   : > { %v17748_v24 = vpop.f32.mrf.mxu1  ;;  %18047 = vmatmul.mubr.msk.f32.gmra.mxu1 %vm209_vm1, %v25492_v31  ;;  %v17701_v38 = vpop.f32.mrf.mxu0  ;;  %18000 = vmatmul.mubr.msk.f32.gmra.mxu0 %vm209_vm1, %v21725_v49  ;;  %v7091_v40 = vld [vmem:[#allocation2 + $0x272] sm:$0xff] }
 0x292   : > { %18049 = vmatprep.mubr.msk.f32.mxu1 %vm209_vm1, %v25493_v58  ;;  %v21730_v55 = vadd.f32 %v17748_v24, %v4714_v53  ;;  %v4716_v7 = vadd.f32 %v17701_v38, %v21482_v23  ;;  %18002 = vmatprep.mubr.msk.f32.mxu0 %vm209_vm1, %v25495_v18  ;;  %v21748_v24 = vld [vmem:[#allocation2 + $0x2a2] sm:$0xff]  ;;  %v21761_v38 = vld [vmem:[#allocation2 + $0x2b2] sm:$0xff] }
 0x293   : > { %v5016_v8 = vpop.f32.mrf.mxu1  ;;  %v4636_v33 = vpop.f32.mrf.mxu0  ;;  %25497 = vst [vmem:[#allocation60_spill] sm:$0xff] %v21748_v24  ;;  %25498 = vst [vmem:[#allocation32_spill] sm:$0xff] %v21761_v38  ;;  %v21768_v18 = vld [vmem:[#allocation2 + $0x2c2] sm:$0xff] }
 0x294   : > { %v21735_v60 = vadd.f32 %v5016_v8, %v4713_v35  ;;  %v4715_v13 = vadd.f32 %v4636_v33, %v21487_v16  ;;  %v21757_v8 = vld [vmem:[#allocation2 + $0x2b1] sm:$0xff]  ;;  %25499 = vst [vmem:[#allocation62_spill] sm:$0xff] %v21768_v18 }
 0x295   : > { %v17751_v30 = vpop.f32.mrf.mxu1  ;;  %18050 = vmatmul.mubr.msk.f32.gmra.mxu1 %vm209_vm1, %v25494_v5  ;;  %v17704_v31 = vpop.f32.mrf.mxu0  ;;  %18003 = vmatmul.mubr.msk.f32.gmra.mxu0 %vm209_vm1, %v6701_v19 }
 0x296   : > { %18052 = vmatprep.mubr.msk.f32.mxu1 %vm209_vm1, %v25496_v48  ;;  %v21746_v23 = vadd.f32 %v17751_v30, %v4716_v7  ;;  %v4718_v63 = vadd.f32 %v17704_v31, %v21495_v45  ;;  %18005 = vmatprep.mubr.msk.f32.mxu0 %vm209_vm1, %v21743_v12  ;;  %v21763_v7 = vld [vmem:[#allocation2 + $0x2c1] sm:$0xff] }
 0x297   : > { %v5026_v53 = vpop.f32.mrf.mxu1  ;;  %v4646_v16 = vpop.f32.mrf.mxu0  ;;  %v21785_v31 = vld [vmem:[#allocation2 + $0x2e1] sm:$0xff] }
 0x298   : > { %v21752_v58 = vadd.f32 %v5026_v53, %v4715_v13  ;;  %v4717_v45 = vadd.f32 %v4646_v16, %v21502_v32  ;;  %v21779_v32 = vld [vmem:[#allocation2 + $0x2d1] sm:$0xff]  ;;  %v21790_v16 = vld [vmem:[#allocation2 + $0x2e2] sm:$0xff] }
 0x299   : > { %v17754_v35 = vpop.f32.mrf.mxu1  ;;  %18053 = vmatmul.mubr.msk.f32.gmra.mxu1 %vm209_vm1, %v7091_v40  ;;  %v17707_v19 = vpop.f32.mrf.mxu0  ;;  %18006 = vmatmul.mubr.msk.f32.gmra.mxu0 %vm209_vm1, %v21757_v8  ;;  %v21783_v53 = vld [vmem:[#allocation2 + $0x2d2] sm:$0xff]  ;;  %25501 = vst [vmem:[#allocation61_spill] sm:$0xff] %v21790_v16 }
 0x29a   : > { %18055 = vmatprep.mubr.msk.f32.mxu1 %vm209_vm1, %v21748_v24  ;;  %v21766_v30 = vadd.f32 %v17754_v35, %v4718_v63  ;;  %v4720_v33 = vadd.f32 %v17707_v19, %v21511_v4  ;;  %18008 = vmatprep.mubr.msk.f32.mxu0 %vm209_vm1, %v21763_v7  ;;  %25500 = vst [vmem:[#allocation64_spill] sm:$0xff] %v21783_v53  ;;  %v6709_v24 = vld [vmem:[#allocation2 + $0x311] sm:$0xff] }
 0x29b   : > { %v5036_v5 = vpop.f32.mrf.mxu1  ;;  %v4656_v13 = vpop.f32.mrf.mxu0 }
 0x29c   : > { %v21773_v48 = vadd.f32 %v5036_v5, %v4717_v45  ;;  %v4719_v4 = vadd.f32 %v4656_v13, %v21518_v57  ;;  %v21801_v57 = vld [vmem:[#allocation2 + $0x2f1] sm:$0xff] }
 0x29d   : > { %v17757_v40 = vpop.f32.mrf.mxu1  ;;  %18056 = vmatmul.mubr.msk.f32.gmra.mxu1 %vm209_vm1, %v21761_v38  ;;  %v17710_v45 = vpop.f32.mrf.mxu0  ;;  %18009 = vmatmul.mubr.msk.f32.gmra.mxu0 %vm209_vm1, %v21779_v32 }
 0x29e   : > { %18058 = vmatprep.mubr.msk.f32.mxu1 %vm209_vm1, %v21768_v18  ;;  %v21788_v63 = vadd.f32 %v17757_v40, %v4720_v33  ;;  %v4722_v5 = vadd.f32 %v17710_v45, %v21529_v20  ;;  %18011 = vmatprep.mubr.msk.f32.mxu0 %vm209_vm1, %v21785_v31  ;;  %v21805_v40 = vld [vmem:[#allocation2 + $0x2f2] sm:$0xff] }
 0x29f   : > { %v5046_v35 = vpop.f32.mrf.mxu1  ;;  %v4666_v33 = vpop.f32.mrf.mxu0  ;;  %25503 = vst [vmem:[#allocation50_spill] sm:$0xff] %v21805_v40 }
 0x2a0   : > { %v21795_v19 = vadd.f32 %v5046_v35, %v4719_v4  ;;  %v4721_v13 = vadd.f32 %v4666_v33, %v21534_v47  ;;  %v7459_v33 = vld [vmem:[#allocation2 + $0x140] sm:$0xff] }
 0x2a1   : > { %v17760_v18 = vpop.f32.mrf.mxu1  ;;  %18059 = vmatmul.mubr.msk.f32.gmra.mxu1 %vm209_vm1, %v21783_v53  ;;  %v17713_v35 = vpop.f32.mrf.mxu0  ;;  %18012 = vmatmul.mubr.msk.f32.gmra.mxu0 %vm209_vm1, %v21801_v57 }
 0x2a2   : > { %25502 = vst [vmem:[#allocation33_spill] sm:$0xff] %v21795_v19  ;;  %18061 = vmatprep.mubr.msk.f32.mxu1 %vm209_vm1, %v21790_v16  ;;  %v21808_v20 = vadd.f32 %v17760_v18, %v4722_v5  ;;  %v4724_v45 = vadd.f32 %v17713_v35, %v21545_v11  ;;  %v25506_v16 = vld [vmem:[#allocation37_spill] sm:$0xff]  ;;  %v25507_v18 = vld [vmem:[#allocation30_spill] sm:$0xff] }
 0x2a3   : > { %v5056_v4 = vpop.f32.mrf.mxu1  ;;  %18014 = vmatprep.mubr.msk.f32.mxu0 %vm209_vm1, %v25506_v16  ;;  %v4676_v47 = vpop.f32.mrf.mxu0  ;;  %v7099_v5 = vld [vmem:[#allocation2 + $0x312] sm:$0xff] }
 0x2a4   : > { %25504 = vst [vmem:[#allocation35_spill] sm:$0xff] %v21808_v20  ;;  %v21813_v53 = vadd.f32 %v5056_v4, %v4721_v13  ;;  %v4723_v20 = vadd.f32 %v4676_v47, %v21550_v46  ;;  %v7849_v13 = vld [vmem:[#allocation2 + $0x141] sm:$0xff]  ;;  %v21833_v46 = vld [vmem:[#allocation2 + $0x151] sm:$0xff]  ;;  %v21845_v47 = vld [vmem:[%s25183_s1 + $0x2c] sm:$0x3] }
 0x2a5   : > { %v17763_v38 = vpop.f32.mrf.mxu1  ;;  %18062 = vmatmul.mubr.msk.f32.gmra.mxu1 %vm209_vm1, %v21805_v40  ;;  %v17716_v4 = vpop.f32.mrf.mxu0  ;;  %18015 = vmatmul.mubr.msk.f32.gmra.mxu0 %vm209_vm1, %v6709_v24  ;;  %25508 = vst [vmem:[#allocation39_spill] sm:$0xff] %v21833_v46 }
 0x2a6   : > { %25505 = vst [vmem:[#allocation40_spill] sm:$0xff] %v21813_v53  ;;  %18064 = vmatprep.mubr.msk.f32.mxu1 %vm209_vm1, %v25507_v18  ;;  %v21822_v19 = vadd.f32 %v17763_v38, %v4724_v45  ;;  %v4726_v35 = vadd.f32 %v17716_v4, %v21557_v28  ;;  %18069 = vmatprep.mubr.msk.f32.mxu0 %vm209_vm1, %v7459_v33  ;;  %v21830_v18 = vld [vmem:[#allocation2 + $0x150] sm:$0xff]  ;;  %v21838_v28 = vld [vmem:[#allocation2 + $0x160] sm:$0xff] }
 0x2a7   : > { %v5066_v11 = vpop.f32.mrf.mxu1  ;;  %v4686_v53 = vpop.f32.mrf.mxu0 }
 0x2a8   : > { %v21826_v40 = vadd.f32 %v5066_v11, %v4723_v20  ;;  %v4725_v38 = vadd.f32 %v4686_v53, %v21565_v10  ;;  %v21854_v53 = vld [vmem:[#allocation2 + $0x170] sm:$0xff]  ;;  %v21859_v11 = vld [vmem:[%s25183_s1 + $0x2e] sm:$0x3] }
 0x2a9   : > { %v17766_v16 = vpop.f32.mrf.mxu1  ;;  %18065 = vmatmul.mubr.msk.f32.gmra.mxu1 %vm209_vm1, %v7099_v5  ;;  %v17771_v20 = vpop.f32.mrf.mxu0  ;;  %18070 = vmatmul.mubr.msk.f32.vlgmr.msra.gmra.mxu0 %vm209_vm1, %v21830_v18 }
 0x2aa   : > { %18119 = vmatprep.mubr.msk.f32.mxu1 %vm209_vm1, %v7849_v13  ;;  %v21836_v45 = vadd.f32 %v17766_v16, %v4726_v35  ;;  %v5476_v33 = vadd.f32 %v17771_v20, %v21581_v59  ;;  %18168 = vmatpush3.msk.msra.mxu0 %vm661_vm0, %v21563_v25  ;;  %v21865_v59 = vld [vmem:[#allocation2 + $0x180] sm:$0xff] }
 0x2ab   : > { %v5076_v24 = vpop.f32.mrf.mxu1  ;;  %v5316_v13 = vpop.f32.mrf.mxu0  ;;  %18072 = vmatprep.mubr.msk.f32.mxu0 %vm209_vm1, %v21838_v28  ;;  %18267 = vmatprep.subr.msk.mxu0 %vm661_vm0, %v21845_v47  ;;  %v21889_v20 = vld [vmem:[#allocation2 + $0x1a0] sm:$0xff] }
 0x2ac   : > { %v21847_v5 = vadd.f32 %v5076_v24, %v4725_v38  ;;  %v5475_v25 = vadd.f32 %v5316_v13, %v21591_v14 }
 0x2ad   : > { %v17821_v10 = vpop.f32.mrf.mxu1  ;;  %18120 = vmatmul.mubr.msk.f32.vlgmr.msra.gmra.mxu1 %vm209_vm1, %v21833_v46  ;;  %v17774_v16 = vpop.f32.mrf.mxu0  ;;  %18073 = vmatmul.mubr.msk.f32.gmra.mxu0 %vm209_vm1, %v21854_v53 }
 0x2ae   : > { %18122 = vmatprep.mubr.msk.f32.mxu1 %vm209_vm1, %v21611_v54  ;;  %v21868_v4 = vadd.f32 %v17821_v10, %v5476_v33  ;;  %18218 = vmatpush3.msk.msra.mxu1 %vm661_vm0, %v21575_v61  ;;  %v5478_v54 = vadd.f32 %v17774_v16, %v21599_v51  ;;  %v21885_v61 = vld [vmem:[#allocation2 + $0x190] sm:$0xff]  ;;  %v7467_v16 = vld [vmem:[#allocation2 + $0x1e0] sm:$0xff] }
 0x2af   : > { %v5706_v35 = vpop.f32.mrf.mxu1  ;;  %18317 = vmatprep.subr.msk.mxu1 %vm661_vm0, %v21859_v11  ;;  %18075 = vmatprep.mubr.msk.f32.mxu0 %vm209_vm1, %v21865_v59  ;;  %v5326_v24 = vpop.f32.mrf.mxu0 }
 0x2b0   : > { %v21879_v38 = vadd.f32 %v5706_v35, %v5475_v25  ;;  %v5477_v33 = vadd.f32 %v5326_v24, %v21603_v15  ;;  %v7857_v24 = vld [vmem:[#allocation2 + $0x1e1] sm:$0xff] }
 0x2b1   : > { %v17824_v14 = vpop.f32.mrf.mxu1  ;;  %18123 = vmatmul.mubr.msk.f32.gmra.mxu1 %vm209_vm1, %v21623_v44  ;;  %v17777_v13 = vpop.f32.mrf.mxu0  ;;  %18076 = vmatmul.mubr.msk.f32.gmra.mxu0 %vm209_vm1, %v21885_v61 }
 0x2b2   : > { %18125 = vmatprep.mubr.msk.f32.mxu1 %vm209_vm1, %v21627_v37  ;;  %v21892_v51 = vadd.f32 %v17824_v14, %v5478_v54  ;;  %v5480_v44 = vadd.f32 %v17777_v13, %v21614_v41  ;;  %18078 = vmatprep.mubr.msk.f32.mxu0 %vm209_vm1, %v21889_v20  ;;  %v21903_v37 = vld [vmem:[#allocation2 + $0x1b0] sm:$0xff] }
 0x2b3   : > { %v5716_v10 = vpop.f32.mrf.mxu1  ;;  %v5336_v15 = vpop.f32.mrf.mxu0 }
 0x2b4   : > { %v21897_v25 = vadd.f32 %v5716_v10, %v5477_v33  ;;  %v5479_v54 = vadd.f32 %v5336_v15, %v21618_v62 }
 0x2b5   : > { %v17827_v35 = vpop.f32.mrf.mxu1  ;;  %18126 = vmatmul.mubr.msk.f32.gmra.mxu1 %vm209_vm1, %v21641_v26  ;;  %v17780_v33 = vpop.f32.mrf.mxu0  ;;  %18079 = vmatmul.mubr.msk.f32.gmra.mxu0 %vm209_vm1, %v21903_v37 }
 0x2b6   : > { %18128 = vmatprep.mubr.msk.f32.mxu1 %vm209_vm1, %v21645_v43  ;;  %v21908_v14 = vadd.f32 %v17827_v35, %v5480_v44  ;;  %v5482_v26 = vadd.f32 %v17780_v33, %v21630_v42  ;;  %18081 = vmatprep.mubr.msk.f32.mxu0 %vm209_vm1, %v7467_v16  ;;  %v21918_v43 = vld [vmem:[#allocation2 + $0x1f0] sm:$0xff]  ;;  %v21923_v35 = vld [vmem:[#allocation2 + $0x200] sm:$0xff] }
 0x2b7   : > { %v5726_v41 = vpop.f32.mrf.mxu1  ;;  %v5346_v62 = vpop.f32.mrf.mxu0  ;;  %v21921_v44 = vld [vmem:[#allocation2 + $0x1f1] sm:$0xff] }
 0x2b8   : > { %v21913_v10 = vadd.f32 %v5726_v41, %v5479_v54  ;;  %25509 = vst [vmem:[#allocation43_spill] sm:$0xff] %v21921_v44  ;;  %v5481_v15 = vadd.f32 %v5346_v62, %v21635_v52 }
 0x2b9   : > { %v17830_v13 = vpop.f32.mrf.mxu1  ;;  %18129 = vmatmul.mubr.msk.f32.gmra.mxu1 %vm209_vm1, %v21659_v39  ;;  %v17783_v41 = vpop.f32.mrf.mxu0  ;;  %18082 = vmatmul.mubr.msk.f32.gmra.mxu0 %vm209_vm1, %v21918_v43 }
 0x2ba   : > { %18131 = vmatprep.mubr.msk.f32.mxu1 %vm209_vm1, %v7857_v24  ;;  %v21926_v42 = vadd.f32 %v17830_v13, %v5482_v26  ;;  %v5484_v39 = vadd.f32 %v17783_v41, %v21648_v22  ;;  %18084 = vmatprep.mubr.msk.f32.mxu0 %vm209_vm1, %v21923_v35  ;;  %v21937_v24 = vld [vmem:[#allocation2 + $0x210] sm:$0xff]  ;;  %v21941_v26 = vld [vmem:[#allocation2 + $0x220] sm:$0xff] }
 0x2bb   : > { %v5736_v54 = vpop.f32.mrf.mxu1  ;;  %v5356_v52 = vpop.f32.mrf.mxu0 }
 0x2bc   : > { %v21931_v16 = vadd.f32 %v5736_v54, %v5481_v15  ;;  %v5483_v13 = vadd.f32 %v5356_v52, %v21653_v36 }
 0x2bd   : > { %v17833_v33 = vpop.f32.mrf.mxu1  ;;  %18132 = vmatmul.mubr.msk.f32.gmra.mxu1 %vm209_vm1, %v21921_v44  ;;  %v17786_v15 = vpop.f32.mrf.mxu0  ;;  %18085 = vmatmul.mubr.msk.f32.gmra.mxu0 %vm209_vm1, %v21937_v24 }
 0x2be   : > { %18134 = vmatprep.mubr.msk.f32.mxu1 %vm209_vm1, %v21677_v2  ;;  %v21944_v22 = vadd.f32 %v17833_v33, %v5484_v39  ;;  %v5486_v54 = vadd.f32 %v17786_v15, %v21664_v17  ;;  %18087 = vmatprep.mubr.msk.f32.mxu0 %vm209_vm1, %v21941_v26  ;;  %v21955_v2 = vld [vmem:[#allocation2 + $0x230] sm:$0xff]  ;;  %v21959_v39 = vld [vmem:[#allocation2 + $0x240] sm:$0xff] }
 0x2bf   : > { %v5746_v62 = vpop.f32.mrf.mxu1  ;;  %v5366_v36 = vpop.f32.mrf.mxu0 }
 0x2c0   : > { %v21949_v41 = vadd.f32 %v5746_v62, %v5483_v13  ;;  %v5485_v33 = vadd.f32 %v5366_v36, %v21669_v27 }
 0x2c1   : > { %v17836_v44 = vpop.f32.mrf.mxu1  ;;  %18135 = vmatmul.mubr.msk.f32.gmra.mxu1 %vm209_vm1, %v21689_v0  ;;  %v17789_v13 = vpop.f32.mrf.mxu0  ;;  %18088 = vmatmul.mubr.msk.f32.gmra.mxu0 %vm209_vm1, %v21955_v2 }
 0x2c2   : > { %18137 = vmatprep.mubr.msk.f32.mxu1 %vm209_vm1, %v21693_v34  ;;  %v21962_v17 = vadd.f32 %v17836_v44, %v5486_v54  ;;  %v5488_v0 = vadd.f32 %v17789_v13, %v21680_v3  ;;  %18090 = vmatprep.mubr.msk.f32.mxu0 %vm209_vm1, %v21959_v39  ;;  %v21973_v34 = vld [vmem:[#allocation2 + $0x250] sm:$0xff]  ;;  %v7475_v44 = vld [vmem:[#allocation2 + $0x280] sm:$0xff] }
 0x2c3   : > { %v5756_v52 = vpop.f32.mrf.mxu1  ;;  %v5376_v27 = vpop.f32.mrf.mxu0 }
 0x2c4   : > { %v21967_v62 = vadd.f32 %v5756_v52, %v5485_v33  ;;  %v5487_v54 = vadd.f32 %v5376_v27, %v21684_v9  ;;  %v7865_v33 = vld [vmem:[#allocation2 + $0x281] sm:$0xff] }
 0x2c5   : > { %v17839_v15 = vpop.f32.mrf.mxu1  ;;  %18138 = vmatmul.mubr.msk.f32.gmra.mxu1 %vm209_vm1, %v21707_v6  ;;  %v17792_v52 = vpop.f32.mrf.mxu0  ;;  %18091 = vmatmul.mubr.msk.f32.gmra.mxu0 %vm209_vm1, %v21973_v34 }
 0x2c6   : > { %18140 = vmatprep.mubr.msk.f32.mxu1 %vm209_vm1, %v21711_v29  ;;  %v21978_v36 = vadd.f32 %v17839_v15, %v5488_v0  ;;  %v5490_v6 = vadd.f32 %v17792_v52, %v21696_v56  ;;  %18093 = vmatprep.mubr.msk.f32.mxu0 %vm209_vm1, %v7475_v44  ;;  %v21988_v29 = vld [vmem:[#allocation2 + $0x290] sm:$0xff]  ;;  %v21993_v15 = vld [vmem:[#allocation2 + $0x2a0] sm:$0xff] }
 0x2c7   : > { %v5766_v3 = vpop.f32.mrf.mxu1  ;;  %v5386_v9 = vpop.f32.mrf.mxu0  ;;  %v21991_v0 = vld [vmem:[#allocation2 + $0x291] sm:$0xff] }
 0x2c8   : > { %v21983_v13 = vadd.f32 %v5766_v3, %v5487_v54  ;;  %25510 = vst [vmem:[#allocation45_spill] sm:$0xff] %v21991_v0  ;;  %v5489_v27 = vadd.f32 %v5386_v9, %v21701_v21 }
 0x2c9   : > { %v17842_v46 = vpop.f32.mrf.mxu1  ;;  %18141 = vmatmul.mubr.msk.f32.gmra.mxu1 %vm209_vm1, %v21725_v49  ;;  %v17795_v3 = vpop.f32.mrf.mxu0  ;;  %18094 = vmatmul.mubr.msk.f32.gmra.mxu0 %vm209_vm1, %v21988_v29 }
 0x2ca   : > { %18143 = vmatprep.mubr.msk.f32.mxu1 %vm209_vm1, %v7865_v33  ;;  %v21996_v56 = vadd.f32 %v17842_v46, %v5490_v6  ;;  %v5492_v49 = vadd.f32 %v17795_v3, %v21714_v1  ;;  %18096 = vmatprep.mubr.msk.f32.mxu0 %vm209_vm1, %v21993_v15  ;;  %v22007_v33 = vld [vmem:[#allocation2 + $0x2b0] sm:$0xff] }
 0x2cb   : > { %v5776_v54 = vpop.f32.mrf.mxu1  ;;  %v5396_v21 = vpop.f32.mrf.mxu0 }
 0x2cc   : > { %v22001_v44 = vadd.f32 %v5776_v54, %v5489_v27  ;;  %v5491_v46 = vadd.f32 %v5396_v21, %v21719_v50 }
 0x2cd   : > { %v17845_v52 = vpop.f32.mrf.mxu1  ;;  %18144 = vmatmul.mubr.msk.f32.gmra.mxu1 %vm209_vm1, %v21991_v0  ;;  %v17798_v9 = vpop.f32.mrf.mxu0  ;;  %18097 = vmatmul.mubr.msk.f32.gmra.mxu0 %vm209_vm1, %v22007_v33  ;;  %v25511_v0 = vld [vmem:[#allocation48_spill] sm:$0xff] }
 0x2ce   : > { %18146 = vmatprep.mubr.msk.f32.mxu1 %vm209_vm1, %v21743_v12  ;;  %v22012_v6 = vadd.f32 %v17845_v52, %v5492_v49  ;;  %v5494_v27 = vadd.f32 %v17798_v9, %v21730_v55  ;;  %18099 = vmatprep.mubr.msk.f32.mxu0 %vm209_vm1, %v25511_v0  ;;  %v22023_v12 = vld [vmem:[#allocation2 + $0x2d0] sm:$0xff] }
 0x2cf   : > { %v5786_v1 = vpop.f32.mrf.mxu1  ;;  %v5406_v50 = vpop.f32.mrf.mxu0 }
 0x2d0   : > { %v22017_v54 = vadd.f32 %v5786_v1, %v5491_v46  ;;  %v5493_v49 = vadd.f32 %v5406_v50, %v21735_v60  ;;  %v25512_v1 = vld [vmem:[#allocation49_spill] sm:$0xff]  ;;  %v7483_v60 = vld [vmem:[#allocation2 + $0x320] sm:$0xff] }
 0x2d1   : > { %v17848_v3 = vpop.f32.mrf.mxu1  ;;  %18147 = vmatmul.mubr.msk.f32.gmra.mxu1 %vm209_vm1, %v21757_v8  ;;  %v17801_v21 = vpop.f32.mrf.mxu0  ;;  %18100 = vmatmul.mubr.msk.f32.gmra.mxu0 %vm209_vm1, %v22023_v12 }
 0x2d2   : > { %18149 = vmatprep.mubr.msk.f32.mxu1 %vm209_vm1, %v21763_v7  ;;  %v22028_v52 = vadd.f32 %v17848_v3, %v5494_v27  ;;  %v5496_v8 = vadd.f32 %v17801_v21, %v21746_v23  ;;  %18102 = vmatprep.mubr.msk.f32.mxu0 %vm209_vm1, %v25512_v1  ;;  %v7873_v23 = vld [vmem:[#allocation2 + $0x321] sm:$0xff] }
 0x2d3   : > { %v5796_v55 = vpop.f32.mrf.mxu1  ;;  %v5416_v7 = vpop.f32.mrf.mxu0 }
 0x2d4   : > { %v22033_v46 = vadd.f32 %v5796_v55, %v5493_v49  ;;  %v5495_v9 = vadd.f32 %v5416_v7, %v21752_v58  ;;  %v25513_v49 = vld [vmem:[#allocation29_spill] sm:$0xff] }
 0x2d5   : > { %v17851_v0 = vpop.f32.mrf.mxu1  ;;  %18150 = vmatmul.mubr.msk.f32.gmra.mxu1 %vm209_vm1, %v21779_v32  ;;  %v17804_v50 = vpop.f32.mrf.mxu0  ;;  %18103 = vmatmul.mubr.msk.f32.gmra.mxu0 %vm209_vm1, %v25513_v49  ;;  %v22077_v49 = vld [vmem:[#allocation2 + $0x351] sm:$0xff] }
 0x2d6   : > { %18152 = vmatprep.mubr.msk.f32.mxu1 %vm209_vm1, %v21785_v31  ;;  %v22042_v27 = vadd.f32 %v17851_v0, %v5496_v8  ;;  %v5498_v32 = vadd.f32 %v17804_v50, %v21766_v30  ;;  %18105 = vmatprep.mubr.msk.f32.mxu0 %vm209_vm1, %v7483_v60  ;;  %v22052_v31 = vld [vmem:[#allocation2 + $0x330] sm:$0xff]  ;;  %v22057_v0 = vld [vmem:[#allocation2 + $0x340] sm:$0xff]  ;;  %25519 = vst [vmem:[#allocation31_spill] sm:$0xff] %v22077_v49 }
 0x2d7   : > { %v5806_v3 = vpop.f32.mrf.mxu1  ;;  %v5426_v58 = vpop.f32.mrf.mxu0  ;;  %v22055_v8 = vld [vmem:[#allocation2 + $0x331] sm:$0xff]  ;;  %25515 = vst [vmem:[#allocation47_spill] sm:$0xff] %v22057_v0 }
 0x2d8   : > { %v22047_v55 = vadd.f32 %v5806_v3, %v5495_v9  ;;  %25514 = vst [vmem:[#allocation42_spill] sm:$0xff] %v22055_v8  ;;  %v5497_v1 = vadd.f32 %v5426_v58, %v21773_v48  ;;  %v22062_v9 = vld [vmem:[#allocation2 + $0x341] sm:$0xff]  ;;  %v22073_v48 = vld [vmem:[#allocation2 + $0x350] sm:$0xff] }
 0x2d9   : > { %v17854_v21 = vpop.f32.mrf.mxu1  ;;  %18153 = vmatmul.mubr.msk.f32.gmra.mxu1 %vm209_vm1, %v21801_v57  ;;  %25516 = vst [vmem:[#allocation12_spill] sm:$0xff] %v22062_v9  ;;  %v17807_v3 = vpop.f32.mrf.mxu0  ;;  %18106 = vmatmul.mubr.msk.f32.gmra.mxu0 %vm209_vm1, %v22052_v31  ;;  %25518 = vst [vmem:[#allocation59_spill] sm:$0xff] %v22073_v48 }
 0x2da   : > { %18155 = vmatprep.mubr.msk.f32.mxu1 %vm209_vm1, %v7873_v23  ;;  %v22060_v30 = vadd.f32 %v17854_v21, %v5498_v32  ;;  %v5500_v57 = vadd.f32 %v17807_v3, %v21788_v63  ;;  %18108 = vmatprep.mubr.msk.f32.mxu0 %vm209_vm1, %v22057_v0  ;;  %v22079_v32 = vld [vmem:[#allocation2 + $0x360] sm:$0xff]  ;;  %v25521_v63 = vld [vmem:[#allocation33_spill] sm:$0xff] }
 0x2db   : > { %v5816_v7 = vpop.f32.mrf.mxu1  ;;  %v5436_v50 = vpop.f32.mrf.mxu0  ;;  %25520 = vst [vmem:[#allocation7_spill] sm:$0xff] %v22079_v32 }
 0x2dc   : > { %v22067_v60 = vadd.f32 %v5816_v7, %v5497_v1  ;;  %v5499_v21 = vadd.f32 %v5436_v50, %v25521_v63  ;;  %v22084_v7 = vld [vmem:[#allocation2 + $0x361] sm:$0xff]  ;;  %v22099_v50 = vld [vmem:[#allocation2 + $0x371] sm:$0xff] }
 0x2dd   : > { %v17857_v23 = vpop.f32.mrf.mxu1  ;;  %18156 = vmatmul.mubr.msk.f32.gmra.mxu1 %vm209_vm1, %v22055_v8  ;;  %25522 = vst [vmem:[#allocation46_spill] sm:$0xff] %v22084_v7  ;;  %v17810_v3 = vpop.f32.mrf.mxu0  ;;  %18109 = vmatmul.mubr.msk.f32.gmra.mxu0 %vm209_vm1, %v22073_v48  ;;  %v25523_v8 = vld [vmem:[#allocation35_spill] sm:$0xff]  ;;  %25525 = vst [vmem:[#allocation15_spill] sm:$0xff] %v22099_v50  ;;  %v22101_v63 = vld [vmem:[#allocation2 + $0x380] sm:$0xff] }
 0x2de   : > { %25517 = vst [vmem:[#allocation58_spill] sm:$0xff] %v22067_v60  ;;  %18158 = vmatprep.mubr.msk.f32.mxu1 %vm209_vm1, %v22062_v9  ;;  %v22082_v58 = vadd.f32 %v17857_v23, %v5500_v57  ;;  %v5502_v0 = vadd.f32 %v17810_v3, %v25523_v8  ;;  %18111 = vmatprep.mubr.msk.f32.mxu0 %vm209_vm1, %v22079_v32  ;;  %v22095_v57 = vld [vmem:[#allocation2 + $0x370] sm:$0xff]  ;;  %25526 = vst [vmem:[#allocation63_spill] sm:$0xff] %v22101_v63  ;;  %v25527_v8 = vld [vmem:[#allocation40_spill] sm:$0xff] }
 0x2df   : > { %v5826_v1 = vpop.f32.mrf.mxu1  ;;  %v5446_v23 = vpop.f32.mrf.mxu0 }
 0x2e0   : > { %v22089_v60 = vadd.f32 %v5826_v1, %v5499_v21  ;;  %v5501_v21 = vadd.f32 %v5446_v23, %v25527_v8  ;;  %v22121_v23 = vld [vmem:[#allocation2 + $0x391] sm:$0xff]  ;;  %v8239_v8 = vld [vmem:[#allocation2 + $0x142] sm:$0xff] }
 0x2e1   : > { %v17860_v9 = vpop.f32.mrf.mxu1  ;;  %18159 = vmatmul.mubr.msk.f32.gmra.mxu1 %vm209_vm1, %v22077_v49  ;;  %v17813_v49 = vpop.f32.mrf.mxu0  ;;  %18112 = vmatmul.mubr.msk.f32.gmra.mxu0 %vm209_vm1, %v22095_v57  ;;  %25530 = vst [vmem:[#allocation30_spill] sm:$0xff] %v22121_v23 }
 0x2e2   : > { %25524 = vst [vmem:[#allocation44_spill] sm:$0xff] %v22089_v60  ;;  %18161 = vmatprep.mubr.msk.f32.mxu1 %vm209_vm1, %v22084_v7  ;;  %v22104_v1 = vadd.f32 %v17860_v9, %v5502_v0  ;;  %v22106_v60 = vld [vmem:[#allocation2 + $0x381] sm:$0xff]  ;;  %v5504_v32 = vadd.f32 %v17813_v49, %v21822_v19  ;;  %18114 = vmatprep.mubr.msk.f32.mxu0 %vm209_vm1, %v22101_v63  ;;  %v22117_v0 = vld [vmem:[#allocation2 + $0x390] sm:$0xff] }
 0x2e3   : > { %v5836_v3 = vpop.f32.mrf.mxu1  ;;  %25528 = vst [vmem:[#allocation21_spill] sm:$0xff] %v22106_v60  ;;  %v5456_v9 = vpop.f32.mrf.mxu0 }
 0x2e4   : > { %v22111_v48 = vadd.f32 %v5836_v3, %v5501_v21  ;;  %v5503_v19 = vadd.f32 %v5456_v9, %v21826_v40 }
 0x2e5   : > { %v17863_v7 = vpop.f32.mrf.mxu1  ;;  %18162 = vmatmul.mubr.msk.f32.gmra.mxu1 %vm209_vm1, %v22099_v50  ;;  %v17816_v3 = vpop.f32.mrf.mxu0  ;;  %18115 = vmatmul.mubr.msk.f32.gmra.mxu0 %vm209_vm1, %v22117_v0 }
 0x2e6   : > { %25529 = vst [vmem:[#allocation37_spill] sm:$0xff] %v22111_v48  ;;  %18164 = vmatprep.mubr.msk.f32.mxu1 %vm209_vm1, %v22106_v60  ;;  %v22124_v49 = vadd.f32 %v17863_v7, %v5504_v32  ;;  %v5506_v50 = vadd.f32 %v17816_v3, %v21836_v45  ;;  %18169 = vmatprep.mubr.msk.f32.mxu0 %vm209_vm1, %v8239_v8  ;;  %v22134_v60 = vld [vmem:[#allocation2 + $0x152] sm:$0xff]  ;;  %v22141_v45 = vld [vmem:[#allocation2 + $0x162] sm:$0xff]  ;;  %v22148_v8 = vld [vmem:[%s25183_s1 + $0x30] sm:$0x3] }
 0x2e7   : > { %v5846_v21 = vpop.f32.mrf.mxu1  ;;  %v5466_v40 = vpop.f32.mrf.mxu0 }
 0x2e8   : > { %v22129_v63 = vadd.f32 %v5846_v21, %v5503_v19  ;;  %v5505_v32 = vadd.f32 %v5466_v40, %v21847_v5 }
 0x2e9   : > { %v17866_v48 = vpop.f32.mrf.mxu1  ;;  %18165 = vmatmul.mubr.msk.f32.gmra.mxu1 %vm209_vm1, %v22121_v23  ;;  %v17871_v19 = vpop.f32.mrf.mxu0  ;;  %18170 = vmatmul.mubr.msk.f32.vlgmr.msra.gmra.mxu0 %vm209_vm1, %v22134_v60 }
 0x2ea   : > { %18219 = vmatprep.mubr.msk.f32.mxu1 %vm209_vm1, %v21830_v18  ;;  %v22139_v7 = vadd.f32 %v17866_v48, %v5506_v50  ;;  %v6256_v18 = vadd.f32 %v17871_v19, %v21868_v4  ;;  %18268 = vmatpush3.msk.msra.mxu0 %vm661_vm0, %v21845_v47  ;;  %v22157_v48 = vld [vmem:[#allocation2 + $0x172] sm:$0xff]  ;;  %v22168_v4 = vld [vmem:[#allocation2 + $0x182] sm:$0xff] }
 0x2eb   : > { %v5856_v9 = vpop.f32.mrf.mxu1  ;;  %v22162_v50 = vld [vmem:[%s25183_s1 + $0x32] sm:$0x3]  ;;  %v6096_v3 = vpop.f32.mrf.mxu0  ;;  %18172 = vmatprep.mubr.msk.f32.mxu0 %vm209_vm1, %v22141_v45  ;;  %18367 = vmatprep.subr.msk.mxu0 %vm661_vm0, %v22148_v8 }
 0x2ec   : > { %v22150_v21 = vadd.f32 %v5856_v9, %v5505_v32  ;;  %v6255_v47 = vadd.f32 %v6096_v3, %v21879_v38 }
 0x2ed   : > { %v17921_v5 = vpop.f32.mrf.mxu1  ;;  %18220 = vmatmul.mubr.msk.f32.vlgmr.msra.gmra.mxu1 %vm209_vm1, %v21838_v28  ;;  %v17874_v32 = vpop.f32.mrf.mxu0  ;;  %18173 = vmatmul.mubr.msk.f32.gmra.mxu0 %vm209_vm1, %v22157_v48 }
 0x2ee   : > { %18222 = vmatprep.mubr.msk.f32.mxu1 %vm209_vm1, %v21854_v53  ;;  %v22171_v40 = vadd.f32 %v17921_v5, %v6256_v18  ;;  %18318 = vmatpush3.msk.msra.mxu1 %vm661_vm0, %v21859_v11  ;;  %v6258_v53 = vadd.f32 %v17874_v32, %v21892_v51  ;;  %v22188_v11 = vld [vmem:[#allocation2 + $0x192] sm:$0xff]  ;;  %v22192_v18 = vld [vmem:[#allocation2 + $0x1a2] sm:$0xff] }
 0x2ef   : > { %v6487_v28 = vpop.f32.mrf.mxu1  ;;  %18417 = vmatprep.subr.msk.mxu1 %vm661_vm0, %v22162_v50  ;;  %18175 = vmatprep.mubr.msk.f32.mxu0 %vm209_vm1, %v22168_v4  ;;  %v6106_v19 = vpop.f32.mrf.mxu0 }
 0x2f0   : > { %v22182_v9 = vadd.f32 %v6487_v28, %v6255_v47  ;;  %v6257_v5 = vadd.f32 %v6106_v19, %v21897_v25 }
 0x2f1   : > { %v17924_v38 = vpop.f32.mrf.mxu1  ;;  %18223 = vmatmul.mubr.msk.f32.gmra.mxu1 %vm209_vm1, %v21865_v59  ;;  %v17877_v47 = vpop.f32.mrf.mxu0  ;;  %18176 = vmatmul.mubr.msk.f32.gmra.mxu0 %vm209_vm1, %v22188_v11 }
 0x2f2   : > { %18225 = vmatprep.mubr.msk.f32.mxu1 %vm209_vm1, %v21885_v61  ;;  %v22195_v51 = vadd.f32 %v17924_v38, %v6258_v53  ;;  %v6260_v59 = vadd.f32 %v17877_v47, %v21908_v14  ;;  %18178 = vmatprep.mubr.msk.f32.mxu0 %vm209_vm1, %v22192_v18  ;;  %v22206_v61 = vld [vmem:[#allocation2 + $0x1b2] sm:$0xff]  ;;  %v22210_v53 = vld [vmem:[#allocation2 + $0x1c0] sm:$0xff] }
 0x2f3   : > { %v6497_v3 = vpop.f32.mrf.mxu1  ;;  %v6116_v25 = vpop.f32.mrf.mxu0  ;;  %25531 = vst [vmem:[#allocation48_spill] sm:$0xff] %v22210_v53  ;;  %v8247_v38 = vld [vmem:[#allocation2 + $0x1e2] sm:$0xff] }
 0x2f4   : > { %v22200_v28 = vadd.f32 %v6497_v3, %v6257_v5  ;;  %v6259_v14 = vadd.f32 %v6116_v25, %v21913_v10 }
 0x2f5   : > { %v17927_v32 = vpop.f32.mrf.mxu1  ;;  %18226 = vmatmul.mubr.msk.f32.gmra.mxu1 %vm209_vm1, %v21889_v20  ;;  %v17880_v3 = vpop.f32.mrf.mxu0  ;;  %18179 = vmatmul.mubr.msk.f32.gmra.mxu0 %vm209_vm1, %v22206_v61 }
 0x2f6   : > { %18228 = vmatprep.mubr.msk.f32.mxu1 %vm209_vm1, %v21903_v37  ;;  %v22213_v19 = vadd.f32 %v17927_v32, %v6260_v59  ;;  %v6262_v20 = vadd.f32 %v17880_v3, %v21926_v42  ;;  %18181 = vmatprep.mubr.msk.f32.mxu0 %vm209_vm1, %v8247_v38  ;;  %v22223_v37 = vld [vmem:[#allocation2 + $0x1f2] sm:$0xff]  ;;  %v22227_v59 = vld [vmem:[#allocation2 + $0x202] sm:$0xff] }
 0x2f7   : > { %v6507_v5 = vpop.f32.mrf.mxu1  ;;  %v6126_v10 = vpop.f32.mrf.mxu0 }
 0x2f8   : > { %v22218_v47 = vadd.f32 %v6507_v5, %v6259_v14  ;;  %v6261_v32 = vadd.f32 %v6126_v10, %v21931_v16 }
 0x2f9   : > { %v17930_v23 = vpop.f32.mrf.mxu1  ;;  %18229 = vmatmul.mubr.msk.f32.gmra.mxu1 %vm209_vm1, %v22210_v53  ;;  %v17883_v14 = vpop.f32.mrf.mxu0  ;;  %18182 = vmatmul.mubr.msk.f32.gmra.mxu0 %vm209_vm1, %v22223_v37 }
 0x2fa   : > { %18231 = vmatprep.mubr.msk.f32.mxu1 %vm209_vm1, %v21918_v43  ;;  %v22230_v25 = vadd.f32 %v17930_v23, %v6262_v20  ;;  %v6264_v5 = vadd.f32 %v17883_v14, %v21944_v22  ;;  %18184 = vmatprep.mubr.msk.f32.mxu0 %vm209_vm1, %v22227_v59  ;;  %v22241_v43 = vld [vmem:[#allocation2 + $0x212] sm:$0xff]  ;;  %v22245_v23 = vld [vmem:[#allocation2 + $0x222] sm:$0xff] }
 0x2fb   : > { %v6517_v42 = vpop.f32.mrf.mxu1  ;;  %v6136_v16 = vpop.f32.mrf.mxu0 }
 0x2fc   : > { %v22235_v38 = vadd.f32 %v6517_v42, %v6261_v32  ;;  %v6263_v20 = vadd.f32 %v6136_v16, %v21949_v41 }
 0x2fd   : > { %v17933_v3 = vpop.f32.mrf.mxu1  ;;  %18232 = vmatmul.mubr.msk.f32.gmra.mxu1 %vm209_vm1, %v21923_v35  ;;  %v17886_v32 = vpop.f32.mrf.mxu0  ;;  %18185 = vmatmul.mubr.msk.f32.gmra.mxu0 %vm209_vm1, %v22241_v43 }
 0x2fe   : > { %18234 = vmatprep.mubr.msk.f32.mxu1 %vm209_vm1, %v21937_v24  ;;  %v22248_v22 = vadd.f32 %v17933_v3, %v6264_v5  ;;  %v6266_v35 = vadd.f32 %v17886_v32, %v21962_v17  ;;  %18187 = vmatprep.mubr.msk.f32.mxu0 %vm209_vm1, %v22245_v23  ;;  %v22259_v24 = vld [vmem:[#allocation2 + $0x232] sm:$0xff]  ;;  %v22263_v5 = vld [vmem:[#allocation2 + $0x242] sm:$0xff] }
 0x2ff   : > { %v6527_v10 = vpop.f32.mrf.mxu1  ;;  %v6146_v41 = vpop.f32.mrf.mxu0 }
 0x300   : > { %v22253_v42 = vadd.f32 %v6527_v10, %v6263_v20  ;;  %v6265_v3 = vadd.f32 %v6146_v41, %v21967_v62 }
 0x301   : > { %v17936_v14 = vpop.f32.mrf.mxu1  ;;  %18235 = vmatmul.mubr.msk.f32.gmra.mxu1 %vm209_vm1, %v21941_v26  ;;  %v17889_v20 = vpop.f32.mrf.mxu0  ;;  %18188 = vmatmul.mubr.msk.f32.gmra.mxu0 %vm209_vm1, %v22259_v24 }
 0x302   : > { %18237 = vmatprep.mubr.msk.f32.mxu1 %vm209_vm1, %v21955_v2  ;;  %v22266_v17 = vadd.f32 %v17936_v14, %v6266_v35  ;;  %v6268_v26 = vadd.f32 %v17889_v20, %v21978_v36  ;;  %18190 = vmatprep.mubr.msk.f32.mxu0 %vm209_vm1, %v22263_v5  ;;  %v22277_v2 = vld [vmem:[#allocation2 + $0x252] sm:$0xff]  ;;  %v22281_v35 = vld [vmem:[#allocation2 + $0x260] sm:$0xff] }
 0x303   : > { %v6537_v16 = vpop.f32.mrf.mxu1  ;;  %v6156_v62 = vpop.f32.mrf.mxu0  ;;  %25532 = vst [vmem:[#allocation49_spill] sm:$0xff] %v22281_v35  ;;  %v8255_v14 = vld [vmem:[#allocation2 + $0x282] sm:$0xff] }
 0x304   : > { %v22271_v10 = vadd.f32 %v6537_v16, %v6265_v3  ;;  %v6267_v36 = vadd.f32 %v6156_v62, %v21983_v13 }
 0x305   : > { %v17939_v32 = vpop.f32.mrf.mxu1  ;;  %18238 = vmatmul.mubr.msk.f32.gmra.mxu1 %vm209_vm1, %v21959_v39  ;;  %v17892_v16 = vpop.f32.mrf.mxu0  ;;  %18191 = vmatmul.mubr.msk.f32.gmra.mxu0 %vm209_vm1, %v22277_v2 }
 0x306   : > { %18240 = vmatprep.mubr.msk.f32.mxu1 %vm209_vm1, %v21973_v34  ;;  %v22284_v41 = vadd.f32 %v17939_v32, %v6268_v26  ;;  %v6270_v39 = vadd.f32 %v17892_v16, %v21996_v56  ;;  %18193 = vmatprep.mubr.msk.f32.mxu0 %vm209_vm1, %v8255_v14  ;;  %v22294_v34 = vld [vmem:[#allocation2 + $0x292] sm:$0xff]  ;;  %v25533_v16 = vld [vmem:[#allocation60_spill] sm:$0xff] }
 0x307   : > { %v6547_v3 = vpop.f32.mrf.mxu1  ;;  %v6166_v13 = vpop.f32.mrf.mxu0 }
 0x308   : > { %v22289_v20 = vadd.f32 %v6547_v3, %v6267_v36  ;;  %v6269_v26 = vadd.f32 %v6166_v13, %v22001_v44  ;;  %v22312_v44 = vld [vmem:[#allocation2 + $0x2c0] sm:$0xff] }
 0x309   : > { %v17942_v53 = vpop.f32.mrf.mxu1  ;;  %18241 = vmatmul.mubr.msk.f32.gmra.mxu1 %vm209_vm1, %v22281_v35  ;;  %v17895_v56 = vpop.f32.mrf.mxu0  ;;  %18194 = vmatmul.mubr.msk.f32.gmra.mxu0 %vm209_vm1, %v22294_v34  ;;  %25534 = vst [vmem:[#allocation29_spill] sm:$0xff] %v22312_v44 }
 0x30a   : > { %18243 = vmatprep.mubr.msk.f32.mxu1 %vm209_vm1, %v21988_v29  ;;  %v22299_v32 = vadd.f32 %v17942_v53, %v6270_v39  ;;  %v6272_v36 = vadd.f32 %v17895_v56, %v22012_v6  ;;  %18196 = vmatprep.mubr.msk.f32.mxu0 %vm209_vm1, %v25533_v16 }
 0x30b   : > { %v6557_v62 = vpop.f32.mrf.mxu1  ;;  %v6176_v29 = vpop.f32.mrf.mxu0 }
 0x30c   : > { %v22304_v3 = vadd.f32 %v6557_v62, %v6269_v26  ;;  %v6271_v53 = vadd.f32 %v6176_v29, %v22017_v54  ;;  %v25535_v26 = vld [vmem:[#allocation32_spill] sm:$0xff]  ;;  %v22333_v29 = vld [vmem:[#allocation2 + $0x2f0] sm:$0xff] }
 0x30d   : > { %v17945_v14 = vpop.f32.mrf.mxu1  ;;  %18244 = vmatmul.mubr.msk.f32.gmra.mxu1 %vm209_vm1, %v21993_v15  ;;  %v17898_v13 = vpop.f32.mrf.mxu0  ;;  %18197 = vmatmul.mubr.msk.f32.gmra.mxu0 %vm209_vm1, %v25535_v26  ;;  %v22328_v54 = vld [vmem:[#allocation2 + $0x2e0] sm:$0xff]  ;;  %25538 = vst [vmem:[#allocation35_spill] sm:$0xff] %v22333_v29 }
 0x30e   : > { %18246 = vmatprep.mubr.msk.f32.mxu1 %vm209_vm1, %v22007_v33  ;;  %v22315_v39 = vadd.f32 %v17945_v14, %v6272_v36  ;;  %v6274_v15 = vadd.f32 %v17898_v13, %v22028_v52  ;;  %v25536_v33 = vld [vmem:[#allocation62_spill] sm:$0xff]  ;;  %25537 = vst [vmem:[#allocation33_spill] sm:$0xff] %v22328_v54 }
 0x30f   : > { %v6567_v6 = vpop.f32.mrf.mxu1  ;;  %18199 = vmatprep.mubr.msk.f32.mxu0 %vm209_vm1, %v25536_v33  ;;  %v6186_v16 = vpop.f32.mrf.mxu0 }
 0x310   : > { %v22320_v62 = vadd.f32 %v6567_v6, %v6271_v53  ;;  %v6273_v36 = vadd.f32 %v6186_v16, %v22033_v46  ;;  %v25539_v6 = vld [vmem:[#allocation64_spill] sm:$0xff] }
 0x311   : > { %v17948_v56 = vpop.f32.mrf.mxu1  ;;  %18247 = vmatmul.mubr.msk.f32.gmra.mxu1 %vm209_vm1, %v22312_v44  ;;  %v17901_v53 = vpop.f32.mrf.mxu0  ;;  %18200 = vmatmul.mubr.msk.f32.gmra.mxu0 %vm209_vm1, %v25539_v6 }
 0x312   : > { %18249 = vmatprep.mubr.msk.f32.mxu1 %vm209_vm1, %v22023_v12  ;;  %v22331_v14 = vadd.f32 %v17948_v56, %v6274_v15  ;;  %v6276_v13 = vadd.f32 %v17901_v53, %v22042_v27  ;;  %v25540_v12 = vld [vmem:[#allocation61_spill] sm:$0xff]  ;;  %v22346_v15 = vld [vmem:[#allocation2 + $0x300] sm:$0xff] }
 0x313   : > { %v6577_v52 = vpop.f32.mrf.mxu1  ;;  %18202 = vmatprep.mubr.msk.f32.mxu0 %vm209_vm1, %v25540_v12  ;;  %v6196_v46 = vpop.f32.mrf.mxu0  ;;  %25541 = vst [vmem:[#allocation40_spill] sm:$0xff] %v22346_v15  ;;  %v8263_v56 = vld [vmem:[#allocation2 + $0x322] sm:$0xff] }
 0x314   : > { %v22338_v26 = vadd.f32 %v6577_v52, %v6273_v36  ;;  %v6275_v16 = vadd.f32 %v6196_v46, %v22047_v55  ;;  %v25542_v52 = vld [vmem:[#allocation50_spill] sm:$0xff] }
 0x315   : > { %v17951_v33 = vpop.f32.mrf.mxu1  ;;  %18250 = vmatmul.mubr.msk.f32.gmra.mxu1 %vm209_vm1, %v22328_v54  ;;  %v17904_v36 = vpop.f32.mrf.mxu0  ;;  %18203 = vmatmul.mubr.msk.f32.gmra.mxu0 %vm209_vm1, %v25542_v52 }
 0x316   : > { %18252 = vmatprep.mubr.msk.f32.mxu1 %vm209_vm1, %v22333_v29  ;;  %v22349_v6 = vadd.f32 %v17951_v33, %v6276_v13  ;;  %v6278_v53 = vadd.f32 %v17904_v36, %v22060_v30  ;;  %18205 = vmatprep.mubr.msk.f32.mxu0 %vm209_vm1, %v8263_v56  ;;  %v22359_v29 = vld [vmem:[#allocation2 + $0x332] sm:$0xff]  ;;  %v22363_v13 = vld [vmem:[#allocation2 + $0x342] sm:$0xff] }
 0x317   : > { %v6587_v27 = vpop.f32.mrf.mxu1  ;;  %v6206_v55 = vpop.f32.mrf.mxu0  ;;  %25543 = vst [vmem:[#allocation60_spill] sm:$0xff] %v22363_v13  ;;  %v25544_v33 = vld [vmem:[#allocation58_spill] sm:$0xff] }
 0x318   : > { %v22354_v54 = vadd.f32 %v6587_v27, %v6275_v16  ;;  %v6277_v46 = vadd.f32 %v6206_v55, %v25544_v33  ;;  %v22381_v55 = vld [vmem:[#allocation2 + $0x362] sm:$0xff] }
 0x319   : > { %v17954_v12 = vpop.f32.mrf.mxu1  ;;  %18253 = vmatmul.mubr.msk.f32.gmra.mxu1 %vm209_vm1, %v22346_v15  ;;  %v17907_v16 = vpop.f32.mrf.mxu0  ;;  %18206 = vmatmul.mubr.msk.f32.gmra.mxu0 %vm209_vm1, %v22359_v29  ;;  %v25545_v15 = vld [vmem:[#allocation47_spill] sm:$0xff]  ;;  %25547 = vst [vmem:[#allocation32_spill] sm:$0xff] %v22381_v55  ;;  %v25548_v33 = vld [vmem:[#allocation44_spill] sm:$0xff] }
 0x31a   : > { %18255 = vmatprep.mubr.msk.f32.mxu1 %vm209_vm1, %v22052_v31  ;;  %v22366_v52 = vadd.f32 %v17954_v12, %v6278_v53  ;;  %v6280_v27 = vadd.f32 %v17907_v16, %v22082_v58  ;;  %18208 = vmatprep.mubr.msk.f32.mxu0 %vm209_vm1, %v22363_v13  ;;  %v22377_v31 = vld [vmem:[#allocation2 + $0x352] sm:$0xff] }
 0x31b   : > { %v6597_v30 = vpop.f32.mrf.mxu1  ;;  %v6216_v53 = vpop.f32.mrf.mxu0  ;;  %v25546_v12 = vld [vmem:[#allocation59_spill] sm:$0xff] }
 0x31c   : > { %v22371_v56 = vadd.f32 %v6597_v30, %v6277_v46  ;;  %v6279_v44 = vadd.f32 %v6216_v53, %v25548_v33  ;;  %v25550_v13 = vld [vmem:[#allocation7_spill] sm:$0xff]  ;;  %v25552_v53 = vld [vmem:[#allocation37_spill] sm:$0xff] }
 0x31d   : > { %v17957_v36 = vpop.f32.mrf.mxu1  ;;  %18256 = vmatmul.mubr.msk.f32.gmra.mxu1 %vm209_vm1, %v25545_v15  ;;  %v17910_v30 = vpop.f32.mrf.mxu0  ;;  %18209 = vmatmul.mubr.msk.f32.gmra.mxu0 %vm209_vm1, %v22377_v31 }
 0x31e   : > { %18258 = vmatprep.mubr.msk.f32.mxu1 %vm209_vm1, %v25546_v12  ;;  %v22384_v58 = vadd.f32 %v17957_v36, %v6280_v27  ;;  %v6282_v15 = vadd.f32 %v17910_v30, %v22104_v1  ;;  %18211 = vmatprep.mubr.msk.f32.mxu0 %vm209_vm1, %v22381_v55  ;;  %v22395_v12 = vld [vmem:[#allocation2 + $0x372] sm:$0xff]  ;;  %v22399_v36 = vld [vmem:[#allocation2 + $0x382] sm:$0xff] }
 0x31f   : > { %v6607_v46 = vpop.f32.mrf.mxu1  ;;  %v6226_v27 = vpop.f32.mrf.mxu0  ;;  %25551 = vst [vmem:[#allocation64_spill] sm:$0xff] %v22399_v36 }
 0x320   : > { %v22389_v16 = vadd.f32 %v6607_v46, %v6279_v44  ;;  %v6281_v33 = vadd.f32 %v6226_v27, %v25552_v53 }
 0x321   : > { %v17960_v35 = vpop.f32.mrf.mxu1  ;;  %18259 = vmatmul.mubr.msk.f32.gmra.mxu1 %vm209_vm1, %v25550_v13  ;;  %v17913_v46 = vpop.f32.mrf.mxu0  ;;  %18212 = vmatmul.mubr.msk.f32.gmra.mxu0 %vm209_vm1, %v22395_v12 }
 0x322   : > { %25549 = vst [vmem:[#allocation62_spill] sm:$0xff] %v22389_v16  ;;  %18261 = vmatprep.mubr.msk.f32.mxu1 %vm209_vm1, %v22095_v57  ;;  %v22402_v1 = vadd.f32 %v17960_v35, %v6282_v15  ;;  %v6284_v13 = vadd.f32 %v17913_v46, %v22124_v49  ;;  %v25553_v16 = vld [vmem:[#allocation63_spill] sm:$0xff]  ;;  %18214 = vmatprep.mubr.msk.f32.mxu0 %vm209_vm1, %v22399_v36  ;;  %v22417_v15 = vld [vmem:[#allocation2 + $0x3a0] sm:$0xff] }
 0x323   : > { %v6617_v44 = vpop.f32.mrf.mxu1  ;;  %v22413_v57 = vld [vmem:[#allocation2 + $0x392] sm:$0xff]  ;;  %v6236_v35 = vpop.f32.mrf.mxu0  ;;  %25554 = vst [vmem:[#allocation61_spill] sm:$0xff] %v22417_v15  ;;  %v22431_v36 = vld [vmem:[#allocation2 + $0x161] sm:$0xff] }
 0x324   : > { %v22407_v30 = vadd.f32 %v6617_v44, %v6281_v33  ;;  %v6283_v27 = vadd.f32 %v6236_v35, %v22129_v63  ;;  %v22438_v35 = vld [vmem:[#allocation2 + $0x171] sm:$0xff] }
 0x325   : > { %v17963_v55 = vpop.f32.mrf.mxu1  ;;  %18262 = vmatmul.mubr.msk.f32.gmra.mxu1 %vm209_vm1, %v25553_v16  ;;  %v17916_v33 = vpop.f32.mrf.mxu0  ;;  %18215 = vmatmul.mubr.msk.f32.gmra.mxu0 %vm209_vm1, %v22413_v57 }
 0x326   : > { %18264 = vmatprep.mubr.msk.f32.mxu1 %vm209_vm1, %v22117_v0  ;;  %v22420_v49 = vadd.f32 %v17963_v55, %v6284_v13  ;;  %v6286_v16 = vadd.f32 %v17916_v33, %v22139_v7  ;;  %v25555_v0 = vld [vmem:[#allocation39_spill] sm:$0xff] }
 0x327   : > { %v6627_v53 = vpop.f32.mrf.mxu1  ;;  %18269 = vmatprep.mubr.msk.f32.mxu0 %vm209_vm1, %v25555_v0  ;;  %v6246_v63 = vpop.f32.mrf.mxu0  ;;  %v22460_v0 = vld [vmem:[#allocation2 + $0x191] sm:$0xff] }
 0x328   : > { %v22425_v44 = vadd.f32 %v6627_v53, %v6283_v27  ;;  %v6285_v55 = vadd.f32 %v6246_v63, %v22150_v21  ;;  %v22445_v53 = vld [vmem:[%s25183_s1 + $0x34] sm:$0x3] }
 0x329   : > { %v17966_v46 = vpop.f32.mrf.mxu1  ;;  %18265 = vmatmul.mubr.msk.f32.gmra.mxu1 %vm209_vm1, %v22417_v15  ;;  %v17971_v27 = vpop.f32.mrf.mxu0  ;;  %18270 = vmatmul.mubr.msk.f32.vlgmr.msra.gmra.mxu0 %vm209_vm1, %v22431_v36 }
 0x32a   : > { %18319 = vmatprep.mubr.msk.f32.mxu1 %vm209_vm1, %v22134_v60  ;;  %v22436_v13 = vadd.f32 %v17966_v46, %v6286_v16  ;;  %v7037_v60 = vadd.f32 %v17971_v27, %v22171_v40  ;;  %18368 = vmatpush3.msk.msra.mxu0 %vm661_vm0, %v22148_v8  ;;  %v22454_v16 = vld [vmem:[#allocation2 + $0x181] sm:$0xff]  ;;  %v22482_v27 = vld [vmem:[#allocation2 + $0x1b1] sm:$0xff] }
 0x32b   : > { %v6637_v7 = vpop.f32.mrf.mxu1  ;;  %v6877_v46 = vpop.f32.mrf.mxu0  ;;  %18272 = vmatprep.mubr.msk.f32.mxu0 %vm209_vm1, %v22438_v35  ;;  %18467 = vmatprep.subr.msk.mxu0 %vm661_vm0, %v22445_v53 }
 0x32c   : > { %v22447_v33 = vadd.f32 %v6637_v7, %v6285_v55  ;;  %v7036_v40 = vadd.f32 %v6877_v46, %v22182_v9  ;;  %v22478_v9 = vld [vmem:[#allocation2 + $0x1a1] sm:$0xff] }
 0x32d   : > { %v18021_v21 = vpop.f32.mrf.mxu1  ;;  %18320 = vmatmul.mubr.msk.f32.vlgmr.msra.gmra.mxu1 %vm209_vm1, %v22141_v45  ;;  %v17974_v45 = vpop.f32.mrf.mxu0  ;;  %18273 = vmatmul.mubr.msk.f32.gmra.mxu0 %vm209_vm1, %v22454_v16 }
 0x32e   : > { %18322 = vmatprep.mubr.msk.f32.mxu1 %vm209_vm1, %v22157_v48  ;;  %v22463_v63 = vadd.f32 %v18021_v21, %v7037_v60  ;;  %18418 = vmatpush3.msk.msra.mxu1 %vm661_vm0, %v22162_v50  ;;  %v7039_v55 = vadd.f32 %v17974_v45, %v22195_v51  ;;  %v22500_v45 = vld [vmem:[#allocation2 + $0x1c2] sm:$0xff] }
 0x32f   : > { %v7267_v8 = vpop.f32.mrf.mxu1  ;;  %18275 = vmatprep.mubr.msk.f32.mxu0 %vm209_vm1, %v22460_v0  ;;  %v6887_v50 = vpop.f32.mrf.mxu0  ;;  %25556 = vst [vmem:[#allocation50_spill] sm:$0xff] %v22500_v45 }
 0x330   : > { %v22472_v48 = vadd.f32 %v7267_v8, %v7036_v40  ;;  %v7038_v60 = vadd.f32 %v6887_v50, %v22200_v28 }
 0x331   : > { %v18024_v7 = vpop.f32.mrf.mxu1  ;;  %18323 = vmatmul.mubr.msk.f32.gmra.mxu1 %vm209_vm1, %v22168_v4  ;;  %v17977_v46 = vpop.f32.mrf.mxu0  ;;  %18276 = vmatmul.mubr.msk.f32.gmra.mxu0 %vm209_vm1, %v22478_v9 }
 0x332   : > { %18325 = vmatprep.mubr.msk.f32.mxu1 %vm209_vm1, %v22188_v11  ;;  %v22485_v51 = vadd.f32 %v18024_v7, %v7039_v55  ;;  %v7041_v4 = vadd.f32 %v17977_v46, %v22213_v19  ;;  %18278 = vmatprep.mubr.msk.f32.mxu0 %vm209_vm1, %v22482_v27  ;;  %v22496_v11 = vld [vmem:[#allocation2 + $0x1c1] sm:$0xff] }
 0x333   : > { %v7277_v21 = vpop.f32.mrf.mxu1  ;;  %v6897_v28 = vpop.f32.mrf.mxu0  ;;  %v22514_v46 = vld [vmem:[#allocation2 + $0x201] sm:$0xff] }
 0x334   : > { %v22490_v40 = vadd.f32 %v7277_v21, %v7038_v60  ;;  %v7040_v55 = vadd.f32 %v6897_v28, %v22218_v47 }
 0x335   : > { %v18027_v8 = vpop.f32.mrf.mxu1  ;;  %18326 = vmatmul.mubr.msk.f32.gmra.mxu1 %vm209_vm1, %v22192_v18  ;;  %v17980_v50 = vpop.f32.mrf.mxu0  ;;  %18279 = vmatmul.mubr.msk.f32.gmra.mxu0 %vm209_vm1, %v22496_v11 }
 0x336   : > { %18328 = vmatprep.mubr.msk.f32.mxu1 %vm209_vm1, %v22206_v61  ;;  %v22503_v19 = vadd.f32 %v18027_v8, %v7041_v4  ;;  %v7043_v18 = vadd.f32 %v17980_v50, %v22230_v25  ;;  %v25557_v61 = vld [vmem:[#allocation43_spill] sm:$0xff] }
 0x337   : > { %v7287_v7 = vpop.f32.mrf.mxu1  ;;  %18281 = vmatprep.mubr.msk.f32.mxu0 %vm209_vm1, %v25557_v61  ;;  %v6907_v47 = vpop.f32.mrf.mxu0  ;;  %v22518_v4 = vld [vmem:[#allocation2 + $0x211] sm:$0xff] }
 0x338   : > { %v22508_v60 = vadd.f32 %v7287_v7, %v7040_v55  ;;  %v7042_v8 = vadd.f32 %v6907_v47, %v22235_v38 }
 0x339   : > { %v18030_v21 = vpop.f32.mrf.mxu1  ;;  %18329 = vmatmul.mubr.msk.f32.gmra.mxu1 %vm209_vm1, %v22500_v45  ;;  %v17983_v55 = vpop.f32.mrf.mxu0  ;;  %18282 = vmatmul.mubr.msk.f32.gmra.mxu0 %vm209_vm1, %v22514_v46  ;;  %v22586_v45 = vld [vmem:[#allocation2 + $0x2a1] sm:$0xff] }
 0x33a   : > { %18331 = vmatprep.mubr.msk.f32.mxu1 %vm209_vm1, %v22223_v37  ;;  %v22521_v25 = vadd.f32 %v18030_v21, %v7043_v18  ;;  %v7045_v7 = vadd.f32 %v17983_v55, %v22248_v22  ;;  %18284 = vmatprep.mubr.msk.f32.mxu0 %vm209_vm1, %v22518_v4  ;;  %v22532_v37 = vld [vmem:[#allocation2 + $0x221] sm:$0xff]  ;;  %v22536_v18 = vld [vmem:[#allocation2 + $0x231] sm:$0xff] }
 0x33b   : > { %v7297_v28 = vpop.f32.mrf.mxu1  ;;  %v6917_v38 = vpop.f32.mrf.mxu0 }
 0x33c   : > { %v22526_v50 = vadd.f32 %v7297_v28, %v7042_v8  ;;  %v7044_v21 = vadd.f32 %v6917_v38, %v22253_v42 }
 0x33d   : > { %v18033_v61 = vpop.f32.mrf.mxu1  ;;  %18332 = vmatmul.mubr.msk.f32.gmra.mxu1 %vm209_vm1, %v22227_v59  ;;  %v17986_v8 = vpop.f32.mrf.mxu0  ;;  %18285 = vmatmul.mubr.msk.f32.gmra.mxu0 %vm209_vm1, %v22532_v37 }
 0x33e   : > { %18334 = vmatprep.mubr.msk.f32.mxu1 %vm209_vm1, %v22241_v43  ;;  %v22539_v22 = vadd.f32 %v18033_v61, %v7045_v7  ;;  %v7047_v59 = vadd.f32 %v17986_v8, %v22266_v17  ;;  %18287 = vmatprep.mubr.msk.f32.mxu0 %vm209_vm1, %v22536_v18  ;;  %v22550_v43 = vld [vmem:[#allocation2 + $0x241] sm:$0xff]  ;;  %v22554_v7 = vld [vmem:[#allocation2 + $0x251] sm:$0xff] }
 0x33f   : > { %v7307_v47 = vpop.f32.mrf.mxu1  ;;  %v6927_v42 = vpop.f32.mrf.mxu0 }
 0x340   : > { %v22544_v28 = vadd.f32 %v7307_v47, %v7044_v21  ;;  %v7046_v61 = vadd.f32 %v6927_v42, %v22271_v10 }
 0x341   : > { %v18036_v55 = vpop.f32.mrf.mxu1  ;;  %18335 = vmatmul.mubr.msk.f32.gmra.mxu1 %vm209_vm1, %v22245_v23  ;;  %v17989_v21 = vpop.f32.mrf.mxu0  ;;  %18288 = vmatmul.mubr.msk.f32.gmra.mxu0 %vm209_vm1, %v22550_v43 }
 0x342   : > { %18337 = vmatprep.mubr.msk.f32.mxu1 %vm209_vm1, %v22259_v24  ;;  %v22557_v17 = vadd.f32 %v18036_v55, %v7047_v59  ;;  %v7049_v23 = vadd.f32 %v17989_v21, %v22284_v41  ;;  %18290 = vmatprep.mubr.msk.f32.mxu0 %vm209_vm1, %v22554_v7  ;;  %v22568_v24 = vld [vmem:[#allocation2 + $0x261] sm:$0xff] }
 0x343   : > { %v7317_v38 = vpop.f32.mrf.mxu1  ;;  %v6937_v10 = vpop.f32.mrf.mxu0  ;;  %v22572_v59 = vld [vmem:[#allocation2 + $0x262] sm:$0xff] }
 0x344   : > { %v22562_v47 = vadd.f32 %v7317_v38, %v7046_v61  ;;  %25558 = vst [vmem:[#allocation58_spill] sm:$0xff] %v22572_v59  ;;  %v7048_v55 = vadd.f32 %v6937_v10, %v22289_v20 }
 0x345   : > { %v18039_v8 = vpop.f32.mrf.mxu1  ;;  %18338 = vmatmul.mubr.msk.f32.gmra.mxu1 %vm209_vm1, %v22263_v5  ;;  %v17992_v61 = vpop.f32.mrf.mxu0  ;;  %18291 = vmatmul.mubr.msk.f32.gmra.mxu0 %vm209_vm1, %v22568_v24 }
 0x346   : > { %18340 = vmatprep.mubr.msk.f32.mxu1 %vm209_vm1, %v22277_v2  ;;  %v22575_v41 = vadd.f32 %v18039_v8, %v7049_v23  ;;  %v7051_v5 = vadd.f32 %v17992_v61, %v22299_v32  ;;  %v25559_v2 = vld [vmem:[#allocation45_spill] sm:$0xff]  ;;  %v22592_v8 = vld [vmem:[#allocation2 + $0x2b1] sm:$0xff] }
 0x347   : > { %v7327_v42 = vpop.f32.mrf.mxu1  ;;  %18293 = vmatprep.mubr.msk.f32.mxu0 %vm209_vm1, %v25559_v2  ;;  %v6947_v20 = vpop.f32.mrf.mxu0  ;;  %v22590_v23 = vld [vmem:[#allocation2 + $0x2a2] sm:$0xff]  ;;  %25561 = vst [vmem:[#allocation59_spill] sm:$0xff] %v22592_v8 }
 0x348   : > { %v22580_v38 = vadd.f32 %v7327_v42, %v7048_v55  ;;  %25560 = vst [vmem:[#allocation47_spill] sm:$0xff] %v22590_v23  ;;  %v7050_v32 = vadd.f32 %v6947_v20, %v22304_v3  ;;  %v22597_v42 = vld [vmem:[#allocation2 + $0x2b2] sm:$0xff]  ;;  %v22608_v3 = vld [vmem:[#allocation2 + $0x2c1] sm:$0xff] }
 0x349   : > { %v18042_v21 = vpop.f32.mrf.mxu1  ;;  %18341 = vmatmul.mubr.msk.f32.gmra.mxu1 %vm209_vm1, %v22572_v59  ;;  %25562 = vst [vmem:[#allocation44_spill] sm:$0xff] %v22597_v42  ;;  %v17995_v61 = vpop.f32.mrf.mxu0  ;;  %18294 = vmatmul.mubr.msk.f32.gmra.mxu0 %vm209_vm1, %v22586_v45  ;;  %v22614_v20 = vld [vmem:[#allocation2 + $0x2d1] sm:$0xff] }
 0x34a   : > { %18343 = vmatprep.mubr.msk.f32.mxu1 %vm209_vm1, %v22294_v34  ;;  %v22595_v10 = vadd.f32 %v18042_v21, %v7051_v5  ;;  %v7053_v2 = vadd.f32 %v17995_v61, %v22315_v39  ;;  %18296 = vmatprep.mubr.msk.f32.mxu0 %vm209_vm1, %v22592_v8  ;;  %v22612_v21 = vld [vmem:[#allocation2 + $0x2c2] sm:$0xff]  ;;  %25564 = vst [vmem:[#allocation37_spill] sm:$0xff] %v22614_v20  ;;  %v22619_v61 = vld [vmem:[#allocation2 + $0x2d2] sm:$0xff] }
 0x34b   : > { %v7337_v55 = vpop.f32.mrf.mxu1  ;;  %v6957_v5 = vpop.f32.mrf.mxu0  ;;  %25563 = vst [vmem:[#allocation7_spill] sm:$0xff] %v22612_v21  ;;  %25565 = vst [vmem:[#allocation63_spill] sm:$0xff] %v22619_v61 }
 0x34c   : > { %v22602_v59 = vadd.f32 %v7337_v55, %v7050_v32  ;;  %v7052_v39 = vadd.f32 %v6957_v5, %v22320_v62  ;;  %v22630_v62 = vld [vmem:[#allocation2 + $0x2e1] sm:$0xff]  ;;  %v22636_v5 = vld [vmem:[#allocation2 + $0x2f1] sm:$0xff] }
 0x34d   : > { %v18045_v34 = vpop.f32.mrf.mxu1  ;;  %18344 = vmatmul.mubr.msk.f32.gmra.mxu1 %vm209_vm1, %v22590_v23  ;;  %v17998_v23 = vpop.f32.mrf.mxu0  ;;  %18297 = vmatmul.mubr.msk.f32.gmra.mxu0 %vm209_vm1, %v22608_v3  ;;  %25568 = vst [vmem:[#allocation45_spill] sm:$0xff] %v22636_v5 }
 0x34e   : > { %18346 = vmatprep.mubr.msk.f32.mxu1 %vm209_vm1, %v22597_v42  ;;  %v22617_v32 = vadd.f32 %v18045_v34, %v7053_v2  ;;  %v7055_v15 = vadd.f32 %v17998_v23, %v22331_v14  ;;  %18299 = vmatprep.mubr.msk.f32.mxu0 %vm209_vm1, %v22614_v20  ;;  %v22634_v34 = vld [vmem:[#allocation2 + $0x2e2] sm:$0xff] }
 0x34f   : > { %v7347_v55 = vpop.f32.mrf.mxu1  ;;  %v6967_v2 = vpop.f32.mrf.mxu0  ;;  %25567 = vst [vmem:[#allocation43_spill] sm:$0xff] %v22634_v34 }
 0x350   : > { %v22624_v8 = vadd.f32 %v7347_v55, %v7052_v39  ;;  %v7054_v14 = vadd.f32 %v6967_v2, %v22338_v26  ;;  %v22641_v55 = vld [vmem:[#allocation2 + $0x2f2] sm:$0xff]  ;;  %v22652_v26 = vld [vmem:[#allocation2 + $0x301] sm:$0xff] }
 0x351   : > { %v18048_v42 = vpop.f32.mrf.mxu1  ;;  %18347 = vmatmul.mubr.msk.f32.gmra.mxu1 %vm209_vm1, %v22612_v21  ;;  %25569 = vst [vmem:[#allocation65_spill] sm:$0xff] %v22641_v55  ;;  %v18001_v21 = vpop.f32.mrf.mxu0  ;;  %18300 = vmatmul.mubr.msk.f32.gmra.mxu0 %vm209_vm1, %v22630_v62 }
 0x352   : > { %25566 = vst [vmem:[#allocation39_spill] sm:$0xff] %v22624_v8  ;;  %18349 = vmatprep.mubr.msk.f32.mxu1 %vm209_vm1, %v22619_v61  ;;  %v22639_v23 = vadd.f32 %v18048_v42, %v7055_v15  ;;  %v7057_v20 = vadd.f32 %v18001_v21, %v22349_v6  ;;  %18302 = vmatprep.mubr.msk.f32.mxu0 %vm209_vm1, %v22636_v5  ;;  %v22656_v42 = vld [vmem:[#allocation2 + $0x302] sm:$0xff] }
 0x353   : > { %v7357_v39 = vpop.f32.mrf.mxu1  ;;  %v6977_v15 = vpop.f32.mrf.mxu0  ;;  %25571 = vst [vmem:[#allocation67_spill] sm:$0xff] %v22656_v42 }
 0x354   : > { %v22646_v8 = vadd.f32 %v7357_v39, %v7054_v14  ;;  %v7056_v2 = vadd.f32 %v6977_v15, %v22354_v54 }
 0x355   : > { %v18051_v61 = vpop.f32.mrf.mxu1  ;;  %18350 = vmatmul.mubr.msk.f32.gmra.mxu1 %vm209_vm1, %v22634_v34  ;;  %v18004_v14 = vpop.f32.mrf.mxu0  ;;  %18303 = vmatmul.mubr.msk.f32.gmra.mxu0 %vm209_vm1, %v22652_v26 }
 0x356   : > { %25570 = vst [vmem:[#allocation66_spill] sm:$0xff] %v22646_v8  ;;  %18352 = vmatprep.mubr.msk.f32.mxu1 %vm209_vm1, %v22641_v55  ;;  %v22659_v6 = vadd.f32 %v18051_v61, %v7057_v20  ;;  %v7059_v39 = vadd.f32 %v18004_v14, %v22366_v52  ;;  %v25572_v55 = vld [vmem:[#allocation42_spill] sm:$0xff]  ;;  %v25573_v52 = vld [vmem:[#allocation12_spill] sm:$0xff] }
 0x357   : > { %v7367_v21 = vpop.f32.mrf.mxu1  ;;  %18305 = vmatprep.mubr.msk.f32.mxu0 %vm209_vm1, %v25572_v55  ;;  %v6987_v8 = vpop.f32.mrf.mxu0  ;;  %v25575_v55 = vld [vmem:[#allocation31_spill] sm:$0xff] }
 0x358   : > { %v22664_v34 = vadd.f32 %v7367_v21, %v7056_v2  ;;  %v7058_v54 = vadd.f32 %v6987_v8, %v22371_v56  ;;  %v25576_v56 = vld [vmem:[#allocation62_spill] sm:$0xff] }
 0x359   : > { %v18054_v5 = vpop.f32.mrf.mxu1  ;;  %18353 = vmatmul.mubr.msk.f32.gmra.mxu1 %vm209_vm1, %v22656_v42  ;;  %v18007_v15 = vpop.f32.mrf.mxu0  ;;  %18306 = vmatmul.mubr.msk.f32.gmra.mxu0 %vm209_vm1, %v25573_v52  ;;  %v25574_v42 = vld [vmem:[#allocation60_spill] sm:$0xff] }
 0x35a   : > { %18355 = vmatprep.mubr.msk.f32.mxu1 %vm209_vm1, %v22359_v29  ;;  %v22673_v20 = vadd.f32 %v18054_v5, %v7059_v39  ;;  %v7061_v2 = vadd.f32 %v18007_v15, %v22384_v58  ;;  %18308 = vmatprep.mubr.msk.f32.mxu0 %vm209_vm1, %v25575_v55  ;;  %v25577_v58 = vld [vmem:[#allocation46_spill] sm:$0xff]  ;;  %v25578_v15 = vld [vmem:[#allocation32_spill] sm:$0xff]  ;;  %v25579_v55 = vld [vmem:[#allocation15_spill] sm:$0xff] }
 0x35b   : > { %v7377_v61 = vpop.f32.mrf.mxu1  ;;  %v6997_v29 = vpop.f32.mrf.mxu0 }
 0x35c   : > { %v22678_v21 = vadd.f32 %v7377_v61, %v7058_v54  ;;  %v7060_v8 = vadd.f32 %v6997_v29, %v25576_v56 }
 0x35d   : > { %v18057_v14 = vpop.f32.mrf.mxu1  ;;  %18356 = vmatmul.mubr.msk.f32.gmra.mxu1 %vm209_vm1, %v25574_v42  ;;  %v18010_v52 = vpop.f32.mrf.mxu0  ;;  %18309 = vmatmul.mubr.msk.f32.gmra.mxu0 %vm209_vm1, %v25577_v58  ;;  %v25581_v58 = vld [vmem:[#allocation64_spill] sm:$0xff] }
 0x35e   : > { %18358 = vmatprep.mubr.msk.f32.mxu1 %vm209_vm1, %v22377_v31  ;;  %v22687_v5 = vadd.f32 %v18057_v14, %v7061_v2  ;;  %v7063_v54 = vadd.f32 %v18010_v52, %v22402_v1  ;;  %18311 = vmatprep.mubr.msk.f32.mxu0 %vm209_vm1, %v25579_v55  ;;  %v25580_v1 = vld [vmem:[#allocation21_spill] sm:$0xff] }
 0x35f   : > { %v7387_v39 = vpop.f32.mrf.mxu1  ;;  %v7007_v31 = vpop.f32.mrf.mxu0 }
 0x360   : > { %v22692_v61 = vadd.f32 %v7387_v39, %v7060_v8  ;;  %v7062_v2 = vadd.f32 %v7007_v31, %v22407_v30 }
 0x361   : > { %v18060_v42 = vpop.f32.mrf.mxu1  ;;  %18359 = vmatmul.mubr.msk.f32.gmra.mxu1 %vm209_vm1, %v25578_v15  ;;  %v18013_v56 = vpop.f32.mrf.mxu0  ;;  %18312 = vmatmul.mubr.msk.f32.gmra.mxu0 %vm209_vm1, %v25580_v1  ;;  %v25582_v15 = vld [vmem:[#allocation30_spill] sm:$0xff] }
 0x362   : > { %18361 = vmatprep.mubr.msk.f32.mxu1 %vm209_vm1, %v22395_v12  ;;  %v22701_v14 = vadd.f32 %v18060_v42, %v7063_v54  ;;  %v7065_v8 = vadd.f32 %v18013_v56, %v22420_v49  ;;  %18314 = vmatprep.mubr.msk.f32.mxu0 %vm209_vm1, %v25582_v15  ;;  %v22712_v12 = vld [vmem:[#allocation2 + $0x3a1] sm:$0xff] }
 0x363   : > { %v7397_v29 = vpop.f32.mrf.mxu1  ;;  %v7017_v30 = vpop.f32.mrf.mxu0  ;;  %v22716_v54 = vld [vmem:[#allocation2 + $0x3a2] sm:$0xff] }
 0x364   : > { %v22706_v39 = vadd.f32 %v7397_v29, %v7062_v2  ;;  %v9801_v42 = vld [vmem:[#allocation2 + $0x160] sm:$0xff]  ;;  %v7064_v49 = vadd.f32 %v7017_v30, %v22425_v44 }
 0x365   : > { %v18063_v52 = vpop.f32.mrf.mxu1  ;;  %18362 = vmatmul.mubr.msk.f32.gmra.mxu1 %vm209_vm1, %v25581_v58  ;;  %v18016_v2 = vpop.f32.mrf.mxu0  ;;  %18315 = vmatmul.mubr.msk.f32.gmra.mxu0 %vm209_vm1, %v22712_v12  ;;  %v9803_v15 = vld [vmem:[#allocation2 + $0x180] sm:$0xff] }
 0x366   : > { %18364 = vmatprep.mubr.msk.f32.mxu1 %vm209_vm1, %v22413_v57  ;;  %v22719_v55 = vadd.f32 %v18063_v52, %v7065_v8  ;;  %v7067_v29 = vadd.f32 %v18016_v2, %v22436_v13  ;;  %18369 = vmatprep.mubr.msk.f32.mxu0 %vm209_vm1, %v9801_v42  ;;  %v9802_v57 = vld [vmem:[#allocation2 + $0x170] sm:$0xff] }
 0x367   : > { %v7407_v31 = vpop.f32.mrf.mxu1  ;;  %v7027_v58 = vpop.f32.mrf.mxu0 }
 0x368   : > { %v22724_v56 = vadd.f32 %v7407_v31, %v7064_v49  ;;  %v7066_v44 = vadd.f32 %v7027_v58, %v22447_v33  ;;  %v9805_v31 = vld [vmem:[#allocation2 + $0x1a0] sm:$0xff] }
 0x369   : > { %v18066_v1 = vpop.f32.mrf.mxu1  ;;  %18365 = vmatmul.mubr.msk.f32.gmra.mxu1 %vm209_vm1, %v22716_v54  ;;  %v18071_v13 = vpop.f32.mrf.mxu0  ;;  %18370 = vmatmul.mubr.msk.f32.vlgmr.msra.gmra.mxu0 %vm209_vm1, %v9802_v57 }
 0x36a   : > { %18419 = vmatprep.mubr.msk.f32.mxu1 %vm209_vm1, %v22431_v36  ;;  %v22732_v8 = vadd.f32 %v18066_v1, %v7067_v29  ;;  %v7818_v49 = vadd.f32 %v18071_v13, %v22463_v63  ;;  %18468 = vmatpush3.msk.msra.mxu0 %vm661_vm0, %v22445_v53  ;;  %v9804_v36 = vld [vmem:[#allocation2 + $0x190] sm:$0xff] }
 0x36b   : > { %v7417_v52 = vpop.f32.mrf.mxu1  ;;  %v7658_v33 = vpop.f32.mrf.mxu0  ;;  %18372 = vmatprep.mubr.msk.f32.mxu0 %vm209_vm1, %v9803_v15 }
 0x36c   : > { %v22735_v30 = vadd.f32 %v7417_v52, %v7066_v44  ;;  %v7817_v2 = vadd.f32 %v7658_v33, %v22472_v48 }
 0x36d   : > { %v18121_v42 = vpop.f32.mrf.mxu1  ;;  %18420 = vmatmul.mubr.msk.f32.vlgmr.msra.gmra.mxu1 %vm209_vm1, %v22438_v35  ;;  %v18074_v1 = vpop.f32.mrf.mxu0  ;;  %18373 = vmatmul.mubr.msk.f32.gmra.mxu0 %vm209_vm1, %v9804_v36  ;;  %v9809_v36 = vld [vmem:[#allocation2 + $0x200] sm:$0xff] }
 0x36e   : > { %18422 = vmatprep.mubr.msk.f32.mxu1 %vm209_vm1, %v22454_v16  ;;  %v22746_v29 = vadd.f32 %v18121_v42, %v7818_v49  ;;  %v7820_v53 = vadd.f32 %v18074_v1, %v22485_v51  ;;  %18375 = vmatprep.mubr.msk.f32.mxu0 %vm209_vm1, %v9805_v31  ;;  %v9806_v16 = vld [vmem:[#allocation2 + $0x1b0] sm:$0xff]  ;;  %v25583_v49 = vld [vmem:[#allocation48_spill] sm:$0xff] }
 0x36f   : > { %v8048_v63 = vpop.f32.mrf.mxu1  ;;  %v7668_v58 = vpop.f32.mrf.mxu0 }
 0x370   : > { %v22750_v57 = vadd.f32 %v8048_v63, %v7817_v2  ;;  %v7819_v48 = vadd.f32 %v7668_v58, %v22490_v40  ;;  %v10198_v40 = vld [vmem:[#allocation2 + $0x1d1] sm:$0xff] }
 0x371   : > { %v18124_v35 = vpop.f32.mrf.mxu1  ;;  %18423 = vmatmul.mubr.msk.f32.gmra.mxu1 %vm209_vm1, %v22460_v0  ;;  %v18077_v15 = vpop.f32.mrf.mxu0  ;;  %18376 = vmatmul.mubr.msk.f32.gmra.mxu0 %vm209_vm1, %v9806_v16 }
 0x372   : > { %18425 = vmatprep.mubr.msk.f32.mxu1 %vm209_vm1, %v22478_v9  ;;  %v22758_v44 = vadd.f32 %v18124_v35, %v7820_v53  ;;  %v7822_v51 = vadd.f32 %v18077_v15, %v22503_v19  ;;  %18378 = vmatprep.mubr.msk.f32.mxu0 %vm209_vm1, %v25583_v49  ;;  %v9808_v9 = vld [vmem:[#allocation2 + $0x1d0] sm:$0xff] }
 0x373   : > { %v8058_v52 = vpop.f32.mrf.mxu1  ;;  %v7678_v42 = vpop.f32.mrf.mxu0 }
 0x374   : > { %v22762_v13 = vadd.f32 %v8058_v52, %v7819_v48  ;;  %v7821_v33 = vadd.f32 %v7678_v42, %v22508_v60  ;;  %v9811_v60 = vld [vmem:[#allocation2 + $0x220] sm:$0xff] }
 0x375   : > { %v18127_v0 = vpop.f32.mrf.mxu1  ;;  %18426 = vmatmul.mubr.msk.f32.gmra.mxu1 %vm209_vm1, %v22482_v27  ;;  %v18080_v2 = vpop.f32.mrf.mxu0  ;;  %18379 = vmatmul.mubr.msk.f32.gmra.mxu0 %vm209_vm1, %v9808_v9 }
 0x376   : > { %18428 = vmatprep.mubr.msk.f32.mxu1 %vm209_vm1, %v22496_v11  ;;  %v22771_v31 = vadd.f32 %v18127_v0, %v7822_v51  ;;  %v7824_v27 = vadd.f32 %v18080_v2, %v22521_v25  ;;  %18381 = vmatprep.mubr.msk.f32.mxu0 %vm209_vm1, %v9809_v36  ;;  %v9810_v11 = vld [vmem:[#allocation2 + $0x210] sm:$0xff] }
 0x377   : > { %v8068_v19 = vpop.f32.mrf.mxu1  ;;  %v7688_v53 = vpop.f32.mrf.mxu0 }
 0x378   : > { %v22775_v63 = vadd.f32 %v8068_v19, %v7821_v33  ;;  %v7823_v35 = vadd.f32 %v7688_v53, %v22526_v50  ;;  %v9813_v50 = vld [vmem:[#allocation2 + $0x240] sm:$0xff] }
 0x379   : > { %v18130_v1 = vpop.f32.mrf.mxu1  ;;  %18429 = vmatmul.mubr.msk.f32.gmra.mxu1 %vm209_vm1, %v10198_v40  ;;  %v18083_v48 = vpop.f32.mrf.mxu0  ;;  %18382 = vmatmul.mubr.msk.f32.gmra.mxu0 %vm209_vm1, %v9810_v11  ;;  %v9817_v53 = vld [vmem:[#allocation2 + $0x2a0] sm:$0xff] }
 0x37a   : > { %18431 = vmatprep.mubr.msk.f32.mxu1 %vm209_vm1, %v22514_v46  ;;  %v22782_v16 = vadd.f32 %v18130_v1, %v7824_v27  ;;  %v7826_v25 = vadd.f32 %v18083_v48, %v22539_v22  ;;  %18384 = vmatprep.mubr.msk.f32.mxu0 %vm209_vm1, %v9811_v60  ;;  %v9812_v46 = vld [vmem:[#allocation2 + $0x230] sm:$0xff]  ;;  %v25584_v1 = vld [vmem:[#allocation49_spill] sm:$0xff] }
 0x37b   : > { %v8078_v58 = vpop.f32.mrf.mxu1  ;;  %v7698_v51 = vpop.f32.mrf.mxu0 }
 0x37c   : > { %v22786_v52 = vadd.f32 %v8078_v58, %v7823_v35  ;;  %v7825_v0 = vadd.f32 %v7698_v51, %v22544_v28 }
 0x37d   : > { %v18133_v15 = vpop.f32.mrf.mxu1  ;;  %18432 = vmatmul.mubr.msk.f32.gmra.mxu1 %vm209_vm1, %v22518_v4  ;;  %v18086_v22 = vpop.f32.mrf.mxu0  ;;  %18385 = vmatmul.mubr.msk.f32.gmra.mxu0 %vm209_vm1, %v9812_v46 }
 0x37e   : > { %18434 = vmatprep.mubr.msk.f32.mxu1 %vm209_vm1, %v22532_v37  ;;  %v22794_v49 = vadd.f32 %v18133_v15, %v7826_v25  ;;  %v7828_v42 = vadd.f32 %v18086_v22, %v22557_v17  ;;  %18387 = vmatprep.mubr.msk.f32.mxu0 %vm209_vm1, %v9813_v50  ;;  %v9814_v37 = vld [vmem:[#allocation2 + $0x250] sm:$0xff]  ;;  %v25585_v22 = vld [vmem:[#allocation59_spill] sm:$0xff] }
 0x37f   : > { %v8088_v9 = vpop.f32.mrf.mxu1  ;;  %v7708_v36 = vpop.f32.mrf.mxu0 }
 0x380   : > { %v22798_v40 = vadd.f32 %v8088_v9, %v7825_v0  ;;  %v7827_v28 = vadd.f32 %v7708_v36, %v22562_v47  ;;  %v10206_v47 = vld [vmem:[#allocation2 + $0x271] sm:$0xff] }
 0x381   : > { %v18136_v4 = vpop.f32.mrf.mxu1  ;;  %18435 = vmatmul.mubr.msk.f32.gmra.mxu1 %vm209_vm1, %v22536_v18  ;;  %v18089_v2 = vpop.f32.mrf.mxu0  ;;  %18388 = vmatmul.mubr.msk.f32.gmra.mxu0 %vm209_vm1, %v9814_v37 }
 0x382   : > { %18437 = vmatprep.mubr.msk.f32.mxu1 %vm209_vm1, %v22550_v43  ;;  %v22806_v33 = vadd.f32 %v18136_v4, %v7828_v42  ;;  %v7830_v17 = vadd.f32 %v18089_v2, %v22575_v41  ;;  %18390 = vmatprep.mubr.msk.f32.mxu0 %vm209_vm1, %v25584_v1  ;;  %v9816_v43 = vld [vmem:[#allocation2 + $0x270] sm:$0xff]  ;;  %v25586_v42 = vld [vmem:[#allocation29_spill] sm:$0xff] }
 0x383   : > { %v8098_v19 = vpop.f32.mrf.mxu1  ;;  %v7718_v11 = vpop.f32.mrf.mxu0  ;;  %v25590_v1 = vld [vmem:[#allocation66_spill] sm:$0xff] }
 0x384   : > { %v22810_v27 = vadd.f32 %v8098_v19, %v7827_v28  ;;  %v7829_v60 = vadd.f32 %v7718_v11, %v22580_v38 }
 0x385   : > { %v18139_v18 = vpop.f32.mrf.mxu1  ;;  %18438 = vmatmul.mubr.msk.f32.gmra.mxu1 %vm209_vm1, %v22554_v7  ;;  %v18092_v58 = vpop.f32.mrf.mxu0  ;;  %18391 = vmatmul.mubr.msk.f32.gmra.mxu0 %vm209_vm1, %v9816_v43 }
 0x386   : > { %18440 = vmatprep.mubr.msk.f32.mxu1 %vm209_vm1, %v22568_v24  ;;  %v22819_v35 = vadd.f32 %v18139_v18, %v7830_v17  ;;  %v7832_v7 = vadd.f32 %v18092_v58, %v22595_v10  ;;  %18393 = vmatprep.mubr.msk.f32.mxu0 %vm209_vm1, %v9817_v53  ;;  %v9818_v24 = vld [vmem:[#allocation2 + $0x2b0] sm:$0xff]  ;;  %v25588_v17 = vld [vmem:[#allocation37_spill] sm:$0xff] }
 0x387   : > { %v8108_v41 = vpop.f32.mrf.mxu1  ;;  %v7728_v15 = vpop.f32.mrf.mxu0  ;;  %v25589_v18 = vld [vmem:[#allocation33_spill] sm:$0xff] }
 0x388   : > { %v22823_v48 = vadd.f32 %v8108_v41, %v7829_v60  ;;  %v7831_v38 = vadd.f32 %v7728_v15, %v22602_v59  ;;  %v25587_v59 = vld [vmem:[#allocation39_spill] sm:$0xff]  ;;  %v25592_v58 = vld [vmem:[#allocation45_spill] sm:$0xff]  ;;  %v9825_v15 = vld [vmem:[#allocation2 + $0x340] sm:$0xff] }
 0x389   : > { %v18142_v25 = vpop.f32.mrf.mxu1  ;;  %18441 = vmatmul.mubr.msk.f32.gmra.mxu1 %vm209_vm1, %v10206_v47  ;;  %v18095_v50 = vpop.f32.mrf.mxu0  ;;  %18394 = vmatmul.mubr.msk.f32.gmra.mxu0 %vm209_vm1, %v9818_v24  ;;  %v10214_v24 = vld [vmem:[#allocation2 + $0x311] sm:$0xff] }
 0x38a   : > { %18443 = vmatprep.mubr.msk.f32.mxu1 %vm209_vm1, %v22586_v45  ;;  %v22830_v46 = vadd.f32 %v18142_v25, %v7832_v7  ;;  %v7834_v10 = vadd.f32 %v18095_v50, %v22617_v32  ;;  %18396 = vmatprep.mubr.msk.f32.mxu0 %vm209_vm1, %v25586_v42  ;;  %v9820_v45 = vld [vmem:[#allocation2 + $0x2d0] sm:$0xff]  ;;  %v25593_v7 = vld [vmem:[#allocation40_spill] sm:$0xff] }
 0x38b   : > { %v8118_v51 = vpop.f32.mrf.mxu1  ;;  %v7738_v4 = vpop.f32.mrf.mxu0  ;;  %v10215_v50 = vld [vmem:[#allocation2 + $0x341] sm:$0xff] }
 0x38c   : > { %v22834_v0 = vadd.f32 %v8118_v51, %v7831_v38  ;;  %v22843_v37 = vadd.f32 %v7738_v4, %v25587_v59 }
 0x38d   : > { %v18145_v9 = vpop.f32.mrf.mxu1  ;;  %18444 = vmatmul.mubr.msk.f32.gmra.mxu1 %vm209_vm1, %v25585_v22  ;;  %v18098_v28 = vpop.f32.mrf.mxu0  ;;  %18397 = vmatmul.mubr.msk.f32.gmra.mxu0 %vm209_vm1, %v9820_v45  ;;  %v9827_v45 = vld [vmem:[#allocation2 + $0x360] sm:$0xff] }
 0x38e   : > { %18446 = vmatprep.mubr.msk.f32.mxu1 %vm209_vm1, %v22608_v3  ;;  %v22845_v36 = vadd.f32 %v18145_v9, %v7834_v10  ;;  %v7836_v19 = vadd.f32 %v18098_v28, %v22639_v23  ;;  %18399 = vmatprep.mubr.msk.f32.mxu0 %vm209_vm1, %v25589_v18  ;;  %v25591_v23 = vld [vmem:[#allocation35_spill] sm:$0xff]  ;;  %v9828_v18 = vld [vmem:[#allocation2 + $0x370] sm:$0xff] }
 0x38f   : > { %v22847_v32 = vpop.f32.mrf.mxu1  ;;  %v7748_v3 = vpop.f32.mrf.mxu0 }
 0x390   : > { %v22858_v43 = vadd.f32 %v7748_v3, %v25590_v1  ;;  %v9829_v1 = vld [vmem:[#allocation2 + $0x380] sm:$0xff] }
 0x391   : > { %v18148_v2 = vpop.f32.mrf.mxu1  ;;  %18447 = vmatmul.mubr.msk.f32.gmra.mxu1 %vm209_vm1, %v25588_v17  ;;  %v18101_v53 = vpop.f32.mrf.mxu0  ;;  %18400 = vmatmul.mubr.msk.f32.gmra.mxu0 %vm209_vm1, %v25591_v23 }
 0x392   : > { %18449 = vmatprep.mubr.msk.f32.mxu1 %vm209_vm1, %v22630_v62  ;;  %v22860_v11 = vadd.f32 %v18148_v2, %v7836_v19  ;;  %v7838_v60 = vadd.f32 %v18101_v53, %v22659_v6  ;;  %18402 = vmatprep.mubr.msk.f32.mxu0 %vm209_vm1, %v25593_v7  ;;  %v9824_v62 = vld [vmem:[#allocation2 + $0x310] sm:$0xff]  ;;  %v10217_v19 = vld [vmem:[#allocation2 + $0x361] sm:$0xff] }
 0x393   : > { %v22862_v47 = vpop.f32.mrf.mxu1  ;;  %v7758_v25 = vpop.f32.mrf.mxu0 }
 0x394   : > { %v22874_v38 = vadd.f32 %v7758_v25, %v22664_v34  ;;  %v10216_v34 = vld [vmem:[#allocation2 + $0x351] sm:$0xff] }
 0x395   : > { %v18151_v41 = vpop.f32.mrf.mxu1  ;;  %18450 = vmatmul.mubr.msk.f32.gmra.mxu1 %vm209_vm1, %v25592_v58  ;;  %v18104_v10 = vpop.f32.mrf.mxu0  ;;  %18403 = vmatmul.mubr.msk.f32.gmra.mxu0 %vm209_vm1, %v9824_v62  ;;  %v9830_v62 = vld [vmem:[#allocation2 + $0x390] sm:$0xff] }
 0x396   : > { %18452 = vmatprep.mubr.msk.f32.mxu1 %vm209_vm1, %v22652_v26  ;;  %v22876_v51 = vadd.f32 %v18151_v41, %v7838_v60  ;;  %v7840_v9 = vadd.f32 %v18104_v10, %v22673_v20  ;;  %18405 = vmatprep.mubr.msk.f32.mxu0 %vm209_vm1, %v9825_v15  ;;  %v9826_v26 = vld [vmem:[#allocation2 + $0x350] sm:$0xff]  ;;  %v10219_v41 = vld [vmem:[#allocation2 + $0x381] sm:$0xff] }
 0x397   : > { %v22878_v6 = vpop.f32.mrf.mxu1  ;;  %v7768_v42 = vpop.f32.mrf.mxu0 }
 0x398   : > { %v22886_v4 = vadd.f32 %v7768_v42, %v22678_v21  ;;  %v10218_v21 = vld [vmem:[#allocation2 + $0x371] sm:$0xff] }
 0x399   : > { %v18154_v22 = vpop.f32.mrf.mxu1  ;;  %18453 = vmatmul.mubr.msk.f32.gmra.mxu1 %vm209_vm1, %v10214_v24  ;;  %v18107_v20 = vpop.f32.mrf.mxu0  ;;  %18406 = vmatmul.mubr.msk.f32.gmra.mxu0 %vm209_vm1, %v9826_v26  ;;  %v9832_v26 = vld [vmem:[#allocation2 + $0x3b0] sm:$0xff] }
 0x39a   : > { %18455 = vmatprep.mubr.msk.f32.mxu1 %vm209_vm1, %v10215_v50  ;;  %v22888_v59 = vadd.f32 %v18154_v22, %v7840_v9  ;;  %v7842_v2 = vadd.f32 %v18107_v20, %v22687_v5  ;;  %18408 = vmatprep.mubr.msk.f32.mxu0 %vm209_vm1, %v9827_v45  ;;  %v25598_v22 = vld [vmem:[#allocation61_spill] sm:$0xff] }
 0x39b   : > { %v22890_v28 = vpop.f32.mrf.mxu1  ;;  %v7778_v3 = vpop.f32.mrf.mxu0 }
 0x39c   : > { %v22898_v53 = vadd.f32 %v7778_v3, %v22692_v61  ;;  %v10220_v61 = vld [vmem:[#allocation2 + $0x391] sm:$0xff]  ;;  %v10583_v3 = vld [vmem:[#allocation2 + $0x182] sm:$0xff] }
 0x39d   : > { %v18157_v17 = vpop.f32.mrf.mxu1  ;;  %18456 = vmatmul.mubr.msk.f32.gmra.mxu1 %vm209_vm1, %v10216_v34  ;;  %v18110_v5 = vpop.f32.mrf.mxu0  ;;  %18409 = vmatmul.mubr.msk.f32.gmra.mxu0 %vm209_vm1, %v9828_v18  ;;  %v10581_v34 = vld [vmem:[#allocation2 + $0x162] sm:$0xff] }
 0x39e   : > { %18458 = vmatprep.mubr.msk.f32.mxu1 %vm209_vm1, %v10217_v19  ;;  %25594 = vst [vmem:[#allocation42_spill] sm:$0xff] %v22898_v53  ;;  %v22900_v23 = vadd.f32 %v18157_v17, %v7842_v2  ;;  %v7844_v58 = vadd.f32 %v18110_v5, %v22701_v14  ;;  %18411 = vmatprep.mubr.msk.f32.mxu0 %vm209_vm1, %v9829_v1 }
 0x39f   : > { %v22902_v60 = vpop.f32.mrf.mxu1  ;;  %v7788_v25 = vpop.f32.mrf.mxu0 }
 0x3a0   : > { %25595 = vst [vmem:[#allocation12_spill] sm:$0xff] %v22902_v60  ;;  %v22910_v24 = vadd.f32 %v7788_v25, %v22706_v39  ;;  %v10222_v39 = vld [vmem:[#allocation2 + $0x3b1] sm:$0xff]  ;;  %v10585_v25 = vld [vmem:[#allocation2 + $0x1a2] sm:$0xff] }
 0x3a1   : > { %v18160_v7 = vpop.f32.mrf.mxu1  ;;  %18459 = vmatmul.mubr.msk.f32.gmra.mxu1 %vm209_vm1, %v10218_v21  ;;  %v18113_v10 = vpop.f32.mrf.mxu0  ;;  %18412 = vmatmul.mubr.msk.f32.gmra.mxu0 %vm209_vm1, %v9830_v62 }
 0x3a2   : > { %18461 = vmatprep.mubr.msk.f32.mxu1 %vm209_vm1, %v10219_v41  ;;  %25596 = vst [vmem:[#allocation60_spill] sm:$0xff] %v22910_v24  ;;  %v22912_v15 = vadd.f32 %v18160_v7, %v7844_v58  ;;  %v7846_v14 = vadd.f32 %v18113_v10, %v22719_v55  ;;  %18414 = vmatprep.mubr.msk.f32.mxu0 %vm209_vm1, %v25598_v22  ;;  %v10584_v7 = vld [vmem:[#allocation2 + $0x192] sm:$0xff] }
 0x3a3   : > { %v22914_v50 = vpop.f32.mrf.mxu1  ;;  %v7798_v42 = vpop.f32.mrf.mxu0 }
 0x3a4   : > { %25597 = vst [vmem:[#allocation31_spill] sm:$0xff] %v22914_v50  ;;  %v22924_v45 = vadd.f32 %v7798_v42, %v22724_v56  ;;  %v15679_v56 = vld [vmem:[%s25184_s2 + $0x8] sm:$0xff] }
 0x3a5   : > { %v18163_v9 = vpop.f32.mrf.mxu1  ;;  %18462 = vmatmul.mubr.msk.f32.gmra.mxu1 %vm209_vm1, %v10220_v61  ;;  %v18116_v55 = vpop.f32.mrf.mxu0  ;;  %18415 = vmatmul.mubr.msk.f32.gmra.mxu0 %vm209_vm1, %v9832_v26 }
 0x3a6   : > { %18464 = vmatprep.mubr.msk.f32.mxu1 %vm209_vm1, %v22712_v12  ;;  %25599 = vst [vmem:[#allocation62_spill] sm:$0xff] %v22924_v45  ;;  %v22926_v19 = vadd.f32 %v18163_v9, %v7846_v14  ;;  %v7848_v2 = vadd.f32 %v18116_v55, %v22732_v8  ;;  %18469 = vmatprep.mubr.msk.f32.mxu0 %vm209_vm1, %v10581_v34  ;;  %v10582_v12 = vld [vmem:[#allocation2 + $0x172] sm:$0xff] }
 0x3a7   : > { %v22928_v20 = vpop.f32.mrf.mxu1  ;;  %v7808_v18 = vpop.f32.mrf.mxu0  ;;  %18517 = vmatprep.subr.mxu1 %v15679_v56 }
 0x3a8   : > { %25600 = vst [vmem:[#allocation46_spill] sm:$0xff] %v22928_v20  ;;  %v22938_v21 = vadd.f32 %v7808_v18, %v22735_v30  ;;  %18518 = vmatpush3.msra.mxu1 %v15679_v56  ;;  %v10589_v56 = vld [vmem:[#allocation2 + $0x202] sm:$0xff] }
 0x3a9   : > { %v18166_v17 = vpop.f32.mrf.mxu1  ;;  %18465 = vmatmul.mubr.msk.f32.gmra.mxu1 %vm209_vm1, %v10222_v39  ;;  %v18171_v8 = vpop.f32.mrf.mxu0  ;;  %18470 = vmatmul.mubr.msk.f32.vlgmr.msra.gmra.mxu0 %vm209_vm1, %v10582_v12 }
 0x3aa   : > { %25601 = vst [vmem:[#allocation32_spill] sm:$0xff] %v22938_v21  ;;  %v22940_v1 = vadd.f32 %v18166_v17, %v7848_v2  ;;  %v8598_v5 = vadd.f32 %v18171_v8, %v22746_v29  ;;  %18472 = vmatprep.mubr.msk.f32.mxu0 %vm209_vm1, %v10583_v3  ;;  %v10586_v29 = vld [vmem:[#allocation2 + $0x1b2] sm:$0xff] }
 0x3ab   : > { %v22942_v41 = vpop.f32.mrf.mxu1  ;;  %v8438_v62 = vpop.f32.mrf.mxu0  ;;  %v25603_v17 = vld [vmem:[#allocation50_spill] sm:$0xff] }
 0x3ac   : > { %25602 = vst [vmem:[#allocation15_spill] sm:$0xff] %v22942_v41  ;;  %v22948_v61 = vadd.f32 %v8438_v62, %v22750_v57  ;;  %v10591_v62 = vld [vmem:[#allocation2 + $0x222] sm:$0xff] }
 0x3ad   : > { %v18221_v58 = vpop.f32.mrf.mxu1  ;;  %v18174_v14 = vpop.f32.mrf.mxu0  ;;  %18473 = vmatmul.mubr.msk.f32.gmra.mxu0 %vm209_vm1, %v10584_v7 }
 0x3ae   : > { %v22950_v30 = vadd.f32 %v18221_v58, %v8598_v5  ;;  %v8600_v9 = vadd.f32 %v18174_v14, %v22758_v44  ;;  %18475 = vmatprep.mubr.msk.f32.mxu0 %vm209_vm1, %v10585_v25  ;;  %v10588_v44 = vld [vmem:[#allocation2 + $0x1d2] sm:$0xff] }
 0x3af   : > { %v22952_v10 = vpop.f32.mrf.mxu1  ;;  %v8448_v26 = vpop.f32.mrf.mxu0  ;;  %v10590_v58 = vld [vmem:[#allocation2 + $0x212] sm:$0xff] }
 0x3b0   : > { %v22958_v42 = vadd.f32 %v8448_v26, %v22762_v13 }
 0x3b1   : > { %v18224_v22 = vpop.f32.mrf.mxu1  ;;  %v18177_v34 = vpop.f32.mrf.mxu0  ;;  %18476 = vmatmul.mubr.msk.f32.gmra.mxu0 %vm209_vm1, %v10586_v29 }
 0x3b2   : > { %v22960_v39 = vadd.f32 %v18224_v22, %v8600_v9  ;;  %v8602_v55 = vadd.f32 %v18177_v34, %v22771_v31  ;;  %18478 = vmatprep.mubr.msk.f32.mxu0 %vm209_vm1, %v25603_v17  ;;  %v10593_v34 = vld [vmem:[#allocation2 + $0x242] sm:$0xff] }
 0x3b3   : > { %v22962_v57 = vpop.f32.mrf.mxu1  ;;  %v8458_v12 = vpop.f32.mrf.mxu0 }
 0x3b4   : > { %v22969_v18 = vadd.f32 %v8458_v12, %v22775_v63 }
 0x3b5   : > { %v18227_v2 = vpop.f32.mrf.mxu1  ;;  %v18180_v8 = vpop.f32.mrf.mxu0  ;;  %18479 = vmatmul.mubr.msk.f32.gmra.mxu0 %vm209_vm1, %v10588_v44 }
 0x3b6   : > { %v22971_v13 = vadd.f32 %v18227_v2, %v8602_v55  ;;  %v8604_v5 = vadd.f32 %v18180_v8, %v22782_v16  ;;  %18481 = vmatprep.mubr.msk.f32.mxu0 %vm209_vm1, %v10589_v56  ;;  %v10592_v16 = vld [vmem:[#allocation2 + $0x232] sm:$0xff] }
 0x3b7   : > { %v22973_v3 = vpop.f32.mrf.mxu1  ;;  %v8468_v7 = vpop.f32.mrf.mxu0 }
 0x3b8   : > { %v22979_v25 = vadd.f32 %v8468_v7, %v22786_v52 }
 0x3b9   : > { %v18230_v31 = vpop.f32.mrf.mxu1  ;;  %v18183_v9 = vpop.f32.mrf.mxu0  ;;  %18482 = vmatmul.mubr.msk.f32.gmra.mxu0 %vm209_vm1, %v10590_v58 }
 0x3ba   : > { %v22981_v63 = vadd.f32 %v18230_v31, %v8604_v5  ;;  %v8606_v22 = vadd.f32 %v18183_v9, %v22794_v49  ;;  %18484 = vmatprep.mubr.msk.f32.mxu0 %vm209_vm1, %v10591_v62  ;;  %v10594_v49 = vld [vmem:[#allocation2 + $0x252] sm:$0xff] }
 0x3bb   : > { %v22983_v14 = vpop.f32.mrf.mxu1  ;;  %v8478_v26 = vpop.f32.mrf.mxu0  ;;  %v25604_v62 = vld [vmem:[#allocation58_spill] sm:$0xff] }
 0x3bc   : > { %v22989_v55 = vadd.f32 %v8478_v26, %v22798_v40 }
 0x3bd   : > { %v18233_v29 = vpop.f32.mrf.mxu1  ;;  %v18186_v17 = vpop.f32.mrf.mxu0  ;;  %18485 = vmatmul.mubr.msk.f32.gmra.mxu0 %vm209_vm1, %v10592_v16 }
 0x3be   : > { %v22991_v52 = vadd.f32 %v18233_v29, %v8606_v22  ;;  %v8608_v44 = vadd.f32 %v18186_v17, %v22806_v33  ;;  %18487 = vmatprep.mubr.msk.f32.mxu0 %vm209_vm1, %v10593_v34  ;;  %v10596_v33 = vld [vmem:[#allocation2 + $0x272] sm:$0xff] }
 0x3bf   : > { %v22993_v2 = vpop.f32.mrf.mxu1  ;;  %v8488_v56 = vpop.f32.mrf.mxu0 }
 0x3c0   : > { %v22999_v8 = vadd.f32 %v8488_v56, %v22810_v27  ;;  %v25608_v56 = vld [vmem:[#allocation44_spill] sm:$0xff] }
 0x3c1   : > { %v18236_v12 = vpop.f32.mrf.mxu1  ;;  %v18189_v31 = vpop.f32.mrf.mxu0  ;;  %18488 = vmatmul.mubr.msk.f32.gmra.mxu0 %vm209_vm1, %v10594_v49 }
 0x3c2   : > { %v23001_v5 = vadd.f32 %v18236_v12, %v8608_v44  ;;  %v8610_v58 = vadd.f32 %v18189_v31, %v22819_v35  ;;  %18490 = vmatprep.mubr.msk.f32.mxu0 %vm209_vm1, %v25604_v62  ;;  %v25605_v35 = vld [vmem:[#allocation47_spill] sm:$0xff]  ;;  %v8223_v31 = vadd.f32 %v22847_v32, %v22843_v37  ;;  %v8225_v37 = vadd.f32 %v22862_v47, %v22858_v43 }
 0x3c3   : > { %v23003_v40 = vpop.f32.mrf.mxu1  ;;  %v8498_v9 = vpop.f32.mrf.mxu0  ;;  %v8227_v43 = vadd.f32 %v22878_v6, %v22874_v38  ;;  %v8229_v38 = vadd.f32 %v22890_v28, %v22886_v4 }
 0x3c4   : > { %v23010_v22 = vadd.f32 %v8498_v9, %v22823_v48 }
 0x3c5   : > { %v18239_v7 = vpop.f32.mrf.mxu1  ;;  %v18192_v16 = vpop.f32.mrf.mxu0  ;;  %18491 = vmatmul.mubr.msk.f32.gmra.mxu0 %vm209_vm1, %v10596_v33 }
 0x3c6   : > { %v23012_v27 = vadd.f32 %v18239_v7, %v8610_v58  ;;  %v8612_v26 = vadd.f32 %v18192_v16, %v22830_v46  ;;  %18493 = vmatprep.mubr.msk.f32.mxu0 %vm209_vm1, %v25605_v35  ;;  %v25609_v7 = vld [vmem:[#allocation7_spill] sm:$0xff] }
 0x3c7   : > { %v23014_v29 = vpop.f32.mrf.mxu1  ;;  %v8508_v17 = vpop.f32.mrf.mxu0 }
 0x3c8   : > { %v23021_v44 = vadd.f32 %v8508_v17, %v22834_v0 }
 0x3c9   : > { %v18242_v34 = vpop.f32.mrf.mxu1  ;;  %v18195_v49 = vpop.f32.mrf.mxu0  ;;  %18494 = vmatmul.mubr.msk.f32.gmra.mxu0 %vm209_vm1, %v25608_v56 }
 0x3ca   : > { %25606 = vst [vmem:[#allocation21_spill] sm:$0xff] %v23021_v44  ;;  %v23023_v12 = vadd.f32 %v18242_v34, %v8612_v26  ;;  %v8614_v46 = vadd.f32 %v18195_v49, %v22845_v36  ;;  %18496 = vmatprep.mubr.msk.f32.mxu0 %vm209_vm1, %v25609_v7  ;;  %v25612_v26 = vld [vmem:[#allocation63_spill] sm:$0xff] }
 0x3cb   : > { %v23025_v48 = vpop.f32.mrf.mxu1  ;;  %v8518_v62 = vpop.f32.mrf.mxu0  ;;  %v25613_v34 = vld [vmem:[#allocation43_spill] sm:$0xff] }
 0x3cc   : > { %25607 = vst [vmem:[#allocation64_spill] sm:$0xff] %v23025_v48  ;;  %v23034_v0 = vadd.f32 %v8518_v62, %v8223_v31  ;;  %v10604_v7 = vld [vmem:[#allocation2 + $0x312] sm:$0xff] }
 0x3cd   : > { %v18245_v58 = vpop.f32.mrf.mxu1  ;;  %v18198_v16 = vpop.f32.mrf.mxu0  ;;  %18497 = vmatmul.mubr.msk.f32.gmra.mxu0 %vm209_vm1, %v25612_v26 }
 0x3ce   : > { %25610 = vst [vmem:[#allocation30_spill] sm:$0xff] %v23034_v0  ;;  %v23036_v33 = vadd.f32 %v18245_v58, %v8614_v46  ;;  %v8616_v36 = vadd.f32 %v18198_v16, %v22860_v11  ;;  %18499 = vmatprep.mubr.msk.f32.mxu0 %vm209_vm1, %v25613_v34  ;;  %v25616_v46 = vld [vmem:[#allocation65_spill] sm:$0xff]  ;;  %v25617_v58 = vld [vmem:[#allocation67_spill] sm:$0xff] }
 0x3cf   : > { %v23038_v9 = vpop.f32.mrf.mxu1  ;;  %v8528_v35 = vpop.f32.mrf.mxu0  ;;  %v10605_v16 = vld [vmem:[#allocation2 + $0x342] sm:$0xff]  ;;  %v10606_v34 = vld [vmem:[#allocation2 + $0x352] sm:$0xff] }
 0x3d0   : > { %25611 = vst [vmem:[#allocation48_spill] sm:$0xff] %v23038_v9  ;;  %v23047_v17 = vadd.f32 %v8528_v35, %v8225_v37 }
 0x3d1   : > { %v18248_v32 = vpop.f32.mrf.mxu1  ;;  %v18201_v31 = vpop.f32.mrf.mxu0  ;;  %18500 = vmatmul.mubr.msk.f32.gmra.mxu0 %vm209_vm1, %v25616_v46 }
 0x3d2   : > { %25614 = vst [vmem:[#allocation49_spill] sm:$0xff] %v23047_v17  ;;  %v23049_v49 = vadd.f32 %v18248_v32, %v8616_v36  ;;  %v8618_v11 = vadd.f32 %v18201_v31, %v22876_v51  ;;  %18502 = vmatprep.mubr.msk.f32.mxu0 %vm209_vm1, %v25617_v58  ;;  %v10607_v31 = vld [vmem:[#allocation2 + $0x362] sm:$0xff] }
 0x3d3   : > { %v23051_v56 = vpop.f32.mrf.mxu1  ;;  %v8538_v62 = vpop.f32.mrf.mxu0 }
 0x3d4   : > { %25615 = vst [vmem:[#allocation59_spill] sm:$0xff] %v23051_v56  ;;  %v23060_v26 = vadd.f32 %v8538_v62, %v8227_v43  ;;  %v25623_v62 = vmov 0.0  }
 0x3d5   : > { %v18251_v47 = vpop.f32.mrf.mxu1  ;;  %v18204_v32 = vpop.f32.mrf.mxu0  ;;  %18503 = vmatmul.mubr.msk.f32.gmra.mxu0 %vm209_vm1, %v10604_v7  ;;  %v23088_v7 = vld [vmem:[#allocation2 + $0x382] sm:$0xff]  ;;  %400 = vst.msk [vmem:[#allocation3 + $0x8] sm:$0xff] %vm398_vm4, %v25623_v62  ;;  %399 = vst.msk [vmem:[#allocation3] sm:$0xff] %vm398_vm4, %v25623_v62 }
 0x3d6   : > { %25618 = vst [vmem:[#allocation29_spill] sm:$0xff] %v23060_v26  ;;  %v23062_v37 = vadd.f32 %v18251_v47, %v8618_v11  ;;  %v8620_v51 = vadd.f32 %v18204_v32, %v22888_v59  ;;  %18505 = vmatprep.mubr.msk.f32.mxu0 %vm209_vm1, %v10605_v16  ;;  %v23084_v59 = vld [vmem:[#allocation2 + $0x372] sm:$0xff]  ;;  %401 = vst.msk [vmem:[#allocation3 + $0x10] sm:$0xff] %vm398_vm4, %v25623_v62  ;;  %v25625_v16 = vld [vmem:[#allocation5_spill] sm:$0xff] }
 0x3d7   : > { %v23064_v36 = vpop.f32.mrf.mxu1  ;;  %v8548_v35 = vpop.f32.mrf.mxu0  ;;  %402 = vst.msk [vmem:[#allocation3 + $0x18] sm:$0xff] %vm398_vm4, %v25623_v62  ;;  %403 = vst.msk [vmem:[#allocation3 + $0x20] sm:$0xff] %vm398_vm4, %v25623_v62  ;;  %v25626_v32 = vld [vmem:[#allocation6_spill] sm:$0xff] }
 0x3d8   : > { %25619 = vst [vmem:[#allocation39_spill] sm:$0xff] %v23064_v36  ;;  %v23071_v46 = vadd.f32 %v8548_v35, %v8229_v38  ;;  %404 = vst.msk [vmem:[#allocation3 + $0x28] sm:$0xff] %vm398_vm4, %v25623_v62  ;;  %v25627_v38 = vld [vmem:[#allocation9_spill] sm:$0xff]  ;;  %v25631_v35 = vld [vmem:[#allocation36_spill] sm:$0xff] }
 0x3d9   : > { %v18254_v6 = vpop.f32.mrf.mxu1  ;;  %v18207_v47 = vpop.f32.mrf.mxu0  ;;  %18506 = vmatmul.mubr.msk.f32.gmra.mxu0 %vm209_vm1, %v10606_v34  ;;  %405 = vst.msk [vmem:[#allocation3 + $0x30] sm:$0xff] %vm398_vm4, %v25623_v62  ;;  %406 = vst.msk [vmem:[#allocation3 + $0x38] sm:$0xff] %vm398_vm4, %v25623_v62  ;;  %v25630_v34 = vld [vmem:[#allocation13_spill] sm:$0xff] }
 0x3da   : > { %25620 = vst [vmem:[#allocation37_spill] sm:$0xff] %v23071_v46  ;;  %v23073_v43 = vadd.f32 %v18254_v6, %v8620_v51  ;;  %v23079_v58 = vadd.f32 %v18207_v47, %v22900_v23  ;;  %18508 = vmatprep.mubr.msk.f32.mxu0 %vm209_vm1, %v10607_v31  ;;  %407 = vst.msk [vmem:[#allocation3 + $0x40] sm:$0xff] %vm398_vm4, %v25623_v62  ;;  %v25624_v23 = vld [vmem:[#allocation4_spill] sm:$0xff]  ;;  %v25628_v51 = vld [vmem:[#allocation10_spill] sm:$0xff] }
 0x3db   : > { %v23075_v11 = vpop.f32.mrf.mxu1  ;;  %v23086_v28 = vpop.f32.mrf.mxu0  ;;  %408 = vst.msk [vmem:[#allocation3 + $0x48] sm:$0xff] %vm398_vm4, %v25623_v62  ;;  %410 = vst.msk [vmem:[#allocation3 + $0x190] sm:$0xff] %vm398_vm4, %v25623_v62  ;;  %v25629_v6 = vld [vmem:[#allocation11_spill] sm:$0xff]  ;;  %v25632_v31 = vld [vmem:[#allocation14_spill] sm:$0xff] }
 0x3dc   : > { %25621 = vst [vmem:[#allocation33_spill] sm:$0xff] %v23075_v11  ;;  %25622 = vst [vmem:[#allocation66_spill] sm:$0xff] %v23086_v28  ;;  %v25633_v47 = vld [vmem:[#allocation16_spill] sm:$0xff] }
 0x3dd   : > { %v23081_v4 = vpop.f32.mrf.mxu1  ;;  %411 = vst.msk [vmem:[#allocation3 + $0x198] sm:$0xff] %vm398_vm4, %v25623_v62  ;;  %412 = vst.msk [vmem:[#allocation3 + $0x1a0] sm:$0xff] %vm398_vm4, %v25623_v62  ;;  %18509 = vmatmul.mubr.msk.f32.gmra.mxu0 %vm209_vm1, %v23084_v59  ;;  %v11068_v59 = vld [vmem:[%s25184_s2] sm:$0xff] }
 0x3de   : > { %413 = vst.msk [vmem:[#allocation3 + $0x1a8] sm:$0xff] %vm398_vm4, %v25623_v62  ;;  %414 = vst.msk [vmem:[#allocation3 + $0x1b0] sm:$0xff] %vm398_vm4, %v25623_v62  ;;  %18511 = vmatprep.mubr.msk.f32.mxu0 %vm209_vm1, %v23088_v7  ;;  %18567 = vmatprep.subr.mxu0 %v11068_v59 }
 0x3df   : > { %415 = vst.msk [vmem:[#allocation3 + $0x1b8] sm:$0xff] %vm398_vm4, %v25623_v62  ;;  %416 = vst.msk [vmem:[#allocation3 + $0x1c0] sm:$0xff] %vm398_vm4, %v25623_v62  ;;  %18568 = vmatpush3.msra.mxu0 %v11068_v59  ;;  %v23261_v59 = vld [vmem:[#allocation3 + $0x18] sm:$0xff] }
 0x3e0   : > { %417 = vst.msk [vmem:[#allocation3 + $0x1c8] sm:$0xff] %vm398_vm4, %v25623_v62  ;;  %418 = vst.msk [vmem:[#allocation3 + $0x1d0] sm:$0xff] %vm398_vm4, %v25623_v62  ;;  %v23304_v41 = vld [vmem:[#allocation3 + $0x38] sm:$0xff] }
 0x3e1   : > { %419 = vst.msk [vmem:[#allocation3 + $0x1d8] sm:$0xff] %vm398_vm4, %v25623_v62  ;;  %421 = vst.msk [vmem:[#allocation3 + $0x50] sm:$0xff] %vm398_vm4, %v25623_v62 }
 0x3e2   : > { %422 = vst.msk [vmem:[#allocation3 + $0xa0] sm:$0xff] %vm398_vm4, %v25623_v62  ;;  %423 = vst.msk [vmem:[#allocation3 + $0xf0] sm:$0xff] %vm398_vm4, %v25623_v62 }
 0x3e3   : > { %424 = vst.msk [vmem:[#allocation3 + $0x140] sm:$0xff] %vm398_vm4, %v25623_v62  ;;  %428 = vst.msk [vmem:[#allocation3 + $0x98] sm:$0xff] %vm398_vm4, %v25623_v62 }
 0x3e4   : > { %429 = vst.msk [vmem:[#allocation3 + $0xe8] sm:$0xff] %vm398_vm4, %v25623_v62  ;;  %430 = vst.msk [vmem:[#allocation3 + $0x138] sm:$0xff] %vm398_vm4, %v25623_v62 }
 0x3e5   : > { %431 = vst.msk [vmem:[#allocation3 + $0x188] sm:$0xff] %vm398_vm4, %v25623_v62  ;;  %10972 = vst.msk [vmem:[#allocation3 + $0x58] sm:$0xff] %vm398_vm4, %v25624_v23  ;;  %v25634_v23 = vld [vmem:[#allocation17_spill] sm:$0xff] }
 0x3e6   : > { %10973 = vst.msk [vmem:[#allocation3 + $0x60] sm:$0xff] %vm398_vm4, %v25625_v16  ;;  %10974 = vst.msk [vmem:[#allocation3 + $0x68] sm:$0xff] %vm398_vm4, %v25626_v32  ;;  %v25635_v16 = vld [vmem:[#allocation18_spill] sm:$0xff]  ;;  %v25636_v32 = vld [vmem:[#allocation19_spill] sm:$0xff] }
 0x3e7   : > { %10975 = vst.msk [vmem:[#allocation3 + $0x70] sm:$0xff] %vm398_vm4, %v25627_v38  ;;  %10976 = vst.msk [vmem:[#allocation3 + $0x78] sm:$0xff] %vm398_vm4, %v25628_v51  ;;  %v25637_v38 = vld [vmem:[#allocation20_spill] sm:$0xff]  ;;  %v25638_v51 = vld [vmem:[#allocation22_spill] sm:$0xff] }
 0x3e8   : > { %10977 = vst.msk [vmem:[#allocation3 + $0x80] sm:$0xff] %vm398_vm4, %v25629_v6  ;;  %10978 = vst.msk [vmem:[#allocation3 + $0x88] sm:$0xff] %vm398_vm4, %v25630_v34  ;;  %v25639_v6 = vld [vmem:[#allocation38_spill] sm:$0xff]  ;;  %v25640_v34 = vld [vmem:[#allocation23_spill] sm:$0xff] }
 0x3e9   : > { %10979 = vst.msk [vmem:[#allocation3 + $0x90] sm:$0xff] %vm398_vm4, %v25631_v35  ;;  %10980 = vst.msk [vmem:[#allocation3 + $0xa8] sm:$0xff] %vm398_vm4, %v25632_v31  ;;  %v25641_v35 = vld [vmem:[#allocation24_spill] sm:$0xff]  ;;  %v25642_v31 = vld [vmem:[#allocation25_spill] sm:$0xff] }
 0x3ea   : > { %10981 = vst.msk [vmem:[#allocation3 + $0xb0] sm:$0xff] %vm398_vm4, %v25633_v47  ;;  %10982 = vst.msk [vmem:[#allocation3 + $0xb8] sm:$0xff] %vm398_vm4, %v25634_v23  ;;  %v25643_v47 = vld [vmem:[#allocation26_spill] sm:$0xff]  ;;  %v25644_v23 = vld [vmem:[#allocation27_spill] sm:$0xff] }
 0x3eb   : > { %10983 = vst.msk [vmem:[#allocation3 + $0xc0] sm:$0xff] %vm398_vm4, %v25635_v16  ;;  %10984 = vst.msk [vmem:[#allocation3 + $0xc8] sm:$0xff] %vm398_vm4, %v25636_v32  ;;  %v25645_v16 = vld [vmem:[#allocation28_spill] sm:$0xff]  ;;  %v25646_v32 = vld [vmem:[#allocation34_spill] sm:$0xff] }
 0x3ec   : > { %10985 = vst.msk [vmem:[#allocation3 + $0xd0] sm:$0xff] %vm398_vm4, %v25637_v38  ;;  %10986 = vst.msk [vmem:[#allocation3 + $0xd8] sm:$0xff] %vm398_vm4, %v25638_v51  ;;  %v25647_v38 = vld [vmem:[#allocation41_spill] sm:$0xff]  ;;  %v25648_v51 = vld [vmem:[#allocation51_spill] sm:$0xff] }
 0x3ed   : > { %10987 = vst.msk [vmem:[#allocation3 + $0xe0] sm:$0xff] %vm398_vm4, %v25639_v6  ;;  %10988 = vst.msk [vmem:[#allocation3 + $0xf8] sm:$0xff] %vm398_vm4, %v25640_v34  ;;  %v25649_v6 = vld [vmem:[#allocation52_spill] sm:$0xff]  ;;  %v25650_v34 = vld [vmem:[#allocation53_spill] sm:$0xff] }
 0x3ee   : > { %10989 = vst.msk [vmem:[#allocation3 + $0x100] sm:$0xff] %vm398_vm4, %v25641_v35  ;;  %10990 = vst.msk [vmem:[#allocation3 + $0x108] sm:$0xff] %vm398_vm4, %v25642_v31  ;;  %v25651_v35 = vld [vmem:[#allocation54_spill] sm:$0xff]  ;;  %v25652_v31 = vld [vmem:[#allocation55_spill] sm:$0xff] }
 0x3ef   : > { %10991 = vst.msk [vmem:[#allocation3 + $0x110] sm:$0xff] %vm398_vm4, %v25643_v47  ;;  %10992 = vst.msk [vmem:[#allocation3 + $0x118] sm:$0xff] %vm398_vm4, %v25644_v23  ;;  %v25653_v47 = vld [vmem:[#allocation56_spill] sm:$0xff]  ;;  %v25654_v23 = vld [vmem:[#allocation57_spill] sm:$0xff] }
 0x3f0   : > { %10993 = vst.msk [vmem:[#allocation3 + $0x120] sm:$0xff] %vm398_vm4, %v25645_v16  ;;  %10994 = vst.msk [vmem:[#allocation3 + $0x128] sm:$0xff] %vm398_vm4, %v25646_v32  ;;  %v25655_v16 = vld [vmem:[#allocation8_spill] sm:$0xff]  ;;  %v23212_v32 = vadd.f32 %v23081_v4, %v23079_v58  ;;  %v23327_v20 = vld [vmem:[#allocation3 + $0x50] sm:$0xff] }
 0x3f1   : > { %10995 = vst.msk [vmem:[#allocation3 + $0x130] sm:$0xff] %vm398_vm4, %v25647_v38  ;;  %10996 = vst.msk [vmem:[#allocation3 + $0x148] sm:$0xff] %vm398_vm4, %v25648_v51  ;;  %v23214_v38 = vpop.f32.mrf.mxu1  ;;  %v18210_v51 = vpop.f32.mrf.mxu0 }
 0x3f2   : > { %10997 = vst.msk [vmem:[#allocation3 + $0x150] sm:$0xff] %vm398_vm4, %v25649_v6  ;;  %10998 = vst.msk [vmem:[#allocation3 + $0x158] sm:$0xff] %vm398_vm4, %v25650_v34  ;;  %v8624_v58 = vadd.f32 %v18210_v51, %v22912_v15  ;;  %v10610_v6 = vld [vmem:[#allocation2 + $0x392] sm:$0xff] }
 0x3f3   : > { %10999 = vst.msk [vmem:[#allocation3 + $0x160] sm:$0xff] %vm398_vm4, %v25651_v35  ;;  %11000 = vst.msk [vmem:[#allocation3 + $0x168] sm:$0xff] %vm398_vm4, %v25652_v31  ;;  %v18260_v4 = vpop.f32.mrf.mxu1  ;;  %v23229_v34 = vpop.f32.mrf.mxu0  ;;  %18512 = vmatmul.mubr.msk.f32.gmra.mxu0 %vm209_vm1, %v10610_v6  ;;  %v10612_v15 = vld [vmem:[#allocation2 + $0x3b2] sm:$0xff] }
 0x3f4   : > { %11001 = vst.msk [vmem:[#allocation3 + $0x170] sm:$0xff] %vm398_vm4, %v25653_v47  ;;  %11002 = vst.msk [vmem:[#allocation3 + $0x178] sm:$0xff] %vm398_vm4, %v25654_v23  ;;  %v23231_v35 = vadd.f32 %v18260_v4, %v8624_v58  ;;  %18514 = vmatprep.mubr.msk.f32.mxu0 %vm209_vm1, %v22716_v54 }
 0x3f5   : > { %11003 = vst.msk [vmem:[#allocation3 + $0x180] sm:$0xff] %vm398_vm4, %v25655_v16  ;;  %25656 = vst [vmem:[#allocation35_spill] sm:$0xff] %v23214_v38  ;;  %v23233_v31 = vpop.f32.mrf.mxu1  ;;  %v18213_v47 = vpop.f32.mrf.mxu0  ;;  %v11070_v16 = vld [vmem:[#allocation3 + $0x8] sm:$0xff] }
 0x3f6   : > { %420 = vst.msk [vmem:[#allocation3] sm:$0xff] %vm398_vm4, %v25623_v62  ;;  %425 = vst.msk [vmem:[#allocation3 + $0x190] sm:$0xff] %vm398_vm4, %v25623_v62  ;;  %18519 = vmatprep.mubr.msk.f32.mxu1 %vm398_vm4, %v11070_v16 }
 0x3f7   : > { %427 = vst.msk [vmem:[#allocation3 + $0x48] sm:$0xff] %vm398_vm4, %v25623_v62  ;;  %432 = vst.msk [vmem:[#allocation3 + $0x1d8] sm:$0xff] %vm398_vm4, %v25623_v62  ;;  %v8626_v62 = vadd.f32 %v18213_v47, %v22926_v19  ;;  %v18263_v23 = vpop.f32.mrf.mxu1  ;;  %v23242_v7 = vpop.f32.mrf.mxu0  ;;  %v23249_v19 = vld [vmem:[#allocation3 + $0x10] sm:$0xff]  ;;  %18515 = vmatmul.mubr.msk.f32.gmra.mxu0 %vm209_vm1, %v10612_v15 }
 0x3f8   : > { %25657 = vst [vmem:[#allocation45_spill] sm:$0xff] %v23229_v34  ;;  %25658 = vst [vmem:[#allocation40_spill] sm:$0xff] %v23233_v31  ;;  %18520 = vmatmul.mubr.msk.f32.vlgmr.msra.gmra.mxu1 %vm398_vm4, %v23249_v19 }
 0x3f9   : > { %25659 = vst [vmem:[#allocation61_spill] sm:$0xff] %v23242_v7  ;;  %v23244_v58 = vadd.f32 %v18263_v23, %v8626_v62  ;;  %v23246_v4 = vpop.f32.mrf.mxu1  ;;  %25661 = vst [vmem:[#allocation58_spill] sm:$0xff] %v23249_v19  ;;  %v18216_v54 = vpop.f32.mrf.mxu0  ;;  %v15744_v62 = vld [vmem:[%s25184_s2 + $0x10] sm:$0xff]  ;;  %18522 = vmatprep.mubr.msk.f32.mxu1 %vm398_vm4, %v23261_v59 }
 0x3fa   : > { %25660 = vst [vmem:[#allocation50_spill] sm:$0xff] %v23246_v4  ;;  %v8628_v6 = vadd.f32 %v18216_v54, %v22940_v1  ;;  %18617 = vmatprep.subr.mxu1 %v15744_v62  ;;  %25663 = vst [vmem:[#allocation44_spill] sm:$0xff] %v23261_v59  ;;  %v23269_v1 = vld [vmem:[#allocation3 + $0x20] sm:$0xff] }
 0x3fb   : > { %v18266_v47 = vpop.f32.mrf.mxu1  ;;  %v23259_v23 = vpop.f32.mrf.mxu0  ;;  %18618 = vmatpush3.msra.mxu1 %v15744_v62  ;;  %25665 = vst [vmem:[#allocation63_spill] sm:$0xff] %v23269_v1  ;;  %25668 = vst [vmem:[#allocation67_spill] sm:$0xff] %v23304_v41 }
 0x3fc   : > { %25662 = vst [vmem:[#allocation47_spill] sm:$0xff] %v23259_v23  ;;  %v23263_v4 = vadd.f32 %v18266_v47, %v8628_v6  ;;  %18523 = vmatmul.mubr.msk.f32.gmra.mxu1 %vm398_vm4, %v23269_v1  ;;  %v23283_v47 = vld [vmem:[#allocation3 + $0x28] sm:$0xff]  ;;  %25670 = vst [vmem:[#allocation5_spill] sm:$0xff] %v23327_v20 }
 0x3fd   : > { %v11036_v51 = vld [vmem:[#allocation3] sm:$0xff]  ;;  %v23265_v15 = vpop.f32.mrf.mxu1  ;;  %25666 = vst [vmem:[#allocation43_spill] sm:$0xff] %v23283_v47  ;;  %18525 = vmatprep.mubr.msk.f32.mxu1 %vm398_vm4, %v23283_v47 }
 0x3fe   : > { %18569 = vmatprep.mubr.msk.f32.mxu0 %vm398_vm4, %v11036_v51  ;;  %25664 = vst [vmem:[#allocation7_spill] sm:$0xff] %v23265_v15  ;;  %v18271_v51 = vpop.f32.mrf.mxu0 }
 0x3ff   : > { %18570 = vmatmul.mubr.msk.f32.vlgmr.msra.gmra.mxu0 %vm398_vm4, %v11070_v16  ;;  %v23275_v54 = vadd.f32 %v18271_v51, %v22950_v30  ;;  %v23277_v23 = vpop.f32.mrf.mxu1  ;;  %v23289_v16 = vld [vmem:[#allocation3 + $0x30] sm:$0xff] }
 0x400   : > { %18572 = vmatprep.mubr.msk.f32.mxu0 %vm398_vm4, %v23249_v19  ;;  %v23281_v6 = vpop.f32.mrf.mxu0  ;;  %25667 = vst [vmem:[#allocation65_spill] sm:$0xff] %v23289_v16  ;;  %18526 = vmatmul.mubr.msk.f32.gmra.mxu1 %vm398_vm4, %v23289_v16 }
 0x401   : > { %v23285_v62 = vpop.f32.mrf.mxu1  ;;  %18528 = vmatprep.mubr.msk.f32.mxu1 %vm398_vm4, %v23304_v41 }
 0x402   : > { %v18274_v15 = vpop.f32.mrf.mxu0 }
 0x403   : > { %18573 = vmatmul.mubr.msk.f32.gmra.mxu0 %vm398_vm4, %v23261_v59  ;;  %v23296_v30 = vadd.f32 %v18274_v15, %v22960_v39  ;;  %v23298_v51 = vpop.f32.mrf.mxu1  ;;  %v23310_v59 = vld [vmem:[#allocation3 + $0x40] sm:$0xff] }
 0x404   : > { %18575 = vmatprep.mubr.msk.f32.mxu0 %vm398_vm4, %v23269_v1  ;;  %v23302_v19 = vpop.f32.mrf.mxu0  ;;  %25669 = vst [vmem:[#allocation4_spill] sm:$0xff] %v23310_v59  ;;  %18529 = vmatmul.mubr.msk.f32.gmra.mxu1 %vm398_vm4, %v23310_v59 }
 0x405   : > { %v23306_v21 = vpop.f32.mrf.mxu1 }
 0x406   : > { %v18277_v7 = vpop.f32.mrf.mxu0 }
 0x407   : > { %18576 = vmatmul.mubr.msk.f32.gmra.mxu0 %vm398_vm4, %v23283_v47  ;;  %v23317_v39 = vadd.f32 %v18277_v7, %v22971_v13  ;;  %v23319_v15 = vpop.f32.mrf.mxu1 }
 0x408   : > { %18578 = vmatprep.mubr.msk.f32.mxu0 %vm398_vm4, %v23289_v16  ;;  %v23323_v1 = vpop.f32.mrf.mxu0 }
 0x409   : > { %v23325_v31 = vpop.f32.mrf.mxu1 }
 0x40a   : > { %v18280_v45 = vpop.f32.mrf.mxu0 }
 0x40b   : > { %18579 = vmatmul.mubr.msk.f32.gmra.mxu0 %vm398_vm4, %v23304_v41  ;;  %v23332_v59 = vadd.f32 %v18280_v45, %v22981_v63  ;;  %v23334_v13 = vpop.f32.mrf.mxu1 }
 0x40c   : > { %18581 = vmatprep.mubr.msk.f32.mxu0 %vm398_vm4, %v23327_v20  ;;  %v23338_v7 = vpop.f32.mrf.mxu0 }
 0x40d   : > { %v23340_v16 = vpop.f32.mrf.mxu1 }
 0x40e   : > { %v18283_v47 = vpop.f32.mrf.mxu0 }
 0x40f   : > { %v23343_v34 = vadd.f32 %v18283_v47, %v22991_v52  ;;  %v23345_v38 = vpop.f32.mrf.mxu1 }
 0x410   : > { %v23347_v50 = vpop.f32.mrf.mxu0 }
 0x411   : > { %v23349_v41 = vpop.f32.mrf.mxu1 }
 0x412   : > { %v18286_v45 = vpop.f32.mrf.mxu0 }
 0x413   : > { %v23352_v63 = vadd.f32 %v18286_v45, %v23001_v5  ;;  %v23354_v24 = vpop.f32.mrf.mxu1 }
 0x414   : > { %v23356_v20 = vpop.f32.mrf.mxu0 }
 0x415   : > { %v23358_v28 = vpop.f32.mrf.mxu1 }
 0x416   : > { %25671 = vst [vmem:[#allocation6_spill] sm:$0xff] %v23358_v28  ;;  %v18289_v11 = vpop.f32.mrf.mxu0 }
 0x417   : > { %v23361_v52 = vadd.f32 %v18289_v11, %v23012_v27  ;;  %v23363_v47 = vpop.f32.mrf.mxu1 }
 0x418   : > { %25673 = vst [vmem:[#allocation10_spill] sm:$0xff] %v23363_v47  ;;  %v23365_v46 = vpop.f32.mrf.mxu0 }
 0x419   : > { %25672 = vst [vmem:[#allocation9_spill] sm:$0xff] %v23361_v52  ;;  %25674 = vst [vmem:[#allocation11_spill] sm:$0xff] %v23365_v46  ;;  %v23367_v60 = vpop.f32.mrf.mxu1 }
 0x41a   : > { %25675 = vst [vmem:[#allocation13_spill] sm:$0xff] %v23367_v60  ;;  %v18292_v53 = vpop.f32.mrf.mxu0 }
 0x41b   : > { %v23370_v5 = vadd.f32 %v18292_v53, %v23023_v12  ;;  %v23372_v45 = vpop.f32.mrf.mxu1 }
 0x41c   : > { %25677 = vst [vmem:[#allocation14_spill] sm:$0xff] %v23372_v45  ;;  %v23374_v36 = vpop.f32.mrf.mxu0 }
 0x41d   : > { %25676 = vst [vmem:[#allocation36_spill] sm:$0xff] %v23370_v5  ;;  %25678 = vst [vmem:[#allocation16_spill] sm:$0xff] %v23374_v36  ;;  %v23376_v26 = vpop.f32.mrf.mxu1 }
 0x41e   : > { %25679 = vst [vmem:[#allocation17_spill] sm:$0xff] %v23376_v26  ;;  %v18295_v56 = vpop.f32.mrf.mxu0 }
 0x41f   : > { %v23379_v27 = vadd.f32 %v18295_v56, %v23036_v33  ;;  %v23381_v11 = vpop.f32.mrf.mxu1 }
 0x420   : > { %25681 = vst [vmem:[#allocation19_spill] sm:$0xff] %v23381_v11  ;;  %v23383_v17 = vpop.f32.mrf.mxu0 }
 0x421   : > { %25680 = vst [vmem:[#allocation18_spill] sm:$0xff] %v23379_v27  ;;  %25682 = vst [vmem:[#allocation20_spill] sm:$0xff] %v23383_v17  ;;  %v23385_v9 = vpop.f32.mrf.mxu1 }
 0x422   : > { %25683 = vst [vmem:[#allocation22_spill] sm:$0xff] %v23385_v9  ;;  %v18298_v0 = vpop.f32.mrf.mxu0 }
 0x423   : > { %v23388_v53 = vadd.f32 %v18298_v0, %v23049_v49  ;;  %v23390_v12 = vpop.f32.mrf.mxu1 }
 0x424   : > { %25685 = vst [vmem:[#allocation23_spill] sm:$0xff] %v23390_v12  ;;  %v23392_v45 = vpop.f32.mrf.mxu0 }
 0x425   : > { %25684 = vst [vmem:[#allocation38_spill] sm:$0xff] %v23388_v53  ;;  %25686 = vst [vmem:[#allocation24_spill] sm:$0xff] %v23392_v45  ;;  %v23394_v5 = vpop.f32.mrf.mxu1 }
 0x426   : > { %25687 = vst [vmem:[#allocation25_spill] sm:$0xff] %v23394_v5  ;;  %v18301_v26 = vpop.f32.mrf.mxu0 }
 0x427   : > { %v23397_v33 = vadd.f32 %v18301_v26, %v23062_v37  ;;  %v23399_v56 = vpop.f32.mrf.mxu1 }
 0x428   : > { %25689 = vst [vmem:[#allocation27_spill] sm:$0xff] %v23399_v56  ;;  %v23401_v11 = vpop.f32.mrf.mxu0 }
 0x429   : > { %25688 = vst [vmem:[#allocation26_spill] sm:$0xff] %v23397_v33  ;;  %25690 = vst [vmem:[#allocation28_spill] sm:$0xff] %v23401_v11  ;;  %v23403_v27 = vpop.f32.mrf.mxu1 }
 0x42a   : > { %25691 = vst [vmem:[#allocation34_spill] sm:$0xff] %v23403_v27  ;;  %v18304_v9 = vpop.f32.mrf.mxu0 }
 0x42b   : > { %v23406_v0 = vadd.f32 %v18304_v9, %v23073_v43  ;;  %v23408_v49 = vpop.f32.mrf.mxu1 }
 0x42c   : > { %25693 = vst [vmem:[#allocation51_spill] sm:$0xff] %v23408_v49  ;;  %v23410_v12 = vpop.f32.mrf.mxu0 }
 0x42d   : > { %25692 = vst [vmem:[#allocation41_spill] sm:$0xff] %v23406_v0  ;;  %25694 = vst [vmem:[#allocation52_spill] sm:$0xff] %v23410_v12  ;;  %v23412_v53 = vpop.f32.mrf.mxu1 }
 0x42e   : > { %25695 = vst [vmem:[#allocation53_spill] sm:$0xff] %v23412_v53  ;;  %v18307_v5 = vpop.f32.mrf.mxu0 }
 0x42f   : > { %v23415_v26 = vadd.f32 %v18307_v5, %v23212_v32  ;;  %v23417_v37 = vpop.f32.mrf.mxu1 }
 0x430   : > { %25697 = vst [vmem:[#allocation55_spill] sm:$0xff] %v23417_v37  ;;  %v23419_v56 = vpop.f32.mrf.mxu0 }
 0x431   : > { %25696 = vst [vmem:[#allocation54_spill] sm:$0xff] %v23415_v26  ;;  %25698 = vst [vmem:[#allocation56_spill] sm:$0xff] %v23419_v56  ;;  %v23421_v33 = vpop.f32.mrf.mxu1 }
 0x432   : > { %25699 = vst [vmem:[#allocation57_spill] sm:$0xff] %v23421_v33  ;;  %v18310_v27 = vpop.f32.mrf.mxu0  ;;  %v15777_v33 = vld [vmem:[%s25184_s2 + $0x18] sm:$0xff] }
 0x433   : > { %v23424_v9 = vadd.f32 %v18310_v27, %v23231_v35  ;;  %v23426_v43 = vpop.f32.mrf.mxu1  ;;  %18667 = vmatprep.subr.mxu0 %v15777_v33 }
 0x434   : > { %25701 = vst [vmem:[#allocation68_spill] sm:$0xff] %v23426_v43  ;;  %v23428_v49 = vpop.f32.mrf.mxu0  ;;  %18668 = vmatpush3.msra.mxu0 %v15777_v33 }
 0x435   : > { %25700 = vst [vmem:[#allocation8_spill] sm:$0xff] %v23424_v9  ;;  %25702 = vst [vmem:[#allocation69_spill] sm:$0xff] %v23428_v49  ;;  %v23430_v0 = vpop.f32.mrf.mxu1 }
 0x436   : > { %25703 = vst [vmem:[#allocation70_spill] sm:$0xff] %v23430_v0  ;;  %v18313_v53 = vpop.f32.mrf.mxu0 }
 0x437   : > { %v23433_v32 = vadd.f32 %v18313_v53, %v23244_v58  ;;  %v23435_v5 = vpop.f32.mrf.mxu1 }
 0x438   : > { %25705 = vst [vmem:[#allocation72_spill] sm:$0xff] %v23435_v5  ;;  %v23437_v37 = vpop.f32.mrf.mxu0  ;;  %v23456_v5 = vld [vmem:[%s25184_s2 + $0x20] sm:$0xff] }
 0x439   : > { %25704 = vst [vmem:[#allocation71_spill] sm:$0xff] %v23433_v32  ;;  %25706 = vst [vmem:[#allocation73_spill] sm:$0xff] %v23437_v37  ;;  %v23442_v35 = vpop.f32.mrf.mxu1  ;;  %18717 = vmatprep.subr.mxu1 %v23456_v5 }
 0x43a   : > { %25707 = vst [vmem:[#allocation74_spill] sm:$0xff] %v23442_v35  ;;  %v18316_v27 = vpop.f32.mrf.mxu0  ;;  %25712 = vst [vmem:[#allocation79_spill] sm:$0xff] %v23456_v5 }
 0x43b   : > { %v23445_v43 = vadd.f32 %v18316_v27, %v23263_v4  ;;  %v23447_v0 = vpop.f32.mrf.mxu1 }
 0x43c   : > { %25709 = vst [vmem:[#allocation76_spill] sm:$0xff] %v23447_v0  ;;  %v23449_v58 = vpop.f32.mrf.mxu0 }
 0x43d   : > { %25708 = vst [vmem:[#allocation75_spill] sm:$0xff] %v23445_v43  ;;  %25710 = vst [vmem:[#allocation77_spill] sm:$0xff] %v23449_v58  ;;  %v23451_v53 = vpop.f32.mrf.mxu1 }
 0x43e   : > { %25711 = vst [vmem:[#allocation78_spill] sm:$0xff] %v23451_v53  ;;  %v18371_v32 = vpop.f32.mrf.mxu0 }
 0x43f   : > { %v18421_v35 = vpop.f32.mrf.mxu1 }
 0x440   : > { %v10000_v37 = vpop.f32.mrf.mxu0 }
 0x441   : > { %v23459_v33 = vpop.f32.mrf.mxu1 }
 0x442   : > { %v18374_v4 = vpop.f32.mrf.mxu0 }
 0x443   : > { %v23463_v0 = vpop.f32.mrf.mxu1 }
 0x444   : > { %v23461_v27 = vpop.f32.mrf.mxu0 }
 0x445   : > { %v23467_v53 = vpop.f32.mrf.mxu1 }
 0x446   : > { %v23465_v43 = vpop.f32.mrf.mxu0 }
 0x447   : > { %v23473_v49 = vpop.f32.mrf.mxu1 }
 0x448   : > { %v23469_v58 = vpop.f32.mrf.mxu0 }
 0x449   : > { %v23479_v56 = vpop.f32.mrf.mxu1 }
 0x44a   : > { %v23471_v9 = vpop.f32.mrf.mxu0 }
 0x44b   : > { %v23485_v45 = vpop.f32.mrf.mxu1 }
 0x44c   : > { %v23475_v5 = vpop.f32.mrf.mxu0 }
 0x44d   : > { %v23491_v60 = vpop.f32.mrf.mxu1 }
 0x44e   : > { %v23477_v26 = vpop.f32.mrf.mxu0  ;;  %25717 = vst [vmem:[#allocation84_spill] sm:$0xff] %v23491_v60 }
 0x44f   : > { %v23497_v48 = vpop.f32.mrf.mxu1 }
 0x450   : > { %v23481_v12 = vpop.f32.mrf.mxu0  ;;  %25720 = vst [vmem:[#allocation87_spill] sm:$0xff] %v23497_v48 }
 0x451   : > { %25713 = vst [vmem:[#allocation80_spill] sm:$0xff] %v23481_v12  ;;  %v23503_v46 = vpop.f32.mrf.mxu1 }
 0x452   : > { %v23483_v11 = vpop.f32.mrf.mxu0  ;;  %25723 = vst [vmem:[#allocation90_spill] sm:$0xff] %v23503_v46 }
 0x453   : > { %25714 = vst [vmem:[#allocation81_spill] sm:$0xff] %v23483_v11 }
 0x454   : > { %v23487_v17 = vpop.f32.mrf.mxu0 }
 0x455   : > { %25715 = vst [vmem:[#allocation82_spill] sm:$0xff] %v23487_v17  ;;  %v23509_v17 = vpop.f32.mrf.mxu1 }
 0x456   : > { %v23489_v36 = vpop.f32.mrf.mxu0  ;;  %25726 = vst [vmem:[#allocation93_spill] sm:$0xff] %v23509_v17 }
 0x457   : > { %25716 = vst [vmem:[#allocation83_spill] sm:$0xff] %v23489_v36 }
 0x458   : > { %v23493_v47 = vpop.f32.mrf.mxu0 }
 0x459   : > { %25718 = vst [vmem:[#allocation85_spill] sm:$0xff] %v23493_v47  ;;  %v23515_v47 = vpop.f32.mrf.mxu1 }
 0x45a   : > { %v23495_v52 = vpop.f32.mrf.mxu0 }
 0x45b   : > { %25719 = vst [vmem:[#allocation86_spill] sm:$0xff] %v23495_v52 }
 0x45c   : > { %v23499_v44 = vpop.f32.mrf.mxu0 }
 0x45d   : > { %25721 = vst [vmem:[#allocation88_spill] sm:$0xff] %v23499_v44  ;;  %v23521_v44 = vpop.f32.mrf.mxu1 }
 0x45e   : > { %v23501_v28 = vpop.f32.mrf.mxu0  ;;  %25731 = vst [vmem:[#allocation98_spill] sm:$0xff] %v23521_v44 }
 0x45f   : > { %25722 = vst [vmem:[#allocation89_spill] sm:$0xff] %v23501_v28 }
 0x460   : > { %v23505_v11 = vpop.f32.mrf.mxu0 }
 0x461   : > { %25724 = vst [vmem:[#allocation91_spill] sm:$0xff] %v23505_v11  ;;  %v23527_v11 = vpop.f32.mrf.mxu1 }
 0x462   : > { %v23507_v12 = vpop.f32.mrf.mxu0 }
 0x463   : > { %25725 = vst [vmem:[#allocation92_spill] sm:$0xff] %v23507_v12 }
 0x464   : > { %v23511_v36 = vpop.f32.mrf.mxu0 }
 0x465   : > { %25727 = vst [vmem:[#allocation94_spill] sm:$0xff] %v23511_v36  ;;  %v23535_v36 = vpop.f32.mrf.mxu1 }
 0x466   : > { %v23513_v60 = vpop.f32.mrf.mxu0 }
 0x467   : > { %25728 = vst [vmem:[#allocation95_spill] sm:$0xff] %v23513_v60  ;;  %v8988_v60 = vadd.f32 %v22952_v10, %v22948_v61  ;;  %v23553_v61 = vld [vmem:[%s25184_s2 + $0x28] sm:$0xff] }
 0x468   : > { %v23517_v52 = vpop.f32.mrf.mxu0  ;;  %18767 = vmatprep.subr.mxu0 %v23553_v61 }
 0x469   : > { %25729 = vst [vmem:[#allocation96_spill] sm:$0xff] %v23517_v52 }
 0x46a   : > { %v23519_v48 = vpop.f32.mrf.mxu0 }
 0x46b   : > { %25730 = vst [vmem:[#allocation97_spill] sm:$0xff] %v23519_v48  ;;  %v9378_v48 = vadd.f32 %v23281_v6, %v8988_v60 }
 0x46c   : > { %v23523_v28 = vpop.f32.mrf.mxu0 }
 0x46d   : > { %25732 = vst [vmem:[#allocation99_spill] sm:$0xff] %v23523_v28  ;;  %v9769_v28 = vadd.f32 %v23277_v23, %v23275_v54  ;;  %v9768_v10 = vadd.f32 %v23285_v62, %v9378_v48  ;;  %v9771_v23 = vadd.f32 %v23298_v51, %v23296_v30 }
 0x46e   : > { %v23525_v46 = vpop.f32.mrf.mxu0 }
 0x46f   : > { %25733 = vst [vmem:[#allocation100_spill] sm:$0xff] %v23525_v46  ;;  %v8990_v46 = vadd.f32 %v22962_v57, %v22958_v42  ;;  %v10160_v6 = vadd.f32 %v18371_v32, %v9769_v28  ;;  %v8992_v42 = vadd.f32 %v22973_v3, %v22969_v18  ;;  %v10159_v54 = vadd.f32 %v10000_v37, %v9768_v10 }
 0x470   : > { %v23529_v12 = vpop.f32.mrf.mxu0  ;;  %v10162_v28 = vadd.f32 %v18374_v4, %v9771_v23  ;;  %v9773_v3 = vadd.f32 %v23319_v15, %v23317_v39  ;;  %v8996_v39 = vadd.f32 %v22993_v2, %v22989_v55 }
 0x471   : > { %25734 = vst [vmem:[#allocation101_spill] sm:$0xff] %v23529_v12  ;;  %v23546_v12 = vpop.f32.mrf.mxu1  ;;  %v9380_v60 = vadd.f32 %v23302_v19, %v8990_v46  ;;  %v10550_v46 = vadd.f32 %v18421_v35, %v10160_v6  ;;  %v8994_v19 = vadd.f32 %v22983_v14, %v22979_v25  ;;  %v10549_v62 = vadd.f32 %v23459_v33, %v10159_v54  ;;  %v25740_v54 = vld [vmem:[#allocation80_spill] sm:$0xff] }
 0x472   : > { %v23531_v17 = vpop.f32.mrf.mxu0  ;;  %v10552_v35 = vadd.f32 %v23463_v0, %v10162_v28  ;;  %v10164_v25 = vadd.f32 %v23465_v43, %v9773_v3  ;;  %v9775_v33 = vadd.f32 %v23334_v13, %v23332_v59  ;;  %v9386_v0 = vadd.f32 %v23347_v50, %v8996_v39  ;;  %v25743_v28 = vld [vmem:[#allocation87_spill] sm:$0xff]  ;;  %v25749_v39 = vld [vmem:[#allocation90_spill] sm:$0xff] }
 0x473   : > { %25735 = vst [vmem:[#allocation102_spill] sm:$0xff] %v23531_v17  ;;  %v9770_v48 = vadd.f32 %v23306_v21, %v9380_v60  ;;  %v9384_v21 = vadd.f32 %v23338_v7, %v8994_v19  ;;  %v8998_v13 = vadd.f32 %v23003_v40, %v22999_v8 }
 0x474   : > { %v23537_v52 = vpop.f32.mrf.mxu0  ;;  %v10554_v55 = vadd.f32 %v23473_v49, %v10164_v25  ;;  %v10166_v2 = vadd.f32 %v23471_v9, %v9775_v33  ;;  %v9776_v49 = vadd.f32 %v23349_v41, %v9386_v0  ;;  %v25750_v33 = vld [vmem:[#allocation82_spill] sm:$0xff]  ;;  %v25751_v0 = vld [vmem:[#allocation13_spill] sm:$0xff] }
 0x475   : > { %25736 = vst [vmem:[#allocation103_spill] sm:$0xff] %v23537_v52  ;;  %v10161_v30 = vadd.f32 %v23461_v27, %v9770_v48  ;;  %v9774_v27 = vadd.f32 %v23340_v16, %v9384_v21  ;;  %v9388_v6 = vadd.f32 %v23356_v20, %v8998_v13  ;;  %v25742_v48 = vld [vmem:[#allocation6_spill] sm:$0xff]  ;;  %v25753_v13 = vld [vmem:[#allocation93_spill] sm:$0xff] }
 0x476   : > { %v23540_v44 = vpop.f32.mrf.mxu0  ;;  %v10556_v8 = vadd.f32 %v23485_v45, %v10166_v2  ;;  %v10167_v20 = vadd.f32 %v25740_v54, %v9776_v49  ;;  %v25748_v21 = vld [vmem:[#allocation10_spill] sm:$0xff]  ;;  %v25752_v2 = vld [vmem:[#allocation16_spill] sm:$0xff] }
 0x477   : > { %25737 = vst [vmem:[#allocation104_spill] sm:$0xff] %v23540_v44  ;;  %v23565_v44 = vpop.f32.mrf.mxu1  ;;  %v10165_v10 = vadd.f32 %v23475_v5, %v9774_v27  ;;  %v25756_v49 = vld [vmem:[#allocation48_spill] sm:$0xff] }
 0x478   : > { %v23548_v17 = vpop.f32.mrf.mxu0 }
 0x479   : > { %25738 = vst [vmem:[#allocation105_spill] sm:$0xff] %v23548_v17  ;;  %v9382_v17 = vadd.f32 %v23323_v1, %v8992_v42  ;;  %v23577_v37 = vpop.f32.mrf.mxu1  ;;  %v25739_v42 = vld [vmem:[#allocation84_spill] sm:$0xff] }
 0x47a   : > { %v23560_v57 = vpop.f32.mrf.mxu0  ;;  %v10555_v23 = vadd.f32 %v25739_v42, %v10165_v10 }
 0x47b   : > { %v9772_v51 = vadd.f32 %v23325_v31, %v9382_v17  ;;  %v10551_v17 = vadd.f32 %v23467_v53, %v10161_v30  ;;  %v23591_v43 = vpop.f32.mrf.mxu1  ;;  %v9777_v53 = vadd.f32 %v23345_v38, %v23343_v34  ;;  %v9000_v34 = vadd.f32 %v23014_v29, %v23010_v22  ;;  %v25741_v29 = vld [vmem:[#allocation11_spill] sm:$0xff]  ;;  %v25745_v30 = vld [vmem:[#allocation21_spill] sm:$0xff] }
 0x47c   : > { %v23567_v52 = vpop.f32.mrf.mxu0 }
 0x47d   : > { %v10163_v31 = vadd.f32 %v23469_v58, %v9772_v51  ;;  %v23605_v9 = vpop.f32.mrf.mxu1  ;;  %v10168_v40 = vadd.f32 %v23477_v26, %v9777_v53  ;;  %v25754_v53 = vld [vmem:[#allocation83_spill] sm:$0xff] }
 0x47e   : > { %v18471_v18 = vpop.f32.mrf.mxu0 }
 0x47f   : > { %v10940_v1 = vadd.f32 %v18471_v18, %v10550_v46  ;;  %v10553_v50 = vadd.f32 %v23479_v56, %v10163_v31  ;;  %v9779_v56 = vadd.f32 %v23354_v24, %v23352_v63  ;;  %v9390_v24 = vadd.f32 %v25741_v29, %v9000_v34  ;;  %v23627_v63 = vpop.f32.mrf.mxu1  ;;  %v25744_v18 = vld [vmem:[#allocation81_spill] sm:$0xff] }
 0x480   : > { %v10780_v32 = vpop.f32.mrf.mxu0  ;;  %v9778_v46 = vadd.f32 %v25742_v48, %v9388_v6  ;;  %v10558_v19 = vadd.f32 %v25743_v28, %v10168_v40  ;;  %v25757_v6 = vld [vmem:[#allocation36_spill] sm:$0xff]  ;;  %v25762_v48 = vld [vmem:[#allocation98_spill] sm:$0xff] }
 0x481   : > { %11005 = vst.msk [vmem:[#allocation3 + $0x60] sm:$0xff] %vm209_vm1, %v10940_v1  ;;  %v10939_v14 = vadd.f32 %v10780_v32, %v10549_v62  ;;  %v10170_v3 = vadd.f32 %v25744_v18, %v9779_v56  ;;  %v25746_v1 = vld [vmem:[#allocation64_spill] sm:$0xff]  ;;  %v25747_v32 = vld [vmem:[#allocation9_spill] sm:$0xff]  ;;  %v23653_v27 = vpop.f32.mrf.mxu1  ;;  %v25763_v28 = vld [vmem:[#allocation86_spill] sm:$0xff] }
 0x482   : > { %v18474_v15 = vpop.f32.mrf.mxu0  ;;  %v9002_v51 = vadd.f32 %v25746_v1, %v25745_v30  ;;  %v25765_v30 = vld [vmem:[#allocation59_spill] sm:$0xff] }
 0x483   : > { %11004 = vst.msk [vmem:[#allocation3 + $0x58] sm:$0xff] %vm209_vm1, %v10939_v14  ;;  %v10942_v7 = vadd.f32 %v18474_v15, %v10552_v35  ;;  %v9781_v35 = vadd.f32 %v25748_v21, %v25747_v32  ;;  %v10557_v15 = vadd.f32 %v25749_v39, %v10167_v20  ;;  %v25760_v20 = vld [vmem:[#allocation20_spill] sm:$0xff]  ;;  %v23679_v29 = vpop.f32.mrf.mxu1  ;;  %v25767_v32 = vld [vmem:[#allocation19_spill] sm:$0xff] }
 0x484   : > { %v10790_v4 = vpop.f32.mrf.mxu0 }
 0x485   : > { %11007 = vst.msk [vmem:[#allocation3 + $0x70] sm:$0xff] %vm209_vm1, %v10942_v7  ;;  %v10941_v59 = vadd.f32 %v10790_v4, %v10551_v17  ;;  %v10169_v17 = vadd.f32 %v25750_v33, %v9778_v46  ;;  %v9780_v4 = vadd.f32 %v25751_v0, %v9390_v24  ;;  %v25769_v0 = vld [vmem:[#allocation22_spill] sm:$0xff] }
 0x486   : > { %v18477_v58 = vpop.f32.mrf.mxu0 }
 0x487   : > { %11006 = vst.msk [vmem:[#allocation3 + $0x68] sm:$0xff] %vm209_vm1, %v10941_v59  ;;  %v10944_v16 = vadd.f32 %v18477_v58, %v10554_v55  ;;  %v9392_v59 = vadd.f32 %v25752_v2, %v9002_v51  ;;  %v10560_v58 = vadd.f32 %v25753_v13, %v10170_v3  ;;  %v10559_v56 = vadd.f32 %v23515_v47, %v10169_v17  ;;  %v25761_v47 = vld [vmem:[#allocation17_spill] sm:$0xff]  ;;  %v23689_v3 = vld [vmem:[#allocation3 + $0xa0] sm:$0xff]  ;;  %v25766_v51 = vld [vmem:[#allocation18_spill] sm:$0xff] }
 0x488   : > { %v10800_v60 = vpop.f32.mrf.mxu0  ;;  %v23624_v22 = vld [vmem:[#allocation3 + $0x60] sm:$0xff]  ;;  %v9785_v21 = vadd.f32 %v25767_v32, %v25766_v51  ;;  %v25783_v51 = vld [vmem:[#allocation33_spill] sm:$0xff] }
 0x489   : > { %11009 = vst.msk [vmem:[#allocation3 + $0x80] sm:$0xff] %vm209_vm1, %v10944_v16  ;;  %v10943_v38 = vadd.f32 %v10800_v60, %v10553_v50  ;;  %v10172_v50 = vadd.f32 %v25754_v53, %v9781_v35  ;;  %v25755_v16 = vld [vmem:[#allocation30_spill] sm:$0xff] }
 0x48a   : > { %v18480_v5 = vpop.f32.mrf.mxu0  ;;  %v23615_v41 = vld [vmem:[#allocation3 + $0x58] sm:$0xff]  ;;  %v9004_v60 = vadd.f32 %v25756_v49, %v25755_v16 }
 0x48b   : > { %11008 = vst.msk [vmem:[#allocation3 + $0x78] sm:$0xff] %vm209_vm1, %v10943_v38  ;;  %v10946_v45 = vadd.f32 %v18480_v5, %v10556_v8  ;;  %18531 = vmatprep.mubr.msk.f32.mxu1 %vm398_vm4, %v23615_v41  ;;  %18582 = vmatmul.mubr.msk.f32.gmra.mxu0 %vm398_vm4, %v23615_v41  ;;  %v25758_v8 = vld [vmem:[#allocation14_spill] sm:$0xff]  ;;  %v25759_v5 = vld [vmem:[#allocation85_spill] sm:$0xff]  ;;  %v10562_v46 = vadd.f32 %v25762_v48, %v10172_v50  ;;  %v25773_v16 = vld [vmem:[#allocation39_spill] sm:$0xff] }
 0x48c   : > { %v10810_v26 = vpop.f32.mrf.mxu0  ;;  %18532 = vmatmul.mubr.msk.f32.gmra.mxu1 %vm398_vm4, %v23624_v22  ;;  %18584 = vmatprep.mubr.msk.f32.mxu0 %vm398_vm4, %v23624_v22  ;;  %v23650_v7 = vld [vmem:[#allocation3 + $0x70] sm:$0xff]  ;;  %v9783_v40 = vadd.f32 %v25758_v8, %v25757_v6  ;;  %v10171_v42 = vadd.f32 %v25759_v5, %v9780_v4  ;;  %v25775_v6 = vld [vmem:[#allocation23_spill] sm:$0xff] }
 0x48d   : > { %11011 = vst.msk [vmem:[#allocation3 + $0x90] sm:$0xff] %vm209_vm1, %v10946_v45  ;;  %v10945_v62 = vadd.f32 %v10810_v26, %v10555_v23  ;;  %v9394_v45 = vadd.f32 %v25760_v20, %v9004_v60  ;;  %v9782_v26 = vadd.f32 %v25761_v47, %v9392_v59  ;;  %v25774_v60 = vld [vmem:[#allocation38_spill] sm:$0xff]  ;;  %v25776_v5 = vld [vmem:[#allocation91_spill] sm:$0xff]  ;;  %v25779_v47 = vld [vmem:[#allocation28_spill] sm:$0xff] }
 0x48e   : > { %v18483_v25 = vpop.f32.mrf.mxu0  ;;  %v23641_v14 = vld [vmem:[#allocation3 + $0x68] sm:$0xff]  ;;  %v10561_v39 = vadd.f32 %v23527_v11, %v10171_v42  ;;  %v25770_v11 = vld [vmem:[#allocation24_spill] sm:$0xff]  ;;  %v9787_v8 = vadd.f32 %v25775_v6, %v25774_v60  ;;  %v25777_v20 = vld [vmem:[#allocation42_spill] sm:$0xff] }
 0x48f   : > { %11010 = vst.msk [vmem:[#allocation3 + $0x88] sm:$0xff] %vm209_vm1, %v10945_v62  ;;  %v10948_v31 = vadd.f32 %v18483_v25, %v10558_v19  ;;  %18534 = vmatprep.mubr.msk.f32.mxu1 %vm398_vm4, %v23641_v14  ;;  %18585 = vmatmul.mubr.msk.f32.gmra.mxu0 %vm398_vm4, %v23641_v14  ;;  %v10174_v19 = vadd.f32 %v25763_v28, %v9783_v40  ;;  %v25764_v62 = vld [vmem:[#allocation49_spill] sm:$0xff] }
 0x490   : > { %v10820_v55 = vpop.f32.mrf.mxu0  ;;  %18535 = vmatmul.mubr.msk.f32.gmra.mxu1 %vm398_vm4, %v23650_v7  ;;  %18587 = vmatprep.mubr.msk.f32.mxu0 %vm398_vm4, %v23650_v7  ;;  %v23676_v54 = vld [vmem:[#allocation3 + $0x80] sm:$0xff]  ;;  %v9006_v1 = vadd.f32 %v25765_v30, %v25764_v62  ;;  %v9784_v4 = vadd.f32 %v25769_v0, %v9394_v45 }
 0x491   : > { %11013 = vst.msk [vmem:[#allocation3 + $0xb0] sm:$0xff] %vm209_vm1, %v10948_v31  ;;  %v10947_v10 = vadd.f32 %v10820_v55, %v10557_v15  ;;  %v25768_v15 = vld [vmem:[#allocation88_spill] sm:$0xff]  ;;  %v23707_v55 = vpop.f32.mrf.mxu1  ;;  %v10564_v13 = vadd.f32 %v23535_v36, %v10174_v19 }
 0x492   : > { %v18486_v38 = vpop.f32.mrf.mxu0  ;;  %v23667_v34 = vld [vmem:[#allocation3 + $0x78] sm:$0xff]  ;;  %v10173_v33 = vadd.f32 %v25768_v15, %v9782_v26  ;;  %v9396_v59 = vadd.f32 %v25770_v11, %v9006_v1  ;;  %v10175_v42 = vadd.f32 %v25776_v5, %v9784_v4  ;;  %v25778_v45 = vld [vmem:[#allocation12_spill] sm:$0xff]  ;;  %v25782_v1 = vld [vmem:[#allocation37_spill] sm:$0xff] }
 0x493   : > { %11012 = vst.msk [vmem:[#allocation3 + $0xa8] sm:$0xff] %vm209_vm1, %v10947_v10  ;;  %v10950_v23 = vadd.f32 %v18486_v38, %v10560_v58  ;;  %18537 = vmatprep.mubr.msk.f32.mxu1 %vm398_vm4, %v23667_v34  ;;  %18588 = vmatmul.mubr.msk.f32.gmra.mxu0 %vm398_vm4, %v23667_v34  ;;  %v25771_v58 = vld [vmem:[#allocation89_spill] sm:$0xff]  ;;  %v23735_v48 = vpop.f32.mrf.mxu1  ;;  %v9010_v32 = vadd.f32 %v25783_v51, %v25782_v1  ;;  %v25786_v15 = vld [vmem:[#allocation27_spill] sm:$0xff]  ;;  %v25800_v51 = vld [vmem:[#allocation56_spill] sm:$0xff] }
 0x494   : > { %v10830_v24 = vpop.f32.mrf.mxu0  ;;  %18538 = vmatmul.mubr.msk.f32.gmra.mxu1 %vm398_vm4, %v23676_v54  ;;  %18590 = vmatprep.mubr.msk.f32.mxu0 %vm398_vm4, %v23676_v54  ;;  %v23704_v31 = vld [vmem:[#allocation3 + $0x90] sm:$0xff]  ;;  %v10176_v53 = vadd.f32 %v25771_v58, %v9785_v21  ;;  %v25772_v10 = vld [vmem:[#allocation29_spill] sm:$0xff]  ;;  %v10565_v4 = vadd.f32 %v23577_v37, %v10175_v42  ;;  %v25789_v58 = vld [vmem:[#allocation31_spill] sm:$0xff] }
 0x495   : > { %11015 = vst.msk [vmem:[#allocation3 + $0xc0] sm:$0xff] %vm209_vm1, %v10950_v23  ;;  %v10949_v18 = vadd.f32 %v10830_v24, %v10559_v56  ;;  %v9008_v49 = vadd.f32 %v25773_v16, %v25772_v10  ;;  %v10563_v56 = vadd.f32 %v23546_v12, %v10173_v33  ;;  %v8231_v24 = vadd.f32 %v25778_v45, %v25777_v20  ;;  %v25784_v21 = vld [vmem:[#allocation66_spill] sm:$0xff]  ;;  %v23764_v16 = vpop.f32.mrf.mxu1  ;;  %v25793_v5 = vld [vmem:[#allocation35_spill] sm:$0xff]  ;;  %v25795_v45 = vld [vmem:[#allocation41_spill] sm:$0xff] }
 0x496   : > { %v18489_v35 = vpop.f32.mrf.mxu0  ;;  %v23695_v25 = vld [vmem:[#allocation3 + $0x88] sm:$0xff]  ;;  %v10566_v19 = vadd.f32 %v23565_v44, %v10176_v53 }
 0x497   : > { %11014 = vst.msk [vmem:[#allocation3 + $0xb8] sm:$0xff] %vm209_vm1, %v10949_v18  ;;  %v10952_v17 = vadd.f32 %v18489_v35, %v10562_v46  ;;  %18540 = vmatprep.mubr.msk.f32.mxu1 %vm398_vm4, %v23695_v25  ;;  %18591 = vmatmul.mubr.msk.f32.gmra.mxu0 %vm398_vm4, %v23695_v25  ;;  %v9398_v26 = vadd.f32 %v25779_v47, %v9008_v49  ;;  %v25780_v46 = vld [vmem:[#allocation25_spill] sm:$0xff]  ;;  %v25781_v18 = vld [vmem:[#allocation92_spill] sm:$0xff] }
 0x498   : > { %v10840_v2 = vpop.f32.mrf.mxu0  ;;  %18541 = vmatmul.mubr.msk.f32.gmra.mxu1 %vm398_vm4, %v23704_v31  ;;  %18593 = vmatprep.mubr.msk.f32.mxu0 %vm398_vm4, %v23689_v3  ;;  %v23730_v23 = vld [vmem:[#allocation3 + $0xb0] sm:$0xff]  ;;  %v9786_v28 = vadd.f32 %v25780_v46, %v9396_v59  ;;  %v10178_v62 = vadd.f32 %v25781_v18, %v9787_v8  ;;  %v8621_v35 = vadd.f32 %v25784_v21, %v8231_v24  ;;  %v25791_v49 = vld [vmem:[#allocation52_spill] sm:$0xff]  ;;  %v25792_v8 = vld [vmem:[#allocation95_spill] sm:$0xff]  ;;  %v23792_v21 = vpop.f32.mrf.mxu1 }
 0x499   : > { %11017 = vst.msk [vmem:[#allocation3 + $0xd0] sm:$0xff] %vm209_vm1, %v10952_v17  ;;  %v10951_v50 = vadd.f32 %v10840_v2, %v10561_v39  ;;  %v25785_v39 = vld [vmem:[#allocation26_spill] sm:$0xff]  ;;  %v9400_v60 = vadd.f32 %v25791_v49, %v9010_v32  ;;  %v25796_v24 = vld [vmem:[#allocation51_spill] sm:$0xff] }
 0x49a   : > { %v18492_v40 = vpop.f32.mrf.mxu0  ;;  %v23721_v38 = vld [vmem:[#allocation3 + $0xa8] sm:$0xff]  ;;  %v9789_v33 = vadd.f32 %v25786_v15, %v25785_v39  ;;  %v25787_v2 = vld [vmem:[#allocation94_spill] sm:$0xff]  ;;  %v10568_v6 = vadd.f32 %v23591_v43, %v10178_v62  ;;  %v9012_v42 = vadd.f32 %v25793_v5, %v8621_v35  ;;  %v9791_v47 = vadd.f32 %v25796_v24, %v25795_v45  ;;  %v25809_v5 = vld [vmem:[#allocation15_spill] sm:$0xff]  ;;  %v10520_v45 = vpop.f32.mrf.mxu1 }
 0x49b   : > { %11016 = vst.msk [vmem:[#allocation3 + $0xc8] sm:$0xff] %vm209_vm1, %v10951_v50  ;;  %v10954_v36 = vadd.f32 %v18492_v40, %v10564_v13  ;;  %18543 = vmatprep.mubr.msk.f32.mxu1 %vm398_vm4, %v23721_v38  ;;  %18594 = vmatmul.mubr.msk.f32.gmra.mxu0 %vm398_vm4, %v23721_v38  ;;  %v10177_v44 = vadd.f32 %v25787_v2, %v9786_v28  ;;  %v25788_v13 = vld [vmem:[#allocation60_spill] sm:$0xff]  ;;  %v25790_v50 = vld [vmem:[#allocation34_spill] sm:$0xff]  ;;  %v25801_v35 = vld [vmem:[#allocation53_spill] sm:$0xff] }
 0x49c   : > { %v10850_v12 = vpop.f32.mrf.mxu0  ;;  %18544 = vmatmul.mubr.msk.f32.gmra.mxu1 %vm398_vm4, %v23730_v23  ;;  %18596 = vmatprep.mubr.msk.f32.mxu0 %vm398_vm4, %v23730_v23  ;;  %v23759_v59 = vld [vmem:[#allocation3 + $0xc0] sm:$0xff]  ;;  %v8233_v53 = vadd.f32 %v25789_v58, %v25788_v13  ;;  %v9788_v10 = vadd.f32 %v25790_v50, %v9398_v26  ;;  %v10180_v40 = vadd.f32 %v25792_v8, %v9789_v33  ;;  %v25798_v62 = vld [vmem:[#allocation62_spill] sm:$0xff]  ;;  %v25802_v33 = vld [vmem:[#allocation97_spill] sm:$0xff] }
 0x49d   : > { %11019 = vst.msk [vmem:[#allocation3 + $0xe0] sm:$0xff] %vm209_vm1, %v10954_v36  ;;  %v10953_v30 = vadd.f32 %v10850_v12, %v10563_v56  ;;  %v25794_v36 = vld [vmem:[#allocation45_spill] sm:$0xff]  ;;  %v10567_v46 = vadd.f32 %v23605_v9, %v10177_v44  ;;  %v25797_v28 = vld [vmem:[#allocation96_spill] sm:$0xff]  ;;  %v9402_v32 = vadd.f32 %v25800_v51, %v9012_v42  ;;  %v9790_v39 = vadd.f32 %v25801_v35, %v9400_v60  ;;  %v23802_v2 = vld [vmem:[#allocation3 + $0xf0] sm:$0xff] }
 0x49e   : > { %v18495_v17 = vpop.f32.mrf.mxu0  ;;  %v23750_v0 = vld [vmem:[#allocation3 + $0xb8] sm:$0xff]  ;;  %v8623_v20 = vadd.f32 %v25794_v36, %v8233_v53  ;;  %v10570_v15 = vadd.f32 %v23627_v63, %v10180_v40  ;;  %v25803_v44 = vld [vmem:[#allocation40_spill] sm:$0xff]  ;;  %v25804_v13 = vld [vmem:[#allocation61_spill] sm:$0xff] }
 0x49f   : > { %11018 = vst.msk [vmem:[#allocation3 + $0xd8] sm:$0xff] %vm209_vm1, %v10953_v30  ;;  %v10956_v11 = vadd.f32 %v18495_v17, %v10566_v19  ;;  %18546 = vmatprep.mubr.msk.f32.mxu1 %vm398_vm4, %v23750_v0  ;;  %18597 = vmatmul.mubr.msk.f32.gmra.mxu0 %vm398_vm4, %v23750_v0  ;;  %v10179_v19 = vadd.f32 %v25797_v28, %v9788_v10  ;;  %v25799_v30 = vld [vmem:[#allocation46_spill] sm:$0xff]  ;;  %v25806_v50 = vld [vmem:[#allocation55_spill] sm:$0xff]  ;;  %v25810_v36 = vld [vmem:[#allocation57_spill] sm:$0xff] }
 0x4a0   : > { %v10860_v37 = vpop.f32.mrf.mxu0  ;;  %18547 = vmatmul.mubr.msk.f32.gmra.mxu1 %vm398_vm4, %v23759_v59  ;;  %18599 = vmatprep.mubr.msk.f32.mxu0 %vm398_vm4, %v23759_v59  ;;  %v23787_v18 = vld [vmem:[#allocation3 + $0xd0] sm:$0xff]  ;;  %v8235_v1 = vadd.f32 %v25799_v30, %v25798_v62  ;;  %v10182_v17 = vadd.f32 %v25802_v33, %v9791_v47  ;;  %v25807_v63 = vld [vmem:[#allocation99_spill] sm:$0xff]  ;;  %v25811_v24 = vld [vmem:[#allocation69_spill] sm:$0xff] }
 0x4a1   : > { %11021 = vst.msk [vmem:[#allocation3 + $0x100] sm:$0xff] %vm209_vm1, %v10956_v11  ;;  %v10955_v56 = vadd.f32 %v10860_v37, %v10565_v4  ;;  %v9014_v11 = vadd.f32 %v25803_v44, %v8623_v20  ;;  %v25805_v53 = vld [vmem:[#allocation54_spill] sm:$0xff]  ;;  %v10569_v60 = vadd.f32 %v23653_v27, %v10179_v19  ;;  %v9792_v20 = vadd.f32 %v25810_v36, %v9402_v32  ;;  %v25814_v30 = vld [vmem:[#allocation47_spill] sm:$0xff]  ;;  %v25815_v51 = vld [vmem:[#allocation8_spill] sm:$0xff] }
 0x4a2   : > { %v18498_v26 = vpop.f32.mrf.mxu0  ;;  %v23778_v12 = vld [vmem:[#allocation3 + $0xc8] sm:$0xff]  ;;  %v8625_v58 = vadd.f32 %v25804_v13, %v8235_v1  ;;  %v9793_v10 = vadd.f32 %v25806_v50, %v25805_v53  ;;  %v25816_v32 = vld [vmem:[#allocation68_spill] sm:$0xff]  ;;  %v18463_v13 = vpop.f32.mrf.mxu1 }
 0x4a3   : > { %11020 = vst.msk [vmem:[#allocation3 + $0xf8] sm:$0xff] %vm209_vm1, %v10955_v56  ;;  %v10958_v43 = vadd.f32 %v18498_v26, %v10568_v6  ;;  %18549 = vmatprep.mubr.msk.f32.mxu1 %vm398_vm4, %v23778_v12  ;;  %18600 = vmatmul.mubr.msk.f32.gmra.mxu0 %vm398_vm4, %v23778_v12  ;;  %v10181_v6 = vadd.f32 %v25807_v63, %v9790_v39  ;;  %v25808_v56 = vld [vmem:[#allocation32_spill] sm:$0xff]  ;;  %v25817_v33 = vld [vmem:[#allocation101_spill] sm:$0xff]  ;;  %v25821_v63 = vld [vmem:[#allocation7_spill] sm:$0xff] }
 0x4a4   : > { %v10870_v9 = vpop.f32.mrf.mxu0  ;;  %18550 = vmatmul.mubr.msk.f32.gmra.mxu1 %vm398_vm4, %v23787_v18  ;;  %18602 = vmatprep.mubr.msk.f32.mxu0 %vm398_vm4, %v23787_v18  ;;  %v23817_v40 = vld [vmem:[#allocation3 + $0xe0] sm:$0xff]  ;;  %v8237_v42 = vadd.f32 %v25809_v5, %v25808_v56  ;;  %v9404_v47 = vadd.f32 %v25811_v24, %v9014_v11  ;;  %v10572_v26 = vadd.f32 %v23679_v29, %v10182_v17  ;;  %v25818_v44 = vld [vmem:[#allocation73_spill] sm:$0xff] }
 0x4a5   : > { %11023 = vst.msk [vmem:[#allocation3 + $0x110] sm:$0xff] %vm209_vm1, %v10958_v43  ;;  %v10957_v4 = vadd.f32 %v10870_v9, %v10567_v46  ;;  %v25812_v46 = vld [vmem:[#allocation100_spill] sm:$0xff]  ;;  %v25813_v43 = vld [vmem:[#allocation50_spill] sm:$0xff]  ;;  %v9795_v9 = vadd.f32 %v25816_v32, %v25815_v51  ;;  %v25828_v32 = vld [vmem:[#allocation75_spill] sm:$0xff] }
 0x4a6   : > { %v18501_v37 = vpop.f32.mrf.mxu0  ;;  %v23808_v49 = vld [vmem:[#allocation3 + $0xd8] sm:$0xff]  ;;  %v10184_v28 = vadd.f32 %v25812_v46, %v9793_v10  ;;  %v9016_v62 = vadd.f32 %v25813_v43, %v8625_v58  ;;  %v8627_v1 = vadd.f32 %v25814_v30, %v8237_v42  ;;  %v25820_v10 = vld [vmem:[#allocation102_spill] sm:$0xff]  ;;  %v25823_v56 = vld [vmem:[#allocation72_spill] sm:$0xff] }
 0x4a7   : > { %11022 = vst.msk [vmem:[#allocation3 + $0x108] sm:$0xff] %vm209_vm1, %v10957_v4  ;;  %v10960_v8 = vadd.f32 %v18501_v37, %v10570_v15  ;;  %18552 = vmatprep.mubr.msk.f32.mxu1 %vm398_vm4, %v23808_v49  ;;  %18603 = vmatmul.mubr.msk.f32.gmra.mxu0 %vm398_vm4, %v23808_v49  ;;  %v10571_v15 = vadd.f32 %v23707_v55, %v10181_v6  ;;  %v25819_v55 = vld [vmem:[#allocation70_spill] sm:$0xff]  ;;  %v25827_v30 = vld [vmem:[#allocation104_spill] sm:$0xff] }
 0x4a8   : > { %v10880_v27 = vpop.f32.mrf.mxu0  ;;  %18553 = vmatmul.mubr.msk.f32.gmra.mxu1 %vm398_vm4, %v23817_v40  ;;  %18605 = vmatprep.mubr.msk.f32.mxu0 %vm398_vm4, %v23802_v2  ;;  %v10183_v4 = vadd.f32 %v25817_v33, %v9792_v20  ;;  %v23843_v17 = vld [vmem:[#allocation3 + $0x100] sm:$0xff]  ;;  %v9406_v11 = vadd.f32 %v25818_v44, %v9016_v62  ;;  %v9794_v53 = vadd.f32 %v25819_v55, %v9404_v47 }
 0x4a9   : > { %11025 = vst.msk [vmem:[#allocation3 + $0x120] sm:$0xff] %vm209_vm1, %v10960_v8  ;;  %v10959_v19 = vadd.f32 %v10880_v27, %v10569_v60  ;;  %v10574_v50 = vadd.f32 %v23735_v48, %v10184_v28  ;;  %v10186_v37 = vadd.f32 %v25820_v10, %v9795_v9  ;;  %v9018_v6 = vadd.f32 %v25821_v63, %v8627_v1  ;;  %v25822_v8 = vld [vmem:[#allocation71_spill] sm:$0xff]  ;;  %v10530_v28 = vpop.f32.mrf.mxu1  ;;  %v25829_v9 = vld [vmem:[#allocation76_spill] sm:$0xff] }
 0x4aa   : > { %v18504_v35 = vpop.f32.mrf.mxu0  ;;  %v23834_v39 = vld [vmem:[#allocation3 + $0xf8] sm:$0xff]  ;;  %v9797_v5 = vadd.f32 %v25823_v56, %v25822_v8  ;;  %v10573_v20 = vadd.f32 %v23764_v16, %v10183_v4  ;;  %v25826_v16 = vld [vmem:[#allocation77_spill] sm:$0xff] }
 0x4ab   : > { %11024 = vst.msk [vmem:[#allocation3 + $0x118] sm:$0xff] %vm209_vm1, %v10959_v19  ;;  %v10962_v29 = vadd.f32 %v18504_v35, %v10572_v26  ;;  %18555 = vmatprep.mubr.msk.f32.mxu1 %vm398_vm4, %v23834_v39  ;;  %18606 = vmatmul.mubr.msk.f32.gmra.mxu0 %vm398_vm4, %v23834_v39  ;;  %v25824_v27 = vld [vmem:[#allocation103_spill] sm:$0xff]  ;;  %v25825_v26 = vld [vmem:[#allocation74_spill] sm:$0xff]  ;;  %v9408_v43 = vadd.f32 %v25826_v16, %v9018_v6  ;;  %v25834_v16 = vld [vmem:[#allocation44_spill] sm:$0xff] }
 0x4ac   : > { %v10890_v58 = vpop.f32.mrf.mxu0  ;;  %18556 = vmatmul.mubr.msk.f32.gmra.mxu1 %vm398_vm4, %v23843_v17  ;;  %18608 = vmatprep.mubr.msk.f32.mxu0 %vm398_vm4, %v23843_v17  ;;  %v10185_v24 = vadd.f32 %v25824_v27, %v9794_v53  ;;  %v23866_v47 = vld [vmem:[#allocation3 + $0x110] sm:$0xff]  ;;  %v9796_v46 = vadd.f32 %v25825_v26, %v9406_v11  ;;  %v10576_v62 = vadd.f32 %v23792_v21, %v10186_v37 }
 0x4ad   : > { %11027 = vst.msk [vmem:[#allocation3 + $0x130] sm:$0xff] %vm209_vm1, %v10962_v29  ;;  %v10961_v60 = vadd.f32 %v10890_v58, %v10571_v15  ;;  %v10188_v1 = vadd.f32 %v25827_v30, %v9797_v5  ;;  %v9799_v35 = vadd.f32 %v25829_v9, %v25828_v32  ;;  %v25830_v29 = vld [vmem:[#allocation105_spill] sm:$0xff]  ;;  %v18466_v58 = vpop.f32.mrf.mxu1  ;;  %v25833_v27 = vld [vmem:[#allocation58_spill] sm:$0xff] }
 0x4ae   : > { %v18507_v42 = vpop.f32.mrf.mxu0  ;;  %v23857_v36 = vld [vmem:[#allocation3 + $0x108] sm:$0xff]  ;;  %v10575_v4 = vadd.f32 %v10520_v45, %v10185_v24  ;;  %v10187_v44 = vadd.f32 %v25830_v29, %v9796_v46  ;;  %v25831_v45 = vld [vmem:[#allocation78_spill] sm:$0xff] }
 0x4af   : > { %11026 = vst.msk [vmem:[#allocation3 + $0x128] sm:$0xff] %vm209_vm1, %v10961_v60  ;;  %v10964_v48 = vadd.f32 %v18507_v42, %v10574_v50  ;;  %18558 = vmatprep.mubr.msk.f32.mxu1 %vm398_vm4, %v23857_v36  ;;  %18609 = vmatmul.mubr.msk.f32.gmra.mxu0 %vm398_vm4, %v23857_v36  ;;  %v9798_v53 = vadd.f32 %v25831_v45, %v9408_v43  ;;  %v25832_v42 = vld [vmem:[#allocation5_spill] sm:$0xff]  ;;  %v23928_v43 = vld [vmem:[%s25184_s2 + $0x38] sm:$0xff] }
 0x4b0   : > { %v10900_v19 = vpop.f32.mrf.mxu0  ;;  %18559 = vmatmul.mubr.msk.f32.gmra.mxu1 %vm398_vm4, %v23866_v47  ;;  %18611 = vmatprep.mubr.msk.f32.mxu0 %vm398_vm4, %v23866_v47  ;;  %v23887_v21 = vld [vmem:[#allocation3 + $0x120] sm:$0xff]  ;;  %v10578_v50 = vadd.f32 %v18463_v13, %v10188_v1  ;;  %v10190_v10 = vadd.f32 %v23560_v57, %v9799_v35  ;;  %v10577_v6 = vadd.f32 %v10530_v28, %v10187_v44  ;;  %v10540_v57 = vpop.f32.mrf.mxu1  ;;  %v23919_v28 = vld [vmem:[%s25184_s2 + $0x30] sm:$0xff]  ;;  %v25835_v1 = vld [vmem:[#allocation79_spill] sm:$0xff] }
 0x4b1   : > { %11029 = vst.msk [vmem:[#allocation3 + $0x150] sm:$0xff] %vm209_vm1, %v10964_v48  ;;  %v10963_v51 = vadd.f32 %v10900_v19, %v10573_v20  ;;  %v10189_v8 = vadd.f32 %v23567_v52, %v9798_v53  ;;  %v25838_v29 = vld [vmem:[#allocation65_spill] sm:$0xff]  ;;  %v25840_v53 = vld [vmem:[#allocation4_spill] sm:$0xff] }
 0x4b2   : > { %v18510_v15 = vpop.f32.mrf.mxu0  ;;  %v23879_v33 = vld [vmem:[#allocation3 + $0x118] sm:$0xff]  ;;  %v10580_v52 = vadd.f32 %v18466_v58, %v10190_v10 }
 0x4b3   : > { %11028 = vst.msk [vmem:[#allocation3 + $0x148] sm:$0xff] %vm209_vm1, %v10963_v51  ;;  %v10966_v11 = vadd.f32 %v18510_v15, %v10576_v62  ;;  %18561 = vmatprep.mubr.msk.f32.mxu1 %vm398_vm4, %v23879_v33  ;;  %18612 = vmatmul.mubr.msk.f32.gmra.mxu0 %vm398_vm4, %v23879_v33  ;;  %v10579_v26 = vadd.f32 %v10540_v57, %v10189_v8  ;;  %v25836_v51 = vld [vmem:[#allocation63_spill] sm:$0xff] }
 0x4b4   : > { %v10910_v55 = vpop.f32.mrf.mxu0  ;;  %18562 = vmatmul.mubr.msk.f32.gmra.mxu1 %vm398_vm4, %v23887_v21  ;;  %18614 = vmatprep.mubr.msk.f32.mxu0 %vm398_vm4, %v23887_v21  ;;  %v23904_v13 = vld [vmem:[#allocation3 + $0x130] sm:$0xff]  ;;  %v25837_v15 = vld [vmem:[#allocation43_spill] sm:$0xff] }
 0x4b5   : > { %11031 = vst.msk [vmem:[#allocation3 + $0x160] sm:$0xff] %vm209_vm1, %v10966_v11  ;;  %v10965_v37 = vadd.f32 %v10910_v55, %v10575_v4  ;;  %v25839_v55 = vld [vmem:[#allocation67_spill] sm:$0xff] }
 0x4b6   : > { %v18513_v60 = vpop.f32.mrf.mxu0  ;;  %v23896_v63 = vld [vmem:[#allocation3 + $0x128] sm:$0xff] }
 0x4b7   : > { %11030 = vst.msk [vmem:[#allocation3 + $0x158] sm:$0xff] %vm209_vm1, %v10965_v37  ;;  %v10968_v56 = vadd.f32 %v18513_v60, %v10578_v50  ;;  %18564 = vmatprep.mubr.msk.f32.mxu1 %vm398_vm4, %v23896_v63  ;;  %18615 = vmatmul.mubr.msk.f32.gmra.mxu0 %vm398_vm4, %v23896_v63  ;;  %v11754_v50 = vld [vmem:[#allocation3 + $0x48] sm:$0xff] }
 0x4b8   : > { %v10920_v5 = vpop.f32.mrf.mxu0  ;;  %18565 = vmatmul.mubr.msk.f32.gmra.mxu1 %vm398_vm4, %v23904_v13  ;;  %18669 = vmatprep.mubr.msk.f32.mxu0 %vm398_vm4, %v25832_v42  ;;  %v18521_v48 = vpop.f32.mrf.mxu1  ;;  %v24039_v42 = vld [vmem:[#allocation3 + $0xe8] sm:$0xff] }
 0x4b9   : > { %11033 = vst.msk [vmem:[#allocation3 + $0x170] sm:$0xff] %vm209_vm1, %v10968_v56  ;;  %v10967_v20 = vadd.f32 %v10920_v5, %v10577_v6  ;;  %18619 = vmatprep.mubr.msk.f32.mxu1 %vm398_vm4, %v25833_v27  ;;  %v24005_v5 = vld [vmem:[#allocation3 + $0x98] sm:$0xff]  ;;  %v24055_v27 = vld [vmem:[#allocation3 + $0x150] sm:$0xff] }
 0x4ba   : > { %v18516_v24 = vpop.f32.mrf.mxu0  ;;  %v23930_v62 = vpop.f32.mrf.mxu1 }
 0x4bb   : > { %11032 = vst.msk [vmem:[#allocation3 + $0x168] sm:$0xff] %vm209_vm1, %v10967_v20  ;;  %v10970_v46 = vadd.f32 %v18516_v24, %v10580_v52  ;;  %18670 = vmatmul.mubr.msk.f32.vlgmr.msra.gmra.mxu0 %vm398_vm4, %v23615_v41  ;;  %v24041_v52 = vld [vmem:[#allocation3 + $0x140] sm:$0xff]  ;;  %v24051_v20 = vld [vmem:[#allocation3 + $0x148] sm:$0xff] }
 0x4bc   : > { %v10930_v19 = vpop.f32.mrf.mxu0  ;;  %18620 = vmatmul.mubr.msk.f32.vlgmr.msra.gmra.mxu1 %vm398_vm4, %v25834_v16  ;;  %18672 = vmatprep.mubr.msk.f32.mxu0 %vm398_vm4, %v23624_v22  ;;  %v18524_v9 = vpop.f32.mrf.mxu1 }
 0x4bd   : > { %11035 = vst.msk [vmem:[#allocation3 + $0x180] sm:$0xff] %vm209_vm1, %v10970_v46  ;;  %v10969_v30 = vadd.f32 %v10930_v19, %v10579_v26  ;;  %18718 = vmatpush3.msra.mxu1 %v25835_v1  ;;  %18622 = vmatprep.mubr.msk.f32.mxu1 %vm398_vm4, %v25836_v51  ;;  %v24087_v19 = vld [vmem:[#allocation3 + $0x138] sm:$0xff] }
 0x4be   : > { %18768 = vmatpush3.msra.mxu0 %v23553_v61  ;;  %18817 = vmatprep.subr.mxu1 %v23919_v28  ;;  %v23950_v4 = vpop.f32.mrf.mxu1  ;;  %v24063_v24 = vld [vmem:[#allocation3 + $0x158] sm:$0xff] }
 0x4bf   : > { %v18571_v32 = vpop.f32.mrf.mxu0  ;;  %11034 = vst.msk [vmem:[#allocation3 + $0x178] sm:$0xff] %vm209_vm1, %v10969_v30  ;;  %18673 = vmatmul.mubr.msk.f32.gmra.mxu0 %vm398_vm4, %v23641_v14  ;;  %18867 = vmatprep.subr.mxu0 %v23928_v43  ;;  %v24104_v30 = vld [vmem:[%s25184_s2 + $0x40] sm:$0xff] }
 0x4c0   : > { %v23942_v35 = vadd.f32 %v18571_v32, %v18521_v48  ;;  %18623 = vmatmul.mubr.msk.f32.gmra.mxu1 %vm398_vm4, %v25837_v15  ;;  %18675 = vmatprep.mubr.msk.f32.mxu0 %vm398_vm4, %v23650_v7  ;;  %v18527_v11 = vpop.f32.mrf.mxu1  ;;  %v24067_v48 = vld [vmem:[#allocation3 + $0x160] sm:$0xff]  ;;  %v24079_v46 = vld [vmem:[#allocation3 + $0x170] sm:$0xff] }
 0x4c1   : > { %v23948_v61 = vpop.f32.mrf.mxu0  ;;  %18625 = vmatprep.mubr.msk.f32.mxu1 %vm398_vm4, %v25838_v29 }
 0x4c2   : > { %v23966_v37 = vpop.f32.mrf.mxu1  ;;  %v24075_v26 = vld [vmem:[#allocation3 + $0x168] sm:$0xff] }
 0x4c3   : > { %v18574_v44 = vpop.f32.mrf.mxu0  ;;  %18676 = vmatmul.mubr.msk.f32.gmra.mxu0 %vm398_vm4, %v23667_v34 }
 0x4c4   : > { %v23956_v58 = vadd.f32 %v18574_v44, %v18524_v9  ;;  %18626 = vmatmul.mubr.msk.f32.gmra.mxu1 %vm398_vm4, %v25839_v55  ;;  %18678 = vmatprep.mubr.msk.f32.mxu0 %vm398_vm4, %v23676_v54  ;;  %v18530_v8 = vpop.f32.mrf.mxu1 }
 0x4c5   : > { %v23962_v45 = vpop.f32.mrf.mxu0  ;;  %18628 = vmatprep.mubr.msk.f32.mxu1 %vm398_vm4, %v25840_v53 }
 0x4c6   : > { %v24089_v16 = vld [vmem:[#allocation3 + $0x178] sm:$0xff] }
 0x4c7   : > { %v18577_v10 = vpop.f32.mrf.mxu0  ;;  %18679 = vmatmul.mubr.msk.f32.gmra.mxu0 %vm398_vm4, %v23695_v25 }
 0x4c8   : > { %v23970_v60 = vadd.f32 %v18577_v10, %v18527_v11  ;;  %18629 = vmatmul.mubr.msk.f32.gmra.mxu1 %vm398_vm4, %v11754_v50  ;;  %18681 = vmatprep.mubr.msk.f32.mxu0 %vm398_vm4, %v23689_v3 }
 0x4c9   : > { %v23975_v6 = vpop.f32.mrf.mxu0  ;;  %18631 = vmatprep.mubr.msk.f32.mxu1 %vm398_vm4, %v23624_v22 }
 0x4cb   : > { %v18580_v56 = vpop.f32.mrf.mxu0  ;;  %18682 = vmatmul.mubr.msk.f32.gmra.mxu0 %vm398_vm4, %v23721_v38 }
 0x4cc   : > { %v23981_v57 = vadd.f32 %v18580_v56, %v18530_v8  ;;  %18632 = vmatmul.mubr.msk.f32.gmra.mxu1 %vm398_vm4, %v23641_v14  ;;  %18684 = vmatprep.mubr.msk.f32.mxu0 %vm398_vm4, %v23730_v23 }
 0x4cd   : > { %18634 = vmatprep.mubr.msk.f32.mxu1 %vm398_vm4, %v23650_v7 }
 0x4cf   : > { %18685 = vmatmul.mubr.msk.f32.gmra.mxu0 %vm398_vm4, %v23750_v0 }
 0x4d0   : > { %18635 = vmatmul.mubr.msk.f32.gmra.mxu1 %vm398_vm4, %v23667_v34  ;;  %18687 = vmatprep.mubr.msk.f32.mxu0 %vm398_vm4, %v23759_v59 }
 0x4d1   : > { %18637 = vmatprep.mubr.msk.f32.mxu1 %vm398_vm4, %v23676_v54 }
 0x4d3   : > { %18688 = vmatmul.mubr.msk.f32.gmra.mxu0 %vm398_vm4, %v23778_v12 }
 0x4d4   : > { %18638 = vmatmul.mubr.msk.f32.gmra.mxu1 %vm398_vm4, %v23695_v25  ;;  %18690 = vmatprep.mubr.msk.f32.mxu0 %vm398_vm4, %v23787_v18 }
 0x4d5   : > { %18640 = vmatprep.mubr.msk.f32.mxu1 %vm398_vm4, %v23704_v31 }
 0x4d7   : > { %18691 = vmatmul.mubr.msk.f32.gmra.mxu0 %vm398_vm4, %v23808_v49 }
 0x4d8   : > { %18641 = vmatmul.mubr.msk.f32.gmra.mxu1 %vm398_vm4, %v24005_v5  ;;  %18693 = vmatprep.mubr.msk.f32.mxu0 %vm398_vm4, %v23802_v2 }
 0x4d9   : > { %18643 = vmatprep.mubr.msk.f32.mxu1 %vm398_vm4, %v23730_v23 }
 0x4db   : > { %18694 = vmatmul.mubr.msk.f32.gmra.mxu0 %vm398_vm4, %v23834_v39 }
 0x4dc   : > { %18644 = vmatmul.mubr.msk.f32.gmra.mxu1 %vm398_vm4, %v23750_v0  ;;  %18696 = vmatprep.mubr.msk.f32.mxu0 %vm398_vm4, %v23843_v17 }
 0x4dd   : > { %18646 = vmatprep.mubr.msk.f32.mxu1 %vm398_vm4, %v23759_v59 }
 0x4df   : > { %18697 = vmatmul.mubr.msk.f32.gmra.mxu0 %vm398_vm4, %v23857_v36 }
 0x4e0   : > { %18647 = vmatmul.mubr.msk.f32.gmra.mxu1 %vm398_vm4, %v23778_v12  ;;  %18699 = vmatprep.mubr.msk.f32.mxu0 %vm398_vm4, %v23866_v47 }
 0x4e1   : > { %18649 = vmatprep.mubr.msk.f32.mxu1 %vm398_vm4, %v23787_v18 }
 0x4e3   : > { %18700 = vmatmul.mubr.msk.f32.gmra.mxu0 %vm398_vm4, %v23879_v33 }
 0x4e4   : > { %18650 = vmatmul.mubr.msk.f32.gmra.mxu1 %vm398_vm4, %v23808_v49  ;;  %18702 = vmatprep.mubr.msk.f32.mxu0 %vm398_vm4, %v23887_v21 }
 0x4e5   : > { %18652 = vmatprep.mubr.msk.f32.mxu1 %vm398_vm4, %v23817_v40 }
 0x4e7   : > { %18703 = vmatmul.mubr.msk.f32.gmra.mxu0 %vm398_vm4, %v23896_v63 }
 0x4e8   : > { %18653 = vmatmul.mubr.msk.f32.gmra.mxu1 %vm398_vm4, %v24039_v42  ;;  %18705 = vmatprep.mubr.msk.f32.mxu0 %vm398_vm4, %v24041_v52 }
 0x4e9   : > { %18655 = vmatprep.mubr.msk.f32.mxu1 %vm398_vm4, %v23843_v17 }
 0x4eb   : > { %18706 = vmatmul.mubr.msk.f32.gmra.mxu0 %vm398_vm4, %v24051_v20 }
 0x4ec   : > { %18656 = vmatmul.mubr.msk.f32.gmra.mxu1 %vm398_vm4, %v23857_v36  ;;  %18708 = vmatprep.mubr.msk.f32.mxu0 %vm398_vm4, %v24055_v27 }
 0x4ed   : > { %18658 = vmatprep.mubr.msk.f32.mxu1 %vm398_vm4, %v23866_v47 }
 0x4ef   : > { %18709 = vmatmul.mubr.msk.f32.gmra.mxu0 %vm398_vm4, %v24063_v24 }
 0x4f0   : > { %18659 = vmatmul.mubr.msk.f32.gmra.mxu1 %vm398_vm4, %v23879_v33  ;;  %18711 = vmatprep.mubr.msk.f32.mxu0 %vm398_vm4, %v24067_v48 }
 0x4f1   : > { %18661 = vmatprep.mubr.msk.f32.mxu1 %vm398_vm4, %v23887_v21 }
 0x4f3   : > { %18712 = vmatmul.mubr.msk.f32.gmra.mxu0 %vm398_vm4, %v24075_v26 }
 0x4f4   : > { %18662 = vmatmul.mubr.msk.f32.gmra.mxu1 %vm398_vm4, %v23896_v63  ;;  %18714 = vmatprep.mubr.msk.f32.mxu0 %vm398_vm4, %v24079_v46 }
 0x4f5   : > { %18664 = vmatprep.mubr.msk.f32.mxu1 %vm398_vm4, %v23904_v13 }
 0x4f7   : > { %18715 = vmatmul.mubr.msk.f32.gmra.mxu0 %vm398_vm4, %v24089_v16 }
 0x4f8   : > { %18665 = vmatmul.mubr.msk.f32.gmra.mxu1 %vm398_vm4, %v24087_v19  ;;  %18769 = vmatprep.mubr.msk.f32.mxu0 %vm398_vm4, %v23624_v22 }
 0x4f9   : > { %18719 = vmatprep.mubr.msk.f32.mxu1 %vm398_vm4, %v23615_v41  ;;  %v24221_v41 = vld [vmem:[#allocation3 + $0x180] sm:$0xff] }
 0x4fb   : > { %18770 = vmatmul.mubr.msk.f32.vlgmr.msra.gmra.mxu0 %vm398_vm4, %v23641_v14 }
 0x4fc   : > { %18720 = vmatmul.mubr.msk.f32.vlgmr.msra.gmra.mxu1 %vm398_vm4, %v23624_v22  ;;  %18772 = vmatprep.mubr.msk.f32.mxu0 %vm398_vm4, %v23650_v7  ;;  %v24227_v22 = vld [vmem:[#allocation3 + $0x188] sm:$0xff] }
 0x4fd   : > { %18818 = vmatpush3.msra.mxu1 %v23919_v28  ;;  %18722 = vmatprep.mubr.msk.f32.mxu1 %vm398_vm4, %v23641_v14  ;;  %v24266_v14 = vpop.f32.mrf.mxu0 }
 0x4fe   : > { %18868 = vmatpush3.msra.mxu0 %v23928_v43  ;;  %18917 = vmatprep.subr.mxu1 %v24104_v30 }
 0x4ff   : > { %18773 = vmatmul.mubr.msk.f32.gmra.mxu0 %vm398_vm4, %v23667_v34 }
 0x500   : > { %18723 = vmatmul.mubr.msk.f32.gmra.mxu1 %vm398_vm4, %v23650_v7  ;;  %18775 = vmatprep.mubr.msk.f32.mxu0 %vm398_vm4, %v23676_v54  ;;  %v24274_v7 = vpop.f32.mrf.mxu1 }
 0x501   : > { %18725 = vmatprep.mubr.msk.f32.mxu1 %vm398_vm4, %v23667_v34 }
 0x503   : > { %18776 = vmatmul.mubr.msk.f32.gmra.mxu0 %vm398_vm4, %v23695_v25 }
 0x504   : > { %18726 = vmatmul.mubr.msk.f32.gmra.mxu1 %vm398_vm4, %v23676_v54  ;;  %18778 = vmatprep.mubr.msk.f32.mxu0 %vm398_vm4, %v23704_v31 }
 0x505   : > { %18728 = vmatprep.mubr.msk.f32.mxu1 %vm398_vm4, %v23695_v25 }
 0x507   : > { %18779 = vmatmul.mubr.msk.f32.gmra.mxu0 %vm398_vm4, %v24005_v5 }
 0x508   : > { %18729 = vmatmul.mubr.msk.f32.gmra.mxu1 %vm398_vm4, %v23704_v31  ;;  %18781 = vmatprep.mubr.msk.f32.mxu0 %vm398_vm4, %v23730_v23 }
 0x509   : > { %18731 = vmatprep.mubr.msk.f32.mxu1 %vm398_vm4, %v23721_v38 }
 0x50b   : > { %18782 = vmatmul.mubr.msk.f32.gmra.mxu0 %vm398_vm4, %v23750_v0 }
 0x50c   : > { %18732 = vmatmul.mubr.msk.f32.gmra.mxu1 %vm398_vm4, %v23730_v23  ;;  %18784 = vmatprep.mubr.msk.f32.mxu0 %vm398_vm4, %v23759_v59 }
 0x50d   : > { %18734 = vmatprep.mubr.msk.f32.mxu1 %vm398_vm4, %v23750_v0 }
 0x50f   : > { %18785 = vmatmul.mubr.msk.f32.gmra.mxu0 %vm398_vm4, %v23778_v12 }
 0x510   : > { %18735 = vmatmul.mubr.msk.f32.gmra.mxu1 %vm398_vm4, %v23759_v59  ;;  %18787 = vmatprep.mubr.msk.f32.mxu0 %vm398_vm4, %v23787_v18 }
 0x511   : > { %18737 = vmatprep.mubr.msk.f32.mxu1 %vm398_vm4, %v23778_v12 }
 0x513   : > { %18788 = vmatmul.mubr.msk.f32.gmra.mxu0 %vm398_vm4, %v23808_v49 }
 0x514   : > { %18738 = vmatmul.mubr.msk.f32.gmra.mxu1 %vm398_vm4, %v23787_v18  ;;  %18790 = vmatprep.mubr.msk.f32.mxu0 %vm398_vm4, %v23817_v40 }
 0x515   : > { %18740 = vmatprep.mubr.msk.f32.mxu1 %vm398_vm4, %v23808_v49 }
 0x517   : > { %18791 = vmatmul.mubr.msk.f32.gmra.mxu0 %vm398_vm4, %v24039_v42 }
 0x518   : > { %18741 = vmatmul.mubr.msk.f32.gmra.mxu1 %vm398_vm4, %v23817_v40  ;;  %18793 = vmatprep.mubr.msk.f32.mxu0 %vm398_vm4, %v23843_v17 }
 0x519   : > { %18743 = vmatprep.mubr.msk.f32.mxu1 %vm398_vm4, %v23834_v39 }
 0x51b   : > { %18794 = vmatmul.mubr.msk.f32.gmra.mxu0 %vm398_vm4, %v23857_v36 }
 0x51c   : > { %18744 = vmatmul.mubr.msk.f32.gmra.mxu1 %vm398_vm4, %v23843_v17  ;;  %18796 = vmatprep.mubr.msk.f32.mxu0 %vm398_vm4, %v23866_v47 }
 0x51d   : > { %18746 = vmatprep.mubr.msk.f32.mxu1 %vm398_vm4, %v23857_v36 }
 0x51f   : > { %18797 = vmatmul.mubr.msk.f32.gmra.mxu0 %vm398_vm4, %v23879_v33 }
 0x520   : > { %18747 = vmatmul.mubr.msk.f32.gmra.mxu1 %vm398_vm4, %v23866_v47  ;;  %18799 = vmatprep.mubr.msk.f32.mxu0 %vm398_vm4, %v23887_v21 }
 0x521   : > { %18749 = vmatprep.mubr.msk.f32.mxu1 %vm398_vm4, %v23879_v33 }
 0x523   : > { %18800 = vmatmul.mubr.msk.f32.gmra.mxu0 %vm398_vm4, %v23896_v63 }
 0x524   : > { %18750 = vmatmul.mubr.msk.f32.gmra.mxu1 %vm398_vm4, %v23887_v21  ;;  %18802 = vmatprep.mubr.msk.f32.mxu0 %vm398_vm4, %v23904_v13 }
 0x525   : > { %18752 = vmatprep.mubr.msk.f32.mxu1 %vm398_vm4, %v23896_v63 }
 0x527   : > { %18803 = vmatmul.mubr.msk.f32.gmra.mxu0 %vm398_vm4, %v24087_v19 }
 0x528   : > { %18753 = vmatmul.mubr.msk.f32.gmra.mxu1 %vm398_vm4, %v23904_v13  ;;  %18805 = vmatprep.mubr.msk.f32.mxu0 %vm398_vm4, %v24055_v27 }
 0x529   : > { %18755 = vmatprep.mubr.msk.f32.mxu1 %vm398_vm4, %v24051_v20 }
 0x52b   : > { %18806 = vmatmul.mubr.msk.f32.gmra.mxu0 %vm398_vm4, %v24063_v24 }
 0x52c   : > { %18756 = vmatmul.mubr.msk.f32.gmra.mxu1 %vm398_vm4, %v24055_v27  ;;  %18808 = vmatprep.mubr.msk.f32.mxu0 %vm398_vm4, %v24067_v48 }
 0x52d   : > { %18758 = vmatprep.mubr.msk.f32.mxu1 %vm398_vm4, %v24063_v24 }
 0x52f   : > { %18809 = vmatmul.mubr.msk.f32.gmra.mxu0 %vm398_vm4, %v24075_v26 }
 0x530   : > { %18759 = vmatmul.mubr.msk.f32.gmra.mxu1 %vm398_vm4, %v24067_v48  ;;  %18811 = vmatprep.mubr.msk.f32.mxu0 %vm398_vm4, %v24079_v46 }
 0x531   : > { %18761 = vmatprep.mubr.msk.f32.mxu1 %vm398_vm4, %v24075_v26 }
 0x533   : > { %18812 = vmatmul.mubr.msk.f32.gmra.mxu0 %vm398_vm4, %v24089_v16 }
 0x534   : > { %18762 = vmatmul.mubr.msk.f32.gmra.mxu1 %vm398_vm4, %v24079_v46  ;;  %18814 = vmatprep.mubr.msk.f32.mxu0 %vm398_vm4, %v24221_v41 }
 0x535   : > { %18764 = vmatprep.mubr.msk.f32.mxu1 %vm398_vm4, %v24089_v16 }
 0x537   : > { %18815 = vmatmul.mubr.msk.f32.gmra.mxu0 %vm398_vm4, %v24227_v22 }
 0x538   : > { %18765 = vmatmul.mubr.msk.f32.gmra.mxu1 %vm398_vm4, %v24221_v41  ;;  %18869 = vmatprep.mubr.msk.f32.mxu0 %vm398_vm4, %v23721_v38 }
 0x539   : > { %18819 = vmatprep.mubr.msk.f32.mxu1 %vm398_vm4, %v23689_v3 }
 0x53b   : > { %18870 = vmatmul.mubr.msk.f32.vlgmr.msra.gmra.mxu0 %vm398_vm4, %v23730_v23 }
 0x53c   : > { %18820 = vmatmul.mubr.msk.f32.vlgmr.msra.gmra.mxu1 %vm398_vm4, %v23721_v38  ;;  %18872 = vmatprep.mubr.msk.f32.mxu0 %vm398_vm4, %v23750_v0 }
 0x53d   : > { %18918 = vmatpush3.msra.mxu1 %v24104_v30  ;;  %18822 = vmatprep.mubr.msk.f32.mxu1 %vm398_vm4, %v23730_v23 }
 0x53f   : > { %18873 = vmatmul.mubr.msk.f32.gmra.mxu0 %vm398_vm4, %v23759_v59 }
 0x540   : > { %18823 = vmatmul.mubr.msk.f32.gmra.mxu1 %vm398_vm4, %v23750_v0  ;;  %18875 = vmatprep.mubr.msk.f32.mxu0 %vm398_vm4, %v23778_v12 }
 0x541   : > { %18825 = vmatprep.mubr.msk.f32.mxu1 %vm398_vm4, %v23759_v59 }
 0x543   : > { %18876 = vmatmul.mubr.msk.f32.gmra.mxu0 %vm398_vm4, %v23787_v18 }
 0x544   : > { %18826 = vmatmul.mubr.msk.f32.gmra.mxu1 %vm398_vm4, %v23778_v12  ;;  %18878 = vmatprep.mubr.msk.f32.mxu0 %vm398_vm4, %v23808_v49 }
 0x545   : > { %18828 = vmatprep.mubr.msk.f32.mxu1 %vm398_vm4, %v23787_v18 }
 0x547   : > { %18879 = vmatmul.mubr.msk.f32.gmra.mxu0 %vm398_vm4, %v23817_v40 }
 0x548   : > { %18829 = vmatmul.mubr.msk.f32.gmra.mxu1 %vm398_vm4, %v23808_v49  ;;  %18881 = vmatprep.mubr.msk.f32.mxu0 %vm398_vm4, %v23834_v39 }
 0x549   : > { %18831 = vmatprep.mubr.msk.f32.mxu1 %vm398_vm4, %v23802_v2 }
 0x54b   : > { %v18583_v34 = vpop.f32.mrf.mxu0  ;;  %18882 = vmatmul.mubr.msk.f32.gmra.mxu0 %vm398_vm4, %v23843_v17 }
 0x54c   : > { %v18533_v54 = vpop.f32.mrf.mxu1  ;;  %18832 = vmatmul.mubr.msk.f32.gmra.mxu1 %vm398_vm4, %v23834_v39  ;;  %18884 = vmatprep.mubr.msk.f32.mxu0 %vm398_vm4, %v23857_v36 }
 0x54d   : > { %v24282_v3 = vadd.f32 %v18583_v34, %v18533_v54  ;;  %v11627_v25 = vpop.f32.mrf.mxu0  ;;  %18834 = vmatprep.mubr.msk.f32.mxu1 %vm398_vm4, %v23843_v17  ;;  %v13322_v34 = vld [vmem:[#allocation3 + $0x190] sm:$0xff] }
 0x54e   : > { %v11306_v31 = vpop.f32.mrf.mxu1 }
 0x54f   : > { %v24286_v38 = vadd.f32 %v11627_v25, %v11306_v31  ;;  %v18586_v23 = vpop.f32.mrf.mxu0  ;;  %18885 = vmatmul.mubr.msk.f32.gmra.mxu0 %vm398_vm4, %v23866_v47 }
 0x550   : > { %v18536_v0 = vpop.f32.mrf.mxu1  ;;  %18835 = vmatmul.mubr.msk.f32.gmra.mxu1 %vm398_vm4, %v23857_v36  ;;  %18887 = vmatprep.mubr.msk.f32.mxu0 %vm398_vm4, %v23879_v33 }
 0x551   : > { %v24294_v59 = vadd.f32 %v18586_v23, %v18536_v0  ;;  %v11637_v12 = vpop.f32.mrf.mxu0  ;;  %18837 = vmatprep.mubr.msk.f32.mxu1 %vm398_vm4, %v23866_v47  ;;  %v24365_v23 = vld [vmem:[#allocation3 + $0x1a0] sm:$0xff] }
 0x552   : > { %v11316_v18 = vpop.f32.mrf.mxu1 }
 0x553   : > { %v24298_v2 = vadd.f32 %v11637_v12, %v11316_v18  ;;  %v18589_v49 = vpop.f32.mrf.mxu0  ;;  %18888 = vmatmul.mubr.msk.f32.gmra.mxu0 %vm398_vm4, %v23887_v21  ;;  %v24370_v18 = vld [vmem:[#allocation3 + $0x1a8] sm:$0xff] }
 0x554   : > { %v18539_v40 = vpop.f32.mrf.mxu1  ;;  %18838 = vmatmul.mubr.msk.f32.gmra.mxu1 %vm398_vm4, %v23879_v33  ;;  %18890 = vmatprep.mubr.msk.f32.mxu0 %vm398_vm4, %v23896_v63 }
 0x555   : > { %v24306_v39 = vadd.f32 %v18589_v49, %v18539_v40  ;;  %v11647_v17 = vpop.f32.mrf.mxu0  ;;  %18840 = vmatprep.mubr.msk.f32.mxu1 %vm398_vm4, %v23887_v21 }
 0x556   : > { %v11326_v36 = vpop.f32.mrf.mxu1 }
 0x557   : > { %v24310_v47 = vadd.f32 %v11647_v17, %v11326_v36  ;;  %v18592_v28 = vpop.f32.mrf.mxu0  ;;  %18891 = vmatmul.mubr.msk.f32.gmra.mxu0 %vm398_vm4, %v23904_v13 }
 0x558   : > { %v18542_v43 = vpop.f32.mrf.mxu1  ;;  %18841 = vmatmul.mubr.msk.f32.gmra.mxu1 %vm398_vm4, %v23896_v63  ;;  %18893 = vmatprep.mubr.msk.f32.mxu0 %vm398_vm4, %v24051_v20 }
 0x559   : > { %v24318_v33 = vadd.f32 %v18592_v28, %v18542_v43  ;;  %v11657_v1 = vpop.f32.mrf.mxu0  ;;  %18843 = vmatprep.mubr.msk.f32.mxu1 %vm398_vm4, %v24041_v52  ;;  %v24379_v28 = vld [vmem:[#allocation3 + $0x1b0] sm:$0xff] }
 0x55a   : > { %v11336_v21 = vpop.f32.mrf.mxu1 }
 0x55b   : > { %v24322_v51 = vadd.f32 %v11657_v1, %v11336_v21  ;;  %v18595_v32 = vpop.f32.mrf.mxu0  ;;  %18894 = vmatmul.mubr.msk.f32.gmra.mxu0 %vm398_vm4, %v24055_v27  ;;  %v24385_v21 = vld [vmem:[#allocation3 + $0x1b8] sm:$0xff] }
 0x55c   : > { %v18545_v13 = vpop.f32.mrf.mxu1  ;;  %18844 = vmatmul.mubr.msk.f32.gmra.mxu1 %vm398_vm4, %v24051_v20  ;;  %18896 = vmatprep.mubr.msk.f32.mxu0 %vm398_vm4, %v24063_v24  ;;  %v13323_v20 = vld [vmem:[#allocation3 + $0x198] sm:$0xff] }
 0x55d   : > { %v24330_v63 = vadd.f32 %v18595_v32, %v18545_v13  ;;  %v11667_v9 = vpop.f32.mrf.mxu0  ;;  %18846 = vmatprep.mubr.msk.f32.mxu1 %vm398_vm4, %v24055_v27 }
 0x55e   : > { %v11346_v15 = vpop.f32.mrf.mxu1 }
 0x55f   : > { %v24334_v29 = vadd.f32 %v11667_v9, %v11346_v15  ;;  %v18598_v44 = vpop.f32.mrf.mxu0  ;;  %18897 = vmatmul.mubr.msk.f32.gmra.mxu0 %vm398_vm4, %v24067_v48 }
 0x560   : > { %v18548_v11 = vpop.f32.mrf.mxu1  ;;  %18847 = vmatmul.mubr.msk.f32.gmra.mxu1 %vm398_vm4, %v24063_v24  ;;  %18899 = vmatprep.mubr.msk.f32.mxu0 %vm398_vm4, %v24075_v26 }
 0x561   : > { %v24342_v55 = vadd.f32 %v18598_v44, %v18548_v11  ;;  %v11677_v53 = vpop.f32.mrf.mxu0  ;;  %18849 = vmatprep.mubr.msk.f32.mxu1 %vm398_vm4, %v24067_v48  ;;  %v24395_v44 = vld [vmem:[#allocation3 + $0x1c0] sm:$0xff] }
 0x562   : > { %v11356_v50 = vpop.f32.mrf.mxu1 }
 0x563   : > { %v24346_v10 = vadd.f32 %v11677_v53, %v11356_v50  ;;  %v18601_v8 = vpop.f32.mrf.mxu0  ;;  %18900 = vmatmul.mubr.msk.f32.gmra.mxu0 %vm398_vm4, %v24079_v46  ;;  %v24401_v50 = vld [vmem:[#allocation3 + $0x1c8] sm:$0xff] }
 0x564   : > { %v18551_v56 = vpop.f32.mrf.mxu1  ;;  %18850 = vmatmul.mubr.msk.f32.gmra.mxu1 %vm398_vm4, %v24075_v26  ;;  %18902 = vmatprep.mubr.msk.f32.mxu0 %vm398_vm4, %v24089_v16 }
 0x565   : > { %v24354_v5 = vadd.f32 %v18601_v8, %v18551_v56  ;;  %v11687_v52 = vpop.f32.mrf.mxu0  ;;  %18852 = vmatprep.mubr.msk.f32.mxu1 %vm398_vm4, %v24079_v46 }
 0x566   : > { %v11366_v30 = vpop.f32.mrf.mxu1 }
 0x567   : > { %v24358_v54 = vadd.f32 %v11687_v52, %v11366_v30  ;;  %v18604_v25 = vpop.f32.mrf.mxu0  ;;  %18903 = vmatmul.mubr.msk.f32.gmra.mxu0 %vm398_vm4, %v24221_v41  ;;  %v24411_v30 = vld [vmem:[#allocation3 + $0x1d0] sm:$0xff] }
 0x568   : > { %v18554_v31 = vpop.f32.mrf.mxu1  ;;  %18853 = vmatmul.mubr.msk.f32.gmra.mxu1 %vm398_vm4, %v24089_v16  ;;  %18905 = vmatprep.mubr.msk.f32.mxu0 %vm398_vm4, %v13323_v20 }
 0x569   : > { %v24367_v0 = vadd.f32 %v18604_v25, %v18554_v31  ;;  %v11697_v12 = vpop.f32.mrf.mxu0  ;;  %18855 = vmatprep.mubr.msk.f32.mxu1 %vm398_vm4, %v13322_v34 }
 0x56a   : > { %v11376_v49 = vpop.f32.mrf.mxu1 }
 0x56b   : > { %v24372_v40 = vadd.f32 %v11697_v12, %v11376_v49  ;;  %v18607_v17 = vpop.f32.mrf.mxu0  ;;  %18906 = vmatmul.mubr.msk.f32.gmra.mxu0 %vm398_vm4, %v24365_v23 }
 0x56c   : > { %v18557_v36 = vpop.f32.mrf.mxu1  ;;  %18856 = vmatmul.mubr.msk.f32.gmra.mxu1 %vm398_vm4, %v13323_v20  ;;  %18908 = vmatprep.mubr.msk.f32.mxu0 %vm398_vm4, %v24370_v18 }
 0x56d   : > { %v24381_v43 = vadd.f32 %v18607_v17, %v18557_v36  ;;  %v11707_v1 = vpop.f32.mrf.mxu0  ;;  %18858 = vmatprep.mubr.msk.f32.mxu1 %vm398_vm4, %v24365_v23  ;;  %v14074_v36 = vld [vmem:[#allocation3 + $0xb0] sm:$0xff] }
 0x56e   : > { %v11386_v32 = vpop.f32.mrf.mxu1 }
 0x56f   : > { %v24387_v13 = vadd.f32 %v11707_v1, %v11386_v32  ;;  %v18610_v9 = vpop.f32.mrf.mxu0  ;;  %18909 = vmatmul.mubr.msk.f32.gmra.mxu0 %vm398_vm4, %v24379_v28 }
 0x570   : > { %v18560_v15 = vpop.f32.mrf.mxu1  ;;  %18859 = vmatmul.mubr.msk.f32.gmra.mxu1 %vm398_vm4, %v24370_v18  ;;  %18911 = vmatprep.mubr.msk.f32.mxu0 %vm398_vm4, %v24385_v21 }
 0x571   : > { %v24397_v11 = vadd.f32 %v18610_v9, %v18560_v15  ;;  %v11717_v53 = vpop.f32.mrf.mxu0  ;;  %18861 = vmatprep.mubr.msk.f32.mxu1 %vm398_vm4, %v24379_v28 }
 0x572   : > { %v11396_v8 = vpop.f32.mrf.mxu1 }
 0x573   : > { %v24403_v56 = vadd.f32 %v11717_v53, %v11396_v8  ;;  %v18613_v52 = vpop.f32.mrf.mxu0  ;;  %18912 = vmatmul.mubr.msk.f32.gmra.mxu0 %vm398_vm4, %v24395_v44  ;;  %v14075_v8 = vld [vmem:[#allocation3 + $0xb8] sm:$0xff] }
 0x574   : > { %v18563_v20 = vpop.f32.mrf.mxu1  ;;  %18862 = vmatmul.mubr.msk.f32.gmra.mxu1 %vm398_vm4, %v24385_v21  ;;  %18914 = vmatprep.mubr.msk.f32.mxu0 %vm398_vm4, %v24401_v50 }
 0x575   : > { %v24413_v34 = vadd.f32 %v18613_v52, %v18563_v20  ;;  %v11727_v25 = vpop.f32.mrf.mxu0  ;;  %18864 = vmatprep.mubr.msk.f32.mxu1 %vm398_vm4, %v24395_v44  ;;  %v14076_v20 = vld [vmem:[#allocation3 + $0xc0] sm:$0xff] }
 0x576   : > { %v11406_v31 = vpop.f32.mrf.mxu1 }
 0x577   : > { %v24417_v12 = vadd.f32 %v11727_v25, %v11406_v31  ;;  %v18616_v49 = vpop.f32.mrf.mxu0  ;;  %18915 = vmatmul.mubr.msk.f32.gmra.mxu0 %vm398_vm4, %v24411_v30  ;;  %v11588_v25 = vadd.f32 %v23948_v61, %v23930_v62 }
 0x578   : > { %v18566_v17 = vpop.f32.mrf.mxu1  ;;  %18865 = vmatmul.mubr.msk.f32.gmra.mxu1 %vm398_vm4, %v24401_v50 }
 0x579   : > { %25841 = vst [vmem:[#allocation84_spill] sm:$0xff] %v24417_v12  ;;  %v24423_v1 = vadd.f32 %v18616_v49, %v18566_v17  ;;  %v11737_v32 = vpop.f32.mrf.mxu0  ;;  %18919 = vmatprep.mubr.msk.f32.mxu1 %vm398_vm4, %v14074_v36 }
 0x57a   : > { %v11416_v9 = vpop.f32.mrf.mxu1 }
 0x57b   : > { %25842 = vst [vmem:[#allocation80_spill] sm:$0xff] %v24423_v1  ;;  %v24426_v15 = vadd.f32 %v11737_v32, %v11416_v9  ;;  %v18671_v53 = vpop.f32.mrf.mxu0  ;;  %v14077_v1 = vld [vmem:[#allocation3 + $0xc8] sm:$0xff] }
 0x57c   : > { %v18621_v52 = vpop.f32.mrf.mxu1  ;;  %18920 = vmatmul.mubr.msk.f32.vlgmr.msra.gmra.mxu1 %vm398_vm4, %v14075_v8  ;;  %v11598_v8 = vadd.f32 %v23962_v45, %v23950_v4  ;;  %v11608_v4 = vadd.f32 %v23975_v6, %v23966_v37  ;;  %v11618_v37 = vadd.f32 %v24266_v14, %v24274_v7 }
 0x57d   : > { %25843 = vst [vmem:[#allocation11_spill] sm:$0xff] %v24426_v15  ;;  %v12103_v31 = vadd.f32 %v18621_v52, %v23942_v35  ;;  %v12331_v12 = vpop.f32.mrf.mxu0  ;;  %18922 = vmatprep.mubr.msk.f32.mxu1 %vm398_vm4, %v14076_v20  ;;  %v14078_v15 = vld [vmem:[#allocation3 + $0xd0] sm:$0xff] }
 0x57e   : > { %v11943_v49 = vpop.f32.mrf.mxu1 }
 0x57f   : > { %v12102_v17 = vadd.f32 %v11943_v49, %v11588_v25  ;;  %v18674_v36 = vpop.f32.mrf.mxu0  ;;  %v24433_v32 = vadd.f32 %v18671_v53, %v12103_v31  ;;  %v14079_v49 = vld [vmem:[#allocation3 + $0xd8] sm:$0xff] }
 0x580   : > { %v18624_v9 = vpop.f32.mrf.mxu1  ;;  %18923 = vmatmul.mubr.msk.f32.gmra.mxu1 %vm398_vm4, %v14077_v1  ;;  %v14080_v1 = vld [vmem:[#allocation3 + $0xe0] sm:$0xff] }
 0x581   : > { %v12105_v62 = vadd.f32 %v18624_v9, %v23956_v58  ;;  %v12341_v61 = vpop.f32.mrf.mxu0  ;;  %18925 = vmatprep.mubr.msk.f32.mxu1 %vm398_vm4, %v14078_v15  ;;  %v24440_v35 = vadd.f32 %v12331_v12, %v12102_v17 }
 0x582   : > { %v11953_v52 = vpop.f32.mrf.mxu1 }
 0x583   : > { %v12104_v20 = vadd.f32 %v11953_v52, %v11598_v8  ;;  %v18677_v25 = vpop.f32.mrf.mxu0  ;;  %v24442_v53 = vadd.f32 %v18674_v36, %v12105_v62  ;;  %v14082_v62 = vld [vmem:[#allocation3 + $0x100] sm:$0xff] }
 0x584   : > { %v18627_v31 = vpop.f32.mrf.mxu1  ;;  %18926 = vmatmul.mubr.msk.f32.gmra.mxu1 %vm398_vm4, %v14079_v49 }
 0x585   : > { %v12107_v58 = vadd.f32 %v18627_v31, %v23970_v60  ;;  %v12351_v45 = vpop.f32.mrf.mxu0  ;;  %18928 = vmatprep.mubr.msk.f32.mxu1 %vm398_vm4, %v14080_v1  ;;  %v24449_v12 = vadd.f32 %v12341_v61, %v12104_v20 }
 0x586   : > { %v11963_v15 = vpop.f32.mrf.mxu1 }
 0x587   : > { %v12106_v17 = vadd.f32 %v11963_v15, %v11608_v4  ;;  %v18680_v9 = vpop.f32.mrf.mxu0  ;;  %v24451_v8 = vadd.f32 %v18677_v25, %v12107_v58  ;;  %v14083_v25 = vld [vmem:[#allocation3 + $0x108] sm:$0xff]  ;;  %v14085_v15 = vld [vmem:[#allocation3 + $0x118] sm:$0xff] }
 0x588   : > { %v18630_v36 = vpop.f32.mrf.mxu1  ;;  %18929 = vmatmul.mubr.msk.f32.gmra.mxu1 %vm398_vm4, %v24039_v42  ;;  %v14084_v42 = vld [vmem:[#allocation3 + $0x110] sm:$0xff] }
 0x589   : > { %v12109_v60 = vadd.f32 %v18630_v36, %v23981_v57  ;;  %v12361_v6 = vpop.f32.mrf.mxu0  ;;  %18931 = vmatprep.mubr.msk.f32.mxu1 %vm398_vm4, %v14082_v62  ;;  %v24459_v61 = vadd.f32 %v12351_v45, %v12106_v17  ;;  %v14086_v36 = vld [vmem:[#allocation3 + $0x120] sm:$0xff] }
 0x58a   : > { %v11973_v52 = vpop.f32.mrf.mxu1 }
 0x58b   : > { %v12108_v20 = vadd.f32 %v11973_v52, %v11618_v37  ;;  %v18683_v49 = vpop.f32.mrf.mxu0  ;;  %v24461_v31 = vadd.f32 %v18680_v9, %v12109_v60 }
 0x58c   : > { %v18633_v1 = vpop.f32.mrf.mxu1  ;;  %18932 = vmatmul.mubr.msk.f32.gmra.mxu1 %vm398_vm4, %v14083_v25  ;;  %v14088_v25 = vld [vmem:[#allocation3 + $0x130] sm:$0xff] }
 0x58d   : > { %v12111_v4 = vadd.f32 %v18633_v1, %v24282_v3  ;;  %v12371_v14 = vpop.f32.mrf.mxu0  ;;  %18934 = vmatprep.mubr.msk.f32.mxu1 %vm398_vm4, %v14084_v42  ;;  %v24466_v57 = vadd.f32 %v12361_v6, %v12108_v20 }
 0x58e   : > { %v11983_v7 = vpop.f32.mrf.mxu1 }
 0x58f   : > { %v12110_v58 = vadd.f32 %v11983_v7, %v24286_v38  ;;  %v18686_v45 = vpop.f32.mrf.mxu0  ;;  %v24469_v17 = vadd.f32 %v18683_v49, %v12111_v4  ;;  %v14087_v38 = vld [vmem:[#allocation3 + $0x128] sm:$0xff] }
 0x590   : > { %v18636_v9 = vpop.f32.mrf.mxu1  ;;  %18935 = vmatmul.mubr.msk.f32.gmra.mxu1 %vm398_vm4, %v14085_v15 }
 0x591   : > { %v12113_v62 = vadd.f32 %v18636_v9, %v24294_v59  ;;  %v12381_v37 = vpop.f32.mrf.mxu0  ;;  %18937 = vmatprep.mubr.msk.f32.mxu1 %vm398_vm4, %v14086_v36  ;;  %v24474_v3 = vadd.f32 %v12371_v14, %v12110_v58 }
 0x592   : > { %v11993_v60 = vpop.f32.mrf.mxu1 }
 0x593   : > { %v12112_v6 = vadd.f32 %v11993_v60, %v24298_v2  ;;  %v18689_v52 = vpop.f32.mrf.mxu0  ;;  %v24477_v20 = vadd.f32 %v18686_v45, %v12113_v62 }
 0x594   : > { %v18639_v49 = vpop.f32.mrf.mxu1  ;;  %18938 = vmatmul.mubr.msk.f32.gmra.mxu1 %vm398_vm4, %v14087_v38 }
 0x595   : > { %v12115_v1 = vadd.f32 %v18639_v49, %v24306_v39  ;;  %v12391_v42 = vpop.f32.mrf.mxu0  ;;  %18940 = vmatprep.mubr.msk.f32.mxu1 %vm398_vm4, %v14088_v25  ;;  %v24482_v59 = vadd.f32 %v12381_v37, %v12112_v6 }
 0x596   : > { %v12003_v4 = vpop.f32.mrf.mxu1 }
 0x597   : > { %v12114_v14 = vadd.f32 %v12003_v4, %v24310_v47  ;;  %v18692_v7 = vpop.f32.mrf.mxu0  ;;  %v24485_v2 = vadd.f32 %v18689_v52, %v12115_v1 }
 0x598   : > { %v18642_v58 = vpop.f32.mrf.mxu1  ;;  %18941 = vmatmul.mubr.msk.f32.gmra.mxu1 %vm398_vm4, %v24087_v19 }
 0x599   : > { %v12117_v45 = vadd.f32 %v18642_v58, %v24318_v33  ;;  %v12401_v15 = vpop.f32.mrf.mxu0  ;;  %18943 = vmatprep.mubr.msk.f32.mxu1 %vm398_vm4, %v24055_v27  ;;  %v24492_v39 = vadd.f32 %v12391_v42, %v12114_v14 }
 0x59a   : > { %v12013_v9 = vpop.f32.mrf.mxu1 }
 0x59b   : > { %v12116_v36 = vadd.f32 %v12013_v9, %v24322_v51  ;;  %v18695_v62 = vpop.f32.mrf.mxu0  ;;  %v24495_v47 = vadd.f32 %v18692_v7, %v12117_v45 }
 0x59c   : > { %v18645_v37 = vpop.f32.mrf.mxu1  ;;  %18944 = vmatmul.mubr.msk.f32.gmra.mxu1 %vm398_vm4, %v24063_v24 }
 0x59d   : > { %v12119_v19 = vadd.f32 %v18645_v37, %v24330_v63  ;;  %v12411_v60 = vpop.f32.mrf.mxu0  ;;  %18946 = vmatprep.mubr.msk.f32.mxu1 %vm398_vm4, %v24067_v48  ;;  %v24502_v33 = vadd.f32 %v12401_v15, %v12116_v36 }
 0x59e   : > { %v12023_v27 = vpop.f32.mrf.mxu1 }
 0x59f   : > { %v12118_v6 = vadd.f32 %v12023_v27, %v24334_v29  ;;  %v18698_v52 = vpop.f32.mrf.mxu0  ;;  %v24505_v51 = vadd.f32 %v18695_v62, %v12119_v19 }
 0x5a0   : > { %v18648_v38 = vpop.f32.mrf.mxu1  ;;  %18947 = vmatmul.mubr.msk.f32.gmra.mxu1 %vm398_vm4, %v24075_v26 }
 0x5a1   : > { %v12121_v24 = vadd.f32 %v18648_v38, %v24342_v55  ;;  %v12421_v49 = vpop.f32.mrf.mxu0  ;;  %18949 = vmatprep.mubr.msk.f32.mxu1 %vm398_vm4, %v24079_v46  ;;  %v24512_v63 = vadd.f32 %v12411_v60, %v12118_v6 }
 0x5a2   : > { %v12033_v48 = vpop.f32.mrf.mxu1 }
 0x5a3   : > { %v12120_v25 = vadd.f32 %v12033_v48, %v24346_v10  ;;  %v18701_v1 = vpop.f32.mrf.mxu0  ;;  %v24515_v29 = vadd.f32 %v18698_v52, %v12121_v24  ;;  %v25844_v48 = vld [vmem:[#allocation84_spill] sm:$0xff] }
 0x5a4   : > { %v18651_v42 = vpop.f32.mrf.mxu1  ;;  %18950 = vmatmul.mubr.msk.f32.gmra.mxu1 %vm398_vm4, %v24089_v16 }
 0x5a5   : > { %v12123_v26 = vadd.f32 %v18651_v42, %v24354_v5  ;;  %v12431_v4 = vpop.f32.mrf.mxu0  ;;  %18952 = vmatprep.mubr.msk.f32.mxu1 %vm398_vm4, %v24221_v41  ;;  %v24522_v55 = vadd.f32 %v12421_v49, %v12120_v25 }
 0x5a6   : > { %v12043_v46 = vpop.f32.mrf.mxu1 }
 0x5a7   : > { %v12122_v14 = vadd.f32 %v12043_v46, %v24358_v54  ;;  %v18704_v7 = vpop.f32.mrf.mxu0  ;;  %v24525_v10 = vadd.f32 %v18701_v1, %v12123_v26  ;;  %v25845_v26 = vld [vmem:[#allocation80_spill] sm:$0xff] }
 0x5a8   : > { %v18654_v58 = vpop.f32.mrf.mxu1  ;;  %18953 = vmatmul.mubr.msk.f32.gmra.mxu1 %vm398_vm4, %v24227_v22 }
 0x5a9   : > { %v12125_v16 = vadd.f32 %v18654_v58, %v24367_v0  ;;  %v12441_v45 = vpop.f32.mrf.mxu0  ;;  %18955 = vmatprep.mubr.msk.f32.mxu1 %vm398_vm4, %v24365_v23  ;;  %v24532_v5 = vadd.f32 %v12431_v4, %v12122_v14  ;;  %v25846_v14 = vld [vmem:[#allocation11_spill] sm:$0xff] }
 0x5aa   : > { %v12053_v41 = vpop.f32.mrf.mxu1 }
 0x5ab   : > { %v12124_v15 = vadd.f32 %v12053_v41, %v24372_v40  ;;  %v18707_v9 = vpop.f32.mrf.mxu0  ;;  %v24535_v54 = vadd.f32 %v18704_v7, %v12125_v16 }
 0x5ac   : > { %v18657_v36 = vpop.f32.mrf.mxu1  ;;  %18956 = vmatmul.mubr.msk.f32.gmra.mxu1 %vm398_vm4, %v24370_v18 }
 0x5ad   : > { %v12127_v22 = vadd.f32 %v18657_v36, %v24381_v43  ;;  %v12451_v62 = vpop.f32.mrf.mxu0  ;;  %18958 = vmatprep.mubr.msk.f32.mxu1 %vm398_vm4, %v24379_v28  ;;  %v24542_v0 = vadd.f32 %v12441_v45, %v12124_v15 }
 0x5ae   : > { %v12063_v23 = vpop.f32.mrf.mxu1 }
 0x5af   : > { %v12126_v37 = vadd.f32 %v12063_v23, %v24387_v13  ;;  %v18710_v19 = vpop.f32.mrf.mxu0  ;;  %v24545_v40 = vadd.f32 %v18707_v9, %v12127_v22 }
 0x5b0   : > { %v18660_v60 = vpop.f32.mrf.mxu1  ;;  %18959 = vmatmul.mubr.msk.f32.gmra.mxu1 %vm398_vm4, %v24385_v21 }
 0x5b1   : > { %v12129_v18 = vadd.f32 %v18660_v60, %v24397_v11  ;;  %v12461_v27 = vpop.f32.mrf.mxu0  ;;  %18961 = vmatprep.mubr.msk.f32.mxu1 %vm398_vm4, %v24395_v44  ;;  %v24552_v43 = vadd.f32 %v12451_v62, %v12126_v37  ;;  %v14105_v11 = vld [vmem:[#allocation3 + $0x1d8] sm:$0xff] }
 0x5b2   : > { %v12073_v28 = vpop.f32.mrf.mxu1 }
 0x5b3   : > { %v12128_v6 = vadd.f32 %v12073_v28, %v24403_v56  ;;  %v18713_v52 = vpop.f32.mrf.mxu0  ;;  %v24555_v13 = vadd.f32 %v18710_v19, %v12129_v18 }
 0x5b4   : > { %v18663_v38 = vpop.f32.mrf.mxu1  ;;  %18962 = vmatmul.mubr.msk.f32.gmra.mxu1 %vm398_vm4, %v24401_v50 }
 0x5b5   : > { %v12131_v21 = vadd.f32 %v18663_v38, %v24413_v34  ;;  %v12471_v24 = vpop.f32.mrf.mxu0  ;;  %18964 = vmatprep.mubr.msk.f32.mxu1 %vm398_vm4, %v24411_v30  ;;  %v24562_v44 = vadd.f32 %v12461_v27, %v12128_v6 }
 0x5b6   : > { %v12083_v49 = vpop.f32.mrf.mxu1 }
 0x5b7   : > { %v12130_v25 = vadd.f32 %v12083_v49, %v25844_v48  ;;  %v18716_v56 = vpop.f32.mrf.mxu0  ;;  %v24565_v1 = vadd.f32 %v18713_v52, %v12131_v21 }
 0x5b8   : > { %v18666_v42 = vpop.f32.mrf.mxu1  ;;  %18965 = vmatmul.mubr.msk.f32.gmra.mxu1 %vm398_vm4, %v14105_v11 }
 0x5b9   : > { %v12133_v50 = vadd.f32 %v18666_v42, %v25845_v26  ;;  %v12481_v4 = vpop.f32.mrf.mxu0  ;;  %v24569_v34 = vadd.f32 %v12471_v24, %v12130_v25 }
 0x5ba   : > { %v12093_v46 = vpop.f32.mrf.mxu1 }
 0x5bb   : > { %v12132_v30 = vadd.f32 %v12093_v46, %v25846_v14  ;;  %v24572_v7 = vpop.f32.mrf.mxu0  ;;  %v24574_v58 = vadd.f32 %v18716_v56, %v12133_v50 }
 0x5bc   : > { %v18721_v16 = vpop.f32.mrf.mxu1 }
 0x5bd   : > { %v24577_v45 = vadd.f32 %v18721_v16, %v24433_v32  ;;  %v24579_v41 = vpop.f32.mrf.mxu0  ;;  %v24581_v15 = vadd.f32 %v12481_v4, %v12132_v30 }
 0x5be   : > { %v12718_v9 = vpop.f32.mrf.mxu1 }
 0x5bf   : > { %v24584_v36 = vadd.f32 %v12718_v9, %v24440_v35  ;;  %v24586_v22 = vpop.f32.mrf.mxu0 }
 0x5c0   : > { %v18724_v62 = vpop.f32.mrf.mxu1 }
 0x5c1   : > { %v24589_v23 = vadd.f32 %v18724_v62, %v24442_v53  ;;  %v24591_v37 = vpop.f32.mrf.mxu0 }
 0x5c2   : > { %v12728_v19 = vpop.f32.mrf.mxu1 }
 0x5c3   : > { %v24594_v32 = vadd.f32 %v12728_v19, %v24449_v12  ;;  %v24596_v60 = vpop.f32.mrf.mxu0 }
 0x5c4   : > { %v18727_v18 = vpop.f32.mrf.mxu1 }
 0x5c5   : > { %v24599_v27 = vadd.f32 %v18727_v18, %v24451_v8  ;;  %v24601_v35 = vpop.f32.mrf.mxu0 }
 0x5c6   : > { %v12738_v28 = vpop.f32.mrf.mxu1 }
 0x5c7   : > { %v24604_v6 = vadd.f32 %v12738_v28, %v24459_v61  ;;  %v24606_v53 = vpop.f32.mrf.mxu0 }
 0x5c8   : > { %v18730_v52 = vpop.f32.mrf.mxu1 }
 0x5c9   : > { %v24609_v38 = vadd.f32 %v18730_v52, %v24461_v31  ;;  %v24611_v12 = vpop.f32.mrf.mxu0 }
 0x5ca   : > { %v12748_v21 = vpop.f32.mrf.mxu1 }
 0x5cb   : > { %v24614_v24 = vadd.f32 %v12748_v21, %v24466_v57  ;;  %v24616_v8 = vpop.f32.mrf.mxu0 }
 0x5cc   : > { %v18733_v11 = vpop.f32.mrf.mxu1 }
 0x5cd   : > { %v24619_v49 = vadd.f32 %v18733_v11, %v24469_v17  ;;  %v24621_v61 = vpop.f32.mrf.mxu0 }
 0x5ce   : > { %v12758_v48 = vpop.f32.mrf.mxu1 }
 0x5cf   : > { %v24624_v25 = vadd.f32 %v12758_v48, %v24474_v3  ;;  %v24626_v31 = vpop.f32.mrf.mxu0 }
 0x5d0   : > { %v18736_v56 = vpop.f32.mrf.mxu1 }
 0x5d1   : > { %v24629_v42 = vadd.f32 %v18736_v56, %v24477_v20  ;;  %v24631_v57 = vpop.f32.mrf.mxu0 }
 0x5d2   : > { %v12768_v26 = vpop.f32.mrf.mxu1 }
 0x5d3   : > { %v24634_v50 = vadd.f32 %v12768_v26, %v24482_v59  ;;  %v24636_v17 = vpop.f32.mrf.mxu0 }
 0x5d4   : > { %v18739_v4 = vpop.f32.mrf.mxu1 }
 0x5d5   : > { %v24639_v46 = vadd.f32 %v18739_v4, %v24485_v2  ;;  %v24641_v3 = vpop.f32.mrf.mxu0 }
 0x5d6   : > { %v12778_v14 = vpop.f32.mrf.mxu1 }
 0x5d7   : > { %v24644_v30 = vadd.f32 %v12778_v14, %v24492_v39  ;;  %v24646_v20 = vpop.f32.mrf.mxu0 }
 0x5d8   : > { %v18742_v16 = vpop.f32.mrf.mxu1 }
 0x5d9   : > { %v24649_v9 = vadd.f32 %v18742_v16, %v24495_v47  ;;  %v24651_v59 = vpop.f32.mrf.mxu0 }
 0x5da   : > { %v12788_v62 = vpop.f32.mrf.mxu1 }
 0x5db   : > { %v24654_v19 = vadd.f32 %v12788_v62, %v24502_v33  ;;  %v24656_v2 = vpop.f32.mrf.mxu0 }
 0x5dc   : > { %v18745_v18 = vpop.f32.mrf.mxu1 }
 0x5dd   : > { %v24659_v28 = vadd.f32 %v18745_v18, %v24505_v51  ;;  %v24661_v39 = vpop.f32.mrf.mxu0 }
 0x5de   : > { %v12798_v52 = vpop.f32.mrf.mxu1 }
 0x5df   : > { %v24664_v21 = vadd.f32 %v12798_v52, %v24512_v63  ;;  %v24666_v47 = vpop.f32.mrf.mxu0 }
 0x5e0   : > { %v18748_v11 = vpop.f32.mrf.mxu1 }
 0x5e1   : > { %v24669_v48 = vadd.f32 %v18748_v11, %v24515_v29  ;;  %v24671_v33 = vpop.f32.mrf.mxu0 }
 0x5e2   : > { %v12808_v56 = vpop.f32.mrf.mxu1 }
 0x5e3   : > { %v24674_v26 = vadd.f32 %v12808_v56, %v24522_v55  ;;  %v24676_v51 = vpop.f32.mrf.mxu0 }
 0x5e4   : > { %v18751_v4 = vpop.f32.mrf.mxu1 }
 0x5e5   : > { %v24679_v14 = vadd.f32 %v18751_v4, %v24525_v10  ;;  %v24681_v63 = vpop.f32.mrf.mxu0 }
 0x5e6   : > { %25847 = vst [vmem:[#allocation6_spill] sm:$0xff] %v24681_v63  ;;  %v12818_v16 = vpop.f32.mrf.mxu1 }
 0x5e7   : > { %v24684_v62 = vadd.f32 %v12818_v16, %v24532_v5  ;;  %v24686_v29 = vpop.f32.mrf.mxu0 }
 0x5e8   : > { %25848 = vst [vmem:[#allocation87_spill] sm:$0xff] %v24686_v29  ;;  %v18754_v18 = vpop.f32.mrf.mxu1 }
 0x5e9   : > { %v24689_v52 = vadd.f32 %v18754_v18, %v24535_v54  ;;  %v24691_v55 = vpop.f32.mrf.mxu0 }
 0x5ea   : > { %25849 = vst [vmem:[#allocation81_spill] sm:$0xff] %v24691_v55  ;;  %v12828_v11 = vpop.f32.mrf.mxu1 }
 0x5eb   : > { %v24694_v56 = vadd.f32 %v12828_v11, %v24542_v0  ;;  %v24696_v10 = vpop.f32.mrf.mxu0 }
 0x5ec   : > { %25850 = vst [vmem:[#allocation21_spill] sm:$0xff] %v24696_v10  ;;  %v18757_v4 = vpop.f32.mrf.mxu1 }
 0x5ed   : > { %v24699_v63 = vadd.f32 %v18757_v4, %v24545_v40  ;;  %v24701_v5 = vpop.f32.mrf.mxu0 }
 0x5ee   : > { %25851 = vst [vmem:[#allocation64_spill] sm:$0xff] %v24701_v5  ;;  %v12838_v16 = vpop.f32.mrf.mxu1 }
 0x5ef   : > { %v24704_v29 = vadd.f32 %v12838_v16, %v24552_v43  ;;  %v24706_v54 = vpop.f32.mrf.mxu0 }
 0x5f0   : > { %25852 = vst [vmem:[#allocation9_spill] sm:$0xff] %v24706_v54  ;;  %v18760_v18 = vpop.f32.mrf.mxu1 }
 0x5f1   : > { %v24709_v55 = vadd.f32 %v18760_v18, %v24555_v13  ;;  %v24711_v0 = vpop.f32.mrf.mxu0 }
 0x5f2   : > { %25854 = vst [vmem:[#allocation90_spill] sm:$0xff] %v24711_v0  ;;  %v12848_v11 = vpop.f32.mrf.mxu1 }
 0x5f3   : > { %25853 = vst [vmem:[#allocation10_spill] sm:$0xff] %v24709_v55  ;;  %v24714_v10 = vadd.f32 %v12848_v11, %v24562_v44  ;;  %v24716_v40 = vpop.f32.mrf.mxu0 }
 0x5f4   : > { %25856 = vst [vmem:[#allocation13_spill] sm:$0xff] %v24716_v40  ;;  %v18763_v4 = vpop.f32.mrf.mxu1 }
 0x5f5   : > { %25855 = vst [vmem:[#allocation82_spill] sm:$0xff] %v24714_v10  ;;  %v24719_v5 = vadd.f32 %v18763_v4, %v24565_v1  ;;  %v24721_v43 = vpop.f32.mrf.mxu0 }
 0x5f6   : > { %25858 = vst [vmem:[#allocation93_spill] sm:$0xff] %v24721_v43  ;;  %v12858_v16 = vpop.f32.mrf.mxu1 }
 0x5f7   : > { %25857 = vst [vmem:[#allocation16_spill] sm:$0xff] %v24719_v5  ;;  %v24724_v54 = vadd.f32 %v12858_v16, %v24569_v34  ;;  %v24726_v13 = vpop.f32.mrf.mxu0 }
 0x5f8   : > { %25860 = vst [vmem:[#allocation30_spill] sm:$0xff] %v24726_v13  ;;  %v18766_v18 = vpop.f32.mrf.mxu1 }
 0x5f9   : > { %25859 = vst [vmem:[#allocation83_spill] sm:$0xff] %v24724_v54  ;;  %v24729_v0 = vadd.f32 %v18766_v18, %v24574_v58  ;;  %v24731_v44 = vpop.f32.mrf.mxu0 }
 0x5fa   : > { %25862 = vst [vmem:[#allocation36_spill] sm:$0xff] %v24731_v44  ;;  %v12868_v11 = vpop.f32.mrf.mxu1 }
 0x5fb   : > { %25861 = vst [vmem:[#allocation48_spill] sm:$0xff] %v24729_v0  ;;  %v24734_v40 = vadd.f32 %v12868_v11, %v24581_v15  ;;  %v24736_v1 = vpop.f32.mrf.mxu0 }
 0x5fc   : > { %v18821_v4 = vpop.f32.mrf.mxu1 }
 0x5fd   : > { %25863 = vst [vmem:[#allocation14_spill] sm:$0xff] %v24734_v40  ;;  %v24738_v5 = vpop.f32.mrf.mxu0 }
 0x5fe   : > { %v13494_v43 = vpop.f32.mrf.mxu1 }
 0x5ff   : > { %v24742_v13 = vpop.f32.mrf.mxu0 }
 0x600   : > { %v18824_v34 = vpop.f32.mrf.mxu1  ;;  %25864 = vst [vmem:[#allocation85_spill] sm:$0xff] %v24742_v13 }
 0x601   : > { %v24748_v18 = vpop.f32.mrf.mxu0 }
 0x602   : > { %v24740_v16 = vpop.f32.mrf.mxu1  ;;  %25867 = vst [vmem:[#allocation98_spill] sm:$0xff] %v24748_v18 }
 0x603   : > { %v24754_v11 = vpop.f32.mrf.mxu0 }
 0x604   : > { %v24744_v54 = vpop.f32.mrf.mxu1  ;;  %25870 = vst [vmem:[#allocation59_spill] sm:$0xff] %v24754_v11 }
 0x605   : > { %25865 = vst [vmem:[#allocation20_spill] sm:$0xff] %v24744_v54  ;;  %v24760_v10 = vpop.f32.mrf.mxu0 }
 0x606   : > { %v24746_v58 = vpop.f32.mrf.mxu1  ;;  %25873 = vst [vmem:[#allocation88_spill] sm:$0xff] %v24760_v10 }
 0x607   : > { %25866 = vst [vmem:[#allocation17_spill] sm:$0xff] %v24746_v58  ;;  %v24766_v54 = vpop.f32.mrf.mxu0 }
 0x608   : > { %v24750_v44 = vpop.f32.mrf.mxu1  ;;  %25876 = vst [vmem:[#allocation89_spill] sm:$0xff] %v24766_v54 }
 0x609   : > { %25868 = vst [vmem:[#allocation86_spill] sm:$0xff] %v24750_v44  ;;  %v24772_v44 = vpop.f32.mrf.mxu0 }
 0x60a   : > { %v24752_v15 = vpop.f32.mrf.mxu1  ;;  %25879 = vst [vmem:[#allocation38_spill] sm:$0xff] %v24772_v44 }
 0x60b   : > { %25869 = vst [vmem:[#allocation49_spill] sm:$0xff] %v24752_v15 }
 0x60c   : > { %v24756_v40 = vpop.f32.mrf.mxu1 }
 0x60d   : > { %25871 = vst [vmem:[#allocation18_spill] sm:$0xff] %v24756_v40  ;;  %v24778_v40 = vpop.f32.mrf.mxu0 }
 0x60e   : > { %v24758_v0 = vpop.f32.mrf.mxu1  ;;  %25882 = vst [vmem:[#allocation42_spill] sm:$0xff] %v24778_v40 }
 0x60f   : > { %25872 = vst [vmem:[#allocation19_spill] sm:$0xff] %v24758_v0 }
 0x610   : > { %v24762_v55 = vpop.f32.mrf.mxu1 }
 0x611   : > { %25874 = vst [vmem:[#allocation22_spill] sm:$0xff] %v24762_v55  ;;  %v24784_v55 = vpop.f32.mrf.mxu0 }
 0x612   : > { %v24764_v13 = vpop.f32.mrf.mxu1  ;;  %25885 = vst [vmem:[#allocation25_spill] sm:$0xff] %v24784_v55 }
 0x613   : > { %25875 = vst [vmem:[#allocation24_spill] sm:$0xff] %v24764_v13 }
 0x614   : > { %v24768_v58 = vpop.f32.mrf.mxu1 }
 0x615   : > { %25877 = vst [vmem:[#allocation29_spill] sm:$0xff] %v24768_v58  ;;  %v24790_v58 = vpop.f32.mrf.mxu0 }
 0x616   : > { %v24770_v18 = vpop.f32.mrf.mxu1  ;;  %25888 = vst [vmem:[#allocation33_spill] sm:$0xff] %v24790_v58 }
 0x617   : > { %25878 = vst [vmem:[#allocation39_spill] sm:$0xff] %v24770_v18 }
 0x618   : > { %v24774_v15 = vpop.f32.mrf.mxu1 }
 0x619   : > { %25880 = vst [vmem:[#allocation23_spill] sm:$0xff] %v24774_v15  ;;  %v24796_v15 = vpop.f32.mrf.mxu0 }
 0x61a   : > { %v24776_v11 = vpop.f32.mrf.mxu1 }
 0x61b   : > { %25881 = vst [vmem:[#allocation91_spill] sm:$0xff] %v24776_v11 }
 0x61c   : > { %v24780_v0 = vpop.f32.mrf.mxu1 }
 0x61d   : > { %25883 = vst [vmem:[#allocation12_spill] sm:$0xff] %v24780_v0  ;;  %v24802_v0 = vpop.f32.mrf.mxu0 }
 0x61e   : > { %v24782_v10 = vpop.f32.mrf.mxu1  ;;  %25893 = vst [vmem:[#allocation60_spill] sm:$0xff] %v24802_v0 }
 0x61f   : > { %25884 = vst [vmem:[#allocation28_spill] sm:$0xff] %v24782_v10 }
 0x620   : > { %v24786_v13 = vpop.f32.mrf.mxu1 }
 0x621   : > { %25886 = vst [vmem:[#allocation92_spill] sm:$0xff] %v24786_v13  ;;  %v24808_v13 = vpop.f32.mrf.mxu0 }
 0x622   : > { %v24788_v54 = vpop.f32.mrf.mxu1 }
 0x623   : > { %25887 = vst [vmem:[#allocation37_spill] sm:$0xff] %v24788_v54 }
 0x624   : > { %v24792_v18 = vpop.f32.mrf.mxu1 }
 0x625   : > { %25889 = vst [vmem:[#allocation66_spill] sm:$0xff] %v24792_v18  ;;  %v24814_v18 = vpop.f32.mrf.mxu0 }
 0x626   : > { %v24794_v44 = vpop.f32.mrf.mxu1 }
 0x627   : > { %25890 = vst [vmem:[#allocation26_spill] sm:$0xff] %v24794_v44 }
 0x628   : > { %v24798_v11 = vpop.f32.mrf.mxu1 }
 0x629   : > { %25891 = vst [vmem:[#allocation27_spill] sm:$0xff] %v24798_v11  ;;  %v13266_v11 = vadd.f32 %v24572_v7, %v24577_v45  ;;  %v13269_v7 = vadd.f32 %v24601_v35, %v24604_v6  ;;  %v13272_v45 = vadd.f32 %v24606_v53, %v24609_v38  ;;  %v24862_v35 = vadd.f32 %v24641_v3, %v24644_v30 }
 0x62a   : > { %v24800_v40 = vpop.f32.mrf.mxu1  ;;  %v24866_v6 = vadd.f32 %v24646_v20, %v24649_v9  ;;  %v25900_v20 = vld [vmem:[#allocation87_spill] sm:$0xff] }
 0x62b   : > { %25892 = vst [vmem:[#allocation94_spill] sm:$0xff] %v24800_v40  ;;  %v13654_v0 = vadd.f32 %v18821_v4, %v13266_v11  ;;  %v24912_v9 = vadd.f32 %v25900_v20, %v24689_v52 }
 0x62c   : > { %v24804_v10 = vpop.f32.mrf.mxu1 }
 0x62d   : > { %25894 = vst [vmem:[#allocation31_spill] sm:$0xff] %v24804_v10  ;;  %v13265_v10 = vadd.f32 %v24579_v41, %v24584_v36  ;;  %v13271_v41 = vadd.f32 %v24611_v12, %v24614_v24  ;;  %v24872_v12 = vadd.f32 %v24651_v59, %v24654_v19  ;;  %v25901_v59 = vld [vmem:[#allocation81_spill] sm:$0xff] }
 0x62e   : > { %v24806_v55 = vpop.f32.mrf.mxu1  ;;  %v24916_v19 = vadd.f32 %v25901_v59, %v24694_v56 }
 0x62f   : > { %25895 = vst [vmem:[#allocation34_spill] sm:$0xff] %v24806_v55  ;;  %v13268_v55 = vadd.f32 %v24586_v22, %v24589_v23  ;;  %v13653_v22 = vadd.f32 %v13494_v43, %v13265_v10  ;;  %v24842_v23 = vadd.f32 %v24616_v8, %v24619_v49  ;;  %v24878_v8 = vadd.f32 %v24656_v2, %v24659_v28  ;;  %v25902_v2 = vld [vmem:[#allocation21_spill] sm:$0xff]  ;;  %v25907_v10 = vld [vmem:[#allocation10_spill] sm:$0xff] }
 0x630   : > { %v24810_v54 = vpop.f32.mrf.mxu1  ;;  %v14042_v49 = vadd.f32 %v24736_v1, %v13654_v0  ;;  %v24920_v28 = vadd.f32 %v25902_v2, %v24699_v63  ;;  %v25908_v63 = vld [vmem:[#allocation9_spill] sm:$0xff] }
 0x631   : > { %25896 = vst [vmem:[#allocation52_spill] sm:$0xff] %v24810_v54  ;;  %v13267_v54 = vadd.f32 %v24591_v37, %v24594_v32  ;;  %v24846_v37 = vadd.f32 %v24621_v61, %v24624_v25  ;;  %v24850_v32 = vadd.f32 %v24626_v31, %v24629_v42  ;;  %v13656_v38 = vadd.f32 %v18824_v34, %v13268_v55  ;;  %v25906_v55 = vld [vmem:[#allocation17_spill] sm:$0xff] }
 0x632   : > { %v24812_v58 = vpop.f32.mrf.mxu1  ;;  %v24884_v25 = vadd.f32 %v24661_v39, %v24664_v21  ;;  %v24888_v31 = vadd.f32 %v24666_v47, %v24669_v48  ;;  %v24892_v42 = vadd.f32 %v24671_v33, %v24674_v26  ;;  %v14041_v30 = vadd.f32 %v24738_v5, %v13653_v22  ;;  %v25903_v39 = vld [vmem:[#allocation64_spill] sm:$0xff] }
 0x633   : > { %25897 = vst [vmem:[#allocation95_spill] sm:$0xff] %v24812_v58  ;;  %v24828_v58 = vpop.f32.mrf.mxu0  ;;  %v13655_v61 = vadd.f32 %v24740_v16, %v13267_v54  ;;  %v24924_v21 = vadd.f32 %v25903_v39, %v24704_v29  ;;  %v25904_v48 = vld [vmem:[#allocation20_spill] sm:$0xff]  ;;  %v13657_v56 = vadd.f32 %v25906_v55, %v13269_v7  ;;  %v24935_v5 = vadd.f32 %v25908_v63, %v25907_v10  ;;  %v25909_v54 = vld [vmem:[#allocation82_spill] sm:$0xff] }
 0x634   : > { %v24816_v44 = vpop.f32.mrf.mxu1  ;;  %v25910_v29 = vld [vmem:[#allocation90_spill] sm:$0xff] }
 0x635   : > { %25898 = vst [vmem:[#allocation35_spill] sm:$0xff] %v24816_v44  ;;  %v13270_v44 = vadd.f32 %v24596_v60, %v24599_v27  ;;  %v24854_v60 = vadd.f32 %v24631_v57, %v24634_v50  ;;  %v24858_v27 = vadd.f32 %v24636_v17, %v24639_v46  ;;  %v24874_v24 = vpop.f32.mrf.mxu0  ;;  %v24903_v50 = vadd.f32 %v24676_v51, %v24679_v14  ;;  %v25899_v17 = vld [vmem:[#allocation6_spill] sm:$0xff] }
 0x636   : > { %v24820_v40 = vpop.f32.mrf.mxu1  ;;  %v24907_v46 = vadd.f32 %v25899_v17, %v24684_v62  ;;  %v25905_v62 = vld [vmem:[#allocation85_spill] sm:$0xff]  ;;  %v24939_v0 = vadd.f32 %v25910_v29, %v25909_v54  ;;  %v25912_v7 = vld [vmem:[#allocation86_spill] sm:$0xff]  ;;  %v25915_v17 = vld [vmem:[#allocation83_spill] sm:$0xff] }
 0x637   : > { %v13658_v33 = vadd.f32 %v25904_v48, %v13270_v44  ;;  %v24927_v26 = vpop.f32.mrf.mxu0  ;;  %v14044_v52 = vadd.f32 %v25905_v62, %v13656_v38  ;;  %v25911_v44 = vld [vmem:[#allocation98_spill] sm:$0xff]  ;;  %v13660_v22 = vadd.f32 %v25912_v7, %v13272_v45  ;;  %v25913_v38 = vld [vmem:[#allocation16_spill] sm:$0xff] }
 0x638   : > { %v24838_v36 = vpop.f32.mrf.mxu1  ;;  %v14043_v1 = vadd.f32 %v25911_v44, %v13655_v61  ;;  %v25920_v55 = vld [vmem:[#allocation30_spill] sm:$0xff] }
 0x63a   : > { %v24868_v53 = vpop.f32.mrf.mxu1 }
 0x63c   : > { %v18921_v57 = vpop.f32.mrf.mxu1 }
 0x63d   : > { %v14430_v3 = vadd.f32 %v18921_v57, %v14042_v49  ;;  %v25914_v49 = vld [vmem:[#allocation13_spill] sm:$0xff] }
 0x63e   : > { %v14270_v47 = vpop.f32.mrf.mxu1  ;;  %v24949_v57 = vadd.f32 %v25914_v49, %v25913_v38 }
 0x63f   : > { %14462 = vst.msk [vmem:[%s24899_s27 + $0x8] sm:$0xff] %vm398_vm4, %v14430_v3  ;;  %v14563_v51 = vmul.f32 %v14430_v3, %v14430_v3  ;;  %v14429_v14 = vadd.f32 %v14270_v47, %v14041_v30  ;;  %v14494_v4 = vsel %vm398_vm4, %v14430_v3, 0.0  ;;  %v25916_v30 = vld [vmem:[#allocation93_spill] sm:$0xff]  ;;  %v24955_v3 = vpop.f32.mrf.mxu0  ;;  %v25917_v47 = vld [vmem:[#allocation59_spill] sm:$0xff] }
 0x640   : > { %v18924_v43 = vpop.f32.mrf.mxu1  ;;  %v24953_v20 = vadd.f32 %v25916_v30, %v25915_v17  ;;  %v14046_v48 = vadd.f32 %v25917_v47, %v13658_v33  ;;  %v25922_v33 = vld [vmem:[#allocation18_spill] sm:$0xff]  ;;  %v25925_v17 = vld [vmem:[#allocation89_spill] sm:$0xff] }
 0x641   : > { %14461 = vst.msk [vmem:[%s24899_s27] sm:$0xff] %vm398_vm4, %v14429_v14  ;;  %v14493_v34 = vsel %vm398_vm4, %v14429_v14, 0.0  ;;  %v14562_v16 = vmul.f32 %v14429_v14, %v14429_v14  ;;  %v14432_v11 = vadd.f32 %v18924_v43, %v14044_v52  ;;  %v14595_v2 = vsel %vm398_vm4, %v14563_v51, 0.0  ;;  %v25918_v14 = vld [vmem:[#allocation49_spill] sm:$0xff]  ;;  %v25919_v52 = vld [vmem:[#allocation48_spill] sm:$0xff] }
 0x642   : > { %v14495_v61 = vadd.f32 %v14494_v4, %v14493_v34  ;;  %v14280_v59 = vpop.f32.mrf.mxu1  ;;  %v13659_v62 = vadd.f32 %v25918_v14, %v13271_v41  ;;  %v24965_v10 = vadd.f32 %v25920_v55, %v25919_v52  ;;  %v25921_v4 = vld [vmem:[#allocation88_spill] sm:$0xff]  ;;  %v13662_v34 = vadd.f32 %v25922_v33, %v24842_v23  ;;  %v25923_v41 = vld [vmem:[#allocation14_spill] sm:$0xff] }
 0x643   : > { %v14594_v39 = vsel %vm398_vm4, %v14562_v16, 0.0  ;;  %14464 = vst.msk [vmem:[%s24899_s27 + $0x18] sm:$0xff] %vm398_vm4, %v14432_v11  ;;  %v14431_v45 = vadd.f32 %v14280_v59, %v14043_v1  ;;  %v14565_v54 = vmul.f32 %v14432_v11, %v14432_v11  ;;  %v14045_v1 = vadd.f32 %v25921_v4, %v13657_v56  ;;  %v25924_v16 = vld [vmem:[#allocation36_spill] sm:$0xff]  ;;  %v25926_v59 = vld [vmem:[#allocation19_spill] sm:$0xff]  ;;  %v25927_v52 = vld [vmem:[#allocation38_spill] sm:$0xff] }
 0x644   : > { %v14596_v63 = vadd.f32 %v14595_v2, %v14594_v39  ;;  %v18927_v29 = vpop.f32.mrf.mxu1  ;;  %v24975_v7 = vadd.f32 %v25924_v16, %v25923_v41  ;;  %v14048_v30 = vadd.f32 %v25925_v17, %v13660_v22  ;;  %v13661_v2 = vadd.f32 %v25926_v59, %v24846_v37  ;;  %v24980_v39 = vpop.f32.mrf.mxu0 }
 0x645   : > { %14463 = vst.msk [vmem:[%s24899_s27 + $0x10] sm:$0xff] %vm398_vm4, %v14431_v45  ;;  %v14496_v51 = vsel %vm398_vm4, %v14431_v45, 0.0  ;;  %v14564_v43 = vmul.f32 %v14431_v45, %v14431_v45  ;;  %v14434_v44 = vadd.f32 %v18927_v29, %v14046_v48  ;;  %v14498_v45 = vsel %vm398_vm4, %v14432_v11, 0.0 }
 0x646   : > { %v14497_v38 = vadd.f32 %v14496_v51, %v14495_v61  ;;  %v14290_v49 = vpop.f32.mrf.mxu1  ;;  %v14599_v47 = vsel %vm398_vm4, %v14565_v54, 0.0  ;;  %v14047_v22 = vadd.f32 %v25927_v52, %v13659_v62  ;;  %v25928_v51 = vld [vmem:[#allocation22_spill] sm:$0xff]  ;;  %v24994_v41 = vpop.f32.mrf.mxu0 }
 0x647   : > { %v14597_v56 = vsel %vm398_vm4, %v14564_v43, 0.0  ;;  %14466 = vst.msk [vmem:[%s24899_s27 + $0x28] sm:$0xff] %vm398_vm4, %v14434_v44  ;;  %v14433_v23 = vadd.f32 %v14290_v49, %v14045_v1  ;;  %v14567_v55 = vmul.f32 %v14434_v44, %v14434_v44  ;;  %v13664_v43 = vadd.f32 %v25928_v51, %v24850_v32  ;;  %v25930_v49 = vld [vmem:[#allocation25_spill] sm:$0xff] }
 0x648   : > { %v14598_v48 = vadd.f32 %v14597_v56, %v14596_v63  ;;  %v14499_v14 = vadd.f32 %v14498_v45, %v14497_v38  ;;  %v18930_v61 = vpop.f32.mrf.mxu1  ;;  %v25929_v63 = vld [vmem:[#allocation42_spill] sm:$0xff]  ;;  %v14502_v62 = vsel %vm398_vm4, %v14434_v44, 0.0  ;;  %v14049_v17 = vadd.f32 %v25930_v49, %v13661_v2  ;;  %v25935_v49 = vld [vmem:[#allocation23_spill] sm:$0xff] }
 0x649   : > { %14465 = vst.msk [vmem:[%s24899_s27 + $0x20] sm:$0xff] %vm398_vm4, %v14433_v23  ;;  %v14500_v37 = vsel %vm398_vm4, %v14433_v23, 0.0  ;;  %v14566_v29 = vmul.f32 %v14433_v23, %v14433_v23  ;;  %v14436_v11 = vadd.f32 %v18930_v61, %v14048_v30  ;;  %v14050_v33 = vadd.f32 %v25929_v63, %v13662_v34  ;;  %v25931_v30 = vld [vmem:[#allocation24_spill] sm:$0xff] }
 0x64a   : > { %v14501_v4 = vadd.f32 %v14500_v37, %v14499_v14  ;;  %v14600_v1 = vadd.f32 %v14599_v47, %v14598_v48  ;;  %v14300_v54 = vpop.f32.mrf.mxu1  ;;  %v13663_v32 = vadd.f32 %v25931_v30, %v24854_v60  ;;  %v14603_v34 = vsel %vm398_vm4, %v14567_v55, 0.0  ;;  %v25932_v14 = vld [vmem:[#allocation29_spill] sm:$0xff] }
 0x64b   : > { %v14601_v16 = vsel %vm398_vm4, %v14566_v29, 0.0  ;;  %14468 = vst.msk [vmem:[%s24899_s27 + $0x38] sm:$0xff] %vm398_vm4, %v14436_v11  ;;  %v14435_v38 = vadd.f32 %v14300_v54, %v14047_v22  ;;  %v14569_v45 = vmul.f32 %v14436_v11, %v14436_v11  ;;  %v13666_v61 = vadd.f32 %v25932_v14, %v24858_v27  ;;  %v25933_v22 = vld [vmem:[#allocation33_spill] sm:$0xff]  ;;  %v25934_v29 = vld [vmem:[#allocation39_spill] sm:$0xff] }
 0x64c   : > { %v14602_v59 = vadd.f32 %v14601_v16, %v14600_v1  ;;  %v14503_v56 = vadd.f32 %v14502_v62, %v14501_v4  ;;  %v18933_v23 = vpop.f32.mrf.mxu1  ;;  %v14052_v37 = vadd.f32 %v25933_v22, %v13664_v43  ;;  %v13665_v51 = vadd.f32 %v25934_v29, %v24862_v35  ;;  %v25012_v4 = vpop.f32.mrf.mxu0  ;;  %v25937_v14 = vld [vmem:[#allocation91_spill] sm:$0xff] }
 0x64d   : > { %14467 = vst.msk [vmem:[%s24899_s27 + $0x30] sm:$0xff] %vm398_vm4, %v14435_v38  ;;  %v14504_v44 = vsel %vm398_vm4, %v14435_v38, 0.0  ;;  %v14568_v47 = vmul.f32 %v14435_v38, %v14435_v38  ;;  %v14438_v48 = vadd.f32 %v18933_v23, %v14050_v33  ;;  %v14506_v55 = vsel %vm398_vm4, %v14436_v11, 0.0 }
 0x64e   : > { %v14505_v2 = vadd.f32 %v14504_v44, %v14503_v56  ;;  %v14604_v52 = vadd.f32 %v14603_v34, %v14602_v59  ;;  %v14310_v60 = vpop.f32.mrf.mxu1  ;;  %v14607_v27 = vsel %vm398_vm4, %v14569_v45, 0.0  ;;  %v14051_v43 = vadd.f32 %v24796_v15, %v13663_v32  ;;  %v25936_v56 = vld [vmem:[#allocation60_spill] sm:$0xff]  ;;  %v25026_v34 = vpop.f32.mrf.mxu0 }
 0x64f   : > { %v14605_v1 = vsel %vm398_vm4, %v14568_v47, 0.0  ;;  %14470 = vst.msk [vmem:[%s24899_s27 + $0x48] sm:$0xff] %vm398_vm4, %v14438_v48  ;;  %v14437_v54 = vadd.f32 %v14310_v60, %v14049_v17  ;;  %v14571_v16 = vmul.f32 %v14438_v48, %v14438_v48  ;;  %v13668_v30 = vadd.f32 %v25935_v49, %v24866_v6 }
 0x650   : > { %v14606_v63 = vadd.f32 %v14605_v1, %v14604_v52  ;;  %v14507_v33 = vadd.f32 %v14506_v55, %v14505_v2  ;;  %v18936_v62 = vpop.f32.mrf.mxu1  ;;  %v14054_v23 = vadd.f32 %v25936_v56, %v13666_v61  ;;  %v14510_v15 = vsel %vm398_vm4, %v14438_v48, 0.0  ;;  %v25938_v55 = vld [vmem:[#allocation12_spill] sm:$0xff] }
 0x651   : > { %14469 = vst.msk [vmem:[%s24899_s27 + $0x40] sm:$0xff] %vm398_vm4, %v14437_v54  ;;  %v14508_v35 = vsel %vm398_vm4, %v14437_v54, 0.0  ;;  %v14570_v38 = vmul.f32 %v14437_v54, %v14437_v54  ;;  %v14440_v11 = vadd.f32 %v18936_v62, %v14052_v37  ;;  %v14053_v47 = vadd.f32 %v24808_v13, %v13665_v51 }
 0x652   : > { %v14509_v59 = vadd.f32 %v14508_v35, %v14507_v33  ;;  %v14608_v17 = vadd.f32 %v14607_v27, %v14606_v63  ;;  %v14320_v45 = vpop.f32.mrf.mxu1  ;;  %v13667_v6 = vadd.f32 %v25937_v14, %v24872_v12  ;;  %v14611_v61 = vsel %vm398_vm4, %v14571_v16, 0.0  ;;  %v25939_v27 = vld [vmem:[#allocation28_spill] sm:$0xff]  ;;  %v25044_v33 = vpop.f32.mrf.mxu0 }
 0x653   : > { %v14609_v32 = vsel %vm398_vm4, %v14570_v38, 0.0  ;;  %14472 = vst.msk [vmem:[%s24899_s27 + $0x58] sm:$0xff] %vm398_vm4, %v14440_v11  ;;  %v14439_v44 = vadd.f32 %v14320_v45, %v14051_v43  ;;  %v14573_v52 = vmul.f32 %v14440_v11, %v14440_v11  ;;  %v13670_v1 = vadd.f32 %v25938_v55, %v24878_v8  ;;  %v25940_v45 = vld [vmem:[#allocation92_spill] sm:$0xff] }
 0x654   : > { %v14610_v2 = vadd.f32 %v14609_v32, %v14608_v17  ;;  %v14511_v60 = vadd.f32 %v14510_v15, %v14509_v59  ;;  %v18939_v22 = vpop.f32.mrf.mxu1  ;;  %v14056_v54 = vadd.f32 %v24814_v18, %v13668_v30  ;;  %v13669_v63 = vadd.f32 %v25939_v27, %v24884_v25  ;;  %v25052_v30 = vpop.f32.mrf.mxu0 }
 0x655   : > { %14471 = vst.msk [vmem:[%s24899_s27 + $0x50] sm:$0xff] %vm398_vm4, %v14439_v44  ;;  %v14512_v48 = vsel %vm398_vm4, %v14439_v44, 0.0  ;;  %v14572_v37 = vmul.f32 %v14439_v44, %v14439_v44  ;;  %v14442_v29 = vadd.f32 %v18939_v22, %v14054_v23  ;;  %v14514_v62 = vsel %vm398_vm4, %v14440_v11, 0.0 }
 0x656   : > { %v14513_v13 = vadd.f32 %v14512_v48, %v14511_v60  ;;  %v14612_v51 = vadd.f32 %v14611_v61, %v14610_v2  ;;  %v14330_v12 = vpop.f32.mrf.mxu1  ;;  %v14615_v8 = vsel %vm398_vm4, %v14573_v52, 0.0  ;;  %v14055_v18 = vadd.f32 %v24828_v58, %v13667_v6  ;;  %v25941_v2 = vld [vmem:[#allocation37_spill] sm:$0xff]  ;;  %v25067_v48 = vpop.f32.mrf.mxu0 }
 0x657   : > { %v14613_v43 = vsel %vm398_vm4, %v14572_v37, 0.0  ;;  %14474 = vst.msk [vmem:[%s24899_s27 + $0x68] sm:$0xff] %vm398_vm4, %v14442_v29  ;;  %v14441_v16 = vadd.f32 %v14330_v12, %v14053_v47  ;;  %v14575_v25 = vmul.f32 %v14442_v29, %v14442_v29  ;;  %v13672_v56 = vadd.f32 %v25940_v45, %v24888_v31 }
 0x658   : > { %v14614_v35 = vadd.f32 %v14613_v43, %v14612_v51  ;;  %v14515_v38 = vadd.f32 %v14514_v62, %v14513_v13  ;;  %v18942_v49 = vpop.f32.mrf.mxu1  ;;  %v14058_v44 = vadd.f32 %v24874_v24, %v13670_v1  ;;  %v14518_v58 = vsel %vm398_vm4, %v14442_v29, 0.0 }
 0x659   : > { %14473 = vst.msk [vmem:[%s24899_s27 + $0x60] sm:$0xff] %vm398_vm4, %v14441_v16  ;;  %v14516_v11 = vsel %vm398_vm4, %v14441_v16, 0.0  ;;  %v14574_v59 = vmul.f32 %v14441_v16, %v14441_v16  ;;  %v14444_v17 = vadd.f32 %v18942_v49, %v14056_v54  ;;  %v14057_v6 = vadd.f32 %v24927_v26, %v13669_v63  ;;  %v25942_v26 = vld [vmem:[#allocation66_spill] sm:$0xff]  ;;  %v25084_v49 = vpop.f32.mrf.mxu0 }
 0x65a   : > { %v14517_v23 = vadd.f32 %v14516_v11, %v14515_v38  ;;  %v14616_v15 = vadd.f32 %v14615_v8, %v14614_v35  ;;  %v14340_v32 = vpop.f32.mrf.mxu1  ;;  %v13671_v52 = vadd.f32 %v25941_v2, %v24892_v42  ;;  %v14619_v24 = vsel %vm398_vm4, %v14575_v25, 0.0  ;;  %v25943_v54 = vld [vmem:[#allocation26_spill] sm:$0xff]  ;;  %v25944_v11 = vld [vmem:[#allocation27_spill] sm:$0xff] }
 0x65b   : > { %v14617_v47 = vsel %vm398_vm4, %v14574_v59, 0.0  ;;  %14476 = vst.msk [vmem:[%s24899_s27 + $0x78] sm:$0xff] %vm398_vm4, %v14444_v17  ;;  %v14443_v14 = vadd.f32 %v14340_v32, %v14055_v18  ;;  %v14577_v31 = vmul.f32 %v14444_v17, %v14444_v17  ;;  %v13674_v1 = vadd.f32 %v25942_v26, %v24903_v50 }
 0x65c   : > { %v14618_v60 = vadd.f32 %v14617_v47, %v14616_v15  ;;  %v14519_v22 = vadd.f32 %v14518_v58, %v14517_v23  ;;  %v18945_v61 = vpop.f32.mrf.mxu1  ;;  %v14060_v12 = vadd.f32 %v24955_v3, %v13672_v56  ;;  %v13673_v27 = vadd.f32 %v25943_v54, %v24907_v46  ;;  %v25945_v58 = vld [vmem:[#allocation94_spill] sm:$0xff] }
 0x65d   : > { %14475 = vst.msk [vmem:[%s24899_s27 + $0x70] sm:$0xff] %vm398_vm4, %v14443_v14  ;;  %v14520_v37 = vsel %vm398_vm4, %v14443_v14, 0.0  ;;  %v14576_v29 = vmul.f32 %v14443_v14, %v14443_v14  ;;  %v14446_v55 = vadd.f32 %v18945_v61, %v14058_v44  ;;  %v14522_v63 = vsel %vm398_vm4, %v14444_v17, 0.0  ;;  %v25946_v61 = vld [vmem:[#allocation31_spill] sm:$0xff] }
 0x65e   : > { %v14521_v13 = vadd.f32 %v14520_v37, %v14519_v22  ;;  %v14620_v42 = vadd.f32 %v14619_v24, %v14618_v60  ;;  %v14350_v51 = vpop.f32.mrf.mxu1  ;;  %v14623_v16 = vsel %vm398_vm4, %v14577_v31, 0.0  ;;  %v14059_v38 = vadd.f32 %v24980_v39, %v13671_v52  ;;  %v14012_v52 = vpop.f32.mrf.mxu0 }
 0x65f   : > { %v14621_v62 = vsel %vm398_vm4, %v14576_v29, 0.0  ;;  %14478 = vst.msk [vmem:[%s24899_s27 + $0x88] sm:$0xff] %vm398_vm4, %v14446_v55  ;;  %v14445_v43 = vadd.f32 %v14350_v51, %v14057_v6  ;;  %v14579_v3 = vmul.f32 %v14446_v55, %v14446_v55  ;;  %v13676_v59 = vadd.f32 %v25944_v11, %v24912_v9  ;;  %v25949_v11 = vld [vmem:[#allocation95_spill] sm:$0xff] }
 0x660   : > { %v14622_v8 = vadd.f32 %v14621_v62, %v14620_v42  ;;  %v14523_v50 = vadd.f32 %v14522_v63, %v14521_v13  ;;  %v18948_v35 = vpop.f32.mrf.mxu1  ;;  %v14062_v23 = vadd.f32 %v24994_v41, %v13674_v1  ;;  %v14526_v39 = vsel %vm398_vm4, %v14446_v55, 0.0  ;;  %v25947_v55 = vld [vmem:[#allocation34_spill] sm:$0xff]  ;;  %v18913_v63 = vpop.f32.mrf.mxu0 }
 0x661   : > { %14477 = vst.msk [vmem:[%s24899_s27 + $0x80] sm:$0xff] %vm398_vm4, %v14445_v43  ;;  %v14524_v46 = vsel %vm398_vm4, %v14445_v43, 0.0  ;;  %v14578_v18 = vmul.f32 %v14445_v43, %v14445_v43  ;;  %v14448_v25 = vadd.f32 %v18948_v35, %v14060_v12  ;;  %v14061_v44 = vadd.f32 %v25012_v4, %v13673_v27 }
 0x662   : > { %v14525_v17 = vadd.f32 %v14524_v46, %v14523_v50  ;;  %v14624_v45 = vadd.f32 %v14623_v16, %v14622_v8  ;;  %v14360_v56 = vpop.f32.mrf.mxu1  ;;  %v13675_v47 = vadd.f32 %v25945_v58, %v24916_v19  ;;  %v14627_v41 = vsel %vm398_vm4, %v14579_v3, 0.0  ;;  %v25948_v8 = vld [vmem:[#allocation52_spill] sm:$0xff] }
 0x663   : > { %v14625_v15 = vsel %vm398_vm4, %v14578_v18, 0.0  ;;  %14480 = vst.msk [vmem:[%s24899_s27 + $0x98] sm:$0xff] %vm398_vm4, %v14448_v25  ;;  %v14447_v32 = vadd.f32 %v14360_v56, %v14059_v38  ;;  %v14581_v9 = vmul.f32 %v14448_v25, %v14448_v25  ;;  %v13678_v4 = vadd.f32 %v25946_v61, %v24920_v28  ;;  %v14022_v56 = vpop.f32.mrf.mxu0 }
 0x664   : > { %v14626_v14 = vadd.f32 %v14625_v15, %v14624_v45  ;;  %v14527_v6 = vadd.f32 %v14526_v39, %v14525_v17  ;;  %v18951_v2 = vpop.f32.mrf.mxu1  ;;  %v14064_v29 = vadd.f32 %v25026_v34, %v13676_v59  ;;  %v13677_v26 = vadd.f32 %v25947_v55, %v24924_v21 }
 0x665   : > { %14479 = vst.msk [vmem:[%s24899_s27 + $0x90] sm:$0xff] %vm398_vm4, %v14447_v32  ;;  %v14528_v60 = vsel %vm398_vm4, %v14447_v32, 0.0  ;;  %v14580_v31 = vmul.f32 %v14447_v32, %v14447_v32  ;;  %v14450_v22 = vadd.f32 %v18951_v2, %v14062_v23  ;;  %v14530_v1 = vsel %vm398_vm4, %v14448_v25, 0.0  ;;  %v18916_v61 = vpop.f32.mrf.mxu0 }
 0x666   : > { %v14529_v24 = vadd.f32 %v14528_v60, %v14527_v6  ;;  %v14628_v19 = vadd.f32 %v14627_v41, %v14626_v14  ;;  %v14370_v37 = vpop.f32.mrf.mxu1  ;;  %v14631_v51 = vsel %vm398_vm4, %v14581_v9, 0.0  ;;  %v14063_v27 = vadd.f32 %v25044_v33, %v13675_v47 }
 0x667   : > { %v14629_v13 = vsel %vm398_vm4, %v14580_v31, 0.0  ;;  %14482 = vst.msk [vmem:[%s24899_s27 + $0xa8] sm:$0xff] %vm398_vm4, %v14450_v22  ;;  %v14449_v42 = vadd.f32 %v14370_v37, %v14061_v44  ;;  %v14583_v34 = vmul.f32 %v14450_v22, %v14450_v22  ;;  %v14066_v16 = vadd.f32 %v25052_v30, %v13678_v4  ;;  %v25950_v44 = vld [vmem:[#allocation35_spill] sm:$0xff] }
 0x668   : > { %v14630_v12 = vadd.f32 %v14629_v13, %v14628_v19  ;;  %v14531_v28 = vadd.f32 %v14530_v1, %v14529_v24  ;;  %v18954_v54 = vpop.f32.mrf.mxu1  ;;  %v13680_v50 = vadd.f32 %v25948_v8, %v24935_v5  ;;  %v14065_v46 = vadd.f32 %v25067_v48, %v13677_v26 }
 0x669   : > { %14481 = vst.msk [vmem:[%s24899_s27 + $0xa0] sm:$0xff] %vm398_vm4, %v14449_v42  ;;  %v14532_v21 = vsel %vm398_vm4, %v14449_v42, 0.0  ;;  %v14582_v62 = vmul.f32 %v14449_v42, %v14449_v42  ;;  %v14452_v43 = vadd.f32 %v18954_v54, %v14064_v29  ;;  %v14534_v33 = vsel %vm398_vm4, %v14450_v22, 0.0 }
 0x66a   : > { %v14533_v35 = vadd.f32 %v14532_v21, %v14531_v28  ;;  %v14632_v38 = vadd.f32 %v14631_v51, %v14630_v12  ;;  %v14380_v3 = vpop.f32.mrf.mxu1  ;;  %v13679_v59 = vadd.f32 %v25949_v11, %v24939_v0  ;;  %v14635_v23 = vsel %vm398_vm4, %v14583_v34, 0.0 }
 0x66b   : > { %v14633_v18 = vsel %vm398_vm4, %v14582_v62, 0.0  ;;  %14484 = vst.msk [vmem:[%s24899_s27 + $0xb8] sm:$0xff] %vm398_vm4, %v14452_v43  ;;  %v14451_v25 = vadd.f32 %v14380_v3, %v14063_v27  ;;  %v14585_v17 = vmul.f32 %v14452_v43, %v14452_v43  ;;  %v14068_v32 = vadd.f32 %v25084_v49, %v13680_v50 }
 0x66c   : > { %v14634_v30 = vadd.f32 %v14633_v18, %v14632_v38  ;;  %v14535_v45 = vadd.f32 %v14534_v33, %v14533_v35  ;;  %v18957_v5 = vpop.f32.mrf.mxu1  ;;  %v13682_v58 = vadd.f32 %v25950_v44, %v24949_v57  ;;  %v13681_v9 = vadd.f32 %v24820_v40, %v24953_v20 }
 0x66d   : > { %14483 = vst.msk [vmem:[%s24899_s27 + $0xb0] sm:$0xff] %vm398_vm4, %v14451_v25  ;;  %v14536_v48 = vsel %vm398_vm4, %v14451_v25, 0.0  ;;  %v14584_v39 = vmul.f32 %v14451_v25, %v14451_v25  ;;  %v14454_v15 = vadd.f32 %v18957_v5, %v14066_v16  ;;  %v14538_v6 = vsel %vm398_vm4, %v14452_v43, 0.0 }
 0x66e   : > { %v14537_v0 = vadd.f32 %v14536_v48, %v14535_v45  ;;  %v14636_v47 = vadd.f32 %v14635_v23, %v14634_v30  ;;  %v14390_v14 = vpop.f32.mrf.mxu1  ;;  %v14067_v60 = vadd.f32 %v14012_v52, %v13679_v59  ;;  %v14639_v49 = vsel %vm398_vm4, %v14585_v17, 0.0 }
 0x66f   : > { %v14637_v2 = vsel %vm398_vm4, %v14584_v39, 0.0  ;;  %14486 = vst.msk [vmem:[%s24899_s27 + $0xc8] sm:$0xff] %vm398_vm4, %v14454_v15  ;;  %v14453_v41 = vadd.f32 %v14390_v14, %v14065_v46  ;;  %v14587_v4 = vmul.f32 %v14454_v15, %v14454_v15  ;;  %v14070_v19 = vadd.f32 %v18913_v63, %v13682_v58 }
 0x670   : > { %v14638_v31 = vadd.f32 %v14637_v2, %v14636_v47  ;;  %v14539_v22 = vadd.f32 %v14538_v6, %v14537_v0  ;;  %v18960_v57 = vpop.f32.mrf.mxu1  ;;  %v13684_v37 = vadd.f32 %v24838_v36, %v24965_v10  ;;  %v14069_v26 = vadd.f32 %v14022_v56, %v13681_v9  ;;  %v14032_v10 = vpop.f32.mrf.mxu0 }
 0x671   : > { %14485 = vst.msk [vmem:[%s24899_s27 + $0xc0] sm:$0xff] %vm398_vm4, %v14453_v41  ;;  %v14540_v40 = vsel %vm398_vm4, %v14453_v41, 0.0  ;;  %v14586_v20 = vmul.f32 %v14453_v41, %v14453_v41  ;;  %v14456_v24 = vadd.f32 %v18960_v57, %v14068_v32  ;;  %v14542_v1 = vsel %vm398_vm4, %v14454_v15, 0.0 }
 0x672   : > { %v14541_v52 = vadd.f32 %v14540_v40, %v14539_v22  ;;  %v14640_v29 = vadd.f32 %v14639_v49, %v14638_v31  ;;  %v14400_v55 = vpop.f32.mrf.mxu1  ;;  %v13683_v51 = vadd.f32 %v24868_v53, %v24975_v7  ;;  %v14643_v27 = vsel %vm398_vm4, %v14587_v4, 0.0 }
 0x673   : > { %v14641_v13 = vsel %vm398_vm4, %v14586_v20, 0.0  ;;  %14488 = vst.msk [vmem:[%s24899_s27 + $0xd8] sm:$0xff] %vm398_vm4, %v14456_v24  ;;  %v14455_v42 = vadd.f32 %v14400_v55, %v14067_v60  ;;  %v14589_v28 = vmul.f32 %v14456_v24, %v14456_v24  ;;  %v14072_v8 = vadd.f32 %v18916_v61, %v13684_v37 }
 0x674   : > { %v14642_v12 = vadd.f32 %v14641_v13, %v14640_v29  ;;  %v14543_v54 = vadd.f32 %v14542_v1, %v14541_v52  ;;  %v18963_v36 = vpop.f32.mrf.mxu1  ;;  %v14546_v53 = vsel %vm398_vm4, %v14456_v24, 0.0  ;;  %v14071_v35 = vadd.f32 %v14032_v10, %v13683_v51 }
 0x675   : > { %14487 = vst.msk [vmem:[%s24899_s27 + $0xd0] sm:$0xff] %vm398_vm4, %v14455_v42  ;;  %v14544_v63 = vsel %vm398_vm4, %v14455_v42, 0.0  ;;  %v14588_v34 = vmul.f32 %v14455_v42, %v14455_v42  ;;  %v14458_v21 = vadd.f32 %v18963_v36, %v14070_v19  ;;  %v14647_v38 = vsel %vm398_vm4, %v14589_v28, 0.0 }
 0x676   : > { %v14545_v62 = vadd.f32 %v14544_v63, %v14543_v54  ;;  %v14644_v43 = vadd.f32 %v14643_v27, %v14642_v12  ;;  %v14410_v16 = vpop.f32.mrf.mxu1 }
 0x677   : > { %v14645_v7 = vsel %vm398_vm4, %v14588_v34, 0.0  ;;  %14490 = vst.msk [vmem:[%s24899_s27 + $0xe8] sm:$0xff] %vm398_vm4, %v14458_v21  ;;  %v14457_v50 = vadd.f32 %v14410_v16, %v14069_v26  ;;  %v14591_v18 = vmul.f32 %v14458_v21, %v14458_v21  ;;  %v14550_v5 = vsel %vm398_vm4, %v14458_v21, 0.0 }
 0x678   : > { %v14646_v3 = vadd.f32 %v14645_v7, %v14644_v43  ;;  %v14547_v46 = vadd.f32 %v14546_v53, %v14545_v62  ;;  %v18966_v33 = vpop.f32.mrf.mxu1 }
 0x679   : > { %14489 = vst.msk [vmem:[%s24899_s27 + $0xe0] sm:$0xff] %vm398_vm4, %v14457_v50  ;;  %v14548_v25 = vsel %vm398_vm4, %v14457_v50, 0.0  ;;  %v14590_v11 = vmul.f32 %v14457_v50, %v14457_v50  ;;  %v14460_v59 = vadd.f32 %v18966_v33, %v14072_v8  ;;  %v14651_v15 = vsel %vm398_vm4, %v14591_v18, 0.0 }
 0x67a   : > { %v14549_v30 = vadd.f32 %v14548_v25, %v14547_v46  ;;  %v14648_v17 = vadd.f32 %v14647_v38, %v14646_v3  ;;  %v14420_v45 = vpop.f32.mrf.mxu1 }
 0x67b   : > { %v14649_v56 = vsel %vm398_vm4, %v14590_v11, 0.0  ;;  %14492 = vst.msk [vmem:[%s24899_s27 + $0xf8] sm:$0xff] %vm398_vm4, %v14460_v59  ;;  %v14459_v23 = vadd.f32 %v14420_v45, %v14071_v35  ;;  %v14593_v32 = vmul.f32 %v14460_v59, %v14460_v59  ;;  %v14554_v14 = vsel %vm398_vm4, %v14460_v59, 0.0 }
 0x67c   : > { %v14650_v48 = vadd.f32 %v14649_v56, %v14648_v17  ;;  %v14551_v39 = vadd.f32 %v14550_v5, %v14549_v30 }
 0x67d   : > { %14491 = vst.msk [vmem:[%s24899_s27 + $0xf0] sm:$0xff] %vm398_vm4, %v14459_v23  ;;  %v14552_v44 = vsel %vm398_vm4, %v14459_v23, 0.0  ;;  %v14592_v58 = vmul.f32 %v14459_v23, %v14459_v23  ;;  %v14655_v41 = vsel %vm398_vm4, %v14593_v32, 0.0 }
 0x67e   : > { %v14553_v0 = vadd.f32 %v14552_v44, %v14551_v39  ;;  %v14652_v47 = vadd.f32 %v14651_v15, %v14650_v48 }
 0x67f   : > { %v14653_v9 = vsel %vm398_vm4, %v14592_v58, 0.0 }
 0x680   : > { %v14555_v6 = vadd.f32 %v14554_v14, %v14553_v0  ;;  %v14654_v2 = vadd.f32 %v14653_v9, %v14652_v47 }
 0x682   : > { %v14556_v60 = vrot.slane %v14555_v6, 4  ;;  %v14656_v49 = vadd.f32 %v14655_v41, %v14654_v2 }
 0x684   : > { %v14557_v31 = vadd.f32 %v14556_v60, %v14555_v6  ;;  %v14657_v22 = vrot.slane %v14656_v49, 4 }
 0x686   : > { %v14558_v57 = vrot.slane %v14557_v31, 2  ;;  %v14658_v61 = vadd.f32 %v14657_v22, %v14656_v49 }
 0x688   : > { %v14559_v4 = vadd.f32 %v14558_v57, %v14557_v31  ;;  %v14659_v40 = vrot.slane %v14658_v61, 2 }
 0x68a   : > { %v14560_v20 = vrot.slane %v14559_v4, 1  ;;  %v14660_v24 = vadd.f32 %v14659_v40, %v14658_v61 }
 0x68c   : > { %v14561_v19 = vadd.f32 %v14560_v20, %v14559_v4  ;;  %v14661_v37 = vrot.slane %v14660_v24, 1 }
 0x68e   : > { %v14662_v52 = vadd.f32 %v14661_v37, %v14660_v24  ;;  %14664 = vst.msk [vmem:[%s208_s30] sm:$0x1] %vm14663_vm5, %v14561_v19 }
 0x690   : > { %14665 = vst.msk [vmem:[%s208_s30 + $0x1] sm:$0x1] %vm14663_vm5, %v14662_v52 }
 0x691 PF: > { %s15_s15 = sadd.s32 1, %s18982_s15  }
 0x692   : > { %p12_p4 = scmp.ge.s32.totalorder %s15_s15, 4  }
 0x694   :  { %14 = sbr.rel (!%p12_p4) target bundleno = 1 (0x1), region = 128 }

</bundles_post_ra>
